<compile_context>
chip_gen: v7x
topology: tpu7x:2x2x1
jax: 0.10.0
libtpu: 0.0.40
codegen_flags: <defaults>
</compile_context>

<pallas_src>
import jax
import jax.numpy as jnp
from jax.experimental import pallas as pl
from jax.experimental.pallas import tpu as pltpu

# ----------------------------- configuration --------------------------------
B = 2                      # batch
IMG = 32                   # image size (module default 96, kept small)
PATCH = 16                 # patch size (module default)
NPATCH = (IMG // PATCH) ** 2          # 4 patches
TV = NPATCH + 1                       # 5 ViT tokens (cls + patches)
KP = 3 * PATCH * PATCH                # 768 patch features
DV = 64                    # num_hiddens == image_embed_dim (module default 512)
NH = 4                     # num_heads
NBLK_V = 2                 # ViT blocks (module default num_blks = 3)
DE = 64                    # n_embd (module default 128)
NLAYER = 2                 # decoder blocks (module default n_layer = 8)
VOCAB = 128                # vocab size (lane-dense logits)
T_TXT = 7                  # text tokens
TD = T_TXT + 1             # decoder sequence length (image token + text)
EPS = 1e-5                 # nn.LayerNorm default eps
_INV_SQRT2 = 0.7071067811865476

BLOCK_KEYS = ("g1", "be1", "wq", "wk", "wv", "wo", "bo",
              "g2", "be2", "w1", "b1", "w2", "b2")


# ------------------------- in-kernel math helpers ----------------------------
def _erf(x):
    # Abramowitz & Stegun 7.1.26 rational approximation (|err| < 1.5e-7).
    a1, a2, a3, a4, a5 = 0.254829592, -0.284496736, 1.421413741, -1.453152027, 1.061405429
    p = 0.3275911
    z = jnp.abs(x)
    t = 1.0 / (1.0 + p * z)
    poly = ((((a5 * t + a4) * t + a3) * t + a2) * t + a1) * t
    y = 1.0 - poly * jnp.exp(-z * z)
    return jnp.where(x < 0.0, -y, y)


def _gelu_exact(x):
    # PyTorch nn.GELU() default (erf based).
    return 0.5 * x * (1.0 + _erf(x * _INV_SQRT2))


def _layernorm(x, g, b):
    mu = jnp.mean(x, axis=-1, keepdims=True)
    var = jnp.mean((x - mu) ** 2, axis=-1, keepdims=True)
    return (x - mu) * jax.lax.rsqrt(var + EPS) * g + b


def _softmax_last(s):
    s = s - jnp.max(s, axis=-1, keepdims=True)
    e = jnp.exp(s)
    # EUP approximate reciprocal; the divide slot is otherwise idle here.
    return e * pl.reciprocal(jnp.sum(e, axis=-1, keepdims=True), approx=True)


def _transformer_block(x, nbatch, t, d, nheads, causal, layer, prefs):
    """Block.forward: x1 = x + attn(ln1(x)); out = ln2(x1) + ffn(ln2(x1))."""
    (g1r, be1r, wqr, wkr, wvr, wor, bor, g2r, be2r, w1r, b1r, w2r, b2r) = prefs
    g1, be1 = g1r[layer], be1r[layer]
    wq, wk, wv = wqr[layer], wkr[layer], wvr[layer]
    wo, bo = wor[layer], bor[layer]
    g2, be2 = g2r[layer], be2r[layer]
    w1, b1, w2, b2 = w1r[layer], b1r[layer], w2r[layer], b2r[layer]

    hs = d // nheads
    xn = _layernorm(x, g1, be1)                                   # (nbatch*t, d)

    # Full-width projections over all nbatch*t tokens; attention scale
    # (C ** -0.5 with C = full embed dim, as in Head) pre-folded into q.
    scale = float(d) ** -0.5
    q = jnp.dot(xn, wq, preferred_element_type=jnp.float32) * scale
    k = jnp.dot(xn, wk, preferred_element_type=jnp.float32)
    v = jnp.dot(xn, wv, preferred_element_type=jnp.float32)

    attn_rows = []
    for bi in range(nbatch):
        r0, r1 = bi * t, (bi + 1) * t
        qb, kb, vb = q[r0:r1, :], k[r0:r1, :], v[r0:r1, :]
        acc = None
        for h in range(nheads):
            c0, c1 = h * hs, (h + 1) * hs
            # scores: contract last dims of both operands (no explicit k.T).
            s = jax.lax.dot_general(qb[:, c0:c1], kb[:, c0:c1],
                                    (((1,), (1,)), ((), ())),
                                    preferred_element_type=jnp.float32)
            if causal:
                row = jax.lax.broadcasted_iota(jnp.int32, (t, t), 0)
                col = jax.lax.broadcasted_iota(jnp.int32, (t, t), 1)
                s = jnp.where(col <= row, s, -1e30)
            p = _softmax_last(s)
            pv = jnp.dot(p, vb[:, c0:c1], preferred_element_type=jnp.float32)
            # Accumulate (p_h @ v_h) @ Wo[h-slice, :] -- no head concat.
            contrib = jnp.dot(pv, wo[c0:c1, :], preferred_element_type=jnp.float32)
            acc = contrib if acc is None else acc + contrib
        attn_rows.append(acc)
    attn = attn_rows[0] if nbatch == 1 else jnp.concatenate(attn_rows, axis=0)

    x1 = x + attn + bo                                            # residual 1
    xn2 = _layernorm(x1, g2, be2)
    h1 = _gelu_exact(jnp.dot(xn2, w1, preferred_element_type=jnp.float32) + b1)
    ffn = jnp.dot(h1, w2, preferred_element_type=jnp.float32) + b2
    # Second residual is around the LN2 output, exactly as in Block.forward.
    return xn2 + ffn


# ------------------------------- fused kernel --------------------------------
def _vlm_kernel(*refs):
    (xp_ref, conv_w_ref, conv_b_ref, cls_ref, vpos_ref) = refs[0:5]
    vblk = refs[5:18]
    vlng_ref, vlnb_ref = refs[18:20]
    pw1_ref, pb1_ref, pw2_ref, pb2_ref = refs[20:24]
    tok_ref, dpos_ref = refs[24:26]
    dblk = refs[26:39]
    flng_ref, flnb_ref = refs[39:41]
    lmw_ref, lmb_ref = refs[41:43]
    out_ref = refs[43]

    # ---- ViT: patch embedding (Conv2d stride=kernel as one matmul) ----
    emb = (jnp.dot(xp_ref[...], conv_w_ref[...], preferred_element_type=jnp.float32)
           + conv_b_ref[...])                                     # (B*NPATCH, DV)

    # ---- ViT: [cls ; patches] + pos, batch folded into rows ----
    cls = cls_ref[...]
    vpos = vpos_ref[...]
    xv = jnp.concatenate(
        [jnp.concatenate([cls, emb[b * NPATCH:(b + 1) * NPATCH, :]], axis=0) + vpos
         for b in range(B)], axis=0)                              # (B*TV, DV)

    # ---- ViT transformer blocks (unrolled) ----
    for l in range(NBLK_V):
        xv = _transformer_block(xv, B, TV, DV, NH, False, l, vblk)

    # ---- ViT final LayerNorm on the cls rows only ----
    cls_rows = jnp.concatenate([xv[b * TV:b * TV + 1, :] for b in range(B)], axis=0)
    image_embeds = _layernorm(cls_rows, vlng_ref[...], vlnb_ref[...])   # (B, DV)

    # ---- MultiModalProjector ----
    ph = _gelu_exact(jnp.dot(image_embeds, pw1_ref[...],
                             preferred_element_type=jnp.float32) + pb1_ref[...])
    img_proj = jnp.dot(ph, pw2_ref[...], preferred_element_type=jnp.float32) + pb2_ref[...]

    # ---- Decoder: [image token ; text tokens] + pos ----
    dpos = dpos_ref[...]
    xd = jnp.concatenate(
        [jnp.concatenate([img_proj[b:b + 1, :], tok_ref[b]], axis=0) + dpos
         for b in range(B)], axis=0)                              # (B*TD, DE)

    # ---- causal decoder blocks (unrolled) ----
    for l in range(NLAYER):
        xd = _transformer_block(xd, B, TD, DE, NH, True, l, dblk)

    # ---- ln_f + lm_head -> lane-dense (B*TD, VOCAB) logits ----
    xd = _layernorm(xd, flng_ref[...], flnb_ref[...])
    out_ref[...] = (jnp.dot(xd, lmw_ref[...], preferred_element_type=jnp.float32)
                    + lmb_ref[...])


# ------------------------------ wrappers -------------------------------------
def _zero_index_map(ndim):
    return lambda i: (0,) * ndim


def extract_patches(x_img):
    # NCHW -> (B*NPATCH, 3*P*P), features ordered (c, ph, pw) to match
    # Conv2d weight.reshape(out, -1).
    bb, c, h, w = x_img.shape
    hp, wp = h // PATCH, w // PATCH
    xp = x_img.reshape(bb, c, hp, PATCH, wp, PATCH)
    xp = xp.transpose(0, 2, 4, 1, 3, 5)
    return xp.reshape(bb * hp * wp, c * PATCH * PATCH)


def vlm_forward(img, idx, params):
    xp = extract_patches(img)
    tok_emb = params["tok_table"][idx]            # embedding gather (pure JAX glue)

    inputs = [xp, params["conv_w"], params["conv_b"], params["cls"], params["vit_pos"]]
    inputs += [params["vit_blocks"][k] for k in BLOCK_KEYS]
    inputs += [params["vit_ln_g"], params["vit_ln_b"],
               params["pw1"], params["pb1"], params["pw2"], params["pb2"],
               tok_emb, params["dec_pos"]]
    inputs += [params["dec_blocks"][k] for k in BLOCK_KEYS]
    inputs += [params["fln_g"], params["fln_b"], params["lm_w"], params["lm_b"]]

    in_specs = [pl.BlockSpec(a.shape, _zero_index_map(a.ndim)) for a in inputs]

    # Single grid step; everything VMEM resident.  (On v7x the batch could be
    # split over a leading "parallel" grid axis to use both TensorCores, but
    # at B*T=16 rows the fused single step is already overhead-minimal.)
    logits2d = pl.pallas_call(
        _vlm_kernel,
        out_shape=jax.ShapeDtypeStruct((B * TD, VOCAB), jnp.float32),
        grid=(1,),
        in_specs=in_specs,
        out_specs=pl.BlockSpec((B * TD, VOCAB), lambda i: (0, 0)),
        compiler_params=pltpu.CompilerParams(dimension_semantics=("arbitrary",)),
    )(*inputs)
    return logits2d.reshape(B, TD, VOCAB)


# -------------------------- pure-JAX reference --------------------------------
def _ref_layernorm(x, g, b):
    mu = x.mean(-1, keepdims=True)
    var = ((x - mu) ** 2).mean(-1, keepdims=True)
    return (x - mu) / jnp.sqrt(var + EPS) * g + b


def _ref_block(x, blk, layer, nheads, causal):
    d = x.shape[-1]
    hs = d // nheads
    t = x.shape[1]
    xn = _ref_layernorm(x, blk["g1"][layer], blk["be1"][layer])
    outs = []
    for h in range(nheads):
        lo, hi = h * hs, (h + 1) * hs
        q = xn @ blk["wq"][layer][:, lo:hi]
        k = xn @ blk["wk"][layer][:, lo:hi]
        v = xn @ blk["wv"][layer][:, lo:hi]
        s = q @ jnp.swapaxes(k, -2, -1) * (float(d) ** -0.5)
        if causal:
            mask = jnp.tril(jnp.ones((t, t), dtype=bool))
            s = jnp.where(mask, s, -jnp.inf)
        outs.append(jax.nn.softmax(s, axis=-1) @ v)
    attn = jnp.concatenate(outs, axis=-1) @ blk["wo"][layer] + blk["bo"][layer]
    x1 = x + attn
    xn2 = _ref_layernorm(x1, blk["g2"][layer], blk["be2"][layer])
    h1 = jax.nn.gelu(xn2 @ blk["w1"][layer] + blk["b1"][layer], approximate=False)
    ffn = h1 @ blk["w2"][layer] + blk["b2"][layer]
    return xn2 + ffn


def ref_forward(img, idx, params):
    xp = extract_patches(img)
    emb = (xp @ params["conv_w"] + params["conv_b"]).reshape(B, NPATCH, DV)
    cls = jnp.broadcast_to(params["cls"][None, :, :], (B, 1, DV))
    x = jnp.concatenate([cls, emb], axis=1) + params["vit_pos"][None]
    for l in range(NBLK_V):
        x = _ref_block(x, params["vit_blocks"], l, NH, causal=False)
    image_embeds = _ref_layernorm(x[:, 0, :], params["vit_ln_g"], params["vit_ln_b"])

    ph = jax.nn.gelu(image_embeds @ params["pw1"] + params["pb1"], approximate=False)
    img_proj = ph @ params["pw2"] + params["pb2"]                 # (B, DE)

    tok_emb = params["tok_table"][idx]                            # (B, T_TXT, DE)
    xd = jnp.concatenate([img_proj[:, None, :], tok_emb], axis=1) + params["dec_pos"][None]
    for l in range(NLAYER):
        xd = _ref_block(xd, params["dec_blocks"], l, NH, causal=True)
    xd = _ref_layernorm(xd, params["fln_g"], params["fln_b"])
    return xd @ params["lm_w"] + params["lm_b"]                   # (B, TD, VOCAB)


# ----------------------------- parameters -------------------------------------
def make_params():
    keys = iter(jax.random.split(jax.random.PRNGKey(1), 1024))

    def rnd(shape, scale=0.02):
        return (scale * jax.random.normal(next(keys), shape)).astype(jnp.float32)

    def make_blocks(d, n):
        cols = {k: [] for k in BLOCK_KEYS}
        for _ in range(n):
            cols["g1"].append(1.0 + rnd((1, d), 0.01))
            cols["be1"].append(rnd((1, d), 0.01))
            cols["wq"].append(rnd((d, d)))
            cols["wk"].append(rnd((d, d)))
            cols["wv"].append(rnd((d, d)))
            cols["wo"].append(rnd((d, d)))
            cols["bo"].append(rnd((1, d)))
            cols["g2"].append(1.0 + rnd((1, d), 0.01))
            cols["be2"].append(rnd((1, d), 0.01))
            cols["w1"].append(rnd((d, 4 * d)))
            cols["b1"].append(rnd((1, 4 * d)))
            cols["w2"].append(rnd((4 * d, d)))
            cols["b2"].append(rnd((1, d)))
        return {k: jnp.stack(v) for k, v in cols.items()}

    # ViT
    conv_w = rnd((DV, 3, PATCH, PATCH)).reshape(DV, -1).T          # (KP, DV)
    conv_b = rnd((1, DV))
    cls = jnp.zeros((1, DV), jnp.float32)                          # torch.zeros param
    vit_pos = rnd((TV, DV))
    vit_blocks = make_blocks(DV, NBLK_V)
    vit_ln_g = 1.0 + rnd((1, DV), 0.01)
    vit_ln_b = rnd((1, DV), 0.01)
    # MultiModalProjector
    pw1 = rnd((DV, 4 * DV)); pb1 = rnd((1, 4 * DV))
    pw2 = rnd((4 * DV, DE)); pb2 = rnd((1, DE))
    # Decoder
    tok_table = rnd((VOCAB, DE))
    dec_pos = rnd((TD, DE))
    dec_blocks = make_blocks(DE, NLAYER)
    fln_g = 1.0 + rnd((1, DE), 0.01)
    fln_b = rnd((1, DE), 0.01)
    lm_w = rnd((DE, VOCAB)); lm_b = rnd((1, VOCAB))

    return dict(conv_w=conv_w, conv_b=conv_b, cls=cls, vit_pos=vit_pos,
                vit_blocks=vit_blocks, vit_ln_g=vit_ln_g, vit_ln_b=vit_ln_b,
                pw1=pw1, pb1=pb1, pw2=pw2, pb2=pb2,
                tok_table=tok_table, dec_pos=dec_pos, dec_blocks=dec_blocks,
                fln_g=fln_g, fln_b=fln_b, lm_w=lm_w, lm_b=lm_b)


# --------------------------------- main ---------------------------------------
if __name__ == "__main__":
    params = make_params()
    k_img, k_idx = jax.random.split(jax.random.PRNGKey(0))
    img = jax.random.normal(k_img, (B, 3, IMG, IMG), dtype=jnp.float32)
    idx = jax.random.randint(k_idx, (B, T_TXT), 0, VOCAB)

    logits = vlm_forward(img, idx, params)
    logits = jax.block_until_ready(logits)
    assert logits.shape == (B, TD, VOCAB), logits.shape

    ref = ref_forward(img, idx, params)
    if not jnp.allclose(logits, ref, atol=2e-3, rtol=2e-3):
        max_err = float(jnp.max(jnp.abs(logits - ref)))
        raise AssertionError(f"Pallas VLM output mismatch, max abs err = {max_err}")

    print("KERNEL_OK")
</pallas_src>

<mosaic_0001>
module attributes {stable_mosaic.version = 11 : i64} {
  func.func @_vlm_kernel(%arg0: i32, %arg1: memref<8x768xf32, #tpu.memory_space<vmem>>, %arg2: memref<768x64xf32, #tpu.memory_space<vmem>>, %arg3: memref<1x64xf32, #tpu.memory_space<vmem>>, %arg4: memref<1x64xf32, #tpu.memory_space<vmem>>, %arg5: memref<5x64xf32, #tpu.memory_space<vmem>>, %arg6: memref<2x1x64xf32, #tpu.memory_space<vmem>>, %arg7: memref<2x1x64xf32, #tpu.memory_space<vmem>>, %arg8: memref<2x64x64xf32, #tpu.memory_space<vmem>>, %arg9: memref<2x64x64xf32, #tpu.memory_space<vmem>>, %arg10: memref<2x64x64xf32, #tpu.memory_space<vmem>>, %arg11: memref<2x64x64xf32, #tpu.memory_space<vmem>>, %arg12: memref<2x1x64xf32, #tpu.memory_space<vmem>>, %arg13: memref<2x1x64xf32, #tpu.memory_space<vmem>>, %arg14: memref<2x1x64xf32, #tpu.memory_space<vmem>>, %arg15: memref<2x64x256xf32, #tpu.memory_space<vmem>>, %arg16: memref<2x1x256xf32, #tpu.memory_space<vmem>>, %arg17: memref<2x256x64xf32, #tpu.memory_space<vmem>>, %arg18: memref<2x1x64xf32, #tpu.memory_space<vmem>>, %arg19: memref<1x64xf32, #tpu.memory_space<vmem>>, %arg20: memref<1x64xf32, #tpu.memory_space<vmem>>, %arg21: memref<64x256xf32, #tpu.memory_space<vmem>>, %arg22: memref<1x256xf32, #tpu.memory_space<vmem>>, %arg23: memref<256x64xf32, #tpu.memory_space<vmem>>, %arg24: memref<1x64xf32, #tpu.memory_space<vmem>>, %arg25: memref<2x7x64xf32, #tpu.memory_space<vmem>>, %arg26: memref<8x64xf32, #tpu.memory_space<vmem>>, %arg27: memref<2x1x64xf32, #tpu.memory_space<vmem>>, %arg28: memref<2x1x64xf32, #tpu.memory_space<vmem>>, %arg29: memref<2x64x64xf32, #tpu.memory_space<vmem>>, %arg30: memref<2x64x64xf32, #tpu.memory_space<vmem>>, %arg31: memref<2x64x64xf32, #tpu.memory_space<vmem>>, %arg32: memref<2x64x64xf32, #tpu.memory_space<vmem>>, %arg33: memref<2x1x64xf32, #tpu.memory_space<vmem>>, %arg34: memref<2x1x64xf32, #tpu.memory_space<vmem>>, %arg35: memref<2x1x64xf32, #tpu.memory_space<vmem>>, %arg36: memref<2x64x256xf32, #tpu.memory_space<vmem>>, %arg37: memref<2x1x256xf32, #tpu.memory_space<vmem>>, %arg38: memref<2x256x64xf32, #tpu.memory_space<vmem>>, %arg39: memref<2x1x64xf32, #tpu.memory_space<vmem>>, %arg40: memref<1x64xf32, #tpu.memory_space<vmem>>, %arg41: memref<1x64xf32, #tpu.memory_space<vmem>>, %arg42: memref<64x128xf32, #tpu.memory_space<vmem>>, %arg43: memref<1x128xf32, #tpu.memory_space<vmem>>, %arg44: memref<16x128xf32, #tpu.memory_space<vmem>>) attributes {dimension_semantics = [#tpu.dimension_semantics<arbitrary>], iteration_bounds = array<i64: 1>, scalar_prefetch = 0 : i64, scratch_operands = 0 : i64, tpu.core_type = #tpu.core_type<tc>, window_params = [{pipeline_mode = #tpu.pipeline_mode<synchronous>, transform_indices = @transform_0, window_bounds = array<i64: 8, 768>}, {pipeline_mode = #tpu.pipeline_mode<synchronous>, transform_indices = @transform_1, window_bounds = array<i64: 768, 64>}, {pipeline_mode = #tpu.pipeline_mode<synchronous>, transform_indices = @transform_2, window_bounds = array<i64: 1, 64>}, {pipeline_mode = #tpu.pipeline_mode<synchronous>, transform_indices = @transform_3, window_bounds = array<i64: 1, 64>}, {pipeline_mode = #tpu.pipeline_mode<synchronous>, transform_indices = @transform_4, window_bounds = array<i64: 5, 64>}, {pipeline_mode = #tpu.pipeline_mode<synchronous>, transform_indices = @transform_5, window_bounds = array<i64: 2, 1, 64>}, {pipeline_mode = #tpu.pipeline_mode<synchronous>, transform_indices = @transform_6, window_bounds = array<i64: 2, 1, 64>}, {pipeline_mode = #tpu.pipeline_mode<synchronous>, transform_indices = @transform_7, window_bounds = array<i64: 2, 64, 64>}, {pipeline_mode = #tpu.pipeline_mode<synchronous>, transform_indices = @transform_8, window_bounds = array<i64: 2, 64, 64>}, {pipeline_mode = #tpu.pipeline_mode<synchronous>, transform_indices = @transform_9, window_bounds = array<i64: 2, 64, 64>}, {pipeline_mode = #tpu.pipeline_mode<synchronous>, transform_indices = @transform_10, window_bounds = array<i64: 2, 64, 64>}, {pipeline_mode = #tpu.pipeline_mode<synchronous>, transform_indices = @transform_11, window_bounds = array<i64: 2, 1, 64>}, {pipeline_mode = #tpu.pipeline_mode<synchronous>, transform_indices = @transform_12, window_bounds = array<i64: 2, 1, 64>}, {pipeline_mode = #tpu.pipeline_mode<synchronous>, transform_indices = @transform_13, window_bounds = array<i64: 2, 1, 64>}, {pipeline_mode = #tpu.pipeline_mode<synchronous>, transform_indices = @transform_14, window_bounds = array<i64: 2, 64, 256>}, {pipeline_mode = #tpu.pipeline_mode<synchronous>, transform_indices = @transform_15, window_bounds = array<i64: 2, 1, 256>}, {pipeline_mode = #tpu.pipeline_mode<synchronous>, transform_indices = @transform_16, window_bounds = array<i64: 2, 256, 64>}, {pipeline_mode = #tpu.pipeline_mode<synchronous>, transform_indices = @transform_17, window_bounds = array<i64: 2, 1, 64>}, {pipeline_mode = #tpu.pipeline_mode<synchronous>, transform_indices = @transform_18, window_bounds = array<i64: 1, 64>}, {pipeline_mode = #tpu.pipeline_mode<synchronous>, transform_indices = @transform_19, window_bounds = array<i64: 1, 64>}, {pipeline_mode = #tpu.pipeline_mode<synchronous>, transform_indices = @transform_20, window_bounds = array<i64: 64, 256>}, {pipeline_mode = #tpu.pipeline_mode<synchronous>, transform_indices = @transform_21, window_bounds = array<i64: 1, 256>}, {pipeline_mode = #tpu.pipeline_mode<synchronous>, transform_indices = @transform_22, window_bounds = array<i64: 256, 64>}, {pipeline_mode = #tpu.pipeline_mode<synchronous>, transform_indices = @transform_23, window_bounds = array<i64: 1, 64>}, {pipeline_mode = #tpu.pipeline_mode<synchronous>, transform_indices = @transform_24, window_bounds = array<i64: 2, 7, 64>}, {pipeline_mode = #tpu.pipeline_mode<synchronous>, transform_indices = @transform_25, window_bounds = array<i64: 8, 64>}, {pipeline_mode = #tpu.pipeline_mode<synchronous>, transform_indices = @transform_26, window_bounds = array<i64: 2, 1, 64>}, {pipeline_mode = #tpu.pipeline_mode<synchronous>, transform_indices = @transform_27, window_bounds = array<i64: 2, 1, 64>}, {pipeline_mode = #tpu.pipeline_mode<synchronous>, transform_indices = @transform_28, window_bounds = array<i64: 2, 64, 64>}, {pipeline_mode = #tpu.pipeline_mode<synchronous>, transform_indices = @transform_29, window_bounds = array<i64: 2, 64, 64>}, {pipeline_mode = #tpu.pipeline_mode<synchronous>, transform_indices = @transform_30, window_bounds = array<i64: 2, 64, 64>}, {pipeline_mode = #tpu.pipeline_mode<synchronous>, transform_indices = @transform_31, window_bounds = array<i64: 2, 64, 64>}, {pipeline_mode = #tpu.pipeline_mode<synchronous>, transform_indices = @transform_32, window_bounds = array<i64: 2, 1, 64>}, {pipeline_mode = #tpu.pipeline_mode<synchronous>, transform_indices = @transform_33, window_bounds = array<i64: 2, 1, 64>}, {pipeline_mode = #tpu.pipeline_mode<synchronous>, transform_indices = @transform_34, window_bounds = array<i64: 2, 1, 64>}, {pipeline_mode = #tpu.pipeline_mode<synchronous>, transform_indices = @transform_35, window_bounds = array<i64: 2, 64, 256>}, {pipeline_mode = #tpu.pipeline_mode<synchronous>, transform_indices = @transform_36, window_bounds = array<i64: 2, 1, 256>}, {pipeline_mode = #tpu.pipeline_mode<synchronous>, transform_indices = @transform_37, window_bounds = array<i64: 2, 256, 64>}, {pipeline_mode = #tpu.pipeline_mode<synchronous>, transform_indices = @transform_38, window_bounds = array<i64: 2, 1, 64>}, {pipeline_mode = #tpu.pipeline_mode<synchronous>, transform_indices = @transform_39, window_bounds = array<i64: 1, 64>}, {pipeline_mode = #tpu.pipeline_mode<synchronous>, transform_indices = @transform_40, window_bounds = array<i64: 1, 64>}, {pipeline_mode = #tpu.pipeline_mode<synchronous>, transform_indices = @transform_41, window_bounds = array<i64: 64, 128>}, {pipeline_mode = #tpu.pipeline_mode<synchronous>, transform_indices = @transform_42, window_bounds = array<i64: 1, 128>}, {pipeline_mode = #tpu.pipeline_mode<synchronous>, transform_indices = @transform_43, window_bounds = array<i64: 16, 128>}]} {
    %c0 = arith.constant 0 : index
    %c0_0 = arith.constant 0 : index
    %0 = vector.load %arg1[%c0, %c0_0] : memref<8x768xf32, #tpu.memory_space<vmem>>, vector<8x768xf32>
    %c0_1 = arith.constant 0 : index
    %c0_2 = arith.constant 0 : index
    %1 = vector.load %arg2[%c0_1, %c0_2] : memref<768x64xf32, #tpu.memory_space<vmem>>, vector<768x64xf32>
    %cst = arith.constant dense<0.000000e+00> : vector<8x64xf32>
    %2 = tpu.matmul %0, %1, %cst {dimension_numbers = #tpu.dot_dimension_numbers<[1], [0], [0], [1], [0, 0, 1, 1], [], []>} : vector<8x768xf32>, vector<768x64xf32>, vector<8x64xf32> -> vector<8x64xf32>
    %c0_3 = arith.constant 0 : index
    %c0_4 = arith.constant 0 : index
    %3 = vector.load %arg3[%c0_3, %c0_4] : memref<1x64xf32, #tpu.memory_space<vmem>>, vector<1x64xf32>
    %4 = vector.broadcast %3 : vector<1x64xf32> to vector<8x64xf32>
    %5 = arith.addf %2, %4 : vector<8x64xf32>
    %c0_5 = arith.constant 0 : index
    %c0_6 = arith.constant 0 : index
    %6 = vector.load %arg4[%c0_5, %c0_6] : memref<1x64xf32, #tpu.memory_space<vmem>>, vector<1x64xf32>
    %c0_7 = arith.constant 0 : index
    %c0_8 = arith.constant 0 : index
    %7 = vector.load %arg5[%c0_7, %c0_8] : memref<5x64xf32, #tpu.memory_space<vmem>>, vector<5x64xf32>
    %8 = vector.extract_strided_slice %5 {offsets = [0, 0], sizes = [4, 64], strides = [1, 1]} : vector<8x64xf32> to vector<4x64xf32>
    %9 = tpu.concatenate %6, %8 in 0 : vector<1x64xf32>, vector<4x64xf32> -> vector<5x64xf32>
    %10 = arith.addf %9, %7 : vector<5x64xf32>
    %11 = vector.extract_strided_slice %5 {offsets = [4, 0], sizes = [4, 64], strides = [1, 1]} : vector<8x64xf32> to vector<4x64xf32>
    %12 = tpu.concatenate %6, %11 in 0 : vector<1x64xf32>, vector<4x64xf32> -> vector<5x64xf32>
    %13 = arith.addf %12, %7 : vector<5x64xf32>
    %14 = tpu.concatenate %10, %13 in 0 : vector<5x64xf32>, vector<5x64xf32> -> vector<10x64xf32>
    %c0_9 = arith.constant 0 : index
    %c0_10 = arith.constant 0 : index
    %c0_11 = arith.constant 0 : index
    %15 = vector.load %arg6[%c0_9, %c0_10, %c0_11] : memref<2x1x64xf32, #tpu.memory_space<vmem>>, vector<1x1x64xf32>
    %16 = vector.shape_cast %15 : vector<1x1x64xf32> to vector<1x64xf32>
    %c0_12 = arith.constant 0 : index
    %c0_13 = arith.constant 0 : index
    %c0_14 = arith.constant 0 : index
    %17 = vector.load %arg7[%c0_12, %c0_13, %c0_14] : memref<2x1x64xf32, #tpu.memory_space<vmem>>, vector<1x1x64xf32>
    %18 = vector.shape_cast %17 : vector<1x1x64xf32> to vector<1x64xf32>
    %c0_15 = arith.constant 0 : index
    %c0_16 = arith.constant 0 : index
    %c0_17 = arith.constant 0 : index
    %19 = vector.load %arg8[%c0_15, %c0_16, %c0_17] : memref<2x64x64xf32, #tpu.memory_space<vmem>>, vector<1x64x64xf32>
    %20 = vector.shape_cast %19 : vector<1x64x64xf32> to vector<64x64xf32>
    %c0_18 = arith.constant 0 : index
    %c0_19 = arith.constant 0 : index
    %c0_20 = arith.constant 0 : index
    %21 = vector.load %arg9[%c0_18, %c0_19, %c0_20] : memref<2x64x64xf32, #tpu.memory_space<vmem>>, vector<1x64x64xf32>
    %22 = vector.shape_cast %21 : vector<1x64x64xf32> to vector<64x64xf32>
    %c0_21 = arith.constant 0 : index
    %c0_22 = arith.constant 0 : index
    %c0_23 = arith.constant 0 : index
    %23 = vector.load %arg10[%c0_21, %c0_22, %c0_23] : memref<2x64x64xf32, #tpu.memory_space<vmem>>, vector<1x64x64xf32>
    %24 = vector.shape_cast %23 : vector<1x64x64xf32> to vector<64x64xf32>
    %c0_24 = arith.constant 0 : index
    %c0_25 = arith.constant 0 : index
    %c0_26 = arith.constant 0 : index
    %25 = vector.load %arg11[%c0_24, %c0_25, %c0_26] : memref<2x64x64xf32, #tpu.memory_space<vmem>>, vector<1x64x64xf32>
    %26 = vector.shape_cast %25 : vector<1x64x64xf32> to vector<64x64xf32>
    %c0_27 = arith.constant 0 : index
    %c0_28 = arith.constant 0 : index
    %c0_29 = arith.constant 0 : index
    %27 = vector.load %arg12[%c0_27, %c0_28, %c0_29] : memref<2x1x64xf32, #tpu.memory_space<vmem>>, vector<1x1x64xf32>
    %28 = vector.shape_cast %27 : vector<1x1x64xf32> to vector<1x64xf32>
    %c0_30 = arith.constant 0 : index
    %c0_31 = arith.constant 0 : index
    %c0_32 = arith.constant 0 : index
    %29 = vector.load %arg13[%c0_30, %c0_31, %c0_32] : memref<2x1x64xf32, #tpu.memory_space<vmem>>, vector<1x1x64xf32>
    %30 = vector.shape_cast %29 : vector<1x1x64xf32> to vector<1x64xf32>
    %c0_33 = arith.constant 0 : index
    %c0_34 = arith.constant 0 : index
    %c0_35 = arith.constant 0 : index
    %31 = vector.load %arg14[%c0_33, %c0_34, %c0_35] : memref<2x1x64xf32, #tpu.memory_space<vmem>>, vector<1x1x64xf32>
    %32 = vector.shape_cast %31 : vector<1x1x64xf32> to vector<1x64xf32>
    %c0_36 = arith.constant 0 : index
    %c0_37 = arith.constant 0 : index
    %c0_38 = arith.constant 0 : index
    %33 = vector.load %arg15[%c0_36, %c0_37, %c0_38] : memref<2x64x256xf32, #tpu.memory_space<vmem>>, vector<1x64x256xf32>
    %34 = vector.shape_cast %33 : vector<1x64x256xf32> to vector<64x256xf32>
    %c0_39 = arith.constant 0 : index
    %c0_40 = arith.constant 0 : index
    %c0_41 = arith.constant 0 : index
    %35 = vector.load %arg16[%c0_39, %c0_40, %c0_41] : memref<2x1x256xf32, #tpu.memory_space<vmem>>, vector<1x1x256xf32>
    %36 = vector.shape_cast %35 : vector<1x1x256xf32> to vector<1x256xf32>
    %c0_42 = arith.constant 0 : index
    %c0_43 = arith.constant 0 : index
    %c0_44 = arith.constant 0 : index
    %37 = vector.load %arg17[%c0_42, %c0_43, %c0_44] : memref<2x256x64xf32, #tpu.memory_space<vmem>>, vector<1x256x64xf32>
    %38 = vector.shape_cast %37 : vector<1x256x64xf32> to vector<256x64xf32>
    %c0_45 = arith.constant 0 : index
    %c0_46 = arith.constant 0 : index
    %c0_47 = arith.constant 0 : index
    %39 = vector.load %arg18[%c0_45, %c0_46, %c0_47] : memref<2x1x64xf32, #tpu.memory_space<vmem>>, vector<1x1x64xf32>
    %40 = vector.shape_cast %39 : vector<1x1x64xf32> to vector<1x64xf32>
    %cst_48 = arith.constant dense<0.000000e+00> : vector<10xf32>
    %41 = vector.multi_reduction <add>, %14, %cst_48 [1] : vector<10x64xf32> to vector<10xf32>
    %42 = vector.shape_cast %41 : vector<10xf32> to vector<10x1xf32>
    %cst_49 = arith.constant 6.400000e+01 : f32
    %43 = vector.broadcast %cst_49 : f32 to vector<10x1xf32>
    %44 = arith.divf %42, %43 : vector<10x1xf32>
    %45 = vector.broadcast %44 : vector<10x1xf32> to vector<10x64xf32>
    %46 = arith.subf %14, %45 : vector<10x64xf32>
    %47 = arith.mulf %46, %46 : vector<10x64xf32>
    %cst_50 = arith.constant dense<0.000000e+00> : vector<10xf32>
    %48 = vector.multi_reduction <add>, %47, %cst_50 [1] : vector<10x64xf32> to vector<10xf32>
    %49 = vector.shape_cast %48 : vector<10xf32> to vector<10x1xf32>
    %cst_51 = arith.constant 6.400000e+01 : f32
    %50 = vector.broadcast %cst_51 : f32 to vector<10x1xf32>
    %51 = arith.divf %49, %50 : vector<10x1xf32>
    %52 = vector.broadcast %44 : vector<10x1xf32> to vector<10x64xf32>
    %53 = arith.subf %14, %52 : vector<10x64xf32>
    %cst_52 = arith.constant 9.99999974E-6 : f32
    %54 = vector.broadcast %cst_52 : f32 to vector<10x1xf32>
    %55 = arith.addf %51, %54 : vector<10x1xf32>
    %56 = math.rsqrt %55 : vector<10x1xf32>
    %57 = vector.broadcast %56 : vector<10x1xf32> to vector<10x64xf32>
    %58 = arith.mulf %53, %57 : vector<10x64xf32>
    %59 = vector.broadcast %16 : vector<1x64xf32> to vector<10x64xf32>
    %60 = arith.mulf %58, %59 : vector<10x64xf32>
    %61 = vector.broadcast %18 : vector<1x64xf32> to vector<10x64xf32>
    %62 = arith.addf %60, %61 : vector<10x64xf32>
    %cst_53 = arith.constant dense<0.000000e+00> : vector<10x64xf32>
    %63 = tpu.matmul %62, %20, %cst_53 {dimension_numbers = #tpu.dot_dimension_numbers<[1], [0], [0], [1], [0, 0, 1, 1], [], []>} : vector<10x64xf32>, vector<64x64xf32>, vector<10x64xf32> -> vector<10x64xf32>
    %cst_54 = arith.constant 1.250000e-01 : f32
    %64 = vector.broadcast %cst_54 : f32 to vector<10x64xf32>
    %65 = arith.mulf %63, %64 : vector<10x64xf32>
    %cst_55 = arith.constant dense<0.000000e+00> : vector<10x64xf32>
    %66 = tpu.matmul %62, %22, %cst_55 {dimension_numbers = #tpu.dot_dimension_numbers<[1], [0], [0], [1], [0, 0, 1, 1], [], []>} : vector<10x64xf32>, vector<64x64xf32>, vector<10x64xf32> -> vector<10x64xf32>
    %cst_56 = arith.constant dense<0.000000e+00> : vector<10x64xf32>
    %67 = tpu.matmul %62, %24, %cst_56 {dimension_numbers = #tpu.dot_dimension_numbers<[1], [0], [0], [1], [0, 0, 1, 1], [], []>} : vector<10x64xf32>, vector<64x64xf32>, vector<10x64xf32> -> vector<10x64xf32>
    %68 = vector.extract_strided_slice %65 {offsets = [0, 0], sizes = [5, 64], strides = [1, 1]} : vector<10x64xf32> to vector<5x64xf32>
    %69 = vector.extract_strided_slice %66 {offsets = [0, 0], sizes = [5, 64], strides = [1, 1]} : vector<10x64xf32> to vector<5x64xf32>
    %70 = vector.extract_strided_slice %67 {offsets = [0, 0], sizes = [5, 64], strides = [1, 1]} : vector<10x64xf32> to vector<5x64xf32>
    %71 = vector.extract_strided_slice %68 {offsets = [0, 0], sizes = [5, 16], strides = [1, 1]} : vector<5x64xf32> to vector<5x16xf32>
    %72 = vector.extract_strided_slice %69 {offsets = [0, 0], sizes = [5, 16], strides = [1, 1]} : vector<5x64xf32> to vector<5x16xf32>
    %cst_57 = arith.constant dense<0.000000e+00> : vector<5x5xf32>
    %73 = tpu.matmul %71, %72, %cst_57 {dimension_numbers = #tpu.dot_dimension_numbers<[1], [1], [0], [0], [0, 0, 1, 0], [], []>} : vector<5x16xf32>, vector<5x16xf32>, vector<5x5xf32> -> vector<5x5xf32>
    %cst_58 = arith.constant dense<0xFF800000> : vector<5xf32>
    %74 = vector.multi_reduction <maximumf>, %73, %cst_58 [1] : vector<5x5xf32> to vector<5xf32>
    %75 = vector.shape_cast %74 : vector<5xf32> to vector<5x1xf32>
    %76 = vector.broadcast %75 : vector<5x1xf32> to vector<5x5xf32>
    %77 = arith.subf %73, %76 : vector<5x5xf32>
    %78 = math.exp %77 : vector<5x5xf32>
    %cst_59 = arith.constant dense<0.000000e+00> : vector<5xf32>
    %79 = vector.multi_reduction <add>, %78, %cst_59 [1] : vector<5x5xf32> to vector<5xf32>
    %80 = vector.shape_cast %79 : vector<5xf32> to vector<5x1xf32>
    %81 = tpu.reciprocal %80 {approx = true} : vector<5x1xf32> -> vector<5x1xf32>
    %82 = vector.broadcast %81 : vector<5x1xf32> to vector<5x5xf32>
    %83 = arith.mulf %78, %82 : vector<5x5xf32>
    %84 = vector.extract_strided_slice %70 {offsets = [0, 0], sizes = [5, 16], strides = [1, 1]} : vector<5x64xf32> to vector<5x16xf32>
    %cst_60 = arith.constant dense<0.000000e+00> : vector<5x16xf32>
    %85 = tpu.matmul %83, %84, %cst_60 {dimension_numbers = #tpu.dot_dimension_numbers<[1], [0], [0], [1], [0, 0, 1, 1], [], []>} : vector<5x5xf32>, vector<5x16xf32>, vector<5x16xf32> -> vector<5x16xf32>
    %86 = vector.extract_strided_slice %26 {offsets = [0, 0], sizes = [16, 64], strides = [1, 1]} : vector<64x64xf32> to vector<16x64xf32>
    %cst_61 = arith.constant dense<0.000000e+00> : vector<5x64xf32>
    %87 = tpu.matmul %85, %86, %cst_61 {dimension_numbers = #tpu.dot_dimension_numbers<[1], [0], [0], [1], [0, 0, 1, 1], [], []>} : vector<5x16xf32>, vector<16x64xf32>, vector<5x64xf32> -> vector<5x64xf32>
    %88 = vector.extract_strided_slice %68 {offsets = [0, 16], sizes = [5, 16], strides = [1, 1]} : vector<5x64xf32> to vector<5x16xf32>
    %89 = vector.extract_strided_slice %69 {offsets = [0, 16], sizes = [5, 16], strides = [1, 1]} : vector<5x64xf32> to vector<5x16xf32>
    %cst_62 = arith.constant dense<0.000000e+00> : vector<5x5xf32>
    %90 = tpu.matmul %88, %89, %cst_62 {dimension_numbers = #tpu.dot_dimension_numbers<[1], [1], [0], [0], [0, 0, 1, 0], [], []>} : vector<5x16xf32>, vector<5x16xf32>, vector<5x5xf32> -> vector<5x5xf32>
    %cst_63 = arith.constant dense<0xFF800000> : vector<5xf32>
    %91 = vector.multi_reduction <maximumf>, %90, %cst_63 [1] : vector<5x5xf32> to vector<5xf32>
    %92 = vector.shape_cast %91 : vector<5xf32> to vector<5x1xf32>
    %93 = vector.broadcast %92 : vector<5x1xf32> to vector<5x5xf32>
    %94 = arith.subf %90, %93 : vector<5x5xf32>
    %95 = math.exp %94 : vector<5x5xf32>
    %cst_64 = arith.constant dense<0.000000e+00> : vector<5xf32>
    %96 = vector.multi_reduction <add>, %95, %cst_64 [1] : vector<5x5xf32> to vector<5xf32>
    %97 = vector.shape_cast %96 : vector<5xf32> to vector<5x1xf32>
    %98 = tpu.reciprocal %97 {approx = true} : vector<5x1xf32> -> vector<5x1xf32>
    %99 = vector.broadcast %98 : vector<5x1xf32> to vector<5x5xf32>
    %100 = arith.mulf %95, %99 : vector<5x5xf32>
    %101 = vector.extract_strided_slice %70 {offsets = [0, 16], sizes = [5, 16], strides = [1, 1]} : vector<5x64xf32> to vector<5x16xf32>
    %cst_65 = arith.constant dense<0.000000e+00> : vector<5x16xf32>
    %102 = tpu.matmul %100, %101, %cst_65 {dimension_numbers = #tpu.dot_dimension_numbers<[1], [0], [0], [1], [0, 0, 1, 1], [], []>} : vector<5x5xf32>, vector<5x16xf32>, vector<5x16xf32> -> vector<5x16xf32>
    %103 = vector.extract_strided_slice %26 {offsets = [16, 0], sizes = [16, 64], strides = [1, 1]} : vector<64x64xf32> to vector<16x64xf32>
    %cst_66 = arith.constant dense<0.000000e+00> : vector<5x64xf32>
    %104 = tpu.matmul %102, %103, %cst_66 {dimension_numbers = #tpu.dot_dimension_numbers<[1], [0], [0], [1], [0, 0, 1, 1], [], []>} : vector<5x16xf32>, vector<16x64xf32>, vector<5x64xf32> -> vector<5x64xf32>
    %105 = arith.addf %87, %104 : vector<5x64xf32>
    %106 = vector.extract_strided_slice %68 {offsets = [0, 32], sizes = [5, 16], strides = [1, 1]} : vector<5x64xf32> to vector<5x16xf32>
    %107 = vector.extract_strided_slice %69 {offsets = [0, 32], sizes = [5, 16], strides = [1, 1]} : vector<5x64xf32> to vector<5x16xf32>
    %cst_67 = arith.constant dense<0.000000e+00> : vector<5x5xf32>
    %108 = tpu.matmul %106, %107, %cst_67 {dimension_numbers = #tpu.dot_dimension_numbers<[1], [1], [0], [0], [0, 0, 1, 0], [], []>} : vector<5x16xf32>, vector<5x16xf32>, vector<5x5xf32> -> vector<5x5xf32>
    %cst_68 = arith.constant dense<0xFF800000> : vector<5xf32>
    %109 = vector.multi_reduction <maximumf>, %108, %cst_68 [1] : vector<5x5xf32> to vector<5xf32>
    %110 = vector.shape_cast %109 : vector<5xf32> to vector<5x1xf32>
    %111 = vector.broadcast %110 : vector<5x1xf32> to vector<5x5xf32>
    %112 = arith.subf %108, %111 : vector<5x5xf32>
    %113 = math.exp %112 : vector<5x5xf32>
    %cst_69 = arith.constant dense<0.000000e+00> : vector<5xf32>
    %114 = vector.multi_reduction <add>, %113, %cst_69 [1] : vector<5x5xf32> to vector<5xf32>
    %115 = vector.shape_cast %114 : vector<5xf32> to vector<5x1xf32>
    %116 = tpu.reciprocal %115 {approx = true} : vector<5x1xf32> -> vector<5x1xf32>
    %117 = vector.broadcast %116 : vector<5x1xf32> to vector<5x5xf32>
    %118 = arith.mulf %113, %117 : vector<5x5xf32>
    %119 = vector.extract_strided_slice %70 {offsets = [0, 32], sizes = [5, 16], strides = [1, 1]} : vector<5x64xf32> to vector<5x16xf32>
    %cst_70 = arith.constant dense<0.000000e+00> : vector<5x16xf32>
    %120 = tpu.matmul %118, %119, %cst_70 {dimension_numbers = #tpu.dot_dimension_numbers<[1], [0], [0], [1], [0, 0, 1, 1], [], []>} : vector<5x5xf32>, vector<5x16xf32>, vector<5x16xf32> -> vector<5x16xf32>
    %121 = vector.extract_strided_slice %26 {offsets = [32, 0], sizes = [16, 64], strides = [1, 1]} : vector<64x64xf32> to vector<16x64xf32>
    %cst_71 = arith.constant dense<0.000000e+00> : vector<5x64xf32>
    %122 = tpu.matmul %120, %121, %cst_71 {dimension_numbers = #tpu.dot_dimension_numbers<[1], [0], [0], [1], [0, 0, 1, 1], [], []>} : vector<5x16xf32>, vector<16x64xf32>, vector<5x64xf32> -> vector<5x64xf32>
    %123 = arith.addf %105, %122 : vector<5x64xf32>
    %124 = vector.extract_strided_slice %68 {offsets = [0, 48], sizes = [5, 16], strides = [1, 1]} : vector<5x64xf32> to vector<5x16xf32>
    %125 = vector.extract_strided_slice %69 {offsets = [0, 48], sizes = [5, 16], strides = [1, 1]} : vector<5x64xf32> to vector<5x16xf32>
    %cst_72 = arith.constant dense<0.000000e+00> : vector<5x5xf32>
    %126 = tpu.matmul %124, %125, %cst_72 {dimension_numbers = #tpu.dot_dimension_numbers<[1], [1], [0], [0], [0, 0, 1, 0], [], []>} : vector<5x16xf32>, vector<5x16xf32>, vector<5x5xf32> -> vector<5x5xf32>
    %cst_73 = arith.constant dense<0xFF800000> : vector<5xf32>
    %127 = vector.multi_reduction <maximumf>, %126, %cst_73 [1] : vector<5x5xf32> to vector<5xf32>
    %128 = vector.shape_cast %127 : vector<5xf32> to vector<5x1xf32>
    %129 = vector.broadcast %128 : vector<5x1xf32> to vector<5x5xf32>
    %130 = arith.subf %126, %129 : vector<5x5xf32>
    %131 = math.exp %130 : vector<5x5xf32>
    %cst_74 = arith.constant dense<0.000000e+00> : vector<5xf32>
    %132 = vector.multi_reduction <add>, %131, %cst_74 [1] : vector<5x5xf32> to vector<5xf32>
    %133 = vector.shape_cast %132 : vector<5xf32> to vector<5x1xf32>
    %134 = tpu.reciprocal %133 {approx = true} : vector<5x1xf32> -> vector<5x1xf32>
    %135 = vector.broadcast %134 : vector<5x1xf32> to vector<5x5xf32>
    %136 = arith.mulf %131, %135 : vector<5x5xf32>
    %137 = vector.extract_strided_slice %70 {offsets = [0, 48], sizes = [5, 16], strides = [1, 1]} : vector<5x64xf32> to vector<5x16xf32>
    %cst_75 = arith.constant dense<0.000000e+00> : vector<5x16xf32>
    %138 = tpu.matmul %136, %137, %cst_75 {dimension_numbers = #tpu.dot_dimension_numbers<[1], [0], [0], [1], [0, 0, 1, 1], [], []>} : vector<5x5xf32>, vector<5x16xf32>, vector<5x16xf32> -> vector<5x16xf32>
    %139 = vector.extract_strided_slice %26 {offsets = [48, 0], sizes = [16, 64], strides = [1, 1]} : vector<64x64xf32> to vector<16x64xf32>
    %cst_76 = arith.constant dense<0.000000e+00> : vector<5x64xf32>
    %140 = tpu.matmul %138, %139, %cst_76 {dimension_numbers = #tpu.dot_dimension_numbers<[1], [0], [0], [1], [0, 0, 1, 1], [], []>} : vector<5x16xf32>, vector<16x64xf32>, vector<5x64xf32> -> vector<5x64xf32>
    %141 = arith.addf %123, %140 : vector<5x64xf32>
    %142 = vector.extract_strided_slice %65 {offsets = [5, 0], sizes = [5, 64], strides = [1, 1]} : vector<10x64xf32> to vector<5x64xf32>
    %143 = vector.extract_strided_slice %66 {offsets = [5, 0], sizes = [5, 64], strides = [1, 1]} : vector<10x64xf32> to vector<5x64xf32>
    %144 = vector.extract_strided_slice %67 {offsets = [5, 0], sizes = [5, 64], strides = [1, 1]} : vector<10x64xf32> to vector<5x64xf32>
    %145 = vector.extract_strided_slice %142 {offsets = [0, 0], sizes = [5, 16], strides = [1, 1]} : vector<5x64xf32> to vector<5x16xf32>
    %146 = vector.extract_strided_slice %143 {offsets = [0, 0], sizes = [5, 16], strides = [1, 1]} : vector<5x64xf32> to vector<5x16xf32>
    %cst_77 = arith.constant dense<0.000000e+00> : vector<5x5xf32>
    %147 = tpu.matmul %145, %146, %cst_77 {dimension_numbers = #tpu.dot_dimension_numbers<[1], [1], [0], [0], [0, 0, 1, 0], [], []>} : vector<5x16xf32>, vector<5x16xf32>, vector<5x5xf32> -> vector<5x5xf32>
    %cst_78 = arith.constant dense<0xFF800000> : vector<5xf32>
    %148 = vector.multi_reduction <maximumf>, %147, %cst_78 [1] : vector<5x5xf32> to vector<5xf32>
    %149 = vector.shape_cast %148 : vector<5xf32> to vector<5x1xf32>
    %150 = vector.broadcast %149 : vector<5x1xf32> to vector<5x5xf32>
    %151 = arith.subf %147, %150 : vector<5x5xf32>
    %152 = math.exp %151 : vector<5x5xf32>
    %cst_79 = arith.constant dense<0.000000e+00> : vector<5xf32>
    %153 = vector.multi_reduction <add>, %152, %cst_79 [1] : vector<5x5xf32> to vector<5xf32>
    %154 = vector.shape_cast %153 : vector<5xf32> to vector<5x1xf32>
    %155 = tpu.reciprocal %154 {approx = true} : vector<5x1xf32> -> vector<5x1xf32>
    %156 = vector.broadcast %155 : vector<5x1xf32> to vector<5x5xf32>
    %157 = arith.mulf %152, %156 : vector<5x5xf32>
    %158 = vector.extract_strided_slice %144 {offsets = [0, 0], sizes = [5, 16], strides = [1, 1]} : vector<5x64xf32> to vector<5x16xf32>
    %cst_80 = arith.constant dense<0.000000e+00> : vector<5x16xf32>
    %159 = tpu.matmul %157, %158, %cst_80 {dimension_numbers = #tpu.dot_dimension_numbers<[1], [0], [0], [1], [0, 0, 1, 1], [], []>} : vector<5x5xf32>, vector<5x16xf32>, vector<5x16xf32> -> vector<5x16xf32>
    %160 = vector.extract_strided_slice %26 {offsets = [0, 0], sizes = [16, 64], strides = [1, 1]} : vector<64x64xf32> to vector<16x64xf32>
    %cst_81 = arith.constant dense<0.000000e+00> : vector<5x64xf32>
    %161 = tpu.matmul %159, %160, %cst_81 {dimension_numbers = #tpu.dot_dimension_numbers<[1], [0], [0], [1], [0, 0, 1, 1], [], []>} : vector<5x16xf32>, vector<16x64xf32>, vector<5x64xf32> -> vector<5x64xf32>
    %162 = vector.extract_strided_slice %142 {offsets = [0, 16], sizes = [5, 16], strides = [1, 1]} : vector<5x64xf32> to vector<5x16xf32>
    %163 = vector.extract_strided_slice %143 {offsets = [0, 16], sizes = [5, 16], strides = [1, 1]} : vector<5x64xf32> to vector<5x16xf32>
    %cst_82 = arith.constant dense<0.000000e+00> : vector<5x5xf32>
    %164 = tpu.matmul %162, %163, %cst_82 {dimension_numbers = #tpu.dot_dimension_numbers<[1], [1], [0], [0], [0, 0, 1, 0], [], []>} : vector<5x16xf32>, vector<5x16xf32>, vector<5x5xf32> -> vector<5x5xf32>
    %cst_83 = arith.constant dense<0xFF800000> : vector<5xf32>
    %165 = vector.multi_reduction <maximumf>, %164, %cst_83 [1] : vector<5x5xf32> to vector<5xf32>
    %166 = vector.shape_cast %165 : vector<5xf32> to vector<5x1xf32>
    %167 = vector.broadcast %166 : vector<5x1xf32> to vector<5x5xf32>
    %168 = arith.subf %164, %167 : vector<5x5xf32>
    %169 = math.exp %168 : vector<5x5xf32>
    %cst_84 = arith.constant dense<0.000000e+00> : vector<5xf32>
    %170 = vector.multi_reduction <add>, %169, %cst_84 [1] : vector<5x5xf32> to vector<5xf32>
    %171 = vector.shape_cast %170 : vector<5xf32> to vector<5x1xf32>
    %172 = tpu.reciprocal %171 {approx = true} : vector<5x1xf32> -> vector<5x1xf32>
    %173 = vector.broadcast %172 : vector<5x1xf32> to vector<5x5xf32>
    %174 = arith.mulf %169, %173 : vector<5x5xf32>
    %175 = vector.extract_strided_slice %144 {offsets = [0, 16], sizes = [5, 16], strides = [1, 1]} : vector<5x64xf32> to vector<5x16xf32>
    %cst_85 = arith.constant dense<0.000000e+00> : vector<5x16xf32>
    %176 = tpu.matmul %174, %175, %cst_85 {dimension_numbers = #tpu.dot_dimension_numbers<[1], [0], [0], [1], [0, 0, 1, 1], [], []>} : vector<5x5xf32>, vector<5x16xf32>, vector<5x16xf32> -> vector<5x16xf32>
    %177 = vector.extract_strided_slice %26 {offsets = [16, 0], sizes = [16, 64], strides = [1, 1]} : vector<64x64xf32> to vector<16x64xf32>
    %cst_86 = arith.constant dense<0.000000e+00> : vector<5x64xf32>
    %178 = tpu.matmul %176, %177, %cst_86 {dimension_numbers = #tpu.dot_dimension_numbers<[1], [0], [0], [1], [0, 0, 1, 1], [], []>} : vector<5x16xf32>, vector<16x64xf32>, vector<5x64xf32> -> vector<5x64xf32>
    %179 = arith.addf %161, %178 : vector<5x64xf32>
    %180 = vector.extract_strided_slice %142 {offsets = [0, 32], sizes = [5, 16], strides = [1, 1]} : vector<5x64xf32> to vector<5x16xf32>
    %181 = vector.extract_strided_slice %143 {offsets = [0, 32], sizes = [5, 16], strides = [1, 1]} : vector<5x64xf32> to vector<5x16xf32>
    %cst_87 = arith.constant dense<0.000000e+00> : vector<5x5xf32>
    %182 = tpu.matmul %180, %181, %cst_87 {dimension_numbers = #tpu.dot_dimension_numbers<[1], [1], [0], [0], [0, 0, 1, 0], [], []>} : vector<5x16xf32>, vector<5x16xf32>, vector<5x5xf32> -> vector<5x5xf32>
    %cst_88 = arith.constant dense<0xFF800000> : vector<5xf32>
    %183 = vector.multi_reduction <maximumf>, %182, %cst_88 [1] : vector<5x5xf32> to vector<5xf32>
    %184 = vector.shape_cast %183 : vector<5xf32> to vector<5x1xf32>
    %185 = vector.broadcast %184 : vector<5x1xf32> to vector<5x5xf32>
    %186 = arith.subf %182, %185 : vector<5x5xf32>
    %187 = math.exp %186 : vector<5x5xf32>
    %cst_89 = arith.constant dense<0.000000e+00> : vector<5xf32>
    %188 = vector.multi_reduction <add>, %187, %cst_89 [1] : vector<5x5xf32> to vector<5xf32>
    %189 = vector.shape_cast %188 : vector<5xf32> to vector<5x1xf32>
    %190 = tpu.reciprocal %189 {approx = true} : vector<5x1xf32> -> vector<5x1xf32>
    %191 = vector.broadcast %190 : vector<5x1xf32> to vector<5x5xf32>
    %192 = arith.mulf %187, %191 : vector<5x5xf32>
    %193 = vector.extract_strided_slice %144 {offsets = [0, 32], sizes = [5, 16], strides = [1, 1]} : vector<5x64xf32> to vector<5x16xf32>
    %cst_90 = arith.constant dense<0.000000e+00> : vector<5x16xf32>
    %194 = tpu.matmul %192, %193, %cst_90 {dimension_numbers = #tpu.dot_dimension_numbers<[1], [0], [0], [1], [0, 0, 1, 1], [], []>} : vector<5x5xf32>, vector<5x16xf32>, vector<5x16xf32> -> vector<5x16xf32>
    %195 = vector.extract_strided_slice %26 {offsets = [32, 0], sizes = [16, 64], strides = [1, 1]} : vector<64x64xf32> to vector<16x64xf32>
    %cst_91 = arith.constant dense<0.000000e+00> : vector<5x64xf32>
    %196 = tpu.matmul %194, %195, %cst_91 {dimension_numbers = #tpu.dot_dimension_numbers<[1], [0], [0], [1], [0, 0, 1, 1], [], []>} : vector<5x16xf32>, vector<16x64xf32>, vector<5x64xf32> -> vector<5x64xf32>
    %197 = arith.addf %179, %196 : vector<5x64xf32>
    %198 = vector.extract_strided_slice %142 {offsets = [0, 48], sizes = [5, 16], strides = [1, 1]} : vector<5x64xf32> to vector<5x16xf32>
    %199 = vector.extract_strided_slice %143 {offsets = [0, 48], sizes = [5, 16], strides = [1, 1]} : vector<5x64xf32> to vector<5x16xf32>
    %cst_92 = arith.constant dense<0.000000e+00> : vector<5x5xf32>
    %200 = tpu.matmul %198, %199, %cst_92 {dimension_numbers = #tpu.dot_dimension_numbers<[1], [1], [0], [0], [0, 0, 1, 0], [], []>} : vector<5x16xf32>, vector<5x16xf32>, vector<5x5xf32> -> vector<5x5xf32>
    %cst_93 = arith.constant dense<0xFF800000> : vector<5xf32>
    %201 = vector.multi_reduction <maximumf>, %200, %cst_93 [1] : vector<5x5xf32> to vector<5xf32>
    %202 = vector.shape_cast %201 : vector<5xf32> to vector<5x1xf32>
    %203 = vector.broadcast %202 : vector<5x1xf32> to vector<5x5xf32>
    %204 = arith.subf %200, %203 : vector<5x5xf32>
    %205 = math.exp %204 : vector<5x5xf32>
    %cst_94 = arith.constant dense<0.000000e+00> : vector<5xf32>
    %206 = vector.multi_reduction <add>, %205, %cst_94 [1] : vector<5x5xf32> to vector<5xf32>
    %207 = vector.shape_cast %206 : vector<5xf32> to vector<5x1xf32>
    %208 = tpu.reciprocal %207 {approx = true} : vector<5x1xf32> -> vector<5x1xf32>
    %209 = vector.broadcast %208 : vector<5x1xf32> to vector<5x5xf32>
    %210 = arith.mulf %205, %209 : vector<5x5xf32>
    %211 = vector.extract_strided_slice %144 {offsets = [0, 48], sizes = [5, 16], strides = [1, 1]} : vector<5x64xf32> to vector<5x16xf32>
    %cst_95 = arith.constant dense<0.000000e+00> : vector<5x16xf32>
    %212 = tpu.matmul %210, %211, %cst_95 {dimension_numbers = #tpu.dot_dimension_numbers<[1], [0], [0], [1], [0, 0, 1, 1], [], []>} : vector<5x5xf32>, vector<5x16xf32>, vector<5x16xf32> -> vector<5x16xf32>
    %213 = vector.extract_strided_slice %26 {offsets = [48, 0], sizes = [16, 64], strides = [1, 1]} : vector<64x64xf32> to vector<16x64xf32>
    %cst_96 = arith.constant dense<0.000000e+00> : vector<5x64xf32>
    %214 = tpu.matmul %212, %213, %cst_96 {dimension_numbers = #tpu.dot_dimension_numbers<[1], [0], [0], [1], [0, 0, 1, 1], [], []>} : vector<5x16xf32>, vector<16x64xf32>, vector<5x64xf32> -> vector<5x64xf32>
    %215 = arith.addf %197, %214 : vector<5x64xf32>
    %216 = tpu.concatenate %141, %215 in 0 : vector<5x64xf32>, vector<5x64xf32> -> vector<10x64xf32>
    %217 = arith.addf %14, %216 : vector<10x64xf32>
    %218 = vector.broadcast %28 : vector<1x64xf32> to vector<10x64xf32>
    %219 = arith.addf %217, %218 : vector<10x64xf32>
    %cst_97 = arith.constant dense<0.000000e+00> : vector<10xf32>
    %220 = vector.multi_reduction <add>, %219, %cst_97 [1] : vector<10x64xf32> to vector<10xf32>
    %221 = vector.shape_cast %220 : vector<10xf32> to vector<10x1xf32>
    %cst_98 = arith.constant 6.400000e+01 : f32
    %222 = vector.broadcast %cst_98 : f32 to vector<10x1xf32>
    %223 = arith.divf %221, %222 : vector<10x1xf32>
    %224 = vector.broadcast %223 : vector<10x1xf32> to vector<10x64xf32>
    %225 = arith.subf %219, %224 : vector<10x64xf32>
    %226 = arith.mulf %225, %225 : vector<10x64xf32>
    %cst_99 = arith.constant dense<0.000000e+00> : vector<10xf32>
    %227 = vector.multi_reduction <add>, %226, %cst_99 [1] : vector<10x64xf32> to vector<10xf32>
    %228 = vector.shape_cast %227 : vector<10xf32> to vector<10x1xf32>
    %cst_100 = arith.constant 6.400000e+01 : f32
    %229 = vector.broadcast %cst_100 : f32 to vector<10x1xf32>
    %230 = arith.divf %228, %229 : vector<10x1xf32>
    %231 = vector.broadcast %223 : vector<10x1xf32> to vector<10x64xf32>
    %232 = arith.subf %219, %231 : vector<10x64xf32>
    %cst_101 = arith.constant 9.99999974E-6 : f32
    %233 = vector.broadcast %cst_101 : f32 to vector<10x1xf32>
    %234 = arith.addf %230, %233 : vector<10x1xf32>
    %235 = math.rsqrt %234 : vector<10x1xf32>
    %236 = vector.broadcast %235 : vector<10x1xf32> to vector<10x64xf32>
    %237 = arith.mulf %232, %236 : vector<10x64xf32>
    %238 = vector.broadcast %30 : vector<1x64xf32> to vector<10x64xf32>
    %239 = arith.mulf %237, %238 : vector<10x64xf32>
    %240 = vector.broadcast %32 : vector<1x64xf32> to vector<10x64xf32>
    %241 = arith.addf %239, %240 : vector<10x64xf32>
    %cst_102 = arith.constant dense<0.000000e+00> : vector<10x256xf32>
    %242 = tpu.matmul %241, %34, %cst_102 {dimension_numbers = #tpu.dot_dimension_numbers<[1], [0], [0], [1], [0, 0, 1, 1], [], []>} : vector<10x64xf32>, vector<64x256xf32>, vector<10x256xf32> -> vector<10x256xf32>
    %243 = vector.broadcast %36 : vector<1x256xf32> to vector<10x256xf32>
    %244 = arith.addf %242, %243 : vector<10x256xf32>
    %cst_103 = arith.constant 5.000000e-01 : f32
    %245 = vector.broadcast %cst_103 : f32 to vector<10x256xf32>
    %246 = arith.mulf %245, %244 : vector<10x256xf32>
    %cst_104 = arith.constant 0.707106769 : f32
    %247 = vector.broadcast %cst_104 : f32 to vector<10x256xf32>
    %248 = arith.mulf %244, %247 : vector<10x256xf32>
    %249 = math.absf %248 : vector<10x256xf32>
    %cst_105 = arith.constant 0.327591091 : f32
    %250 = vector.broadcast %cst_105 : f32 to vector<10x256xf32>
    %251 = arith.mulf %250, %249 : vector<10x256xf32>
    %cst_106 = arith.constant 1.000000e+00 : f32
    %252 = vector.broadcast %cst_106 : f32 to vector<10x256xf32>
    %253 = arith.addf %252, %251 : vector<10x256xf32>
    %cst_107 = arith.constant 1.000000e+00 : f32
    %254 = vector.broadcast %cst_107 : f32 to vector<10x256xf32>
    %255 = arith.divf %254, %253 : vector<10x256xf32>
    %cst_108 = arith.constant 1.06140542 : f32
    %256 = vector.broadcast %cst_108 : f32 to vector<10x256xf32>
    %257 = arith.mulf %256, %255 : vector<10x256xf32>
    %cst_109 = arith.constant -1.45315206 : f32
    %258 = vector.broadcast %cst_109 : f32 to vector<10x256xf32>
    %259 = arith.addf %257, %258 : vector<10x256xf32>
    %260 = arith.mulf %259, %255 : vector<10x256xf32>
    %cst_110 = arith.constant 1.42141378 : f32
    %261 = vector.broadcast %cst_110 : f32 to vector<10x256xf32>
    %262 = arith.addf %260, %261 : vector<10x256xf32>
    %263 = arith.mulf %262, %255 : vector<10x256xf32>
    %cst_111 = arith.constant -0.284496725 : f32
    %264 = vector.broadcast %cst_111 : f32 to vector<10x256xf32>
    %265 = arith.addf %263, %264 : vector<10x256xf32>
    %266 = arith.mulf %265, %255 : vector<10x256xf32>
    %cst_112 = arith.constant 0.254829586 : f32
    %267 = vector.broadcast %cst_112 : f32 to vector<10x256xf32>
    %268 = arith.addf %266, %267 : vector<10x256xf32>
    %269 = arith.mulf %268, %255 : vector<10x256xf32>
    %cst_113 = arith.constant 0.000000e+00 : f32
    %270 = vector.broadcast %cst_113 : f32 to vector<10x256xf32>
    %271 = arith.subf %270, %249 : vector<10x256xf32>
    %272 = arith.mulf %271, %249 : vector<10x256xf32>
    %273 = math.exp %272 : vector<10x256xf32>
    %274 = arith.mulf %269, %273 : vector<10x256xf32>
    %cst_114 = arith.constant 1.000000e+00 : f32
    %275 = vector.broadcast %cst_114 : f32 to vector<10x256xf32>
    %276 = arith.subf %275, %274 : vector<10x256xf32>
    %cst_115 = arith.constant 0.000000e+00 : f32
    %277 = vector.broadcast %cst_115 : f32 to vector<10x256xf32>
    %278 = arith.cmpf olt, %248, %277 : vector<10x256xf32>
    %cst_116 = arith.constant 0.000000e+00 : f32
    %279 = vector.broadcast %cst_116 : f32 to vector<10x256xf32>
    %280 = arith.subf %279, %276 : vector<10x256xf32>
    %281 = arith.select %278, %280, %276 : vector<10x256xi1>, vector<10x256xf32>
    %cst_117 = arith.constant 1.000000e+00 : f32
    %282 = vector.broadcast %cst_117 : f32 to vector<10x256xf32>
    %283 = arith.addf %282, %281 : vector<10x256xf32>
    %284 = arith.mulf %246, %283 : vector<10x256xf32>
    %cst_118 = arith.constant dense<0.000000e+00> : vector<10x64xf32>
    %285 = tpu.matmul %284, %38, %cst_118 {dimension_numbers = #tpu.dot_dimension_numbers<[1], [0], [0], [1], [0, 0, 1, 1], [], []>} : vector<10x256xf32>, vector<256x64xf32>, vector<10x64xf32> -> vector<10x64xf32>
    %286 = vector.broadcast %40 : vector<1x64xf32> to vector<10x64xf32>
    %287 = arith.addf %285, %286 : vector<10x64xf32>
    %288 = arith.addf %241, %287 : vector<10x64xf32>
    %c1 = arith.constant 1 : index
    %c0_119 = arith.constant 0 : index
    %c0_120 = arith.constant 0 : index
    %289 = vector.load %arg6[%c1, %c0_119, %c0_120] : memref<2x1x64xf32, #tpu.memory_space<vmem>>, vector<1x1x64xf32>
    %290 = vector.shape_cast %289 : vector<1x1x64xf32> to vector<1x64xf32>
    %c1_121 = arith.constant 1 : index
    %c0_122 = arith.constant 0 : index
    %c0_123 = arith.constant 0 : index
    %291 = vector.load %arg7[%c1_121, %c0_122, %c0_123] : memref<2x1x64xf32, #tpu.memory_space<vmem>>, vector<1x1x64xf32>
    %292 = vector.shape_cast %291 : vector<1x1x64xf32> to vector<1x64xf32>
    %c1_124 = arith.constant 1 : index
    %c0_125 = arith.constant 0 : index
    %c0_126 = arith.constant 0 : index
    %293 = vector.load %arg8[%c1_124, %c0_125, %c0_126] : memref<2x64x64xf32, #tpu.memory_space<vmem>>, vector<1x64x64xf32>
    %294 = vector.shape_cast %293 : vector<1x64x64xf32> to vector<64x64xf32>
    %c1_127 = arith.constant 1 : index
    %c0_128 = arith.constant 0 : index
    %c0_129 = arith.constant 0 : index
    %295 = vector.load %arg9[%c1_127, %c0_128, %c0_129] : memref<2x64x64xf32, #tpu.memory_space<vmem>>, vector<1x64x64xf32>
    %296 = vector.shape_cast %295 : vector<1x64x64xf32> to vector<64x64xf32>
    %c1_130 = arith.constant 1 : index
    %c0_131 = arith.constant 0 : index
    %c0_132 = arith.constant 0 : index
    %297 = vector.load %arg10[%c1_130, %c0_131, %c0_132] : memref<2x64x64xf32, #tpu.memory_space<vmem>>, vector<1x64x64xf32>
    %298 = vector.shape_cast %297 : vector<1x64x64xf32> to vector<64x64xf32>
    %c1_133 = arith.constant 1 : index
    %c0_134 = arith.constant 0 : index
    %c0_135 = arith.constant 0 : index
    %299 = vector.load %arg11[%c1_133, %c0_134, %c0_135] : memref<2x64x64xf32, #tpu.memory_space<vmem>>, vector<1x64x64xf32>
    %300 = vector.shape_cast %299 : vector<1x64x64xf32> to vector<64x64xf32>
    %c1_136 = arith.constant 1 : index
    %c0_137 = arith.constant 0 : index
    %c0_138 = arith.constant 0 : index
    %301 = vector.load %arg12[%c1_136, %c0_137, %c0_138] : memref<2x1x64xf32, #tpu.memory_space<vmem>>, vector<1x1x64xf32>
    %302 = vector.shape_cast %301 : vector<1x1x64xf32> to vector<1x64xf32>
    %c1_139 = arith.constant 1 : index
    %c0_140 = arith.constant 0 : index
    %c0_141 = arith.constant 0 : index
    %303 = vector.load %arg13[%c1_139, %c0_140, %c0_141] : memref<2x1x64xf32, #tpu.memory_space<vmem>>, vector<1x1x64xf32>
    %304 = vector.shape_cast %303 : vector<1x1x64xf32> to vector<1x64xf32>
    %c1_142 = arith.constant 1 : index
    %c0_143 = arith.constant 0 : index
    %c0_144 = arith.constant 0 : index
    %305 = vector.load %arg14[%c1_142, %c0_143, %c0_144] : memref<2x1x64xf32, #tpu.memory_space<vmem>>, vector<1x1x64xf32>
    %306 = vector.shape_cast %305 : vector<1x1x64xf32> to vector<1x64xf32>
    %c1_145 = arith.constant 1 : index
    %c0_146 = arith.constant 0 : index
    %c0_147 = arith.constant 0 : index
    %307 = vector.load %arg15[%c1_145, %c0_146, %c0_147] : memref<2x64x256xf32, #tpu.memory_space<vmem>>, vector<1x64x256xf32>
    %308 = vector.shape_cast %307 : vector<1x64x256xf32> to vector<64x256xf32>
    %c1_148 = arith.constant 1 : index
    %c0_149 = arith.constant 0 : index
    %c0_150 = arith.constant 0 : index
    %309 = vector.load %arg16[%c1_148, %c0_149, %c0_150] : memref<2x1x256xf32, #tpu.memory_space<vmem>>, vector<1x1x256xf32>
    %310 = vector.shape_cast %309 : vector<1x1x256xf32> to vector<1x256xf32>
    %c1_151 = arith.constant 1 : index
    %c0_152 = arith.constant 0 : index
    %c0_153 = arith.constant 0 : index
    %311 = vector.load %arg17[%c1_151, %c0_152, %c0_153] : memref<2x256x64xf32, #tpu.memory_space<vmem>>, vector<1x256x64xf32>
    %312 = vector.shape_cast %311 : vector<1x256x64xf32> to vector<256x64xf32>
    %c1_154 = arith.constant 1 : index
    %c0_155 = arith.constant 0 : index
    %c0_156 = arith.constant 0 : index
    %313 = vector.load %arg18[%c1_154, %c0_155, %c0_156] : memref<2x1x64xf32, #tpu.memory_space<vmem>>, vector<1x1x64xf32>
    %314 = vector.shape_cast %313 : vector<1x1x64xf32> to vector<1x64xf32>
    %cst_157 = arith.constant dense<0.000000e+00> : vector<10xf32>
    %315 = vector.multi_reduction <add>, %288, %cst_157 [1] : vector<10x64xf32> to vector<10xf32>
    %316 = vector.shape_cast %315 : vector<10xf32> to vector<10x1xf32>
    %cst_158 = arith.constant 6.400000e+01 : f32
    %317 = vector.broadcast %cst_158 : f32 to vector<10x1xf32>
    %318 = arith.divf %316, %317 : vector<10x1xf32>
    %319 = vector.broadcast %318 : vector<10x1xf32> to vector<10x64xf32>
    %320 = arith.subf %288, %319 : vector<10x64xf32>
    %321 = arith.mulf %320, %320 : vector<10x64xf32>
    %cst_159 = arith.constant dense<0.000000e+00> : vector<10xf32>
    %322 = vector.multi_reduction <add>, %321, %cst_159 [1] : vector<10x64xf32> to vector<10xf32>
    %323 = vector.shape_cast %322 : vector<10xf32> to vector<10x1xf32>
    %cst_160 = arith.constant 6.400000e+01 : f32
    %324 = vector.broadcast %cst_160 : f32 to vector<10x1xf32>
    %325 = arith.divf %323, %324 : vector<10x1xf32>
    %326 = vector.broadcast %318 : vector<10x1xf32> to vector<10x64xf32>
    %327 = arith.subf %288, %326 : vector<10x64xf32>
    %cst_161 = arith.constant 9.99999974E-6 : f32
    %328 = vector.broadcast %cst_161 : f32 to vector<10x1xf32>
    %329 = arith.addf %325, %328 : vector<10x1xf32>
    %330 = math.rsqrt %329 : vector<10x1xf32>
    %331 = vector.broadcast %330 : vector<10x1xf32> to vector<10x64xf32>
    %332 = arith.mulf %327, %331 : vector<10x64xf32>
    %333 = vector.broadcast %290 : vector<1x64xf32> to vector<10x64xf32>
    %334 = arith.mulf %332, %333 : vector<10x64xf32>
    %335 = vector.broadcast %292 : vector<1x64xf32> to vector<10x64xf32>
    %336 = arith.addf %334, %335 : vector<10x64xf32>
    %cst_162 = arith.constant dense<0.000000e+00> : vector<10x64xf32>
    %337 = tpu.matmul %336, %294, %cst_162 {dimension_numbers = #tpu.dot_dimension_numbers<[1], [0], [0], [1], [0, 0, 1, 1], [], []>} : vector<10x64xf32>, vector<64x64xf32>, vector<10x64xf32> -> vector<10x64xf32>
    %cst_163 = arith.constant 1.250000e-01 : f32
    %338 = vector.broadcast %cst_163 : f32 to vector<10x64xf32>
    %339 = arith.mulf %337, %338 : vector<10x64xf32>
    %cst_164 = arith.constant dense<0.000000e+00> : vector<10x64xf32>
    %340 = tpu.matmul %336, %296, %cst_164 {dimension_numbers = #tpu.dot_dimension_numbers<[1], [0], [0], [1], [0, 0, 1, 1], [], []>} : vector<10x64xf32>, vector<64x64xf32>, vector<10x64xf32> -> vector<10x64xf32>
    %cst_165 = arith.constant dense<0.000000e+00> : vector<10x64xf32>
    %341 = tpu.matmul %336, %298, %cst_165 {dimension_numbers = #tpu.dot_dimension_numbers<[1], [0], [0], [1], [0, 0, 1, 1], [], []>} : vector<10x64xf32>, vector<64x64xf32>, vector<10x64xf32> -> vector<10x64xf32>
    %342 = vector.extract_strided_slice %339 {offsets = [0, 0], sizes = [5, 64], strides = [1, 1]} : vector<10x64xf32> to vector<5x64xf32>
    %343 = vector.extract_strided_slice %340 {offsets = [0, 0], sizes = [5, 64], strides = [1, 1]} : vector<10x64xf32> to vector<5x64xf32>
    %344 = vector.extract_strided_slice %341 {offsets = [0, 0], sizes = [5, 64], strides = [1, 1]} : vector<10x64xf32> to vector<5x64xf32>
    %345 = vector.extract_strided_slice %342 {offsets = [0, 0], sizes = [5, 16], strides = [1, 1]} : vector<5x64xf32> to vector<5x16xf32>
    %346 = vector.extract_strided_slice %343 {offsets = [0, 0], sizes = [5, 16], strides = [1, 1]} : vector<5x64xf32> to vector<5x16xf32>
    %cst_166 = arith.constant dense<0.000000e+00> : vector<5x5xf32>
    %347 = tpu.matmul %345, %346, %cst_166 {dimension_numbers = #tpu.dot_dimension_numbers<[1], [1], [0], [0], [0, 0, 1, 0], [], []>} : vector<5x16xf32>, vector<5x16xf32>, vector<5x5xf32> -> vector<5x5xf32>
    %cst_167 = arith.constant dense<0xFF800000> : vector<5xf32>
    %348 = vector.multi_reduction <maximumf>, %347, %cst_167 [1] : vector<5x5xf32> to vector<5xf32>
    %349 = vector.shape_cast %348 : vector<5xf32> to vector<5x1xf32>
    %350 = vector.broadcast %349 : vector<5x1xf32> to vector<5x5xf32>
    %351 = arith.subf %347, %350 : vector<5x5xf32>
    %352 = math.exp %351 : vector<5x5xf32>
    %cst_168 = arith.constant dense<0.000000e+00> : vector<5xf32>
    %353 = vector.multi_reduction <add>, %352, %cst_168 [1] : vector<5x5xf32> to vector<5xf32>
    %354 = vector.shape_cast %353 : vector<5xf32> to vector<5x1xf32>
    %355 = tpu.reciprocal %354 {approx = true} : vector<5x1xf32> -> vector<5x1xf32>
    %356 = vector.broadcast %355 : vector<5x1xf32> to vector<5x5xf32>
    %357 = arith.mulf %352, %356 : vector<5x5xf32>
    %358 = vector.extract_strided_slice %344 {offsets = [0, 0], sizes = [5, 16], strides = [1, 1]} : vector<5x64xf32> to vector<5x16xf32>
    %cst_169 = arith.constant dense<0.000000e+00> : vector<5x16xf32>
    %359 = tpu.matmul %357, %358, %cst_169 {dimension_numbers = #tpu.dot_dimension_numbers<[1], [0], [0], [1], [0, 0, 1, 1], [], []>} : vector<5x5xf32>, vector<5x16xf32>, vector<5x16xf32> -> vector<5x16xf32>
    %360 = vector.extract_strided_slice %300 {offsets = [0, 0], sizes = [16, 64], strides = [1, 1]} : vector<64x64xf32> to vector<16x64xf32>
    %cst_170 = arith.constant dense<0.000000e+00> : vector<5x64xf32>
    %361 = tpu.matmul %359, %360, %cst_170 {dimension_numbers = #tpu.dot_dimension_numbers<[1], [0], [0], [1], [0, 0, 1, 1], [], []>} : vector<5x16xf32>, vector<16x64xf32>, vector<5x64xf32> -> vector<5x64xf32>
    %362 = vector.extract_strided_slice %342 {offsets = [0, 16], sizes = [5, 16], strides = [1, 1]} : vector<5x64xf32> to vector<5x16xf32>
    %363 = vector.extract_strided_slice %343 {offsets = [0, 16], sizes = [5, 16], strides = [1, 1]} : vector<5x64xf32> to vector<5x16xf32>
    %cst_171 = arith.constant dense<0.000000e+00> : vector<5x5xf32>
    %364 = tpu.matmul %362, %363, %cst_171 {dimension_numbers = #tpu.dot_dimension_numbers<[1], [1], [0], [0], [0, 0, 1, 0], [], []>} : vector<5x16xf32>, vector<5x16xf32>, vector<5x5xf32> -> vector<5x5xf32>
    %cst_172 = arith.constant dense<0xFF800000> : vector<5xf32>
    %365 = vector.multi_reduction <maximumf>, %364, %cst_172 [1] : vector<5x5xf32> to vector<5xf32>
    %366 = vector.shape_cast %365 : vector<5xf32> to vector<5x1xf32>
    %367 = vector.broadcast %366 : vector<5x1xf32> to vector<5x5xf32>
    %368 = arith.subf %364, %367 : vector<5x5xf32>
    %369 = math.exp %368 : vector<5x5xf32>
    %cst_173 = arith.constant dense<0.000000e+00> : vector<5xf32>
    %370 = vector.multi_reduction <add>, %369, %cst_173 [1] : vector<5x5xf32> to vector<5xf32>
    %371 = vector.shape_cast %370 : vector<5xf32> to vector<5x1xf32>
    %372 = tpu.reciprocal %371 {approx = true} : vector<5x1xf32> -> vector<5x1xf32>
    %373 = vector.broadcast %372 : vector<5x1xf32> to vector<5x5xf32>
    %374 = arith.mulf %369, %373 : vector<5x5xf32>
    %375 = vector.extract_strided_slice %344 {offsets = [0, 16], sizes = [5, 16], strides = [1, 1]} : vector<5x64xf32> to vector<5x16xf32>
    %cst_174 = arith.constant dense<0.000000e+00> : vector<5x16xf32>
    %376 = tpu.matmul %374, %375, %cst_174 {dimension_numbers = #tpu.dot_dimension_numbers<[1], [0], [0], [1], [0, 0, 1, 1], [], []>} : vector<5x5xf32>, vector<5x16xf32>, vector<5x16xf32> -> vector<5x16xf32>
    %377 = vector.extract_strided_slice %300 {offsets = [16, 0], sizes = [16, 64], strides = [1, 1]} : vector<64x64xf32> to vector<16x64xf32>
    %cst_175 = arith.constant dense<0.000000e+00> : vector<5x64xf32>
    %378 = tpu.matmul %376, %377, %cst_175 {dimension_numbers = #tpu.dot_dimension_numbers<[1], [0], [0], [1], [0, 0, 1, 1], [], []>} : vector<5x16xf32>, vector<16x64xf32>, vector<5x64xf32> -> vector<5x64xf32>
    %379 = arith.addf %361, %378 : vector<5x64xf32>
    %380 = vector.extract_strided_slice %342 {offsets = [0, 32], sizes = [5, 16], strides = [1, 1]} : vector<5x64xf32> to vector<5x16xf32>
    %381 = vector.extract_strided_slice %343 {offsets = [0, 32], sizes = [5, 16], strides = [1, 1]} : vector<5x64xf32> to vector<5x16xf32>
    %cst_176 = arith.constant dense<0.000000e+00> : vector<5x5xf32>
    %382 = tpu.matmul %380, %381, %cst_176 {dimension_numbers = #tpu.dot_dimension_numbers<[1], [1], [0], [0], [0, 0, 1, 0], [], []>} : vector<5x16xf32>, vector<5x16xf32>, vector<5x5xf32> -> vector<5x5xf32>
    %cst_177 = arith.constant dense<0xFF800000> : vector<5xf32>
    %383 = vector.multi_reduction <maximumf>, %382, %cst_177 [1] : vector<5x5xf32> to vector<5xf32>
    %384 = vector.shape_cast %383 : vector<5xf32> to vector<5x1xf32>
    %385 = vector.broadcast %384 : vector<5x1xf32> to vector<5x5xf32>
    %386 = arith.subf %382, %385 : vector<5x5xf32>
    %387 = math.exp %386 : vector<5x5xf32>
    %cst_178 = arith.constant dense<0.000000e+00> : vector<5xf32>
    %388 = vector.multi_reduction <add>, %387, %cst_178 [1] : vector<5x5xf32> to vector<5xf32>
    %389 = vector.shape_cast %388 : vector<5xf32> to vector<5x1xf32>
    %390 = tpu.reciprocal %389 {approx = true} : vector<5x1xf32> -> vector<5x1xf32>
    %391 = vector.broadcast %390 : vector<5x1xf32> to vector<5x5xf32>
    %392 = arith.mulf %387, %391 : vector<5x5xf32>
    %393 = vector.extract_strided_slice %344 {offsets = [0, 32], sizes = [5, 16], strides = [1, 1]} : vector<5x64xf32> to vector<5x16xf32>
    %cst_179 = arith.constant dense<0.000000e+00> : vector<5x16xf32>
    %394 = tpu.matmul %392, %393, %cst_179 {dimension_numbers = #tpu.dot_dimension_numbers<[1], [0], [0], [1], [0, 0, 1, 1], [], []>} : vector<5x5xf32>, vector<5x16xf32>, vector<5x16xf32> -> vector<5x16xf32>
    %395 = vector.extract_strided_slice %300 {offsets = [32, 0], sizes = [16, 64], strides = [1, 1]} : vector<64x64xf32> to vector<16x64xf32>
    %cst_180 = arith.constant dense<0.000000e+00> : vector<5x64xf32>
    %396 = tpu.matmul %394, %395, %cst_180 {dimension_numbers = #tpu.dot_dimension_numbers<[1], [0], [0], [1], [0, 0, 1, 1], [], []>} : vector<5x16xf32>, vector<16x64xf32>, vector<5x64xf32> -> vector<5x64xf32>
    %397 = arith.addf %379, %396 : vector<5x64xf32>
    %398 = vector.extract_strided_slice %342 {offsets = [0, 48], sizes = [5, 16], strides = [1, 1]} : vector<5x64xf32> to vector<5x16xf32>
    %399 = vector.extract_strided_slice %343 {offsets = [0, 48], sizes = [5, 16], strides = [1, 1]} : vector<5x64xf32> to vector<5x16xf32>
    %cst_181 = arith.constant dense<0.000000e+00> : vector<5x5xf32>
    %400 = tpu.matmul %398, %399, %cst_181 {dimension_numbers = #tpu.dot_dimension_numbers<[1], [1], [0], [0], [0, 0, 1, 0], [], []>} : vector<5x16xf32>, vector<5x16xf32>, vector<5x5xf32> -> vector<5x5xf32>
    %cst_182 = arith.constant dense<0xFF800000> : vector<5xf32>
    %401 = vector.multi_reduction <maximumf>, %400, %cst_182 [1] : vector<5x5xf32> to vector<5xf32>
    %402 = vector.shape_cast %401 : vector<5xf32> to vector<5x1xf32>
    %403 = vector.broadcast %402 : vector<5x1xf32> to vector<5x5xf32>
    %404 = arith.subf %400, %403 : vector<5x5xf32>
    %405 = math.exp %404 : vector<5x5xf32>
    %cst_183 = arith.constant dense<0.000000e+00> : vector<5xf32>
    %406 = vector.multi_reduction <add>, %405, %cst_183 [1] : vector<5x5xf32> to vector<5xf32>
    %407 = vector.shape_cast %406 : vector<5xf32> to vector<5x1xf32>
    %408 = tpu.reciprocal %407 {approx = true} : vector<5x1xf32> -> vector<5x1xf32>
    %409 = vector.broadcast %408 : vector<5x1xf32> to vector<5x5xf32>
    %410 = arith.mulf %405, %409 : vector<5x5xf32>
    %411 = vector.extract_strided_slice %344 {offsets = [0, 48], sizes = [5, 16], strides = [1, 1]} : vector<5x64xf32> to vector<5x16xf32>
    %cst_184 = arith.constant dense<0.000000e+00> : vector<5x16xf32>
    %412 = tpu.matmul %410, %411, %cst_184 {dimension_numbers = #tpu.dot_dimension_numbers<[1], [0], [0], [1], [0, 0, 1, 1], [], []>} : vector<5x5xf32>, vector<5x16xf32>, vector<5x16xf32> -> vector<5x16xf32>
    %413 = vector.extract_strided_slice %300 {offsets = [48, 0], sizes = [16, 64], strides = [1, 1]} : vector<64x64xf32> to vector<16x64xf32>
    %cst_185 = arith.constant dense<0.000000e+00> : vector<5x64xf32>
    %414 = tpu.matmul %412, %413, %cst_185 {dimension_numbers = #tpu.dot_dimension_numbers<[1], [0], [0], [1], [0, 0, 1, 1], [], []>} : vector<5x16xf32>, vector<16x64xf32>, vector<5x64xf32> -> vector<5x64xf32>
    %415 = arith.addf %397, %414 : vector<5x64xf32>
    %416 = vector.extract_strided_slice %339 {offsets = [5, 0], sizes = [5, 64], strides = [1, 1]} : vector<10x64xf32> to vector<5x64xf32>
    %417 = vector.extract_strided_slice %340 {offsets = [5, 0], sizes = [5, 64], strides = [1, 1]} : vector<10x64xf32> to vector<5x64xf32>
    %418 = vector.extract_strided_slice %341 {offsets = [5, 0], sizes = [5, 64], strides = [1, 1]} : vector<10x64xf32> to vector<5x64xf32>
    %419 = vector.extract_strided_slice %416 {offsets = [0, 0], sizes = [5, 16], strides = [1, 1]} : vector<5x64xf32> to vector<5x16xf32>
    %420 = vector.extract_strided_slice %417 {offsets = [0, 0], sizes = [5, 16], strides = [1, 1]} : vector<5x64xf32> to vector<5x16xf32>
    %cst_186 = arith.constant dense<0.000000e+00> : vector<5x5xf32>
    %421 = tpu.matmul %419, %420, %cst_186 {dimension_numbers = #tpu.dot_dimension_numbers<[1], [1], [0], [0], [0, 0, 1, 0], [], []>} : vector<5x16xf32>, vector<5x16xf32>, vector<5x5xf32> -> vector<5x5xf32>
    %cst_187 = arith.constant dense<0xFF800000> : vector<5xf32>
    %422 = vector.multi_reduction <maximumf>, %421, %cst_187 [1] : vector<5x5xf32> to vector<5xf32>
    %423 = vector.shape_cast %422 : vector<5xf32> to vector<5x1xf32>
    %424 = vector.broadcast %423 : vector<5x1xf32> to vector<5x5xf32>
    %425 = arith.subf %421, %424 : vector<5x5xf32>
    %426 = math.exp %425 : vector<5x5xf32>
    %cst_188 = arith.constant dense<0.000000e+00> : vector<5xf32>
    %427 = vector.multi_reduction <add>, %426, %cst_188 [1] : vector<5x5xf32> to vector<5xf32>
    %428 = vector.shape_cast %427 : vector<5xf32> to vector<5x1xf32>
    %429 = tpu.reciprocal %428 {approx = true} : vector<5x1xf32> -> vector<5x1xf32>
    %430 = vector.broadcast %429 : vector<5x1xf32> to vector<5x5xf32>
    %431 = arith.mulf %426, %430 : vector<5x5xf32>
    %432 = vector.extract_strided_slice %418 {offsets = [0, 0], sizes = [5, 16], strides = [1, 1]} : vector<5x64xf32> to vector<5x16xf32>
    %cst_189 = arith.constant dense<0.000000e+00> : vector<5x16xf32>
    %433 = tpu.matmul %431, %432, %cst_189 {dimension_numbers = #tpu.dot_dimension_numbers<[1], [0], [0], [1], [0, 0, 1, 1], [], []>} : vector<5x5xf32>, vector<5x16xf32>, vector<5x16xf32> -> vector<5x16xf32>
    %434 = vector.extract_strided_slice %300 {offsets = [0, 0], sizes = [16, 64], strides = [1, 1]} : vector<64x64xf32> to vector<16x64xf32>
    %cst_190 = arith.constant dense<0.000000e+00> : vector<5x64xf32>
    %435 = tpu.matmul %433, %434, %cst_190 {dimension_numbers = #tpu.dot_dimension_numbers<[1], [0], [0], [1], [0, 0, 1, 1], [], []>} : vector<5x16xf32>, vector<16x64xf32>, vector<5x64xf32> -> vector<5x64xf32>
    %436 = vector.extract_strided_slice %416 {offsets = [0, 16], sizes = [5, 16], strides = [1, 1]} : vector<5x64xf32> to vector<5x16xf32>
    %437 = vector.extract_strided_slice %417 {offsets = [0, 16], sizes = [5, 16], strides = [1, 1]} : vector<5x64xf32> to vector<5x16xf32>
    %cst_191 = arith.constant dense<0.000000e+00> : vector<5x5xf32>
    %438 = tpu.matmul %436, %437, %cst_191 {dimension_numbers = #tpu.dot_dimension_numbers<[1], [1], [0], [0], [0, 0, 1, 0], [], []>} : vector<5x16xf32>, vector<5x16xf32>, vector<5x5xf32> -> vector<5x5xf32>
    %cst_192 = arith.constant dense<0xFF800000> : vector<5xf32>
    %439 = vector.multi_reduction <maximumf>, %438, %cst_192 [1] : vector<5x5xf32> to vector<5xf32>
    %440 = vector.shape_cast %439 : vector<5xf32> to vector<5x1xf32>
    %441 = vector.broadcast %440 : vector<5x1xf32> to vector<5x5xf32>
    %442 = arith.subf %438, %441 : vector<5x5xf32>
    %443 = math.exp %442 : vector<5x5xf32>
    %cst_193 = arith.constant dense<0.000000e+00> : vector<5xf32>
    %444 = vector.multi_reduction <add>, %443, %cst_193 [1] : vector<5x5xf32> to vector<5xf32>
    %445 = vector.shape_cast %444 : vector<5xf32> to vector<5x1xf32>
    %446 = tpu.reciprocal %445 {approx = true} : vector<5x1xf32> -> vector<5x1xf32>
    %447 = vector.broadcast %446 : vector<5x1xf32> to vector<5x5xf32>
    %448 = arith.mulf %443, %447 : vector<5x5xf32>
    %449 = vector.extract_strided_slice %418 {offsets = [0, 16], sizes = [5, 16], strides = [1, 1]} : vector<5x64xf32> to vector<5x16xf32>
    %cst_194 = arith.constant dense<0.000000e+00> : vector<5x16xf32>
    %450 = tpu.matmul %448, %449, %cst_194 {dimension_numbers = #tpu.dot_dimension_numbers<[1], [0], [0], [1], [0, 0, 1, 1], [], []>} : vector<5x5xf32>, vector<5x16xf32>, vector<5x16xf32> -> vector<5x16xf32>
    %451 = vector.extract_strided_slice %300 {offsets = [16, 0], sizes = [16, 64], strides = [1, 1]} : vector<64x64xf32> to vector<16x64xf32>
    %cst_195 = arith.constant dense<0.000000e+00> : vector<5x64xf32>
    %452 = tpu.matmul %450, %451, %cst_195 {dimension_numbers = #tpu.dot_dimension_numbers<[1], [0], [0], [1], [0, 0, 1, 1], [], []>} : vector<5x16xf32>, vector<16x64xf32>, vector<5x64xf32> -> vector<5x64xf32>
    %453 = arith.addf %435, %452 : vector<5x64xf32>
    %454 = vector.extract_strided_slice %416 {offsets = [0, 32], sizes = [5, 16], strides = [1, 1]} : vector<5x64xf32> to vector<5x16xf32>
    %455 = vector.extract_strided_slice %417 {offsets = [0, 32], sizes = [5, 16], strides = [1, 1]} : vector<5x64xf32> to vector<5x16xf32>
    %cst_196 = arith.constant dense<0.000000e+00> : vector<5x5xf32>
    %456 = tpu.matmul %454, %455, %cst_196 {dimension_numbers = #tpu.dot_dimension_numbers<[1], [1], [0], [0], [0, 0, 1, 0], [], []>} : vector<5x16xf32>, vector<5x16xf32>, vector<5x5xf32> -> vector<5x5xf32>
    %cst_197 = arith.constant dense<0xFF800000> : vector<5xf32>
    %457 = vector.multi_reduction <maximumf>, %456, %cst_197 [1] : vector<5x5xf32> to vector<5xf32>
    %458 = vector.shape_cast %457 : vector<5xf32> to vector<5x1xf32>
    %459 = vector.broadcast %458 : vector<5x1xf32> to vector<5x5xf32>
    %460 = arith.subf %456, %459 : vector<5x5xf32>
    %461 = math.exp %460 : vector<5x5xf32>
    %cst_198 = arith.constant dense<0.000000e+00> : vector<5xf32>
    %462 = vector.multi_reduction <add>, %461, %cst_198 [1] : vector<5x5xf32> to vector<5xf32>
    %463 = vector.shape_cast %462 : vector<5xf32> to vector<5x1xf32>
    %464 = tpu.reciprocal %463 {approx = true} : vector<5x1xf32> -> vector<5x1xf32>
    %465 = vector.broadcast %464 : vector<5x1xf32> to vector<5x5xf32>
    %466 = arith.mulf %461, %465 : vector<5x5xf32>
    %467 = vector.extract_strided_slice %418 {offsets = [0, 32], sizes = [5, 16], strides = [1, 1]} : vector<5x64xf32> to vector<5x16xf32>
    %cst_199 = arith.constant dense<0.000000e+00> : vector<5x16xf32>
    %468 = tpu.matmul %466, %467, %cst_199 {dimension_numbers = #tpu.dot_dimension_numbers<[1], [0], [0], [1], [0, 0, 1, 1], [], []>} : vector<5x5xf32>, vector<5x16xf32>, vector<5x16xf32> -> vector<5x16xf32>
    %469 = vector.extract_strided_slice %300 {offsets = [32, 0], sizes = [16, 64], strides = [1, 1]} : vector<64x64xf32> to vector<16x64xf32>
    %cst_200 = arith.constant dense<0.000000e+00> : vector<5x64xf32>
    %470 = tpu.matmul %468, %469, %cst_200 {dimension_numbers = #tpu.dot_dimension_numbers<[1], [0], [0], [1], [0, 0, 1, 1], [], []>} : vector<5x16xf32>, vector<16x64xf32>, vector<5x64xf32> -> vector<5x64xf32>
    %471 = arith.addf %453, %470 : vector<5x64xf32>
    %472 = vector.extract_strided_slice %416 {offsets = [0, 48], sizes = [5, 16], strides = [1, 1]} : vector<5x64xf32> to vector<5x16xf32>
    %473 = vector.extract_strided_slice %417 {offsets = [0, 48], sizes = [5, 16], strides = [1, 1]} : vector<5x64xf32> to vector<5x16xf32>
    %cst_201 = arith.constant dense<0.000000e+00> : vector<5x5xf32>
    %474 = tpu.matmul %472, %473, %cst_201 {dimension_numbers = #tpu.dot_dimension_numbers<[1], [1], [0], [0], [0, 0, 1, 0], [], []>} : vector<5x16xf32>, vector<5x16xf32>, vector<5x5xf32> -> vector<5x5xf32>
    %cst_202 = arith.constant dense<0xFF800000> : vector<5xf32>
    %475 = vector.multi_reduction <maximumf>, %474, %cst_202 [1] : vector<5x5xf32> to vector<5xf32>
    %476 = vector.shape_cast %475 : vector<5xf32> to vector<5x1xf32>
    %477 = vector.broadcast %476 : vector<5x1xf32> to vector<5x5xf32>
    %478 = arith.subf %474, %477 : vector<5x5xf32>
    %479 = math.exp %478 : vector<5x5xf32>
    %cst_203 = arith.constant dense<0.000000e+00> : vector<5xf32>
    %480 = vector.multi_reduction <add>, %479, %cst_203 [1] : vector<5x5xf32> to vector<5xf32>
    %481 = vector.shape_cast %480 : vector<5xf32> to vector<5x1xf32>
    %482 = tpu.reciprocal %481 {approx = true} : vector<5x1xf32> -> vector<5x1xf32>
    %483 = vector.broadcast %482 : vector<5x1xf32> to vector<5x5xf32>
    %484 = arith.mulf %479, %483 : vector<5x5xf32>
    %485 = vector.extract_strided_slice %418 {offsets = [0, 48], sizes = [5, 16], strides = [1, 1]} : vector<5x64xf32> to vector<5x16xf32>
    %cst_204 = arith.constant dense<0.000000e+00> : vector<5x16xf32>
    %486 = tpu.matmul %484, %485, %cst_204 {dimension_numbers = #tpu.dot_dimension_numbers<[1], [0], [0], [1], [0, 0, 1, 1], [], []>} : vector<5x5xf32>, vector<5x16xf32>, vector<5x16xf32> -> vector<5x16xf32>
    %487 = vector.extract_strided_slice %300 {offsets = [48, 0], sizes = [16, 64], strides = [1, 1]} : vector<64x64xf32> to vector<16x64xf32>
    %cst_205 = arith.constant dense<0.000000e+00> : vector<5x64xf32>
    %488 = tpu.matmul %486, %487, %cst_205 {dimension_numbers = #tpu.dot_dimension_numbers<[1], [0], [0], [1], [0, 0, 1, 1], [], []>} : vector<5x16xf32>, vector<16x64xf32>, vector<5x64xf32> -> vector<5x64xf32>
    %489 = arith.addf %471, %488 : vector<5x64xf32>
    %490 = tpu.concatenate %415, %489 in 0 : vector<5x64xf32>, vector<5x64xf32> -> vector<10x64xf32>
    %491 = arith.addf %288, %490 : vector<10x64xf32>
    %492 = vector.broadcast %302 : vector<1x64xf32> to vector<10x64xf32>
    %493 = arith.addf %491, %492 : vector<10x64xf32>
    %cst_206 = arith.constant dense<0.000000e+00> : vector<10xf32>
    %494 = vector.multi_reduction <add>, %493, %cst_206 [1] : vector<10x64xf32> to vector<10xf32>
    %495 = vector.shape_cast %494 : vector<10xf32> to vector<10x1xf32>
    %cst_207 = arith.constant 6.400000e+01 : f32
    %496 = vector.broadcast %cst_207 : f32 to vector<10x1xf32>
    %497 = arith.divf %495, %496 : vector<10x1xf32>
    %498 = vector.broadcast %497 : vector<10x1xf32> to vector<10x64xf32>
    %499 = arith.subf %493, %498 : vector<10x64xf32>
    %500 = arith.mulf %499, %499 : vector<10x64xf32>
    %cst_208 = arith.constant dense<0.000000e+00> : vector<10xf32>
    %501 = vector.multi_reduction <add>, %500, %cst_208 [1] : vector<10x64xf32> to vector<10xf32>
    %502 = vector.shape_cast %501 : vector<10xf32> to vector<10x1xf32>
    %cst_209 = arith.constant 6.400000e+01 : f32
    %503 = vector.broadcast %cst_209 : f32 to vector<10x1xf32>
    %504 = arith.divf %502, %503 : vector<10x1xf32>
    %505 = vector.broadcast %497 : vector<10x1xf32> to vector<10x64xf32>
    %506 = arith.subf %493, %505 : vector<10x64xf32>
    %cst_210 = arith.constant 9.99999974E-6 : f32
    %507 = vector.broadcast %cst_210 : f32 to vector<10x1xf32>
    %508 = arith.addf %504, %507 : vector<10x1xf32>
    %509 = math.rsqrt %508 : vector<10x1xf32>
    %510 = vector.broadcast %509 : vector<10x1xf32> to vector<10x64xf32>
    %511 = arith.mulf %506, %510 : vector<10x64xf32>
    %512 = vector.broadcast %304 : vector<1x64xf32> to vector<10x64xf32>
    %513 = arith.mulf %511, %512 : vector<10x64xf32>
    %514 = vector.broadcast %306 : vector<1x64xf32> to vector<10x64xf32>
    %515 = arith.addf %513, %514 : vector<10x64xf32>
    %cst_211 = arith.constant dense<0.000000e+00> : vector<10x256xf32>
    %516 = tpu.matmul %515, %308, %cst_211 {dimension_numbers = #tpu.dot_dimension_numbers<[1], [0], [0], [1], [0, 0, 1, 1], [], []>} : vector<10x64xf32>, vector<64x256xf32>, vector<10x256xf32> -> vector<10x256xf32>
    %517 = vector.broadcast %310 : vector<1x256xf32> to vector<10x256xf32>
    %518 = arith.addf %516, %517 : vector<10x256xf32>
    %cst_212 = arith.constant 5.000000e-01 : f32
    %519 = vector.broadcast %cst_212 : f32 to vector<10x256xf32>
    %520 = arith.mulf %519, %518 : vector<10x256xf32>
    %cst_213 = arith.constant 0.707106769 : f32
    %521 = vector.broadcast %cst_213 : f32 to vector<10x256xf32>
    %522 = arith.mulf %518, %521 : vector<10x256xf32>
    %523 = math.absf %522 : vector<10x256xf32>
    %cst_214 = arith.constant 0.327591091 : f32
    %524 = vector.broadcast %cst_214 : f32 to vector<10x256xf32>
    %525 = arith.mulf %524, %523 : vector<10x256xf32>
    %cst_215 = arith.constant 1.000000e+00 : f32
    %526 = vector.broadcast %cst_215 : f32 to vector<10x256xf32>
    %527 = arith.addf %526, %525 : vector<10x256xf32>
    %cst_216 = arith.constant 1.000000e+00 : f32
    %528 = vector.broadcast %cst_216 : f32 to vector<10x256xf32>
    %529 = arith.divf %528, %527 : vector<10x256xf32>
    %cst_217 = arith.constant 1.06140542 : f32
    %530 = vector.broadcast %cst_217 : f32 to vector<10x256xf32>
    %531 = arith.mulf %530, %529 : vector<10x256xf32>
    %cst_218 = arith.constant -1.45315206 : f32
    %532 = vector.broadcast %cst_218 : f32 to vector<10x256xf32>
    %533 = arith.addf %531, %532 : vector<10x256xf32>
    %534 = arith.mulf %533, %529 : vector<10x256xf32>
    %cst_219 = arith.constant 1.42141378 : f32
    %535 = vector.broadcast %cst_219 : f32 to vector<10x256xf32>
    %536 = arith.addf %534, %535 : vector<10x256xf32>
    %537 = arith.mulf %536, %529 : vector<10x256xf32>
    %cst_220 = arith.constant -0.284496725 : f32
    %538 = vector.broadcast %cst_220 : f32 to vector<10x256xf32>
    %539 = arith.addf %537, %538 : vector<10x256xf32>
    %540 = arith.mulf %539, %529 : vector<10x256xf32>
    %cst_221 = arith.constant 0.254829586 : f32
    %541 = vector.broadcast %cst_221 : f32 to vector<10x256xf32>
    %542 = arith.addf %540, %541 : vector<10x256xf32>
    %543 = arith.mulf %542, %529 : vector<10x256xf32>
    %cst_222 = arith.constant 0.000000e+00 : f32
    %544 = vector.broadcast %cst_222 : f32 to vector<10x256xf32>
    %545 = arith.subf %544, %523 : vector<10x256xf32>
    %546 = arith.mulf %545, %523 : vector<10x256xf32>
    %547 = math.exp %546 : vector<10x256xf32>
    %548 = arith.mulf %543, %547 : vector<10x256xf32>
    %cst_223 = arith.constant 1.000000e+00 : f32
    %549 = vector.broadcast %cst_223 : f32 to vector<10x256xf32>
    %550 = arith.subf %549, %548 : vector<10x256xf32>
    %cst_224 = arith.constant 0.000000e+00 : f32
    %551 = vector.broadcast %cst_224 : f32 to vector<10x256xf32>
    %552 = arith.cmpf olt, %522, %551 : vector<10x256xf32>
    %cst_225 = arith.constant 0.000000e+00 : f32
    %553 = vector.broadcast %cst_225 : f32 to vector<10x256xf32>
    %554 = arith.subf %553, %550 : vector<10x256xf32>
    %555 = arith.select %552, %554, %550 : vector<10x256xi1>, vector<10x256xf32>
    %cst_226 = arith.constant 1.000000e+00 : f32
    %556 = vector.broadcast %cst_226 : f32 to vector<10x256xf32>
    %557 = arith.addf %556, %555 : vector<10x256xf32>
    %558 = arith.mulf %520, %557 : vector<10x256xf32>
    %cst_227 = arith.constant dense<0.000000e+00> : vector<10x64xf32>
    %559 = tpu.matmul %558, %312, %cst_227 {dimension_numbers = #tpu.dot_dimension_numbers<[1], [0], [0], [1], [0, 0, 1, 1], [], []>} : vector<10x256xf32>, vector<256x64xf32>, vector<10x64xf32> -> vector<10x64xf32>
    %560 = vector.broadcast %314 : vector<1x64xf32> to vector<10x64xf32>
    %561 = arith.addf %559, %560 : vector<10x64xf32>
    %562 = arith.addf %515, %561 : vector<10x64xf32>
    %563 = vector.extract_strided_slice %562 {offsets = [0, 0], sizes = [1, 64], strides = [1, 1]} : vector<10x64xf32> to vector<1x64xf32>
    %564 = vector.extract_strided_slice %562 {offsets = [5, 0], sizes = [1, 64], strides = [1, 1]} : vector<10x64xf32> to vector<1x64xf32>
    %565 = tpu.concatenate %563, %564 in 0 : vector<1x64xf32>, vector<1x64xf32> -> vector<2x64xf32>
    %c0_228 = arith.constant 0 : index
    %c0_229 = arith.constant 0 : index
    %566 = vector.load %arg19[%c0_228, %c0_229] : memref<1x64xf32, #tpu.memory_space<vmem>>, vector<1x64xf32>
    %c0_230 = arith.constant 0 : index
    %c0_231 = arith.constant 0 : index
    %567 = vector.load %arg20[%c0_230, %c0_231] : memref<1x64xf32, #tpu.memory_space<vmem>>, vector<1x64xf32>
    %cst_232 = arith.constant dense<0.000000e+00> : vector<2xf32>
    %568 = vector.multi_reduction <add>, %565, %cst_232 [1] : vector<2x64xf32> to vector<2xf32>
    %569 = vector.shape_cast %568 : vector<2xf32> to vector<2x1xf32>
    %cst_233 = arith.constant 6.400000e+01 : f32
    %570 = vector.broadcast %cst_233 : f32 to vector<2x1xf32>
    %571 = arith.divf %569, %570 : vector<2x1xf32>
    %572 = vector.broadcast %571 : vector<2x1xf32> to vector<2x64xf32>
    %573 = arith.subf %565, %572 : vector<2x64xf32>
    %574 = arith.mulf %573, %573 : vector<2x64xf32>
    %cst_234 = arith.constant dense<0.000000e+00> : vector<2xf32>
    %575 = vector.multi_reduction <add>, %574, %cst_234 [1] : vector<2x64xf32> to vector<2xf32>
    %576 = vector.shape_cast %575 : vector<2xf32> to vector<2x1xf32>
    %cst_235 = arith.constant 6.400000e+01 : f32
    %577 = vector.broadcast %cst_235 : f32 to vector<2x1xf32>
    %578 = arith.divf %576, %577 : vector<2x1xf32>
    %579 = vector.broadcast %571 : vector<2x1xf32> to vector<2x64xf32>
    %580 = arith.subf %565, %579 : vector<2x64xf32>
    %cst_236 = arith.constant 9.99999974E-6 : f32
    %581 = vector.broadcast %cst_236 : f32 to vector<2x1xf32>
    %582 = arith.addf %578, %581 : vector<2x1xf32>
    %583 = math.rsqrt %582 : vector<2x1xf32>
    %584 = vector.broadcast %583 : vector<2x1xf32> to vector<2x64xf32>
    %585 = arith.mulf %580, %584 : vector<2x64xf32>
    %586 = vector.broadcast %566 : vector<1x64xf32> to vector<2x64xf32>
    %587 = arith.mulf %585, %586 : vector<2x64xf32>
    %588 = vector.broadcast %567 : vector<1x64xf32> to vector<2x64xf32>
    %589 = arith.addf %587, %588 : vector<2x64xf32>
    %c0_237 = arith.constant 0 : index
    %c0_238 = arith.constant 0 : index
    %590 = vector.load %arg21[%c0_237, %c0_238] : memref<64x256xf32, #tpu.memory_space<vmem>>, vector<64x256xf32>
    %cst_239 = arith.constant dense<0.000000e+00> : vector<2x256xf32>
    %591 = tpu.matmul %589, %590, %cst_239 {dimension_numbers = #tpu.dot_dimension_numbers<[1], [0], [0], [1], [0, 0, 1, 1], [], []>} : vector<2x64xf32>, vector<64x256xf32>, vector<2x256xf32> -> vector<2x256xf32>
    %c0_240 = arith.constant 0 : index
    %c0_241 = arith.constant 0 : index
    %592 = vector.load %arg22[%c0_240, %c0_241] : memref<1x256xf32, #tpu.memory_space<vmem>>, vector<1x256xf32>
    %593 = vector.broadcast %592 : vector<1x256xf32> to vector<2x256xf32>
    %594 = arith.addf %591, %593 : vector<2x256xf32>
    %cst_242 = arith.constant 5.000000e-01 : f32
    %595 = vector.broadcast %cst_242 : f32 to vector<2x256xf32>
    %596 = arith.mulf %595, %594 : vector<2x256xf32>
    %cst_243 = arith.constant 0.707106769 : f32
    %597 = vector.broadcast %cst_243 : f32 to vector<2x256xf32>
    %598 = arith.mulf %594, %597 : vector<2x256xf32>
    %599 = math.absf %598 : vector<2x256xf32>
    %cst_244 = arith.constant 0.327591091 : f32
    %600 = vector.broadcast %cst_244 : f32 to vector<2x256xf32>
    %601 = arith.mulf %600, %599 : vector<2x256xf32>
    %cst_245 = arith.constant 1.000000e+00 : f32
    %602 = vector.broadcast %cst_245 : f32 to vector<2x256xf32>
    %603 = arith.addf %602, %601 : vector<2x256xf32>
    %cst_246 = arith.constant 1.000000e+00 : f32
    %604 = vector.broadcast %cst_246 : f32 to vector<2x256xf32>
    %605 = arith.divf %604, %603 : vector<2x256xf32>
    %cst_247 = arith.constant 1.06140542 : f32
    %606 = vector.broadcast %cst_247 : f32 to vector<2x256xf32>
    %607 = arith.mulf %606, %605 : vector<2x256xf32>
    %cst_248 = arith.constant -1.45315206 : f32
    %608 = vector.broadcast %cst_248 : f32 to vector<2x256xf32>
    %609 = arith.addf %607, %608 : vector<2x256xf32>
    %610 = arith.mulf %609, %605 : vector<2x256xf32>
    %cst_249 = arith.constant 1.42141378 : f32
    %611 = vector.broadcast %cst_249 : f32 to vector<2x256xf32>
    %612 = arith.addf %610, %611 : vector<2x256xf32>
    %613 = arith.mulf %612, %605 : vector<2x256xf32>
    %cst_250 = arith.constant -0.284496725 : f32
    %614 = vector.broadcast %cst_250 : f32 to vector<2x256xf32>
    %615 = arith.addf %613, %614 : vector<2x256xf32>
    %616 = arith.mulf %615, %605 : vector<2x256xf32>
    %cst_251 = arith.constant 0.254829586 : f32
    %617 = vector.broadcast %cst_251 : f32 to vector<2x256xf32>
    %618 = arith.addf %616, %617 : vector<2x256xf32>
    %619 = arith.mulf %618, %605 : vector<2x256xf32>
    %cst_252 = arith.constant 0.000000e+00 : f32
    %620 = vector.broadcast %cst_252 : f32 to vector<2x256xf32>
    %621 = arith.subf %620, %599 : vector<2x256xf32>
    %622 = arith.mulf %621, %599 : vector<2x256xf32>
    %623 = math.exp %622 : vector<2x256xf32>
    %624 = arith.mulf %619, %623 : vector<2x256xf32>
    %cst_253 = arith.constant 1.000000e+00 : f32
    %625 = vector.broadcast %cst_253 : f32 to vector<2x256xf32>
    %626 = arith.subf %625, %624 : vector<2x256xf32>
    %cst_254 = arith.constant 0.000000e+00 : f32
    %627 = vector.broadcast %cst_254 : f32 to vector<2x256xf32>
    %628 = arith.cmpf olt, %598, %627 : vector<2x256xf32>
    %cst_255 = arith.constant 0.000000e+00 : f32
    %629 = vector.broadcast %cst_255 : f32 to vector<2x256xf32>
    %630 = arith.subf %629, %626 : vector<2x256xf32>
    %631 = arith.select %628, %630, %626 : vector<2x256xi1>, vector<2x256xf32>
    %cst_256 = arith.constant 1.000000e+00 : f32
    %632 = vector.broadcast %cst_256 : f32 to vector<2x256xf32>
    %633 = arith.addf %632, %631 : vector<2x256xf32>
    %634 = arith.mulf %596, %633 : vector<2x256xf32>
    %c0_257 = arith.constant 0 : index
    %c0_258 = arith.constant 0 : index
    %635 = vector.load %arg23[%c0_257, %c0_258] : memref<256x64xf32, #tpu.memory_space<vmem>>, vector<256x64xf32>
    %cst_259 = arith.constant dense<0.000000e+00> : vector<2x64xf32>
    %636 = tpu.matmul %634, %635, %cst_259 {dimension_numbers = #tpu.dot_dimension_numbers<[1], [0], [0], [1], [0, 0, 1, 1], [], []>} : vector<2x256xf32>, vector<256x64xf32>, vector<2x64xf32> -> vector<2x64xf32>
    %c0_260 = arith.constant 0 : index
    %c0_261 = arith.constant 0 : index
    %637 = vector.load %arg24[%c0_260, %c0_261] : memref<1x64xf32, #tpu.memory_space<vmem>>, vector<1x64xf32>
    %638 = vector.broadcast %637 : vector<1x64xf32> to vector<2x64xf32>
    %639 = arith.addf %636, %638 : vector<2x64xf32>
    %c0_262 = arith.constant 0 : index
    %c0_263 = arith.constant 0 : index
    %640 = vector.load %arg26[%c0_262, %c0_263] : memref<8x64xf32, #tpu.memory_space<vmem>>, vector<8x64xf32>
    %641 = vector.extract_strided_slice %639 {offsets = [0, 0], sizes = [1, 64], strides = [1, 1]} : vector<2x64xf32> to vector<1x64xf32>
    %c0_264 = arith.constant 0 : index
    %c0_265 = arith.constant 0 : index
    %c0_266 = arith.constant 0 : index
    %642 = vector.load %arg25[%c0_264, %c0_265, %c0_266] : memref<2x7x64xf32, #tpu.memory_space<vmem>>, vector<1x7x64xf32>
    %643 = vector.shape_cast %642 : vector<1x7x64xf32> to vector<7x64xf32>
    %644 = tpu.concatenate %641, %643 in 0 : vector<1x64xf32>, vector<7x64xf32> -> vector<8x64xf32>
    %645 = arith.addf %644, %640 : vector<8x64xf32>
    %646 = vector.extract_strided_slice %639 {offsets = [1, 0], sizes = [1, 64], strides = [1, 1]} : vector<2x64xf32> to vector<1x64xf32>
    %c1_267 = arith.constant 1 : index
    %c0_268 = arith.constant 0 : index
    %c0_269 = arith.constant 0 : index
    %647 = vector.load %arg25[%c1_267, %c0_268, %c0_269] : memref<2x7x64xf32, #tpu.memory_space<vmem>>, vector<1x7x64xf32>
    %648 = vector.shape_cast %647 : vector<1x7x64xf32> to vector<7x64xf32>
    %649 = tpu.concatenate %646, %648 in 0 : vector<1x64xf32>, vector<7x64xf32> -> vector<8x64xf32>
    %650 = arith.addf %649, %640 : vector<8x64xf32>
    %651 = tpu.concatenate %645, %650 in 0 : vector<8x64xf32>, vector<8x64xf32> -> vector<16x64xf32>
    %c0_270 = arith.constant 0 : index
    %c0_271 = arith.constant 0 : index
    %c0_272 = arith.constant 0 : index
    %652 = vector.load %arg27[%c0_270, %c0_271, %c0_272] : memref<2x1x64xf32, #tpu.memory_space<vmem>>, vector<1x1x64xf32>
    %653 = vector.shape_cast %652 : vector<1x1x64xf32> to vector<1x64xf32>
    %c0_273 = arith.constant 0 : index
    %c0_274 = arith.constant 0 : index
    %c0_275 = arith.constant 0 : index
    %654 = vector.load %arg28[%c0_273, %c0_274, %c0_275] : memref<2x1x64xf32, #tpu.memory_space<vmem>>, vector<1x1x64xf32>
    %655 = vector.shape_cast %654 : vector<1x1x64xf32> to vector<1x64xf32>
    %c0_276 = arith.constant 0 : index
    %c0_277 = arith.constant 0 : index
    %c0_278 = arith.constant 0 : index
    %656 = vector.load %arg29[%c0_276, %c0_277, %c0_278] : memref<2x64x64xf32, #tpu.memory_space<vmem>>, vector<1x64x64xf32>
    %657 = vector.shape_cast %656 : vector<1x64x64xf32> to vector<64x64xf32>
    %c0_279 = arith.constant 0 : index
    %c0_280 = arith.constant 0 : index
    %c0_281 = arith.constant 0 : index
    %658 = vector.load %arg30[%c0_279, %c0_280, %c0_281] : memref<2x64x64xf32, #tpu.memory_space<vmem>>, vector<1x64x64xf32>
    %659 = vector.shape_cast %658 : vector<1x64x64xf32> to vector<64x64xf32>
    %c0_282 = arith.constant 0 : index
    %c0_283 = arith.constant 0 : index
    %c0_284 = arith.constant 0 : index
    %660 = vector.load %arg31[%c0_282, %c0_283, %c0_284] : memref<2x64x64xf32, #tpu.memory_space<vmem>>, vector<1x64x64xf32>
    %661 = vector.shape_cast %660 : vector<1x64x64xf32> to vector<64x64xf32>
    %c0_285 = arith.constant 0 : index
    %c0_286 = arith.constant 0 : index
    %c0_287 = arith.constant 0 : index
    %662 = vector.load %arg32[%c0_285, %c0_286, %c0_287] : memref<2x64x64xf32, #tpu.memory_space<vmem>>, vector<1x64x64xf32>
    %663 = vector.shape_cast %662 : vector<1x64x64xf32> to vector<64x64xf32>
    %c0_288 = arith.constant 0 : index
    %c0_289 = arith.constant 0 : index
    %c0_290 = arith.constant 0 : index
    %664 = vector.load %arg33[%c0_288, %c0_289, %c0_290] : memref<2x1x64xf32, #tpu.memory_space<vmem>>, vector<1x1x64xf32>
    %665 = vector.shape_cast %664 : vector<1x1x64xf32> to vector<1x64xf32>
    %c0_291 = arith.constant 0 : index
    %c0_292 = arith.constant 0 : index
    %c0_293 = arith.constant 0 : index
    %666 = vector.load %arg34[%c0_291, %c0_292, %c0_293] : memref<2x1x64xf32, #tpu.memory_space<vmem>>, vector<1x1x64xf32>
    %667 = vector.shape_cast %666 : vector<1x1x64xf32> to vector<1x64xf32>
    %c0_294 = arith.constant 0 : index
    %c0_295 = arith.constant 0 : index
    %c0_296 = arith.constant 0 : index
    %668 = vector.load %arg35[%c0_294, %c0_295, %c0_296] : memref<2x1x64xf32, #tpu.memory_space<vmem>>, vector<1x1x64xf32>
    %669 = vector.shape_cast %668 : vector<1x1x64xf32> to vector<1x64xf32>
    %c0_297 = arith.constant 0 : index
    %c0_298 = arith.constant 0 : index
    %c0_299 = arith.constant 0 : index
    %670 = vector.load %arg36[%c0_297, %c0_298, %c0_299] : memref<2x64x256xf32, #tpu.memory_space<vmem>>, vector<1x64x256xf32>
    %671 = vector.shape_cast %670 : vector<1x64x256xf32> to vector<64x256xf32>
    %c0_300 = arith.constant 0 : index
    %c0_301 = arith.constant 0 : index
    %c0_302 = arith.constant 0 : index
    %672 = vector.load %arg37[%c0_300, %c0_301, %c0_302] : memref<2x1x256xf32, #tpu.memory_space<vmem>>, vector<1x1x256xf32>
    %673 = vector.shape_cast %672 : vector<1x1x256xf32> to vector<1x256xf32>
    %c0_303 = arith.constant 0 : index
    %c0_304 = arith.constant 0 : index
    %c0_305 = arith.constant 0 : index
    %674 = vector.load %arg38[%c0_303, %c0_304, %c0_305] : memref<2x256x64xf32, #tpu.memory_space<vmem>>, vector<1x256x64xf32>
    %675 = vector.shape_cast %674 : vector<1x256x64xf32> to vector<256x64xf32>
    %c0_306 = arith.constant 0 : index
    %c0_307 = arith.constant 0 : index
    %c0_308 = arith.constant 0 : index
    %676 = vector.load %arg39[%c0_306, %c0_307, %c0_308] : memref<2x1x64xf32, #tpu.memory_space<vmem>>, vector<1x1x64xf32>
    %677 = vector.shape_cast %676 : vector<1x1x64xf32> to vector<1x64xf32>
    %cst_309 = arith.constant dense<0.000000e+00> : vector<16xf32>
    %678 = vector.multi_reduction <add>, %651, %cst_309 [1] : vector<16x64xf32> to vector<16xf32>
    %679 = vector.shape_cast %678 : vector<16xf32> to vector<16x1xf32>
    %cst_310 = arith.constant 6.400000e+01 : f32
    %680 = vector.broadcast %cst_310 : f32 to vector<16x1xf32>
    %681 = arith.divf %679, %680 : vector<16x1xf32>
    %682 = vector.broadcast %681 : vector<16x1xf32> to vector<16x64xf32>
    %683 = arith.subf %651, %682 : vector<16x64xf32>
    %684 = arith.mulf %683, %683 : vector<16x64xf32>
    %cst_311 = arith.constant dense<0.000000e+00> : vector<16xf32>
    %685 = vector.multi_reduction <add>, %684, %cst_311 [1] : vector<16x64xf32> to vector<16xf32>
    %686 = vector.shape_cast %685 : vector<16xf32> to vector<16x1xf32>
    %cst_312 = arith.constant 6.400000e+01 : f32
    %687 = vector.broadcast %cst_312 : f32 to vector<16x1xf32>
    %688 = arith.divf %686, %687 : vector<16x1xf32>
    %689 = vector.broadcast %681 : vector<16x1xf32> to vector<16x64xf32>
    %690 = arith.subf %651, %689 : vector<16x64xf32>
    %cst_313 = arith.constant 9.99999974E-6 : f32
    %691 = vector.broadcast %cst_313 : f32 to vector<16x1xf32>
    %692 = arith.addf %688, %691 : vector<16x1xf32>
    %693 = math.rsqrt %692 : vector<16x1xf32>
    %694 = vector.broadcast %693 : vector<16x1xf32> to vector<16x64xf32>
    %695 = arith.mulf %690, %694 : vector<16x64xf32>
    %696 = vector.broadcast %653 : vector<1x64xf32> to vector<16x64xf32>
    %697 = arith.mulf %695, %696 : vector<16x64xf32>
    %698 = vector.broadcast %655 : vector<1x64xf32> to vector<16x64xf32>
    %699 = arith.addf %697, %698 : vector<16x64xf32>
    %cst_314 = arith.constant dense<0.000000e+00> : vector<16x64xf32>
    %700 = tpu.matmul %699, %657, %cst_314 {dimension_numbers = #tpu.dot_dimension_numbers<[1], [0], [0], [1], [0, 0, 1, 1], [], []>} : vector<16x64xf32>, vector<64x64xf32>, vector<16x64xf32> -> vector<16x64xf32>
    %cst_315 = arith.constant 1.250000e-01 : f32
    %701 = vector.broadcast %cst_315 : f32 to vector<16x64xf32>
    %702 = arith.mulf %700, %701 : vector<16x64xf32>
    %cst_316 = arith.constant dense<0.000000e+00> : vector<16x64xf32>
    %703 = tpu.matmul %699, %659, %cst_316 {dimension_numbers = #tpu.dot_dimension_numbers<[1], [0], [0], [1], [0, 0, 1, 1], [], []>} : vector<16x64xf32>, vector<64x64xf32>, vector<16x64xf32> -> vector<16x64xf32>
    %cst_317 = arith.constant dense<0.000000e+00> : vector<16x64xf32>
    %704 = tpu.matmul %699, %661, %cst_317 {dimension_numbers = #tpu.dot_dimension_numbers<[1], [0], [0], [1], [0, 0, 1, 1], [], []>} : vector<16x64xf32>, vector<64x64xf32>, vector<16x64xf32> -> vector<16x64xf32>
    %705 = vector.extract_strided_slice %702 {offsets = [0, 0], sizes = [8, 64], strides = [1, 1]} : vector<16x64xf32> to vector<8x64xf32>
    %706 = vector.extract_strided_slice %703 {offsets = [0, 0], sizes = [8, 64], strides = [1, 1]} : vector<16x64xf32> to vector<8x64xf32>
    %707 = vector.extract_strided_slice %704 {offsets = [0, 0], sizes = [8, 64], strides = [1, 1]} : vector<16x64xf32> to vector<8x64xf32>
    %708 = vector.extract_strided_slice %705 {offsets = [0, 0], sizes = [8, 16], strides = [1, 1]} : vector<8x64xf32> to vector<8x16xf32>
    %709 = vector.extract_strided_slice %706 {offsets = [0, 0], sizes = [8, 16], strides = [1, 1]} : vector<8x64xf32> to vector<8x16xf32>
    %cst_318 = arith.constant dense<0.000000e+00> : vector<8x8xf32>
    %710 = tpu.matmul %708, %709, %cst_318 {dimension_numbers = #tpu.dot_dimension_numbers<[1], [1], [0], [0], [0, 0, 1, 0], [], []>} : vector<8x16xf32>, vector<8x16xf32>, vector<8x8xf32> -> vector<8x8xf32>
    %711 = tpu.iota {dimensions = array<i32: 0>} : vector<8x8xi32>
    %712 = tpu.iota {dimensions = array<i32: 1>} : vector<8x8xi32>
    %713 = arith.cmpi sle, %712, %711 : vector<8x8xi32>
    %cst_319 = arith.constant -1.000000e+30 : f32
    %714 = vector.broadcast %cst_319 : f32 to vector<8x8xf32>
    %715 = arith.select %713, %710, %714 : vector<8x8xi1>, vector<8x8xf32>
    %cst_320 = arith.constant dense<0xFF800000> : vector<8xf32>
    %716 = vector.multi_reduction <maximumf>, %715, %cst_320 [1] : vector<8x8xf32> to vector<8xf32>
    %717 = vector.shape_cast %716 : vector<8xf32> to vector<8x1xf32>
    %718 = vector.broadcast %717 : vector<8x1xf32> to vector<8x8xf32>
    %719 = arith.subf %715, %718 : vector<8x8xf32>
    %720 = math.exp %719 : vector<8x8xf32>
    %cst_321 = arith.constant dense<0.000000e+00> : vector<8xf32>
    %721 = vector.multi_reduction <add>, %720, %cst_321 [1] : vector<8x8xf32> to vector<8xf32>
    %722 = vector.shape_cast %721 : vector<8xf32> to vector<8x1xf32>
    %723 = tpu.reciprocal %722 {approx = true} : vector<8x1xf32> -> vector<8x1xf32>
    %724 = vector.broadcast %723 : vector<8x1xf32> to vector<8x8xf32>
    %725 = arith.mulf %720, %724 : vector<8x8xf32>
    %726 = vector.extract_strided_slice %707 {offsets = [0, 0], sizes = [8, 16], strides = [1, 1]} : vector<8x64xf32> to vector<8x16xf32>
    %cst_322 = arith.constant dense<0.000000e+00> : vector<8x16xf32>
    %727 = tpu.matmul %725, %726, %cst_322 {dimension_numbers = #tpu.dot_dimension_numbers<[1], [0], [0], [1], [0, 0, 1, 1], [], []>} : vector<8x8xf32>, vector<8x16xf32>, vector<8x16xf32> -> vector<8x16xf32>
    %728 = vector.extract_strided_slice %663 {offsets = [0, 0], sizes = [16, 64], strides = [1, 1]} : vector<64x64xf32> to vector<16x64xf32>
    %cst_323 = arith.constant dense<0.000000e+00> : vector<8x64xf32>
    %729 = tpu.matmul %727, %728, %cst_323 {dimension_numbers = #tpu.dot_dimension_numbers<[1], [0], [0], [1], [0, 0, 1, 1], [], []>} : vector<8x16xf32>, vector<16x64xf32>, vector<8x64xf32> -> vector<8x64xf32>
    %730 = vector.extract_strided_slice %705 {offsets = [0, 16], sizes = [8, 16], strides = [1, 1]} : vector<8x64xf32> to vector<8x16xf32>
    %731 = vector.extract_strided_slice %706 {offsets = [0, 16], sizes = [8, 16], strides = [1, 1]} : vector<8x64xf32> to vector<8x16xf32>
    %cst_324 = arith.constant dense<0.000000e+00> : vector<8x8xf32>
    %732 = tpu.matmul %730, %731, %cst_324 {dimension_numbers = #tpu.dot_dimension_numbers<[1], [1], [0], [0], [0, 0, 1, 0], [], []>} : vector<8x16xf32>, vector<8x16xf32>, vector<8x8xf32> -> vector<8x8xf32>
    %733 = tpu.iota {dimensions = array<i32: 0>} : vector<8x8xi32>
    %734 = tpu.iota {dimensions = array<i32: 1>} : vector<8x8xi32>
    %735 = arith.cmpi sle, %734, %733 : vector<8x8xi32>
    %cst_325 = arith.constant -1.000000e+30 : f32
    %736 = vector.broadcast %cst_325 : f32 to vector<8x8xf32>
    %737 = arith.select %735, %732, %736 : vector<8x8xi1>, vector<8x8xf32>
    %cst_326 = arith.constant dense<0xFF800000> : vector<8xf32>
    %738 = vector.multi_reduction <maximumf>, %737, %cst_326 [1] : vector<8x8xf32> to vector<8xf32>
    %739 = vector.shape_cast %738 : vector<8xf32> to vector<8x1xf32>
    %740 = vector.broadcast %739 : vector<8x1xf32> to vector<8x8xf32>
    %741 = arith.subf %737, %740 : vector<8x8xf32>
    %742 = math.exp %741 : vector<8x8xf32>
    %cst_327 = arith.constant dense<0.000000e+00> : vector<8xf32>
    %743 = vector.multi_reduction <add>, %742, %cst_327 [1] : vector<8x8xf32> to vector<8xf32>
    %744 = vector.shape_cast %743 : vector<8xf32> to vector<8x1xf32>
    %745 = tpu.reciprocal %744 {approx = true} : vector<8x1xf32> -> vector<8x1xf32>
    %746 = vector.broadcast %745 : vector<8x1xf32> to vector<8x8xf32>
    %747 = arith.mulf %742, %746 : vector<8x8xf32>
    %748 = vector.extract_strided_slice %707 {offsets = [0, 16], sizes = [8, 16], strides = [1, 1]} : vector<8x64xf32> to vector<8x16xf32>
    %cst_328 = arith.constant dense<0.000000e+00> : vector<8x16xf32>
    %749 = tpu.matmul %747, %748, %cst_328 {dimension_numbers = #tpu.dot_dimension_numbers<[1], [0], [0], [1], [0, 0, 1, 1], [], []>} : vector<8x8xf32>, vector<8x16xf32>, vector<8x16xf32> -> vector<8x16xf32>
    %750 = vector.extract_strided_slice %663 {offsets = [16, 0], sizes = [16, 64], strides = [1, 1]} : vector<64x64xf32> to vector<16x64xf32>
    %cst_329 = arith.constant dense<0.000000e+00> : vector<8x64xf32>
    %751 = tpu.matmul %749, %750, %cst_329 {dimension_numbers = #tpu.dot_dimension_numbers<[1], [0], [0], [1], [0, 0, 1, 1], [], []>} : vector<8x16xf32>, vector<16x64xf32>, vector<8x64xf32> -> vector<8x64xf32>
    %752 = arith.addf %729, %751 : vector<8x64xf32>
    %753 = vector.extract_strided_slice %705 {offsets = [0, 32], sizes = [8, 16], strides = [1, 1]} : vector<8x64xf32> to vector<8x16xf32>
    %754 = vector.extract_strided_slice %706 {offsets = [0, 32], sizes = [8, 16], strides = [1, 1]} : vector<8x64xf32> to vector<8x16xf32>
    %cst_330 = arith.constant dense<0.000000e+00> : vector<8x8xf32>
    %755 = tpu.matmul %753, %754, %cst_330 {dimension_numbers = #tpu.dot_dimension_numbers<[1], [1], [0], [0], [0, 0, 1, 0], [], []>} : vector<8x16xf32>, vector<8x16xf32>, vector<8x8xf32> -> vector<8x8xf32>
    %756 = tpu.iota {dimensions = array<i32: 0>} : vector<8x8xi32>
    %757 = tpu.iota {dimensions = array<i32: 1>} : vector<8x8xi32>
    %758 = arith.cmpi sle, %757, %756 : vector<8x8xi32>
    %cst_331 = arith.constant -1.000000e+30 : f32
    %759 = vector.broadcast %cst_331 : f32 to vector<8x8xf32>
    %760 = arith.select %758, %755, %759 : vector<8x8xi1>, vector<8x8xf32>
    %cst_332 = arith.constant dense<0xFF800000> : vector<8xf32>
    %761 = vector.multi_reduction <maximumf>, %760, %cst_332 [1] : vector<8x8xf32> to vector<8xf32>
    %762 = vector.shape_cast %761 : vector<8xf32> to vector<8x1xf32>
    %763 = vector.broadcast %762 : vector<8x1xf32> to vector<8x8xf32>
    %764 = arith.subf %760, %763 : vector<8x8xf32>
    %765 = math.exp %764 : vector<8x8xf32>
    %cst_333 = arith.constant dense<0.000000e+00> : vector<8xf32>
    %766 = vector.multi_reduction <add>, %765, %cst_333 [1] : vector<8x8xf32> to vector<8xf32>
    %767 = vector.shape_cast %766 : vector<8xf32> to vector<8x1xf32>
    %768 = tpu.reciprocal %767 {approx = true} : vector<8x1xf32> -> vector<8x1xf32>
    %769 = vector.broadcast %768 : vector<8x1xf32> to vector<8x8xf32>
    %770 = arith.mulf %765, %769 : vector<8x8xf32>
    %771 = vector.extract_strided_slice %707 {offsets = [0, 32], sizes = [8, 16], strides = [1, 1]} : vector<8x64xf32> to vector<8x16xf32>
    %cst_334 = arith.constant dense<0.000000e+00> : vector<8x16xf32>
    %772 = tpu.matmul %770, %771, %cst_334 {dimension_numbers = #tpu.dot_dimension_numbers<[1], [0], [0], [1], [0, 0, 1, 1], [], []>} : vector<8x8xf32>, vector<8x16xf32>, vector<8x16xf32> -> vector<8x16xf32>
    %773 = vector.extract_strided_slice %663 {offsets = [32, 0], sizes = [16, 64], strides = [1, 1]} : vector<64x64xf32> to vector<16x64xf32>
    %cst_335 = arith.constant dense<0.000000e+00> : vector<8x64xf32>
    %774 = tpu.matmul %772, %773, %cst_335 {dimension_numbers = #tpu.dot_dimension_numbers<[1], [0], [0], [1], [0, 0, 1, 1], [], []>} : vector<8x16xf32>, vector<16x64xf32>, vector<8x64xf32> -> vector<8x64xf32>
    %775 = arith.addf %752, %774 : vector<8x64xf32>
    %776 = vector.extract_strided_slice %705 {offsets = [0, 48], sizes = [8, 16], strides = [1, 1]} : vector<8x64xf32> to vector<8x16xf32>
    %777 = vector.extract_strided_slice %706 {offsets = [0, 48], sizes = [8, 16], strides = [1, 1]} : vector<8x64xf32> to vector<8x16xf32>
    %cst_336 = arith.constant dense<0.000000e+00> : vector<8x8xf32>
    %778 = tpu.matmul %776, %777, %cst_336 {dimension_numbers = #tpu.dot_dimension_numbers<[1], [1], [0], [0], [0, 0, 1, 0], [], []>} : vector<8x16xf32>, vector<8x16xf32>, vector<8x8xf32> -> vector<8x8xf32>
    %779 = tpu.iota {dimensions = array<i32: 0>} : vector<8x8xi32>
    %780 = tpu.iota {dimensions = array<i32: 1>} : vector<8x8xi32>
    %781 = arith.cmpi sle, %780, %779 : vector<8x8xi32>
    %cst_337 = arith.constant -1.000000e+30 : f32
    %782 = vector.broadcast %cst_337 : f32 to vector<8x8xf32>
    %783 = arith.select %781, %778, %782 : vector<8x8xi1>, vector<8x8xf32>
    %cst_338 = arith.constant dense<0xFF800000> : vector<8xf32>
    %784 = vector.multi_reduction <maximumf>, %783, %cst_338 [1] : vector<8x8xf32> to vector<8xf32>
    %785 = vector.shape_cast %784 : vector<8xf32> to vector<8x1xf32>
    %786 = vector.broadcast %785 : vector<8x1xf32> to vector<8x8xf32>
    %787 = arith.subf %783, %786 : vector<8x8xf32>
    %788 = math.exp %787 : vector<8x8xf32>
    %cst_339 = arith.constant dense<0.000000e+00> : vector<8xf32>
    %789 = vector.multi_reduction <add>, %788, %cst_339 [1] : vector<8x8xf32> to vector<8xf32>
    %790 = vector.shape_cast %789 : vector<8xf32> to vector<8x1xf32>
    %791 = tpu.reciprocal %790 {approx = true} : vector<8x1xf32> -> vector<8x1xf32>
    %792 = vector.broadcast %791 : vector<8x1xf32> to vector<8x8xf32>
    %793 = arith.mulf %788, %792 : vector<8x8xf32>
    %794 = vector.extract_strided_slice %707 {offsets = [0, 48], sizes = [8, 16], strides = [1, 1]} : vector<8x64xf32> to vector<8x16xf32>
    %cst_340 = arith.constant dense<0.000000e+00> : vector<8x16xf32>
    %795 = tpu.matmul %793, %794, %cst_340 {dimension_numbers = #tpu.dot_dimension_numbers<[1], [0], [0], [1], [0, 0, 1, 1], [], []>} : vector<8x8xf32>, vector<8x16xf32>, vector<8x16xf32> -> vector<8x16xf32>
    %796 = vector.extract_strided_slice %663 {offsets = [48, 0], sizes = [16, 64], strides = [1, 1]} : vector<64x64xf32> to vector<16x64xf32>
    %cst_341 = arith.constant dense<0.000000e+00> : vector<8x64xf32>
    %797 = tpu.matmul %795, %796, %cst_341 {dimension_numbers = #tpu.dot_dimension_numbers<[1], [0], [0], [1], [0, 0, 1, 1], [], []>} : vector<8x16xf32>, vector<16x64xf32>, vector<8x64xf32> -> vector<8x64xf32>
    %798 = arith.addf %775, %797 : vector<8x64xf32>
    %799 = vector.extract_strided_slice %702 {offsets = [8, 0], sizes = [8, 64], strides = [1, 1]} : vector<16x64xf32> to vector<8x64xf32>
    %800 = vector.extract_strided_slice %703 {offsets = [8, 0], sizes = [8, 64], strides = [1, 1]} : vector<16x64xf32> to vector<8x64xf32>
    %801 = vector.extract_strided_slice %704 {offsets = [8, 0], sizes = [8, 64], strides = [1, 1]} : vector<16x64xf32> to vector<8x64xf32>
    %802 = vector.extract_strided_slice %799 {offsets = [0, 0], sizes = [8, 16], strides = [1, 1]} : vector<8x64xf32> to vector<8x16xf32>
    %803 = vector.extract_strided_slice %800 {offsets = [0, 0], sizes = [8, 16], strides = [1, 1]} : vector<8x64xf32> to vector<8x16xf32>
    %cst_342 = arith.constant dense<0.000000e+00> : vector<8x8xf32>
    %804 = tpu.matmul %802, %803, %cst_342 {dimension_numbers = #tpu.dot_dimension_numbers<[1], [1], [0], [0], [0, 0, 1, 0], [], []>} : vector<8x16xf32>, vector<8x16xf32>, vector<8x8xf32> -> vector<8x8xf32>
    %805 = tpu.iota {dimensions = array<i32: 0>} : vector<8x8xi32>
    %806 = tpu.iota {dimensions = array<i32: 1>} : vector<8x8xi32>
    %807 = arith.cmpi sle, %806, %805 : vector<8x8xi32>
    %cst_343 = arith.constant -1.000000e+30 : f32
    %808 = vector.broadcast %cst_343 : f32 to vector<8x8xf32>
    %809 = arith.select %807, %804, %808 : vector<8x8xi1>, vector<8x8xf32>
    %cst_344 = arith.constant dense<0xFF800000> : vector<8xf32>
    %810 = vector.multi_reduction <maximumf>, %809, %cst_344 [1] : vector<8x8xf32> to vector<8xf32>
    %811 = vector.shape_cast %810 : vector<8xf32> to vector<8x1xf32>
    %812 = vector.broadcast %811 : vector<8x1xf32> to vector<8x8xf32>
    %813 = arith.subf %809, %812 : vector<8x8xf32>
    %814 = math.exp %813 : vector<8x8xf32>
    %cst_345 = arith.constant dense<0.000000e+00> : vector<8xf32>
    %815 = vector.multi_reduction <add>, %814, %cst_345 [1] : vector<8x8xf32> to vector<8xf32>
    %816 = vector.shape_cast %815 : vector<8xf32> to vector<8x1xf32>
    %817 = tpu.reciprocal %816 {approx = true} : vector<8x1xf32> -> vector<8x1xf32>
    %818 = vector.broadcast %817 : vector<8x1xf32> to vector<8x8xf32>
    %819 = arith.mulf %814, %818 : vector<8x8xf32>
    %820 = vector.extract_strided_slice %801 {offsets = [0, 0], sizes = [8, 16], strides = [1, 1]} : vector<8x64xf32> to vector<8x16xf32>
    %cst_346 = arith.constant dense<0.000000e+00> : vector<8x16xf32>
    %821 = tpu.matmul %819, %820, %cst_346 {dimension_numbers = #tpu.dot_dimension_numbers<[1], [0], [0], [1], [0, 0, 1, 1], [], []>} : vector<8x8xf32>, vector<8x16xf32>, vector<8x16xf32> -> vector<8x16xf32>
    %822 = vector.extract_strided_slice %663 {offsets = [0, 0], sizes = [16, 64], strides = [1, 1]} : vector<64x64xf32> to vector<16x64xf32>
    %cst_347 = arith.constant dense<0.000000e+00> : vector<8x64xf32>
    %823 = tpu.matmul %821, %822, %cst_347 {dimension_numbers = #tpu.dot_dimension_numbers<[1], [0], [0], [1], [0, 0, 1, 1], [], []>} : vector<8x16xf32>, vector<16x64xf32>, vector<8x64xf32> -> vector<8x64xf32>
    %824 = vector.extract_strided_slice %799 {offsets = [0, 16], sizes = [8, 16], strides = [1, 1]} : vector<8x64xf32> to vector<8x16xf32>
    %825 = vector.extract_strided_slice %800 {offsets = [0, 16], sizes = [8, 16], strides = [1, 1]} : vector<8x64xf32> to vector<8x16xf32>
    %cst_348 = arith.constant dense<0.000000e+00> : vector<8x8xf32>
    %826 = tpu.matmul %824, %825, %cst_348 {dimension_numbers = #tpu.dot_dimension_numbers<[1], [1], [0], [0], [0, 0, 1, 0], [], []>} : vector<8x16xf32>, vector<8x16xf32>, vector<8x8xf32> -> vector<8x8xf32>
    %827 = tpu.iota {dimensions = array<i32: 0>} : vector<8x8xi32>
    %828 = tpu.iota {dimensions = array<i32: 1>} : vector<8x8xi32>
    %829 = arith.cmpi sle, %828, %827 : vector<8x8xi32>
    %cst_349 = arith.constant -1.000000e+30 : f32
    %830 = vector.broadcast %cst_349 : f32 to vector<8x8xf32>
    %831 = arith.select %829, %826, %830 : vector<8x8xi1>, vector<8x8xf32>
    %cst_350 = arith.constant dense<0xFF800000> : vector<8xf32>
    %832 = vector.multi_reduction <maximumf>, %831, %cst_350 [1] : vector<8x8xf32> to vector<8xf32>
    %833 = vector.shape_cast %832 : vector<8xf32> to vector<8x1xf32>
    %834 = vector.broadcast %833 : vector<8x1xf32> to vector<8x8xf32>
    %835 = arith.subf %831, %834 : vector<8x8xf32>
    %836 = math.exp %835 : vector<8x8xf32>
    %cst_351 = arith.constant dense<0.000000e+00> : vector<8xf32>
    %837 = vector.multi_reduction <add>, %836, %cst_351 [1] : vector<8x8xf32> to vector<8xf32>
    %838 = vector.shape_cast %837 : vector<8xf32> to vector<8x1xf32>
    %839 = tpu.reciprocal %838 {approx = true} : vector<8x1xf32> -> vector<8x1xf32>
    %840 = vector.broadcast %839 : vector<8x1xf32> to vector<8x8xf32>
    %841 = arith.mulf %836, %840 : vector<8x8xf32>
    %842 = vector.extract_strided_slice %801 {offsets = [0, 16], sizes = [8, 16], strides = [1, 1]} : vector<8x64xf32> to vector<8x16xf32>
    %cst_352 = arith.constant dense<0.000000e+00> : vector<8x16xf32>
    %843 = tpu.matmul %841, %842, %cst_352 {dimension_numbers = #tpu.dot_dimension_numbers<[1], [0], [0], [1], [0, 0, 1, 1], [], []>} : vector<8x8xf32>, vector<8x16xf32>, vector<8x16xf32> -> vector<8x16xf32>
    %844 = vector.extract_strided_slice %663 {offsets = [16, 0], sizes = [16, 64], strides = [1, 1]} : vector<64x64xf32> to vector<16x64xf32>
    %cst_353 = arith.constant dense<0.000000e+00> : vector<8x64xf32>
    %845 = tpu.matmul %843, %844, %cst_353 {dimension_numbers = #tpu.dot_dimension_numbers<[1], [0], [0], [1], [0, 0, 1, 1], [], []>} : vector<8x16xf32>, vector<16x64xf32>, vector<8x64xf32> -> vector<8x64xf32>
    %846 = arith.addf %823, %845 : vector<8x64xf32>
    %847 = vector.extract_strided_slice %799 {offsets = [0, 32], sizes = [8, 16], strides = [1, 1]} : vector<8x64xf32> to vector<8x16xf32>
    %848 = vector.extract_strided_slice %800 {offsets = [0, 32], sizes = [8, 16], strides = [1, 1]} : vector<8x64xf32> to vector<8x16xf32>
    %cst_354 = arith.constant dense<0.000000e+00> : vector<8x8xf32>
    %849 = tpu.matmul %847, %848, %cst_354 {dimension_numbers = #tpu.dot_dimension_numbers<[1], [1], [0], [0], [0, 0, 1, 0], [], []>} : vector<8x16xf32>, vector<8x16xf32>, vector<8x8xf32> -> vector<8x8xf32>
    %850 = tpu.iota {dimensions = array<i32: 0>} : vector<8x8xi32>
    %851 = tpu.iota {dimensions = array<i32: 1>} : vector<8x8xi32>
    %852 = arith.cmpi sle, %851, %850 : vector<8x8xi32>
    %cst_355 = arith.constant -1.000000e+30 : f32
    %853 = vector.broadcast %cst_355 : f32 to vector<8x8xf32>
    %854 = arith.select %852, %849, %853 : vector<8x8xi1>, vector<8x8xf32>
    %cst_356 = arith.constant dense<0xFF800000> : vector<8xf32>
    %855 = vector.multi_reduction <maximumf>, %854, %cst_356 [1] : vector<8x8xf32> to vector<8xf32>
    %856 = vector.shape_cast %855 : vector<8xf32> to vector<8x1xf32>
    %857 = vector.broadcast %856 : vector<8x1xf32> to vector<8x8xf32>
    %858 = arith.subf %854, %857 : vector<8x8xf32>
    %859 = math.exp %858 : vector<8x8xf32>
    %cst_357 = arith.constant dense<0.000000e+00> : vector<8xf32>
    %860 = vector.multi_reduction <add>, %859, %cst_357 [1] : vector<8x8xf32> to vector<8xf32>
    %861 = vector.shape_cast %860 : vector<8xf32> to vector<8x1xf32>
    %862 = tpu.reciprocal %861 {approx = true} : vector<8x1xf32> -> vector<8x1xf32>
    %863 = vector.broadcast %862 : vector<8x1xf32> to vector<8x8xf32>
    %864 = arith.mulf %859, %863 : vector<8x8xf32>
    %865 = vector.extract_strided_slice %801 {offsets = [0, 32], sizes = [8, 16], strides = [1, 1]} : vector<8x64xf32> to vector<8x16xf32>
    %cst_358 = arith.constant dense<0.000000e+00> : vector<8x16xf32>
    %866 = tpu.matmul %864, %865, %cst_358 {dimension_numbers = #tpu.dot_dimension_numbers<[1], [0], [0], [1], [0, 0, 1, 1], [], []>} : vector<8x8xf32>, vector<8x16xf32>, vector<8x16xf32> -> vector<8x16xf32>
    %867 = vector.extract_strided_slice %663 {offsets = [32, 0], sizes = [16, 64], strides = [1, 1]} : vector<64x64xf32> to vector<16x64xf32>
    %cst_359 = arith.constant dense<0.000000e+00> : vector<8x64xf32>
    %868 = tpu.matmul %866, %867, %cst_359 {dimension_numbers = #tpu.dot_dimension_numbers<[1], [0], [0], [1], [0, 0, 1, 1], [], []>} : vector<8x16xf32>, vector<16x64xf32>, vector<8x64xf32> -> vector<8x64xf32>
    %869 = arith.addf %846, %868 : vector<8x64xf32>
    %870 = vector.extract_strided_slice %799 {offsets = [0, 48], sizes = [8, 16], strides = [1, 1]} : vector<8x64xf32> to vector<8x16xf32>
    %871 = vector.extract_strided_slice %800 {offsets = [0, 48], sizes = [8, 16], strides = [1, 1]} : vector<8x64xf32> to vector<8x16xf32>
    %cst_360 = arith.constant dense<0.000000e+00> : vector<8x8xf32>
    %872 = tpu.matmul %870, %871, %cst_360 {dimension_numbers = #tpu.dot_dimension_numbers<[1], [1], [0], [0], [0, 0, 1, 0], [], []>} : vector<8x16xf32>, vector<8x16xf32>, vector<8x8xf32> -> vector<8x8xf32>
    %873 = tpu.iota {dimensions = array<i32: 0>} : vector<8x8xi32>
    %874 = tpu.iota {dimensions = array<i32: 1>} : vector<8x8xi32>
    %875 = arith.cmpi sle, %874, %873 : vector<8x8xi32>
    %cst_361 = arith.constant -1.000000e+30 : f32
    %876 = vector.broadcast %cst_361 : f32 to vector<8x8xf32>
    %877 = arith.select %875, %872, %876 : vector<8x8xi1>, vector<8x8xf32>
    %cst_362 = arith.constant dense<0xFF800000> : vector<8xf32>
    %878 = vector.multi_reduction <maximumf>, %877, %cst_362 [1] : vector<8x8xf32> to vector<8xf32>
    %879 = vector.shape_cast %878 : vector<8xf32> to vector<8x1xf32>
    %880 = vector.broadcast %879 : vector<8x1xf32> to vector<8x8xf32>
    %881 = arith.subf %877, %880 : vector<8x8xf32>
    %882 = math.exp %881 : vector<8x8xf32>
    %cst_363 = arith.constant dense<0.000000e+00> : vector<8xf32>
    %883 = vector.multi_reduction <add>, %882, %cst_363 [1] : vector<8x8xf32> to vector<8xf32>
    %884 = vector.shape_cast %883 : vector<8xf32> to vector<8x1xf32>
    %885 = tpu.reciprocal %884 {approx = true} : vector<8x1xf32> -> vector<8x1xf32>
    %886 = vector.broadcast %885 : vector<8x1xf32> to vector<8x8xf32>
    %887 = arith.mulf %882, %886 : vector<8x8xf32>
    %888 = vector.extract_strided_slice %801 {offsets = [0, 48], sizes = [8, 16], strides = [1, 1]} : vector<8x64xf32> to vector<8x16xf32>
    %cst_364 = arith.constant dense<0.000000e+00> : vector<8x16xf32>
    %889 = tpu.matmul %887, %888, %cst_364 {dimension_numbers = #tpu.dot_dimension_numbers<[1], [0], [0], [1], [0, 0, 1, 1], [], []>} : vector<8x8xf32>, vector<8x16xf32>, vector<8x16xf32> -> vector<8x16xf32>
    %890 = vector.extract_strided_slice %663 {offsets = [48, 0], sizes = [16, 64], strides = [1, 1]} : vector<64x64xf32> to vector<16x64xf32>
    %cst_365 = arith.constant dense<0.000000e+00> : vector<8x64xf32>
    %891 = tpu.matmul %889, %890, %cst_365 {dimension_numbers = #tpu.dot_dimension_numbers<[1], [0], [0], [1], [0, 0, 1, 1], [], []>} : vector<8x16xf32>, vector<16x64xf32>, vector<8x64xf32> -> vector<8x64xf32>
    %892 = arith.addf %869, %891 : vector<8x64xf32>
    %893 = tpu.concatenate %798, %892 in 0 : vector<8x64xf32>, vector<8x64xf32> -> vector<16x64xf32>
    %894 = arith.addf %651, %893 : vector<16x64xf32>
    %895 = vector.broadcast %665 : vector<1x64xf32> to vector<16x64xf32>
    %896 = arith.addf %894, %895 : vector<16x64xf32>
    %cst_366 = arith.constant dense<0.000000e+00> : vector<16xf32>
    %897 = vector.multi_reduction <add>, %896, %cst_366 [1] : vector<16x64xf32> to vector<16xf32>
    %898 = vector.shape_cast %897 : vector<16xf32> to vector<16x1xf32>
    %cst_367 = arith.constant 6.400000e+01 : f32
    %899 = vector.broadcast %cst_367 : f32 to vector<16x1xf32>
    %900 = arith.divf %898, %899 : vector<16x1xf32>
    %901 = vector.broadcast %900 : vector<16x1xf32> to vector<16x64xf32>
    %902 = arith.subf %896, %901 : vector<16x64xf32>
    %903 = arith.mulf %902, %902 : vector<16x64xf32>
    %cst_368 = arith.constant dense<0.000000e+00> : vector<16xf32>
    %904 = vector.multi_reduction <add>, %903, %cst_368 [1] : vector<16x64xf32> to vector<16xf32>
    %905 = vector.shape_cast %904 : vector<16xf32> to vector<16x1xf32>
    %cst_369 = arith.constant 6.400000e+01 : f32
    %906 = vector.broadcast %cst_369 : f32 to vector<16x1xf32>
    %907 = arith.divf %905, %906 : vector<16x1xf32>
    %908 = vector.broadcast %900 : vector<16x1xf32> to vector<16x64xf32>
    %909 = arith.subf %896, %908 : vector<16x64xf32>
    %cst_370 = arith.constant 9.99999974E-6 : f32
    %910 = vector.broadcast %cst_370 : f32 to vector<16x1xf32>
    %911 = arith.addf %907, %910 : vector<16x1xf32>
    %912 = math.rsqrt %911 : vector<16x1xf32>
    %913 = vector.broadcast %912 : vector<16x1xf32> to vector<16x64xf32>
    %914 = arith.mulf %909, %913 : vector<16x64xf32>
    %915 = vector.broadcast %667 : vector<1x64xf32> to vector<16x64xf32>
    %916 = arith.mulf %914, %915 : vector<16x64xf32>
    %917 = vector.broadcast %669 : vector<1x64xf32> to vector<16x64xf32>
    %918 = arith.addf %916, %917 : vector<16x64xf32>
    %cst_371 = arith.constant dense<0.000000e+00> : vector<16x256xf32>
    %919 = tpu.matmul %918, %671, %cst_371 {dimension_numbers = #tpu.dot_dimension_numbers<[1], [0], [0], [1], [0, 0, 1, 1], [], []>} : vector<16x64xf32>, vector<64x256xf32>, vector<16x256xf32> -> vector<16x256xf32>
    %920 = vector.broadcast %673 : vector<1x256xf32> to vector<16x256xf32>
    %921 = arith.addf %919, %920 : vector<16x256xf32>
    %cst_372 = arith.constant 5.000000e-01 : f32
    %922 = vector.broadcast %cst_372 : f32 to vector<16x256xf32>
    %923 = arith.mulf %922, %921 : vector<16x256xf32>
    %cst_373 = arith.constant 0.707106769 : f32
    %924 = vector.broadcast %cst_373 : f32 to vector<16x256xf32>
    %925 = arith.mulf %921, %924 : vector<16x256xf32>
    %926 = math.absf %925 : vector<16x256xf32>
    %cst_374 = arith.constant 0.327591091 : f32
    %927 = vector.broadcast %cst_374 : f32 to vector<16x256xf32>
    %928 = arith.mulf %927, %926 : vector<16x256xf32>
    %cst_375 = arith.constant 1.000000e+00 : f32
    %929 = vector.broadcast %cst_375 : f32 to vector<16x256xf32>
    %930 = arith.addf %929, %928 : vector<16x256xf32>
    %cst_376 = arith.constant 1.000000e+00 : f32
    %931 = vector.broadcast %cst_376 : f32 to vector<16x256xf32>
    %932 = arith.divf %931, %930 : vector<16x256xf32>
    %cst_377 = arith.constant 1.06140542 : f32
    %933 = vector.broadcast %cst_377 : f32 to vector<16x256xf32>
    %934 = arith.mulf %933, %932 : vector<16x256xf32>
    %cst_378 = arith.constant -1.45315206 : f32
    %935 = vector.broadcast %cst_378 : f32 to vector<16x256xf32>
    %936 = arith.addf %934, %935 : vector<16x256xf32>
    %937 = arith.mulf %936, %932 : vector<16x256xf32>
    %cst_379 = arith.constant 1.42141378 : f32
    %938 = vector.broadcast %cst_379 : f32 to vector<16x256xf32>
    %939 = arith.addf %937, %938 : vector<16x256xf32>
    %940 = arith.mulf %939, %932 : vector<16x256xf32>
    %cst_380 = arith.constant -0.284496725 : f32
    %941 = vector.broadcast %cst_380 : f32 to vector<16x256xf32>
    %942 = arith.addf %940, %941 : vector<16x256xf32>
    %943 = arith.mulf %942, %932 : vector<16x256xf32>
    %cst_381 = arith.constant 0.254829586 : f32
    %944 = vector.broadcast %cst_381 : f32 to vector<16x256xf32>
    %945 = arith.addf %943, %944 : vector<16x256xf32>
    %946 = arith.mulf %945, %932 : vector<16x256xf32>
    %cst_382 = arith.constant 0.000000e+00 : f32
    %947 = vector.broadcast %cst_382 : f32 to vector<16x256xf32>
    %948 = arith.subf %947, %926 : vector<16x256xf32>
    %949 = arith.mulf %948, %926 : vector<16x256xf32>
    %950 = math.exp %949 : vector<16x256xf32>
    %951 = arith.mulf %946, %950 : vector<16x256xf32>
    %cst_383 = arith.constant 1.000000e+00 : f32
    %952 = vector.broadcast %cst_383 : f32 to vector<16x256xf32>
    %953 = arith.subf %952, %951 : vector<16x256xf32>
    %cst_384 = arith.constant 0.000000e+00 : f32
    %954 = vector.broadcast %cst_384 : f32 to vector<16x256xf32>
    %955 = arith.cmpf olt, %925, %954 : vector<16x256xf32>
    %cst_385 = arith.constant 0.000000e+00 : f32
    %956 = vector.broadcast %cst_385 : f32 to vector<16x256xf32>
    %957 = arith.subf %956, %953 : vector<16x256xf32>
    %958 = arith.select %955, %957, %953 : vector<16x256xi1>, vector<16x256xf32>
    %cst_386 = arith.constant 1.000000e+00 : f32
    %959 = vector.broadcast %cst_386 : f32 to vector<16x256xf32>
    %960 = arith.addf %959, %958 : vector<16x256xf32>
    %961 = arith.mulf %923, %960 : vector<16x256xf32>
    %cst_387 = arith.constant dense<0.000000e+00> : vector<16x64xf32>
    %962 = tpu.matmul %961, %675, %cst_387 {dimension_numbers = #tpu.dot_dimension_numbers<[1], [0], [0], [1], [0, 0, 1, 1], [], []>} : vector<16x256xf32>, vector<256x64xf32>, vector<16x64xf32> -> vector<16x64xf32>
    %963 = vector.broadcast %677 : vector<1x64xf32> to vector<16x64xf32>
    %964 = arith.addf %962, %963 : vector<16x64xf32>
    %965 = arith.addf %918, %964 : vector<16x64xf32>
    %c1_388 = arith.constant 1 : index
    %c0_389 = arith.constant 0 : index
    %c0_390 = arith.constant 0 : index
    %966 = vector.load %arg27[%c1_388, %c0_389, %c0_390] : memref<2x1x64xf32, #tpu.memory_space<vmem>>, vector<1x1x64xf32>
    %967 = vector.shape_cast %966 : vector<1x1x64xf32> to vector<1x64xf32>
    %c1_391 = arith.constant 1 : index
    %c0_392 = arith.constant 0 : index
    %c0_393 = arith.constant 0 : index
    %968 = vector.load %arg28[%c1_391, %c0_392, %c0_393] : memref<2x1x64xf32, #tpu.memory_space<vmem>>, vector<1x1x64xf32>
    %969 = vector.shape_cast %968 : vector<1x1x64xf32> to vector<1x64xf32>
    %c1_394 = arith.constant 1 : index
    %c0_395 = arith.constant 0 : index
    %c0_396 = arith.constant 0 : index
    %970 = vector.load %arg29[%c1_394, %c0_395, %c0_396] : memref<2x64x64xf32, #tpu.memory_space<vmem>>, vector<1x64x64xf32>
    %971 = vector.shape_cast %970 : vector<1x64x64xf32> to vector<64x64xf32>
    %c1_397 = arith.constant 1 : index
    %c0_398 = arith.constant 0 : index
    %c0_399 = arith.constant 0 : index
    %972 = vector.load %arg30[%c1_397, %c0_398, %c0_399] : memref<2x64x64xf32, #tpu.memory_space<vmem>>, vector<1x64x64xf32>
    %973 = vector.shape_cast %972 : vector<1x64x64xf32> to vector<64x64xf32>
    %c1_400 = arith.constant 1 : index
    %c0_401 = arith.constant 0 : index
    %c0_402 = arith.constant 0 : index
    %974 = vector.load %arg31[%c1_400, %c0_401, %c0_402] : memref<2x64x64xf32, #tpu.memory_space<vmem>>, vector<1x64x64xf32>
    %975 = vector.shape_cast %974 : vector<1x64x64xf32> to vector<64x64xf32>
    %c1_403 = arith.constant 1 : index
    %c0_404 = arith.constant 0 : index
    %c0_405 = arith.constant 0 : index
    %976 = vector.load %arg32[%c1_403, %c0_404, %c0_405] : memref<2x64x64xf32, #tpu.memory_space<vmem>>, vector<1x64x64xf32>
    %977 = vector.shape_cast %976 : vector<1x64x64xf32> to vector<64x64xf32>
    %c1_406 = arith.constant 1 : index
    %c0_407 = arith.constant 0 : index
    %c0_408 = arith.constant 0 : index
    %978 = vector.load %arg33[%c1_406, %c0_407, %c0_408] : memref<2x1x64xf32, #tpu.memory_space<vmem>>, vector<1x1x64xf32>
    %979 = vector.shape_cast %978 : vector<1x1x64xf32> to vector<1x64xf32>
    %c1_409 = arith.constant 1 : index
    %c0_410 = arith.constant 0 : index
    %c0_411 = arith.constant 0 : index
    %980 = vector.load %arg34[%c1_409, %c0_410, %c0_411] : memref<2x1x64xf32, #tpu.memory_space<vmem>>, vector<1x1x64xf32>
    %981 = vector.shape_cast %980 : vector<1x1x64xf32> to vector<1x64xf32>
    %c1_412 = arith.constant 1 : index
    %c0_413 = arith.constant 0 : index
    %c0_414 = arith.constant 0 : index
    %982 = vector.load %arg35[%c1_412, %c0_413, %c0_414] : memref<2x1x64xf32, #tpu.memory_space<vmem>>, vector<1x1x64xf32>
    %983 = vector.shape_cast %982 : vector<1x1x64xf32> to vector<1x64xf32>
    %c1_415 = arith.constant 1 : index
    %c0_416 = arith.constant 0 : index
    %c0_417 = arith.constant 0 : index
    %984 = vector.load %arg36[%c1_415, %c0_416, %c0_417] : memref<2x64x256xf32, #tpu.memory_space<vmem>>, vector<1x64x256xf32>
    %985 = vector.shape_cast %984 : vector<1x64x256xf32> to vector<64x256xf32>
    %c1_418 = arith.constant 1 : index
    %c0_419 = arith.constant 0 : index
    %c0_420 = arith.constant 0 : index
    %986 = vector.load %arg37[%c1_418, %c0_419, %c0_420] : memref<2x1x256xf32, #tpu.memory_space<vmem>>, vector<1x1x256xf32>
    %987 = vector.shape_cast %986 : vector<1x1x256xf32> to vector<1x256xf32>
    %c1_421 = arith.constant 1 : index
    %c0_422 = arith.constant 0 : index
    %c0_423 = arith.constant 0 : index
    %988 = vector.load %arg38[%c1_421, %c0_422, %c0_423] : memref<2x256x64xf32, #tpu.memory_space<vmem>>, vector<1x256x64xf32>
    %989 = vector.shape_cast %988 : vector<1x256x64xf32> to vector<256x64xf32>
    %c1_424 = arith.constant 1 : index
    %c0_425 = arith.constant 0 : index
    %c0_426 = arith.constant 0 : index
    %990 = vector.load %arg39[%c1_424, %c0_425, %c0_426] : memref<2x1x64xf32, #tpu.memory_space<vmem>>, vector<1x1x64xf32>
    %991 = vector.shape_cast %990 : vector<1x1x64xf32> to vector<1x64xf32>
    %cst_427 = arith.constant dense<0.000000e+00> : vector<16xf32>
    %992 = vector.multi_reduction <add>, %965, %cst_427 [1] : vector<16x64xf32> to vector<16xf32>
    %993 = vector.shape_cast %992 : vector<16xf32> to vector<16x1xf32>
    %cst_428 = arith.constant 6.400000e+01 : f32
    %994 = vector.broadcast %cst_428 : f32 to vector<16x1xf32>
    %995 = arith.divf %993, %994 : vector<16x1xf32>
    %996 = vector.broadcast %995 : vector<16x1xf32> to vector<16x64xf32>
    %997 = arith.subf %965, %996 : vector<16x64xf32>
    %998 = arith.mulf %997, %997 : vector<16x64xf32>
    %cst_429 = arith.constant dense<0.000000e+00> : vector<16xf32>
    %999 = vector.multi_reduction <add>, %998, %cst_429 [1] : vector<16x64xf32> to vector<16xf32>
    %1000 = vector.shape_cast %999 : vector<16xf32> to vector<16x1xf32>
    %cst_430 = arith.constant 6.400000e+01 : f32
    %1001 = vector.broadcast %cst_430 : f32 to vector<16x1xf32>
    %1002 = arith.divf %1000, %1001 : vector<16x1xf32>
    %1003 = vector.broadcast %995 : vector<16x1xf32> to vector<16x64xf32>
    %1004 = arith.subf %965, %1003 : vector<16x64xf32>
    %cst_431 = arith.constant 9.99999974E-6 : f32
    %1005 = vector.broadcast %cst_431 : f32 to vector<16x1xf32>
    %1006 = arith.addf %1002, %1005 : vector<16x1xf32>
    %1007 = math.rsqrt %1006 : vector<16x1xf32>
    %1008 = vector.broadcast %1007 : vector<16x1xf32> to vector<16x64xf32>
    %1009 = arith.mulf %1004, %1008 : vector<16x64xf32>
    %1010 = vector.broadcast %967 : vector<1x64xf32> to vector<16x64xf32>
    %1011 = arith.mulf %1009, %1010 : vector<16x64xf32>
    %1012 = vector.broadcast %969 : vector<1x64xf32> to vector<16x64xf32>
    %1013 = arith.addf %1011, %1012 : vector<16x64xf32>
    %cst_432 = arith.constant dense<0.000000e+00> : vector<16x64xf32>
    %1014 = tpu.matmul %1013, %971, %cst_432 {dimension_numbers = #tpu.dot_dimension_numbers<[1], [0], [0], [1], [0, 0, 1, 1], [], []>} : vector<16x64xf32>, vector<64x64xf32>, vector<16x64xf32> -> vector<16x64xf32>
    %cst_433 = arith.constant 1.250000e-01 : f32
    %1015 = vector.broadcast %cst_433 : f32 to vector<16x64xf32>
    %1016 = arith.mulf %1014, %1015 : vector<16x64xf32>
    %cst_434 = arith.constant dense<0.000000e+00> : vector<16x64xf32>
    %1017 = tpu.matmul %1013, %973, %cst_434 {dimension_numbers = #tpu.dot_dimension_numbers<[1], [0], [0], [1], [0, 0, 1, 1], [], []>} : vector<16x64xf32>, vector<64x64xf32>, vector<16x64xf32> -> vector<16x64xf32>
    %cst_435 = arith.constant dense<0.000000e+00> : vector<16x64xf32>
    %1018 = tpu.matmul %1013, %975, %cst_435 {dimension_numbers = #tpu.dot_dimension_numbers<[1], [0], [0], [1], [0, 0, 1, 1], [], []>} : vector<16x64xf32>, vector<64x64xf32>, vector<16x64xf32> -> vector<16x64xf32>
    %1019 = vector.extract_strided_slice %1016 {offsets = [0, 0], sizes = [8, 64], strides = [1, 1]} : vector<16x64xf32> to vector<8x64xf32>
    %1020 = vector.extract_strided_slice %1017 {offsets = [0, 0], sizes = [8, 64], strides = [1, 1]} : vector<16x64xf32> to vector<8x64xf32>
    %1021 = vector.extract_strided_slice %1018 {offsets = [0, 0], sizes = [8, 64], strides = [1, 1]} : vector<16x64xf32> to vector<8x64xf32>
    %1022 = vector.extract_strided_slice %1019 {offsets = [0, 0], sizes = [8, 16], strides = [1, 1]} : vector<8x64xf32> to vector<8x16xf32>
    %1023 = vector.extract_strided_slice %1020 {offsets = [0, 0], sizes = [8, 16], strides = [1, 1]} : vector<8x64xf32> to vector<8x16xf32>
    %cst_436 = arith.constant dense<0.000000e+00> : vector<8x8xf32>
    %1024 = tpu.matmul %1022, %1023, %cst_436 {dimension_numbers = #tpu.dot_dimension_numbers<[1], [1], [0], [0], [0, 0, 1, 0], [], []>} : vector<8x16xf32>, vector<8x16xf32>, vector<8x8xf32> -> vector<8x8xf32>
    %1025 = tpu.iota {dimensions = array<i32: 0>} : vector<8x8xi32>
    %1026 = tpu.iota {dimensions = array<i32: 1>} : vector<8x8xi32>
    %1027 = arith.cmpi sle, %1026, %1025 : vector<8x8xi32>
    %cst_437 = arith.constant -1.000000e+30 : f32
    %1028 = vector.broadcast %cst_437 : f32 to vector<8x8xf32>
    %1029 = arith.select %1027, %1024, %1028 : vector<8x8xi1>, vector<8x8xf32>
    %cst_438 = arith.constant dense<0xFF800000> : vector<8xf32>
    %1030 = vector.multi_reduction <maximumf>, %1029, %cst_438 [1] : vector<8x8xf32> to vector<8xf32>
    %1031 = vector.shape_cast %1030 : vector<8xf32> to vector<8x1xf32>
    %1032 = vector.broadcast %1031 : vector<8x1xf32> to vector<8x8xf32>
    %1033 = arith.subf %1029, %1032 : vector<8x8xf32>
    %1034 = math.exp %1033 : vector<8x8xf32>
    %cst_439 = arith.constant dense<0.000000e+00> : vector<8xf32>
    %1035 = vector.multi_reduction <add>, %1034, %cst_439 [1] : vector<8x8xf32> to vector<8xf32>
    %1036 = vector.shape_cast %1035 : vector<8xf32> to vector<8x1xf32>
    %1037 = tpu.reciprocal %1036 {approx = true} : vector<8x1xf32> -> vector<8x1xf32>
    %1038 = vector.broadcast %1037 : vector<8x1xf32> to vector<8x8xf32>
    %1039 = arith.mulf %1034, %1038 : vector<8x8xf32>
    %1040 = vector.extract_strided_slice %1021 {offsets = [0, 0], sizes = [8, 16], strides = [1, 1]} : vector<8x64xf32> to vector<8x16xf32>
    %cst_440 = arith.constant dense<0.000000e+00> : vector<8x16xf32>
    %1041 = tpu.matmul %1039, %1040, %cst_440 {dimension_numbers = #tpu.dot_dimension_numbers<[1], [0], [0], [1], [0, 0, 1, 1], [], []>} : vector<8x8xf32>, vector<8x16xf32>, vector<8x16xf32> -> vector<8x16xf32>
    %1042 = vector.extract_strided_slice %977 {offsets = [0, 0], sizes = [16, 64], strides = [1, 1]} : vector<64x64xf32> to vector<16x64xf32>
    %cst_441 = arith.constant dense<0.000000e+00> : vector<8x64xf32>
    %1043 = tpu.matmul %1041, %1042, %cst_441 {dimension_numbers = #tpu.dot_dimension_numbers<[1], [0], [0], [1], [0, 0, 1, 1], [], []>} : vector<8x16xf32>, vector<16x64xf32>, vector<8x64xf32> -> vector<8x64xf32>
    %1044 = vector.extract_strided_slice %1019 {offsets = [0, 16], sizes = [8, 16], strides = [1, 1]} : vector<8x64xf32> to vector<8x16xf32>
    %1045 = vector.extract_strided_slice %1020 {offsets = [0, 16], sizes = [8, 16], strides = [1, 1]} : vector<8x64xf32> to vector<8x16xf32>
    %cst_442 = arith.constant dense<0.000000e+00> : vector<8x8xf32>
    %1046 = tpu.matmul %1044, %1045, %cst_442 {dimension_numbers = #tpu.dot_dimension_numbers<[1], [1], [0], [0], [0, 0, 1, 0], [], []>} : vector<8x16xf32>, vector<8x16xf32>, vector<8x8xf32> -> vector<8x8xf32>
    %1047 = tpu.iota {dimensions = array<i32: 0>} : vector<8x8xi32>
    %1048 = tpu.iota {dimensions = array<i32: 1>} : vector<8x8xi32>
    %1049 = arith.cmpi sle, %1048, %1047 : vector<8x8xi32>
    %cst_443 = arith.constant -1.000000e+30 : f32
    %1050 = vector.broadcast %cst_443 : f32 to vector<8x8xf32>
    %1051 = arith.select %1049, %1046, %1050 : vector<8x8xi1>, vector<8x8xf32>
    %cst_444 = arith.constant dense<0xFF800000> : vector<8xf32>
    %1052 = vector.multi_reduction <maximumf>, %1051, %cst_444 [1] : vector<8x8xf32> to vector<8xf32>
    %1053 = vector.shape_cast %1052 : vector<8xf32> to vector<8x1xf32>
    %1054 = vector.broadcast %1053 : vector<8x1xf32> to vector<8x8xf32>
    %1055 = arith.subf %1051, %1054 : vector<8x8xf32>
    %1056 = math.exp %1055 : vector<8x8xf32>
    %cst_445 = arith.constant dense<0.000000e+00> : vector<8xf32>
    %1057 = vector.multi_reduction <add>, %1056, %cst_445 [1] : vector<8x8xf32> to vector<8xf32>
    %1058 = vector.shape_cast %1057 : vector<8xf32> to vector<8x1xf32>
    %1059 = tpu.reciprocal %1058 {approx = true} : vector<8x1xf32> -> vector<8x1xf32>
    %1060 = vector.broadcast %1059 : vector<8x1xf32> to vector<8x8xf32>
    %1061 = arith.mulf %1056, %1060 : vector<8x8xf32>
    %1062 = vector.extract_strided_slice %1021 {offsets = [0, 16], sizes = [8, 16], strides = [1, 1]} : vector<8x64xf32> to vector<8x16xf32>
    %cst_446 = arith.constant dense<0.000000e+00> : vector<8x16xf32>
    %1063 = tpu.matmul %1061, %1062, %cst_446 {dimension_numbers = #tpu.dot_dimension_numbers<[1], [0], [0], [1], [0, 0, 1, 1], [], []>} : vector<8x8xf32>, vector<8x16xf32>, vector<8x16xf32> -> vector<8x16xf32>
    %1064 = vector.extract_strided_slice %977 {offsets = [16, 0], sizes = [16, 64], strides = [1, 1]} : vector<64x64xf32> to vector<16x64xf32>
    %cst_447 = arith.constant dense<0.000000e+00> : vector<8x64xf32>
    %1065 = tpu.matmul %1063, %1064, %cst_447 {dimension_numbers = #tpu.dot_dimension_numbers<[1], [0], [0], [1], [0, 0, 1, 1], [], []>} : vector<8x16xf32>, vector<16x64xf32>, vector<8x64xf32> -> vector<8x64xf32>
    %1066 = arith.addf %1043, %1065 : vector<8x64xf32>
    %1067 = vector.extract_strided_slice %1019 {offsets = [0, 32], sizes = [8, 16], strides = [1, 1]} : vector<8x64xf32> to vector<8x16xf32>
    %1068 = vector.extract_strided_slice %1020 {offsets = [0, 32], sizes = [8, 16], strides = [1, 1]} : vector<8x64xf32> to vector<8x16xf32>
    %cst_448 = arith.constant dense<0.000000e+00> : vector<8x8xf32>
    %1069 = tpu.matmul %1067, %1068, %cst_448 {dimension_numbers = #tpu.dot_dimension_numbers<[1], [1], [0], [0], [0, 0, 1, 0], [], []>} : vector<8x16xf32>, vector<8x16xf32>, vector<8x8xf32> -> vector<8x8xf32>
    %1070 = tpu.iota {dimensions = array<i32: 0>} : vector<8x8xi32>
    %1071 = tpu.iota {dimensions = array<i32: 1>} : vector<8x8xi32>
    %1072 = arith.cmpi sle, %1071, %1070 : vector<8x8xi32>
    %cst_449 = arith.constant -1.000000e+30 : f32
    %1073 = vector.broadcast %cst_449 : f32 to vector<8x8xf32>
    %1074 = arith.select %1072, %1069, %1073 : vector<8x8xi1>, vector<8x8xf32>
    %cst_450 = arith.constant dense<0xFF800000> : vector<8xf32>
    %1075 = vector.multi_reduction <maximumf>, %1074, %cst_450 [1] : vector<8x8xf32> to vector<8xf32>
    %1076 = vector.shape_cast %1075 : vector<8xf32> to vector<8x1xf32>
    %1077 = vector.broadcast %1076 : vector<8x1xf32> to vector<8x8xf32>
    %1078 = arith.subf %1074, %1077 : vector<8x8xf32>
    %1079 = math.exp %1078 : vector<8x8xf32>
    %cst_451 = arith.constant dense<0.000000e+00> : vector<8xf32>
    %1080 = vector.multi_reduction <add>, %1079, %cst_451 [1] : vector<8x8xf32> to vector<8xf32>
    %1081 = vector.shape_cast %1080 : vector<8xf32> to vector<8x1xf32>
    %1082 = tpu.reciprocal %1081 {approx = true} : vector<8x1xf32> -> vector<8x1xf32>
    %1083 = vector.broadcast %1082 : vector<8x1xf32> to vector<8x8xf32>
    %1084 = arith.mulf %1079, %1083 : vector<8x8xf32>
    %1085 = vector.extract_strided_slice %1021 {offsets = [0, 32], sizes = [8, 16], strides = [1, 1]} : vector<8x64xf32> to vector<8x16xf32>
    %cst_452 = arith.constant dense<0.000000e+00> : vector<8x16xf32>
    %1086 = tpu.matmul %1084, %1085, %cst_452 {dimension_numbers = #tpu.dot_dimension_numbers<[1], [0], [0], [1], [0, 0, 1, 1], [], []>} : vector<8x8xf32>, vector<8x16xf32>, vector<8x16xf32> -> vector<8x16xf32>
    %1087 = vector.extract_strided_slice %977 {offsets = [32, 0], sizes = [16, 64], strides = [1, 1]} : vector<64x64xf32> to vector<16x64xf32>
    %cst_453 = arith.constant dense<0.000000e+00> : vector<8x64xf32>
    %1088 = tpu.matmul %1086, %1087, %cst_453 {dimension_numbers = #tpu.dot_dimension_numbers<[1], [0], [0], [1], [0, 0, 1, 1], [], []>} : vector<8x16xf32>, vector<16x64xf32>, vector<8x64xf32> -> vector<8x64xf32>
    %1089 = arith.addf %1066, %1088 : vector<8x64xf32>
    %1090 = vector.extract_strided_slice %1019 {offsets = [0, 48], sizes = [8, 16], strides = [1, 1]} : vector<8x64xf32> to vector<8x16xf32>
    %1091 = vector.extract_strided_slice %1020 {offsets = [0, 48], sizes = [8, 16], strides = [1, 1]} : vector<8x64xf32> to vector<8x16xf32>
    %cst_454 = arith.constant dense<0.000000e+00> : vector<8x8xf32>
    %1092 = tpu.matmul %1090, %1091, %cst_454 {dimension_numbers = #tpu.dot_dimension_numbers<[1], [1], [0], [0], [0, 0, 1, 0], [], []>} : vector<8x16xf32>, vector<8x16xf32>, vector<8x8xf32> -> vector<8x8xf32>
    %1093 = tpu.iota {dimensions = array<i32: 0>} : vector<8x8xi32>
    %1094 = tpu.iota {dimensions = array<i32: 1>} : vector<8x8xi32>
    %1095 = arith.cmpi sle, %1094, %1093 : vector<8x8xi32>
    %cst_455 = arith.constant -1.000000e+30 : f32
    %1096 = vector.broadcast %cst_455 : f32 to vector<8x8xf32>
    %1097 = arith.select %1095, %1092, %1096 : vector<8x8xi1>, vector<8x8xf32>
    %cst_456 = arith.constant dense<0xFF800000> : vector<8xf32>
    %1098 = vector.multi_reduction <maximumf>, %1097, %cst_456 [1] : vector<8x8xf32> to vector<8xf32>
    %1099 = vector.shape_cast %1098 : vector<8xf32> to vector<8x1xf32>
    %1100 = vector.broadcast %1099 : vector<8x1xf32> to vector<8x8xf32>
    %1101 = arith.subf %1097, %1100 : vector<8x8xf32>
    %1102 = math.exp %1101 : vector<8x8xf32>
    %cst_457 = arith.constant dense<0.000000e+00> : vector<8xf32>
    %1103 = vector.multi_reduction <add>, %1102, %cst_457 [1] : vector<8x8xf32> to vector<8xf32>
    %1104 = vector.shape_cast %1103 : vector<8xf32> to vector<8x1xf32>
    %1105 = tpu.reciprocal %1104 {approx = true} : vector<8x1xf32> -> vector<8x1xf32>
    %1106 = vector.broadcast %1105 : vector<8x1xf32> to vector<8x8xf32>
    %1107 = arith.mulf %1102, %1106 : vector<8x8xf32>
    %1108 = vector.extract_strided_slice %1021 {offsets = [0, 48], sizes = [8, 16], strides = [1, 1]} : vector<8x64xf32> to vector<8x16xf32>
    %cst_458 = arith.constant dense<0.000000e+00> : vector<8x16xf32>
    %1109 = tpu.matmul %1107, %1108, %cst_458 {dimension_numbers = #tpu.dot_dimension_numbers<[1], [0], [0], [1], [0, 0, 1, 1], [], []>} : vector<8x8xf32>, vector<8x16xf32>, vector<8x16xf32> -> vector<8x16xf32>
    %1110 = vector.extract_strided_slice %977 {offsets = [48, 0], sizes = [16, 64], strides = [1, 1]} : vector<64x64xf32> to vector<16x64xf32>
    %cst_459 = arith.constant dense<0.000000e+00> : vector<8x64xf32>
    %1111 = tpu.matmul %1109, %1110, %cst_459 {dimension_numbers = #tpu.dot_dimension_numbers<[1], [0], [0], [1], [0, 0, 1, 1], [], []>} : vector<8x16xf32>, vector<16x64xf32>, vector<8x64xf32> -> vector<8x64xf32>
    %1112 = arith.addf %1089, %1111 : vector<8x64xf32>
    %1113 = vector.extract_strided_slice %1016 {offsets = [8, 0], sizes = [8, 64], strides = [1, 1]} : vector<16x64xf32> to vector<8x64xf32>
    %1114 = vector.extract_strided_slice %1017 {offsets = [8, 0], sizes = [8, 64], strides = [1, 1]} : vector<16x64xf32> to vector<8x64xf32>
    %1115 = vector.extract_strided_slice %1018 {offsets = [8, 0], sizes = [8, 64], strides = [1, 1]} : vector<16x64xf32> to vector<8x64xf32>
    %1116 = vector.extract_strided_slice %1113 {offsets = [0, 0], sizes = [8, 16], strides = [1, 1]} : vector<8x64xf32> to vector<8x16xf32>
    %1117 = vector.extract_strided_slice %1114 {offsets = [0, 0], sizes = [8, 16], strides = [1, 1]} : vector<8x64xf32> to vector<8x16xf32>
    %cst_460 = arith.constant dense<0.000000e+00> : vector<8x8xf32>
    %1118 = tpu.matmul %1116, %1117, %cst_460 {dimension_numbers = #tpu.dot_dimension_numbers<[1], [1], [0], [0], [0, 0, 1, 0], [], []>} : vector<8x16xf32>, vector<8x16xf32>, vector<8x8xf32> -> vector<8x8xf32>
    %1119 = tpu.iota {dimensions = array<i32: 0>} : vector<8x8xi32>
    %1120 = tpu.iota {dimensions = array<i32: 1>} : vector<8x8xi32>
    %1121 = arith.cmpi sle, %1120, %1119 : vector<8x8xi32>
    %cst_461 = arith.constant -1.000000e+30 : f32
    %1122 = vector.broadcast %cst_461 : f32 to vector<8x8xf32>
    %1123 = arith.select %1121, %1118, %1122 : vector<8x8xi1>, vector<8x8xf32>
    %cst_462 = arith.constant dense<0xFF800000> : vector<8xf32>
    %1124 = vector.multi_reduction <maximumf>, %1123, %cst_462 [1] : vector<8x8xf32> to vector<8xf32>
    %1125 = vector.shape_cast %1124 : vector<8xf32> to vector<8x1xf32>
    %1126 = vector.broadcast %1125 : vector<8x1xf32> to vector<8x8xf32>
    %1127 = arith.subf %1123, %1126 : vector<8x8xf32>
    %1128 = math.exp %1127 : vector<8x8xf32>
    %cst_463 = arith.constant dense<0.000000e+00> : vector<8xf32>
    %1129 = vector.multi_reduction <add>, %1128, %cst_463 [1] : vector<8x8xf32> to vector<8xf32>
    %1130 = vector.shape_cast %1129 : vector<8xf32> to vector<8x1xf32>
    %1131 = tpu.reciprocal %1130 {approx = true} : vector<8x1xf32> -> vector<8x1xf32>
    %1132 = vector.broadcast %1131 : vector<8x1xf32> to vector<8x8xf32>
    %1133 = arith.mulf %1128, %1132 : vector<8x8xf32>
    %1134 = vector.extract_strided_slice %1115 {offsets = [0, 0], sizes = [8, 16], strides = [1, 1]} : vector<8x64xf32> to vector<8x16xf32>
    %cst_464 = arith.constant dense<0.000000e+00> : vector<8x16xf32>
    %1135 = tpu.matmul %1133, %1134, %cst_464 {dimension_numbers = #tpu.dot_dimension_numbers<[1], [0], [0], [1], [0, 0, 1, 1], [], []>} : vector<8x8xf32>, vector<8x16xf32>, vector<8x16xf32> -> vector<8x16xf32>
    %1136 = vector.extract_strided_slice %977 {offsets = [0, 0], sizes = [16, 64], strides = [1, 1]} : vector<64x64xf32> to vector<16x64xf32>
    %cst_465 = arith.constant dense<0.000000e+00> : vector<8x64xf32>
    %1137 = tpu.matmul %1135, %1136, %cst_465 {dimension_numbers = #tpu.dot_dimension_numbers<[1], [0], [0], [1], [0, 0, 1, 1], [], []>} : vector<8x16xf32>, vector<16x64xf32>, vector<8x64xf32> -> vector<8x64xf32>
    %1138 = vector.extract_strided_slice %1113 {offsets = [0, 16], sizes = [8, 16], strides = [1, 1]} : vector<8x64xf32> to vector<8x16xf32>
    %1139 = vector.extract_strided_slice %1114 {offsets = [0, 16], sizes = [8, 16], strides = [1, 1]} : vector<8x64xf32> to vector<8x16xf32>
    %cst_466 = arith.constant dense<0.000000e+00> : vector<8x8xf32>
    %1140 = tpu.matmul %1138, %1139, %cst_466 {dimension_numbers = #tpu.dot_dimension_numbers<[1], [1], [0], [0], [0, 0, 1, 0], [], []>} : vector<8x16xf32>, vector<8x16xf32>, vector<8x8xf32> -> vector<8x8xf32>
    %1141 = tpu.iota {dimensions = array<i32: 0>} : vector<8x8xi32>
    %1142 = tpu.iota {dimensions = array<i32: 1>} : vector<8x8xi32>
    %1143 = arith.cmpi sle, %1142, %1141 : vector<8x8xi32>
    %cst_467 = arith.constant -1.000000e+30 : f32
    %1144 = vector.broadcast %cst_467 : f32 to vector<8x8xf32>
    %1145 = arith.select %1143, %1140, %1144 : vector<8x8xi1>, vector<8x8xf32>
    %cst_468 = arith.constant dense<0xFF800000> : vector<8xf32>
    %1146 = vector.multi_reduction <maximumf>, %1145, %cst_468 [1] : vector<8x8xf32> to vector<8xf32>
    %1147 = vector.shape_cast %1146 : vector<8xf32> to vector<8x1xf32>
    %1148 = vector.broadcast %1147 : vector<8x1xf32> to vector<8x8xf32>
    %1149 = arith.subf %1145, %1148 : vector<8x8xf32>
    %1150 = math.exp %1149 : vector<8x8xf32>
    %cst_469 = arith.constant dense<0.000000e+00> : vector<8xf32>
    %1151 = vector.multi_reduction <add>, %1150, %cst_469 [1] : vector<8x8xf32> to vector<8xf32>
    %1152 = vector.shape_cast %1151 : vector<8xf32> to vector<8x1xf32>
    %1153 = tpu.reciprocal %1152 {approx = true} : vector<8x1xf32> -> vector<8x1xf32>
    %1154 = vector.broadcast %1153 : vector<8x1xf32> to vector<8x8xf32>
    %1155 = arith.mulf %1150, %1154 : vector<8x8xf32>
    %1156 = vector.extract_strided_slice %1115 {offsets = [0, 16], sizes = [8, 16], strides = [1, 1]} : vector<8x64xf32> to vector<8x16xf32>
    %cst_470 = arith.constant dense<0.000000e+00> : vector<8x16xf32>
    %1157 = tpu.matmul %1155, %1156, %cst_470 {dimension_numbers = #tpu.dot_dimension_numbers<[1], [0], [0], [1], [0, 0, 1, 1], [], []>} : vector<8x8xf32>, vector<8x16xf32>, vector<8x16xf32> -> vector<8x16xf32>
    %1158 = vector.extract_strided_slice %977 {offsets = [16, 0], sizes = [16, 64], strides = [1, 1]} : vector<64x64xf32> to vector<16x64xf32>
    %cst_471 = arith.constant dense<0.000000e+00> : vector<8x64xf32>
    %1159 = tpu.matmul %1157, %1158, %cst_471 {dimension_numbers = #tpu.dot_dimension_numbers<[1], [0], [0], [1], [0, 0, 1, 1], [], []>} : vector<8x16xf32>, vector<16x64xf32>, vector<8x64xf32> -> vector<8x64xf32>
    %1160 = arith.addf %1137, %1159 : vector<8x64xf32>
    %1161 = vector.extract_strided_slice %1113 {offsets = [0, 32], sizes = [8, 16], strides = [1, 1]} : vector<8x64xf32> to vector<8x16xf32>
    %1162 = vector.extract_strided_slice %1114 {offsets = [0, 32], sizes = [8, 16], strides = [1, 1]} : vector<8x64xf32> to vector<8x16xf32>
    %cst_472 = arith.constant dense<0.000000e+00> : vector<8x8xf32>
    %1163 = tpu.matmul %1161, %1162, %cst_472 {dimension_numbers = #tpu.dot_dimension_numbers<[1], [1], [0], [0], [0, 0, 1, 0], [], []>} : vector<8x16xf32>, vector<8x16xf32>, vector<8x8xf32> -> vector<8x8xf32>
    %1164 = tpu.iota {dimensions = array<i32: 0>} : vector<8x8xi32>
    %1165 = tpu.iota {dimensions = array<i32: 1>} : vector<8x8xi32>
    %1166 = arith.cmpi sle, %1165, %1164 : vector<8x8xi32>
    %cst_473 = arith.constant -1.000000e+30 : f32
    %1167 = vector.broadcast %cst_473 : f32 to vector<8x8xf32>
    %1168 = arith.select %1166, %1163, %1167 : vector<8x8xi1>, vector<8x8xf32>
    %cst_474 = arith.constant dense<0xFF800000> : vector<8xf32>
    %1169 = vector.multi_reduction <maximumf>, %1168, %cst_474 [1] : vector<8x8xf32> to vector<8xf32>
    %1170 = vector.shape_cast %1169 : vector<8xf32> to vector<8x1xf32>
    %1171 = vector.broadcast %1170 : vector<8x1xf32> to vector<8x8xf32>
    %1172 = arith.subf %1168, %1171 : vector<8x8xf32>
    %1173 = math.exp %1172 : vector<8x8xf32>
    %cst_475 = arith.constant dense<0.000000e+00> : vector<8xf32>
    %1174 = vector.multi_reduction <add>, %1173, %cst_475 [1] : vector<8x8xf32> to vector<8xf32>
    %1175 = vector.shape_cast %1174 : vector<8xf32> to vector<8x1xf32>
    %1176 = tpu.reciprocal %1175 {approx = true} : vector<8x1xf32> -> vector<8x1xf32>
    %1177 = vector.broadcast %1176 : vector<8x1xf32> to vector<8x8xf32>
    %1178 = arith.mulf %1173, %1177 : vector<8x8xf32>
    %1179 = vector.extract_strided_slice %1115 {offsets = [0, 32], sizes = [8, 16], strides = [1, 1]} : vector<8x64xf32> to vector<8x16xf32>
    %cst_476 = arith.constant dense<0.000000e+00> : vector<8x16xf32>
    %1180 = tpu.matmul %1178, %1179, %cst_476 {dimension_numbers = #tpu.dot_dimension_numbers<[1], [0], [0], [1], [0, 0, 1, 1], [], []>} : vector<8x8xf32>, vector<8x16xf32>, vector<8x16xf32> -> vector<8x16xf32>
    %1181 = vector.extract_strided_slice %977 {offsets = [32, 0], sizes = [16, 64], strides = [1, 1]} : vector<64x64xf32> to vector<16x64xf32>
    %cst_477 = arith.constant dense<0.000000e+00> : vector<8x64xf32>
    %1182 = tpu.matmul %1180, %1181, %cst_477 {dimension_numbers = #tpu.dot_dimension_numbers<[1], [0], [0], [1], [0, 0, 1, 1], [], []>} : vector<8x16xf32>, vector<16x64xf32>, vector<8x64xf32> -> vector<8x64xf32>
    %1183 = arith.addf %1160, %1182 : vector<8x64xf32>
    %1184 = vector.extract_strided_slice %1113 {offsets = [0, 48], sizes = [8, 16], strides = [1, 1]} : vector<8x64xf32> to vector<8x16xf32>
    %1185 = vector.extract_strided_slice %1114 {offsets = [0, 48], sizes = [8, 16], strides = [1, 1]} : vector<8x64xf32> to vector<8x16xf32>
    %cst_478 = arith.constant dense<0.000000e+00> : vector<8x8xf32>
    %1186 = tpu.matmul %1184, %1185, %cst_478 {dimension_numbers = #tpu.dot_dimension_numbers<[1], [1], [0], [0], [0, 0, 1, 0], [], []>} : vector<8x16xf32>, vector<8x16xf32>, vector<8x8xf32> -> vector<8x8xf32>
    %1187 = tpu.iota {dimensions = array<i32: 0>} : vector<8x8xi32>
    %1188 = tpu.iota {dimensions = array<i32: 1>} : vector<8x8xi32>
    %1189 = arith.cmpi sle, %1188, %1187 : vector<8x8xi32>
    %cst_479 = arith.constant -1.000000e+30 : f32
    %1190 = vector.broadcast %cst_479 : f32 to vector<8x8xf32>
    %1191 = arith.select %1189, %1186, %1190 : vector<8x8xi1>, vector<8x8xf32>
    %cst_480 = arith.constant dense<0xFF800000> : vector<8xf32>
    %1192 = vector.multi_reduction <maximumf>, %1191, %cst_480 [1] : vector<8x8xf32> to vector<8xf32>
    %1193 = vector.shape_cast %1192 : vector<8xf32> to vector<8x1xf32>
    %1194 = vector.broadcast %1193 : vector<8x1xf32> to vector<8x8xf32>
    %1195 = arith.subf %1191, %1194 : vector<8x8xf32>
    %1196 = math.exp %1195 : vector<8x8xf32>
    %cst_481 = arith.constant dense<0.000000e+00> : vector<8xf32>
    %1197 = vector.multi_reduction <add>, %1196, %cst_481 [1] : vector<8x8xf32> to vector<8xf32>
    %1198 = vector.shape_cast %1197 : vector<8xf32> to vector<8x1xf32>
    %1199 = tpu.reciprocal %1198 {approx = true} : vector<8x1xf32> -> vector<8x1xf32>
    %1200 = vector.broadcast %1199 : vector<8x1xf32> to vector<8x8xf32>
    %1201 = arith.mulf %1196, %1200 : vector<8x8xf32>
    %1202 = vector.extract_strided_slice %1115 {offsets = [0, 48], sizes = [8, 16], strides = [1, 1]} : vector<8x64xf32> to vector<8x16xf32>
    %cst_482 = arith.constant dense<0.000000e+00> : vector<8x16xf32>
    %1203 = tpu.matmul %1201, %1202, %cst_482 {dimension_numbers = #tpu.dot_dimension_numbers<[1], [0], [0], [1], [0, 0, 1, 1], [], []>} : vector<8x8xf32>, vector<8x16xf32>, vector<8x16xf32> -> vector<8x16xf32>
    %1204 = vector.extract_strided_slice %977 {offsets = [48, 0], sizes = [16, 64], strides = [1, 1]} : vector<64x64xf32> to vector<16x64xf32>
    %cst_483 = arith.constant dense<0.000000e+00> : vector<8x64xf32>
    %1205 = tpu.matmul %1203, %1204, %cst_483 {dimension_numbers = #tpu.dot_dimension_numbers<[1], [0], [0], [1], [0, 0, 1, 1], [], []>} : vector<8x16xf32>, vector<16x64xf32>, vector<8x64xf32> -> vector<8x64xf32>
    %1206 = arith.addf %1183, %1205 : vector<8x64xf32>
    %1207 = tpu.concatenate %1112, %1206 in 0 : vector<8x64xf32>, vector<8x64xf32> -> vector<16x64xf32>
    %1208 = arith.addf %965, %1207 : vector<16x64xf32>
    %1209 = vector.broadcast %979 : vector<1x64xf32> to vector<16x64xf32>
    %1210 = arith.addf %1208, %1209 : vector<16x64xf32>
    %cst_484 = arith.constant dense<0.000000e+00> : vector<16xf32>
    %1211 = vector.multi_reduction <add>, %1210, %cst_484 [1] : vector<16x64xf32> to vector<16xf32>
    %1212 = vector.shape_cast %1211 : vector<16xf32> to vector<16x1xf32>
    %cst_485 = arith.constant 6.400000e+01 : f32
    %1213 = vector.broadcast %cst_485 : f32 to vector<16x1xf32>
    %1214 = arith.divf %1212, %1213 : vector<16x1xf32>
    %1215 = vector.broadcast %1214 : vector<16x1xf32> to vector<16x64xf32>
    %1216 = arith.subf %1210, %1215 : vector<16x64xf32>
    %1217 = arith.mulf %1216, %1216 : vector<16x64xf32>
    %cst_486 = arith.constant dense<0.000000e+00> : vector<16xf32>
    %1218 = vector.multi_reduction <add>, %1217, %cst_486 [1] : vector<16x64xf32> to vector<16xf32>
    %1219 = vector.shape_cast %1218 : vector<16xf32> to vector<16x1xf32>
    %cst_487 = arith.constant 6.400000e+01 : f32
    %1220 = vector.broadcast %cst_487 : f32 to vector<16x1xf32>
    %1221 = arith.divf %1219, %1220 : vector<16x1xf32>
    %1222 = vector.broadcast %1214 : vector<16x1xf32> to vector<16x64xf32>
    %1223 = arith.subf %1210, %1222 : vector<16x64xf32>
    %cst_488 = arith.constant 9.99999974E-6 : f32
    %1224 = vector.broadcast %cst_488 : f32 to vector<16x1xf32>
    %1225 = arith.addf %1221, %1224 : vector<16x1xf32>
    %1226 = math.rsqrt %1225 : vector<16x1xf32>
    %1227 = vector.broadcast %1226 : vector<16x1xf32> to vector<16x64xf32>
    %1228 = arith.mulf %1223, %1227 : vector<16x64xf32>
    %1229 = vector.broadcast %981 : vector<1x64xf32> to vector<16x64xf32>
    %1230 = arith.mulf %1228, %1229 : vector<16x64xf32>
    %1231 = vector.broadcast %983 : vector<1x64xf32> to vector<16x64xf32>
    %1232 = arith.addf %1230, %1231 : vector<16x64xf32>
    %cst_489 = arith.constant dense<0.000000e+00> : vector<16x256xf32>
    %1233 = tpu.matmul %1232, %985, %cst_489 {dimension_numbers = #tpu.dot_dimension_numbers<[1], [0], [0], [1], [0, 0, 1, 1], [], []>} : vector<16x64xf32>, vector<64x256xf32>, vector<16x256xf32> -> vector<16x256xf32>
    %1234 = vector.broadcast %987 : vector<1x256xf32> to vector<16x256xf32>
    %1235 = arith.addf %1233, %1234 : vector<16x256xf32>
    %cst_490 = arith.constant 5.000000e-01 : f32
    %1236 = vector.broadcast %cst_490 : f32 to vector<16x256xf32>
    %1237 = arith.mulf %1236, %1235 : vector<16x256xf32>
    %cst_491 = arith.constant 0.707106769 : f32
    %1238 = vector.broadcast %cst_491 : f32 to vector<16x256xf32>
    %1239 = arith.mulf %1235, %1238 : vector<16x256xf32>
    %1240 = math.absf %1239 : vector<16x256xf32>
    %cst_492 = arith.constant 0.327591091 : f32
    %1241 = vector.broadcast %cst_492 : f32 to vector<16x256xf32>
    %1242 = arith.mulf %1241, %1240 : vector<16x256xf32>
    %cst_493 = arith.constant 1.000000e+00 : f32
    %1243 = vector.broadcast %cst_493 : f32 to vector<16x256xf32>
    %1244 = arith.addf %1243, %1242 : vector<16x256xf32>
    %cst_494 = arith.constant 1.000000e+00 : f32
    %1245 = vector.broadcast %cst_494 : f32 to vector<16x256xf32>
    %1246 = arith.divf %1245, %1244 : vector<16x256xf32>
    %cst_495 = arith.constant 1.06140542 : f32
    %1247 = vector.broadcast %cst_495 : f32 to vector<16x256xf32>
    %1248 = arith.mulf %1247, %1246 : vector<16x256xf32>
    %cst_496 = arith.constant -1.45315206 : f32
    %1249 = vector.broadcast %cst_496 : f32 to vector<16x256xf32>
    %1250 = arith.addf %1248, %1249 : vector<16x256xf32>
    %1251 = arith.mulf %1250, %1246 : vector<16x256xf32>
    %cst_497 = arith.constant 1.42141378 : f32
    %1252 = vector.broadcast %cst_497 : f32 to vector<16x256xf32>
    %1253 = arith.addf %1251, %1252 : vector<16x256xf32>
    %1254 = arith.mulf %1253, %1246 : vector<16x256xf32>
    %cst_498 = arith.constant -0.284496725 : f32
    %1255 = vector.broadcast %cst_498 : f32 to vector<16x256xf32>
    %1256 = arith.addf %1254, %1255 : vector<16x256xf32>
    %1257 = arith.mulf %1256, %1246 : vector<16x256xf32>
    %cst_499 = arith.constant 0.254829586 : f32
    %1258 = vector.broadcast %cst_499 : f32 to vector<16x256xf32>
    %1259 = arith.addf %1257, %1258 : vector<16x256xf32>
    %1260 = arith.mulf %1259, %1246 : vector<16x256xf32>
    %cst_500 = arith.constant 0.000000e+00 : f32
    %1261 = vector.broadcast %cst_500 : f32 to vector<16x256xf32>
    %1262 = arith.subf %1261, %1240 : vector<16x256xf32>
    %1263 = arith.mulf %1262, %1240 : vector<16x256xf32>
    %1264 = math.exp %1263 : vector<16x256xf32>
    %1265 = arith.mulf %1260, %1264 : vector<16x256xf32>
    %cst_501 = arith.constant 1.000000e+00 : f32
    %1266 = vector.broadcast %cst_501 : f32 to vector<16x256xf32>
    %1267 = arith.subf %1266, %1265 : vector<16x256xf32>
    %cst_502 = arith.constant 0.000000e+00 : f32
    %1268 = vector.broadcast %cst_502 : f32 to vector<16x256xf32>
    %1269 = arith.cmpf olt, %1239, %1268 : vector<16x256xf32>
    %cst_503 = arith.constant 0.000000e+00 : f32
    %1270 = vector.broadcast %cst_503 : f32 to vector<16x256xf32>
    %1271 = arith.subf %1270, %1267 : vector<16x256xf32>
    %1272 = arith.select %1269, %1271, %1267 : vector<16x256xi1>, vector<16x256xf32>
    %cst_504 = arith.constant 1.000000e+00 : f32
    %1273 = vector.broadcast %cst_504 : f32 to vector<16x256xf32>
    %1274 = arith.addf %1273, %1272 : vector<16x256xf32>
    %1275 = arith.mulf %1237, %1274 : vector<16x256xf32>
    %cst_505 = arith.constant dense<0.000000e+00> : vector<16x64xf32>
    %1276 = tpu.matmul %1275, %989, %cst_505 {dimension_numbers = #tpu.dot_dimension_numbers<[1], [0], [0], [1], [0, 0, 1, 1], [], []>} : vector<16x256xf32>, vector<256x64xf32>, vector<16x64xf32> -> vector<16x64xf32>
    %1277 = vector.broadcast %991 : vector<1x64xf32> to vector<16x64xf32>
    %1278 = arith.addf %1276, %1277 : vector<16x64xf32>
    %1279 = arith.addf %1232, %1278 : vector<16x64xf32>
    %c0_506 = arith.constant 0 : index
    %c0_507 = arith.constant 0 : index
    %1280 = vector.load %arg40[%c0_506, %c0_507] : memref<1x64xf32, #tpu.memory_space<vmem>>, vector<1x64xf32>
    %c0_508 = arith.constant 0 : index
    %c0_509 = arith.constant 0 : index
    %1281 = vector.load %arg41[%c0_508, %c0_509] : memref<1x64xf32, #tpu.memory_space<vmem>>, vector<1x64xf32>
    %cst_510 = arith.constant dense<0.000000e+00> : vector<16xf32>
    %1282 = vector.multi_reduction <add>, %1279, %cst_510 [1] : vector<16x64xf32> to vector<16xf32>
    %1283 = vector.shape_cast %1282 : vector<16xf32> to vector<16x1xf32>
    %cst_511 = arith.constant 6.400000e+01 : f32
    %1284 = vector.broadcast %cst_511 : f32 to vector<16x1xf32>
    %1285 = arith.divf %1283, %1284 : vector<16x1xf32>
    %1286 = vector.broadcast %1285 : vector<16x1xf32> to vector<16x64xf32>
    %1287 = arith.subf %1279, %1286 : vector<16x64xf32>
    %1288 = arith.mulf %1287, %1287 : vector<16x64xf32>
    %cst_512 = arith.constant dense<0.000000e+00> : vector<16xf32>
    %1289 = vector.multi_reduction <add>, %1288, %cst_512 [1] : vector<16x64xf32> to vector<16xf32>
    %1290 = vector.shape_cast %1289 : vector<16xf32> to vector<16x1xf32>
    %cst_513 = arith.constant 6.400000e+01 : f32
    %1291 = vector.broadcast %cst_513 : f32 to vector<16x1xf32>
    %1292 = arith.divf %1290, %1291 : vector<16x1xf32>
    %1293 = vector.broadcast %1285 : vector<16x1xf32> to vector<16x64xf32>
    %1294 = arith.subf %1279, %1293 : vector<16x64xf32>
    %cst_514 = arith.constant 9.99999974E-6 : f32
    %1295 = vector.broadcast %cst_514 : f32 to vector<16x1xf32>
    %1296 = arith.addf %1292, %1295 : vector<16x1xf32>
    %1297 = math.rsqrt %1296 : vector<16x1xf32>
    %1298 = vector.broadcast %1297 : vector<16x1xf32> to vector<16x64xf32>
    %1299 = arith.mulf %1294, %1298 : vector<16x64xf32>
    %1300 = vector.broadcast %1280 : vector<1x64xf32> to vector<16x64xf32>
    %1301 = arith.mulf %1299, %1300 : vector<16x64xf32>
    %1302 = vector.broadcast %1281 : vector<1x64xf32> to vector<16x64xf32>
    %1303 = arith.addf %1301, %1302 : vector<16x64xf32>
    %c0_515 = arith.constant 0 : index
    %c0_516 = arith.constant 0 : index
    %1304 = vector.load %arg42[%c0_515, %c0_516] : memref<64x128xf32, #tpu.memory_space<vmem>>, vector<64x128xf32>
    %cst_517 = arith.constant dense<0.000000e+00> : vector<16x128xf32>
    %1305 = tpu.matmul %1303, %1304, %cst_517 {dimension_numbers = #tpu.dot_dimension_numbers<[1], [0], [0], [1], [0, 0, 1, 1], [], []>} : vector<16x64xf32>, vector<64x128xf32>, vector<16x128xf32> -> vector<16x128xf32>
    %c0_518 = arith.constant 0 : index
    %c0_519 = arith.constant 0 : index
    %1306 = vector.load %arg43[%c0_518, %c0_519] : memref<1x128xf32, #tpu.memory_space<vmem>>, vector<1x128xf32>
    %1307 = vector.broadcast %1306 : vector<1x128xf32> to vector<16x128xf32>
    %1308 = arith.addf %1305, %1307 : vector<16x128xf32>
    %c0_520 = arith.constant 0 : index
    %c0_521 = arith.constant 0 : index
    %1309 = vector.load %arg44[%c0_520, %c0_521] : memref<16x128xf32, #tpu.memory_space<vmem>>, vector<16x128xf32>
    tpu.vector_store %arg44[%c0_520, %c0_521], %1308 {strides = array<i32>} : memref<16x128xf32, #tpu.memory_space<vmem>>, vector<16x128xf32>,
    return
  }
  func.func @transform_0(%arg0: i32) -> (i32, i32) {
    %c0_i32 = arith.constant 0 : i32
    %c0_i32_0 = arith.constant 0 : i32
    %c0_i32_1 = arith.constant 0 : i32
    return %c0_i32, %c0_i32_0 : i32, i32
  }
  func.func @transform_1(%arg0: i32) -> (i32, i32) {
    %c0_i32 = arith.constant 0 : i32
    %c0_i32_0 = arith.constant 0 : i32
    %c0_i32_1 = arith.constant 0 : i32
    return %c0_i32, %c0_i32_0 : i32, i32
  }
  func.func @transform_2(%arg0: i32) -> (i32, i32) {
    %c0_i32 = arith.constant 0 : i32
    %c0_i32_0 = arith.constant 0 : i32
    %c0_i32_1 = arith.constant 0 : i32
    return %c0_i32, %c0_i32_0 : i32, i32
  }
  func.func @transform_3(%arg0: i32) -> (i32, i32) {
    %c0_i32 = arith.constant 0 : i32
    %c0_i32_0 = arith.constant 0 : i32
    %c0_i32_1 = arith.constant 0 : i32
    return %c0_i32, %c0_i32_0 : i32, i32
  }
  func.func @transform_4(%arg0: i32) -> (i32, i32) {
    %c0_i32 = arith.constant 0 : i32
    %c0_i32_0 = arith.constant 0 : i32
    %c0_i32_1 = arith.constant 0 : i32
    return %c0_i32, %c0_i32_0 : i32, i32
  }
  func.func @transform_5(%arg0: i32) -> (i32, i32, i32) {
    %c0_i32 = arith.constant 0 : i32
    %c0_i32_0 = arith.constant 0 : i32
    %c0_i32_1 = arith.constant 0 : i32
    %c0_i32_2 = arith.constant 0 : i32
    return %c0_i32, %c0_i32_0, %c0_i32_1 : i32, i32, i32
  }
  func.func @transform_6(%arg0: i32) -> (i32, i32, i32) {
    %c0_i32 = arith.constant 0 : i32
    %c0_i32_0 = arith.constant 0 : i32
    %c0_i32_1 = arith.constant 0 : i32
    %c0_i32_2 = arith.constant 0 : i32
    return %c0_i32, %c0_i32_0, %c0_i32_1 : i32, i32, i32
  }
  func.func @transform_7(%arg0: i32) -> (i32, i32, i32) {
    %c0_i32 = arith.constant 0 : i32
    %c0_i32_0 = arith.constant 0 : i32
    %c0_i32_1 = arith.constant 0 : i32
    %c0_i32_2 = arith.constant 0 : i32
    return %c0_i32, %c0_i32_0, %c0_i32_1 : i32, i32, i32
  }
  func.func @transform_8(%arg0: i32) -> (i32, i32, i32) {
    %c0_i32 = arith.constant 0 : i32
    %c0_i32_0 = arith.constant 0 : i32
    %c0_i32_1 = arith.constant 0 : i32
    %c0_i32_2 = arith.constant 0 : i32
    return %c0_i32, %c0_i32_0, %c0_i32_1 : i32, i32, i32
  }
  func.func @transform_9(%arg0: i32) -> (i32, i32, i32) {
    %c0_i32 = arith.constant 0 : i32
    %c0_i32_0 = arith.constant 0 : i32
    %c0_i32_1 = arith.constant 0 : i32
    %c0_i32_2 = arith.constant 0 : i32
    return %c0_i32, %c0_i32_0, %c0_i32_1 : i32, i32, i32
  }
  func.func @transform_10(%arg0: i32) -> (i32, i32, i32) {
    %c0_i32 = arith.constant 0 : i32
    %c0_i32_0 = arith.constant 0 : i32
    %c0_i32_1 = arith.constant 0 : i32
    %c0_i32_2 = arith.constant 0 : i32
    return %c0_i32, %c0_i32_0, %c0_i32_1 : i32, i32, i32
  }
  func.func @transform_11(%arg0: i32) -> (i32, i32, i32) {
    %c0_i32 = arith.constant 0 : i32
    %c0_i32_0 = arith.constant 0 : i32
    %c0_i32_1 = arith.constant 0 : i32
    %c0_i32_2 = arith.constant 0 : i32
    return %c0_i32, %c0_i32_0, %c0_i32_1 : i32, i32, i32
  }
  func.func @transform_12(%arg0: i32) -> (i32, i32, i32) {
    %c0_i32 = arith.constant 0 : i32
    %c0_i32_0 = arith.constant 0 : i32
    %c0_i32_1 = arith.constant 0 : i32
    %c0_i32_2 = arith.constant 0 : i32
    return %c0_i32, %c0_i32_0, %c0_i32_1 : i32, i32, i32
  }
  func.func @transform_13(%arg0: i32) -> (i32, i32, i32) {
    %c0_i32 = arith.constant 0 : i32
    %c0_i32_0 = arith.constant 0 : i32
    %c0_i32_1 = arith.constant 0 : i32
    %c0_i32_2 = arith.constant 0 : i32
    return %c0_i32, %c0_i32_0, %c0_i32_1 : i32, i32, i32
  }
  func.func @transform_14(%arg0: i32) -> (i32, i32, i32) {
    %c0_i32 = arith.constant 0 : i32
    %c0_i32_0 = arith.constant 0 : i32
    %c0_i32_1 = arith.constant 0 : i32
    %c0_i32_2 = arith.constant 0 : i32
    return %c0_i32, %c0_i32_0, %c0_i32_1 : i32, i32, i32
  }
  func.func @transform_15(%arg0: i32) -> (i32, i32, i32) {
    %c0_i32 = arith.constant 0 : i32
    %c0_i32_0 = arith.constant 0 : i32
    %c0_i32_1 = arith.constant 0 : i32
    %c0_i32_2 = arith.constant 0 : i32
    return %c0_i32, %c0_i32_0, %c0_i32_1 : i32, i32, i32
  }
  func.func @transform_16(%arg0: i32) -> (i32, i32, i32) {
    %c0_i32 = arith.constant 0 : i32
    %c0_i32_0 = arith.constant 0 : i32
    %c0_i32_1 = arith.constant 0 : i32
    %c0_i32_2 = arith.constant 0 : i32
    return %c0_i32, %c0_i32_0, %c0_i32_1 : i32, i32, i32
  }
  func.func @transform_17(%arg0: i32) -> (i32, i32, i32) {
    %c0_i32 = arith.constant 0 : i32
    %c0_i32_0 = arith.constant 0 : i32
    %c0_i32_1 = arith.constant 0 : i32
    %c0_i32_2 = arith.constant 0 : i32
    return %c0_i32, %c0_i32_0, %c0_i32_1 : i32, i32, i32
  }
  func.func @transform_18(%arg0: i32) -> (i32, i32) {
    %c0_i32 = arith.constant 0 : i32
    %c0_i32_0 = arith.constant 0 : i32
    %c0_i32_1 = arith.constant 0 : i32
    return %c0_i32, %c0_i32_0 : i32, i32
  }
  func.func @transform_19(%arg0: i32) -> (i32, i32) {
    %c0_i32 = arith.constant 0 : i32
    %c0_i32_0 = arith.constant 0 : i32
    %c0_i32_1 = arith.constant 0 : i32
    return %c0_i32, %c0_i32_0 : i32, i32
  }
  func.func @transform_20(%arg0: i32) -> (i32, i32) {
    %c0_i32 = arith.constant 0 : i32
    %c0_i32_0 = arith.constant 0 : i32
    %c0_i32_1 = arith.constant 0 : i32
    return %c0_i32, %c0_i32_0 : i32, i32
  }
  func.func @transform_21(%arg0: i32) -> (i32, i32) {
    %c0_i32 = arith.constant 0 : i32
    %c0_i32_0 = arith.constant 0 : i32
    %c0_i32_1 = arith.constant 0 : i32
    return %c0_i32, %c0_i32_0 : i32, i32
  }
  func.func @transform_22(%arg0: i32) -> (i32, i32) {
    %c0_i32 = arith.constant 0 : i32
    %c0_i32_0 = arith.constant 0 : i32
    %c0_i32_1 = arith.constant 0 : i32
    return %c0_i32, %c0_i32_0 : i32, i32
  }
  func.func @transform_23(%arg0: i32) -> (i32, i32) {
    %c0_i32 = arith.constant 0 : i32
    %c0_i32_0 = arith.constant 0 : i32
    %c0_i32_1 = arith.constant 0 : i32
    return %c0_i32, %c0_i32_0 : i32, i32
  }
  func.func @transform_24(%arg0: i32) -> (i32, i32, i32) {
    %c0_i32 = arith.constant 0 : i32
    %c0_i32_0 = arith.constant 0 : i32
    %c0_i32_1 = arith.constant 0 : i32
    %c0_i32_2 = arith.constant 0 : i32
    return %c0_i32, %c0_i32_0, %c0_i32_1 : i32, i32, i32
  }
  func.func @transform_25(%arg0: i32) -> (i32, i32) {
    %c0_i32 = arith.constant 0 : i32
    %c0_i32_0 = arith.constant 0 : i32
    %c0_i32_1 = arith.constant 0 : i32
    return %c0_i32, %c0_i32_0 : i32, i32
  }
  func.func @transform_26(%arg0: i32) -> (i32, i32, i32) {
    %c0_i32 = arith.constant 0 : i32
    %c0_i32_0 = arith.constant 0 : i32
    %c0_i32_1 = arith.constant 0 : i32
    %c0_i32_2 = arith.constant 0 : i32
    return %c0_i32, %c0_i32_0, %c0_i32_1 : i32, i32, i32
  }
  func.func @transform_27(%arg0: i32) -> (i32, i32, i32) {
    %c0_i32 = arith.constant 0 : i32
    %c0_i32_0 = arith.constant 0 : i32
    %c0_i32_1 = arith.constant 0 : i32
    %c0_i32_2 = arith.constant 0 : i32
    return %c0_i32, %c0_i32_0, %c0_i32_1 : i32, i32, i32
  }
  func.func @transform_28(%arg0: i32) -> (i32, i32, i32) {
    %c0_i32 = arith.constant 0 : i32
    %c0_i32_0 = arith.constant 0 : i32
    %c0_i32_1 = arith.constant 0 : i32
    %c0_i32_2 = arith.constant 0 : i32
    return %c0_i32, %c0_i32_0, %c0_i32_1 : i32, i32, i32
  }
  func.func @transform_29(%arg0: i32) -> (i32, i32, i32) {
    %c0_i32 = arith.constant 0 : i32
    %c0_i32_0 = arith.constant 0 : i32
    %c0_i32_1 = arith.constant 0 : i32
    %c0_i32_2 = arith.constant 0 : i32
    return %c0_i32, %c0_i32_0, %c0_i32_1 : i32, i32, i32
  }
  func.func @transform_30(%arg0: i32) -> (i32, i32, i32) {
    %c0_i32 = arith.constant 0 : i32
    %c0_i32_0 = arith.constant 0 : i32
    %c0_i32_1 = arith.constant 0 : i32
    %c0_i32_2 = arith.constant 0 : i32
    return %c0_i32, %c0_i32_0, %c0_i32_1 : i32, i32, i32
  }
  func.func @transform_31(%arg0: i32) -> (i32, i32, i32) {
    %c0_i32 = arith.constant 0 : i32
    %c0_i32_0 = arith.constant 0 : i32
    %c0_i32_1 = arith.constant 0 : i32
    %c0_i32_2 = arith.constant 0 : i32
    return %c0_i32, %c0_i32_0, %c0_i32_1 : i32, i32, i32
  }
  func.func @transform_32(%arg0: i32) -> (i32, i32, i32) {
    %c0_i32 = arith.constant 0 : i32
    %c0_i32_0 = arith.constant 0 : i32
    %c0_i32_1 = arith.constant 0 : i32
    %c0_i32_2 = arith.constant 0 : i32
    return %c0_i32, %c0_i32_0, %c0_i32_1 : i32, i32, i32
  }
  func.func @transform_33(%arg0: i32) -> (i32, i32, i32) {
    %c0_i32 = arith.constant 0 : i32
    %c0_i32_0 = arith.constant 0 : i32
    %c0_i32_1 = arith.constant 0 : i32
    %c0_i32_2 = arith.constant 0 : i32
    return %c0_i32, %c0_i32_0, %c0_i32_1 : i32, i32, i32
  }
  func.func @transform_34(%arg0: i32) -> (i32, i32, i32) {
    %c0_i32 = arith.constant 0 : i32
    %c0_i32_0 = arith.constant 0 : i32
    %c0_i32_1 = arith.constant 0 : i32
    %c0_i32_2 = arith.constant 0 : i32
    return %c0_i32, %c0_i32_0, %c0_i32_1 : i32, i32, i32
  }
  func.func @transform_35(%arg0: i32) -> (i32, i32, i32) {
    %c0_i32 = arith.constant 0 : i32
    %c0_i32_0 = arith.constant 0 : i32
    %c0_i32_1 = arith.constant 0 : i32
    %c0_i32_2 = arith.constant 0 : i32
    return %c0_i32, %c0_i32_0, %c0_i32_1 : i32, i32, i32
  }
  func.func @transform_36(%arg0: i32) -> (i32, i32, i32) {
    %c0_i32 = arith.constant 0 : i32
    %c0_i32_0 = arith.constant 0 : i32
    %c0_i32_1 = arith.constant 0 : i32
    %c0_i32_2 = arith.constant 0 : i32
    return %c0_i32, %c0_i32_0, %c0_i32_1 : i32, i32, i32
  }
  func.func @transform_37(%arg0: i32) -> (i32, i32, i32) {
    %c0_i32 = arith.constant 0 : i32
    %c0_i32_0 = arith.constant 0 : i32
    %c0_i32_1 = arith.constant 0 : i32
    %c0_i32_2 = arith.constant 0 : i32
    return %c0_i32, %c0_i32_0, %c0_i32_1 : i32, i32, i32
  }
  func.func @transform_38(%arg0: i32) -> (i32, i32, i32) {
    %c0_i32 = arith.constant 0 : i32
    %c0_i32_0 = arith.constant 0 : i32
    %c0_i32_1 = arith.constant 0 : i32
    %c0_i32_2 = arith.constant 0 : i32
    return %c0_i32, %c0_i32_0, %c0_i32_1 : i32, i32, i32
  }
  func.func @transform_39(%arg0: i32) -> (i32, i32) {
    %c0_i32 = arith.constant 0 : i32
    %c0_i32_0 = arith.constant 0 : i32
    %c0_i32_1 = arith.constant 0 : i32
    return %c0_i32, %c0_i32_0 : i32, i32
  }
  func.func @transform_40(%arg0: i32) -> (i32, i32) {
    %c0_i32 = arith.constant 0 : i32
    %c0_i32_0 = arith.constant 0 : i32
    %c0_i32_1 = arith.constant 0 : i32
    return %c0_i32, %c0_i32_0 : i32, i32
  }
  func.func @transform_41(%arg0: i32) -> (i32, i32) {
    %c0_i32 = arith.constant 0 : i32
    %c0_i32_0 = arith.constant 0 : i32
    %c0_i32_1 = arith.constant 0 : i32
    return %c0_i32, %c0_i32_0 : i32, i32
  }
  func.func @transform_42(%arg0: i32) -> (i32, i32) {
    %c0_i32 = arith.constant 0 : i32
    %c0_i32_0 = arith.constant 0 : i32
    %c0_i32_1 = arith.constant 0 : i32
    return %c0_i32, %c0_i32_0 : i32, i32
  }
  func.func @transform_43(%arg0: i32) -> (i32, i32) {
    %c0_i32 = arith.constant 0 : i32
    %c0_i32_0 = arith.constant 0 : i32
    %c0_i32_1 = arith.constant 0 : i32
    return %c0_i32, %c0_i32_0 : i32, i32
  }
}

</mosaic_0001>

<bundles_post_ra>
// kernel: tpu_custom_call.1
= control target key start
LH: loop header
LB: loop body
LE: loop exit
PB: predicated region body
PF: predicated region fallthrough
CT: control target
= control target key end

     0   :  { %s14364_s6 = smov 1   ;;  %s14365_s10 = smov 2   ;;  %s16346_s0 = inlined_call_operand.smem [shape: u32[44], index: -1, kind: input, shape index: {}] }
   0x1   :  { %s14425_s5 = sld [smem:[%s16346_s0]]   ;;  %s14366_s14 = smov 3  }
   0x2   :  { %s14430_s9 = sld [smem:[%s16346_s0 + %s14364_s6]]   ;;  %s14367_s18 = smov 4  }
   0x3   :  { %s14435_s13 = sld [smem:[%s16346_s0 + %s14365_s10]]   ;;  %s14368_s22 = smov 5  }
   0x4   :  { %s14440_s17 = sld [smem:[%s16346_s0 + %s14366_s14]]   ;;  %s14369_s26 = smov 6  }
   0x5   :  { %s14445_s21 = sld [smem:[%s16346_s0 + %s14367_s18]]   ;;  %s14370_s30 = smov 7  }
   0x6   :  { %s14450_s25 = sld [smem:[%s16346_s0 + %s14368_s22]]   ;;  %s14371_s4 = smov 8  }
   0x7   :  { %s14455_s29 = sld [smem:[%s16346_s0 + %s14369_s26]]   ;;  %s14372_s10 = smov 9  }
   0x8   :  { %s14460_s3 = sld [smem:[%s16346_s0 + %s14370_s30]]   ;;  %s14373_s15 = smov 10  }
   0x9   :  { %s14465_s8 = sld [smem:[%s16346_s0 + %s14371_s4]]   ;;  %s14374_s20 = smov 11  }
   0xa   :  { %s14470_s14 = sld [smem:[%s16346_s0 + %s14372_s10]]   ;;  %s14375_s26 = smov 12  }
   0xb   :  { %s14475_s19 = sld [smem:[%s16346_s0 + %s14373_s15]]   ;;  %s14376_s1 = smov 13  }
   0xc   :  { %s14480_s24 = sld [smem:[%s16346_s0 + %s14374_s20]]   ;;  %s14377_s7 = smov 14  }
   0xd   :  { %s14485_s30 = sld [smem:[%s16346_s0 + %s14375_s26]]   ;;  %s14378_s15 = smov 15  }
   0xe   :  { %s14490_s6 = sld [smem:[%s16346_s0 + %s14376_s1]]   ;;  %s14379_s22 = smov 16  }
   0xf   :  { %s14495_s12 = sld [smem:[%s16346_s0 + %s14377_s7]]   ;;  %s14380_s28 = smov 17  }
  0x10   :  { %s14500_s20 = sld [smem:[%s16346_s0 + %s14378_s15]]   ;;  %s14381_s7 = smov 18  }
  0x11   :  { %s14505_s27 = sld [smem:[%s16346_s0 + %s14379_s22]]   ;;  %s14382_s15 = smov 19  }
  0x12   :  { %s14510_s4 = sld [smem:[%s16346_s0 + %s14380_s28]]   ;;  %s14383_s22 = smov 20  }
  0x13   :  { %s14384_s28 = smov 21   ;;  %s14406_s16 = smov 43  }
  0x14   :  { %16367 = sst [smem:[#allocation8_spill]] %s14490_s6 }
  0x15   :  { %s14515_s6 = sld [smem:[%s16346_s0 + %s14381_s7]]   ;;  %s14385_s7 = smov 22  }
  0x16   :  { %16368 = sst [smem:[#allocation9_spill]] %s14500_s20 }
  0x17   :  { %16369 = sst [smem:[#allocation10_spill]] %s14505_s27 }
  0x18   :  { %16370 = sst [smem:[#allocation11_spill]] %s14510_s4 }
  0x19   :  { %s14520_s20 = sld [smem:[%s16346_s0 + %s14382_s15]]   ;;  %s14386_s15 = smov 23  }
  0x1a   :  { %s14525_s27 = sld [smem:[%s16346_s0 + %s14383_s22]]   ;;  %s14387_s22 = smov 24  }
  0x1b   :  { %16371 = sst [smem:[#allocation12_spill]] %s14515_s6 }
  0x1c   :  { %s14530_s4 = sld [smem:[%s16346_s0 + %s14384_s28]]   ;;  %s14388_s28 = smov 25  }
  0x1d   :  { %s14535_s6 = sld [smem:[%s16346_s0 + %s14385_s7]]   ;;  %s14389_s7 = smov 26  }
  0x1f   :  { %16372 = sst [smem:[#allocation13_spill]] %s14520_s20 }
  0x20   :  { %16373 = sst [smem:[#allocation14_spill]] %s14525_s27 }
  0x21   :  { %s14540_s20 = sld [smem:[%s16346_s0 + %s14386_s15]]   ;;  %s14390_s15 = smov 27  }
  0x22   :  { %16374 = sst [smem:[#allocation15_spill]] %s14530_s4 }
  0x23   :  { %16375 = sst [smem:[#allocation16_spill]] %s14535_s6 }
  0x24   :  { %s14545_s27 = sld [smem:[%s16346_s0 + %s14387_s22]]   ;;  %s14391_s22 = smov 28  }
  0x25   :  { %s14550_s4 = sld [smem:[%s16346_s0 + %s14388_s28]]   ;;  %s14392_s28 = smov 29  }
  0x26   :  { %s14555_s6 = sld [smem:[%s16346_s0 + %s14389_s7]]   ;;  %s14393_s7 = smov 30  }
  0x27   :  { %16376 = sst [smem:[#allocation17_spill]] %s14540_s20 }
  0x28   :  { %s14560_s20 = sld [smem:[%s16346_s0 + %s14390_s15]]   ;;  %s14394_s15 = smov 31  }
  0x2a   :  { %16377 = sst [smem:[#allocation18_spill]] %s14545_s27 }
  0x2b   :  { %16378 = sst [smem:[#allocation19_spill]] %s14550_s4 }
  0x2c   :  { %16379 = sst [smem:[#allocation20_spill]] %s14555_s6 }
  0x2d   :  { %s14565_s27 = sld [smem:[%s16346_s0 + %s14391_s22]]   ;;  %s14395_s22 = smov 32  }
  0x2e   :  { %16380 = sst [smem:[#allocation21_spill]] %s14560_s20 }
  0x2f   :  { %s14570_s4 = sld [smem:[%s16346_s0 + %s14392_s28]]   ;;  %s14396_s28 = smov 33  }
  0x30   :  { %s14575_s6 = sld [smem:[%s16346_s0 + %s14393_s7]]   ;;  %s14397_s7 = smov 34  }
  0x31   :  { %s14580_s20 = sld [smem:[%s16346_s0 + %s14394_s15]]   ;;  %s14398_s15 = smov 35  }
  0x33   :  { %16381 = sst [smem:[#allocation22_spill]] %s14565_s27 }
  0x34   :  { %s14585_s27 = sld [smem:[%s16346_s0 + %s14395_s22]]   ;;  %s14399_s22 = smov 36  }
  0x35   :  { %16382 = sst [smem:[#allocation23_spill]] %s14570_s4 }
  0x36   :  { %16383 = sst [smem:[#allocation24_spill]] %s14575_s6 }
  0x37   :  { %16384 = sst [smem:[#allocation25_spill]] %s14580_s20 }
  0x38   :  { %s14590_s4 = sld [smem:[%s16346_s0 + %s14396_s28]]   ;;  %s14400_s28 = smov 37  }
  0x39   :  { %s14595_s6 = sld [smem:[%s16346_s0 + %s14397_s7]]   ;;  %s14401_s7 = smov 38  }
  0x3a   :  { %16385 = sst [smem:[#allocation26_spill]] %s14585_s27 }
  0x3b   :  { %s14600_s20 = sld [smem:[%s16346_s0 + %s14398_s15]]   ;;  %s14402_s15 = smov 39  }
  0x3c   :  { %s14605_s27 = sld [smem:[%s16346_s0 + %s14399_s22]]   ;;  %s14403_s22 = smov 40  }
  0x3e   :  { %16386 = sst [smem:[#allocation27_spill]] %s14590_s4 }
  0x3f   :  { %16387 = sst [smem:[#allocation28_spill]] %s14595_s6 }
  0x40   :  { %s14610_s4 = sld [smem:[%s16346_s0 + %s14400_s28]]   ;;  %s14404_s28 = smov 41  }
  0x41   :  { %16388 = sst [smem:[#allocation29_spill]] %s14600_s20 }
  0x42   :  { %16389 = sst [smem:[#allocation30_spill]] %s14605_s27 }
  0x43   :  { %s14615_s6 = sld [smem:[%s16346_s0 + %s14401_s7]]   ;;  %s14405_s7 = smov 42  }
  0x44   :  { %s14620_s20 = sld [smem:[%s16346_s0 + %s14402_s15]]  }
  0x45   :  { %s14625_s27 = sld [smem:[%s16346_s0 + %s14403_s22]]  }
  0x46   :  { %16390 = sst [smem:[#allocation31_spill]] %s14610_s4 }
  0x47   :  { %s14630_s4 = sld [smem:[%s16346_s0 + %s14404_s28]]  }
  0x49   :  { %16391 = sst [smem:[#allocation32_spill]] %s14615_s6 }
  0x4a   :  { %16392 = sst [smem:[#allocation33_spill]] %s14620_s20 }
  0x4b   :  { %s11537_s6 = sld [smem:[%s16346_s0 + %s14405_s7]]  }
  0x4c   :  { %s14638_s20 = sld [smem:[%s16346_s0 + %s14406_s16]]  }
  0x4d   :  { %92 = vsyncpa [#allocation3], 0 }
  0x4e   :  { %93 = vsyncpa [#allocation4], 0  ;;  %s14407_s22 = smov [#allocation2]  }
  0x4f   :  { %s184_s23 = sshll.u32 %s14407_s22, 4  ;;  %s185_s23 = int_to_ptr.vmem [resolvable:$true] %s184_s23 }
  0x51   :  { %s14316_s26 = scalar_lea.hbm %s11537_s6, 16 }
  0x52   :  { %p14317_p0 = scmp.ne.s32.totalorder %s11537_s6, %s14316_s26  ;;  %p14320_p1 = scmp.lt.u32.totalorder %s14316_s26, %s11537_s6 }
  0x54   :  { %p14322_p2 = pnand %p14320_p1, %p14317_p0 }
  0x56   :  { %14325 = shalt.err (!%p14322_p2)
}
  0x57   :  { %s14326_s28 = scalar_lea.vmem %s185_s23, 16  ;;  %s14330_s1 = scalar_lea.vmem %s185_s23, 32 }
  0x58   :  { %p14327_p3 = scmp.ne.s32.totalorder %s185_s23, %s14326_s28  ;;  %p14331_p4 = scmp.lt.s32.totalorder %s185_s23, %s185_s23 }
  0x59   :  { %p14332_p5 = scmp.lt.s32.totalorder %s14330_s1, %s14326_s28 }
  0x5b   :  { %p14333_p6 = por %p14332_p5, %p14331_p4 }
  0x5d   :  { %p14334_p7 = pnand %p14333_p6, %p14327_p3 }
  0x5f   :  { %14337 = shalt.err (!%p14334_p7)
}
  0x60   :  { %187 = dma.hbm_to_vmem [thread:$0]  %s11537_s6, 16, %s185_s23, [#allocation3]  }
  0x61   :  { %14360 = dma.done.wait [#allocation3], 16  }
  0x62   :  { %14361 = vsyncadd [#allocation3], 4294967280  ;;  %v213_v0 = vld [vmem:[%s14430_s9 + $0x80] sm:$0xff]  ;;  %v214_v1 = vld [vmem:[%s14430_s9 + $0x88] sm:$0xff]  ;;  %vm515_vm0 = vcmask 1040384   ;;  %vm525_vm1 = vcmask 1044480  }
  0x63   :  { %v197_v2 = vld [vmem:[%s14430_s9] sm:$0xff]  ;;  %v13361_v3 = vpack.c.bf16 %v214_v1, %v213_v0  ;;  %v198_v4 = vld [vmem:[%s14430_s9 + $0x8] sm:$0xff]  ;;  %v215_v11 = vld [vmem:[%s14430_s9 + $0x90] sm:$0xff]  ;;  %vm614_vm2 = vcmask 523264   ;;  %vm618_vm3 = vcmask 517120   ;;  %vm14409_vm4 = vmmov 0  }
  0x64   :  { %v245_v5 = vld [vmem:[%s14430_s9 + $0x180] sm:$0xff]  ;;  %v246_v6 = vld [vmem:[%s14430_s9 + $0x188] sm:$0xff]  ;;  %v13363_v7 = vpack.c.bf16 %v198_v4, %v197_v2  ;;  %v216_v13 = vld [vmem:[%s14430_s9 + $0x98] sm:$0xff]  ;;  %vm1851_vm5 = vcmask 1042432   ;;  %vm892_vm6 = vcmask 130048   ;;  %vm969_vm7 = vcmask 36864  }
  0x65   :  { %v13393_v8 = vpack.c.bf16 %v246_v6, %v245_v5  ;;  %v229_v9 = vld [vmem:[%s14430_s9 + $0x100] sm:$0xff]  ;;  %v230_v10 = vld [vmem:[%s14430_s9 + $0x108] sm:$0xff]  ;;  %13362 = vmatprep.subr.bf16.mxu0 %v13361_v3  ;;  %v199_v14 = vld [vmem:[%s14430_s9 + $0x10] sm:$0xff]  ;;  %v13365_v16 = vpack.c.bf16 %v216_v13, %v215_v11  ;;  %s14410_s0 = smov 112   ;;  %vm981_vm8 = vcmask 39936   ;;  %s16396_s6 = sld [smem:[#allocation11_spill]] }
  0x66   :  { %v13395_v12 = vpack.c.bf16 %v230_v10, %v229_v9  ;;  %v200_v15 = vld [vmem:[%s14430_s9 + $0x18] sm:$0xff]  ;;  %13364 = vmatpush3.bf16.msra.mxu0 %v13363_v7  ;;  %v247_v18 = vld [vmem:[%s14430_s9 + $0x190] sm:$0xff]  ;;  %v217_v23 = vld [vmem:[%s14430_s9 + $0xa0] sm:$0xff]  ;;  %s16406_s2 = sld [smem:[#allocation24_spill]]  ;;  %s16407_s7 = sld [smem:[#allocation23_spill]] }
  0x67   :  { %13394 = vmatprep.subr.bf16.mxu1 %v13393_v8  ;;  %v13367_v17 = vpack.c.bf16 %v200_v15, %v199_v14  ;;  %v248_v19 = vld [vmem:[%s14430_s9 + $0x198] sm:$0xff]  ;;  %v231_v20 = vld [vmem:[%s14430_s9 + $0x110] sm:$0xff]  ;;  %v218_v24 = vld [vmem:[%s14430_s9 + $0xa8] sm:$0xff]  ;;  %13366 = vmatprep.subr.bf16.mxu0 %v13365_v16  ;;  %s16408_s10 = sld [smem:[#allocation20_spill]]  ;;  %s16409_s11 = sld [smem:[#allocation21_spill]] }
  0x68   :  { %13396 = vmatpush3.bf16.msra.mxu1 %v13395_v12  ;;  %v13397_v21 = vpack.c.bf16 %v248_v19, %v247_v18  ;;  %v232_v22 = vld [vmem:[%s14430_s9 + $0x118] sm:$0xff]  ;;  %v13369_v26 = vpack.c.bf16 %v218_v24, %v217_v23  ;;  %v201_v27 = vld [vmem:[%s14430_s9 + $0x20] sm:$0xff]  ;;  %v202_v28 = vld [vmem:[%s14430_s9 + $0x28] sm:$0xff]  ;;  %s16412_s16 = sld [smem:[#allocation25_spill]]  ;;  %s16413_s15 = sld [smem:[#allocation26_spill]] }
  0x69   :  { %v13399_v25 = vpack.c.bf16 %v232_v22, %v231_v20  ;;  %v249_v29 = vld [vmem:[%s14430_s9 + $0x1a0] sm:$0xff]  ;;  %v250_v30 = vld [vmem:[%s14430_s9 + $0x1a8] sm:$0xff]  ;;  %v13371_v33 = vpack.c.bf16 %v202_v28, %v201_v27  ;;  %v219_v35 = vld [vmem:[%s14430_s9 + $0xb0] sm:$0xff]  ;;  %s16414_s18 = sld [smem:[#allocation29_spill]]  ;;  %s16415_s22 = sld [smem:[#allocation27_spill]] }
  0x6a   :  { %13398 = vmatprep.subr.bf16.mxu1 %v13397_v21  ;;  %v233_v31 = vld [vmem:[%s14430_s9 + $0x120] sm:$0xff]  ;;  %v234_v32 = vld [vmem:[%s14430_s9 + $0x128] sm:$0xff]  ;;  %13368 = vmatpush3.bf16.msra.mxu0 %v13367_v17  ;;  %v13401_v34 = vpack.c.bf16 %v250_v30, %v249_v29  ;;  %v220_v36 = vld [vmem:[%s14430_s9 + $0xb8] sm:$0xff]  ;;  %s16416_s23 = sld [smem:[#allocation28_spill]]  ;;  %s16417_s26 = sld [smem:[#allocation31_spill]] }
  0x6b   :  { %v203_v37 = vld [vmem:[%s14430_s9 + $0x30] sm:$0xff]  ;;  %13370 = vmatprep.subr.bf16.mxu0 %v13369_v26  ;;  %v13403_v38 = vpack.c.bf16 %v234_v32, %v233_v31  ;;  %v13373_v39 = vpack.c.bf16 %v220_v36, %v219_v35  ;;  %v204_v40 = vld [vmem:[%s14430_s9 + $0x38] sm:$0xff]  ;;  %v221_v46 = vld [vmem:[%s14430_s9 + $0xc0] sm:$0xff]  ;;  %s16418_s28 = sld [smem:[#allocation30_spill]]  ;;  %s16419_s1 = sld [smem:[#allocation32_spill]] }
  0x6c   :  { %13400 = vmatpush3.bf16.msra.mxu1 %v13399_v25  ;;  %v251_v41 = vld [vmem:[%s14430_s9 + $0x1b0] sm:$0xff]  ;;  %v252_v42 = vld [vmem:[%s14430_s9 + $0x1b8] sm:$0xff]  ;;  %v222_v47 = vld [vmem:[%s14430_s9 + $0xc8] sm:$0xff]  ;;  %v13375_v48 = vpack.c.bf16 %v204_v40, %v203_v37 }
  0x6d   :  { %13402 = vmatprep.subr.bf16.mxu1 %v13401_v34  ;;  %v13405_v43 = vpack.c.bf16 %v252_v42, %v251_v41  ;;  %v235_v44 = vld [vmem:[%s14430_s9 + $0x130] sm:$0xff]  ;;  %v236_v45 = vld [vmem:[%s14430_s9 + $0x138] sm:$0xff]  ;;  %v253_v49 = vld [vmem:[%s14430_s9 + $0x1c0] sm:$0xff]  ;;  %v13377_v52 = vpack.c.bf16 %v222_v47, %v221_v46 }
  0x6e   :  { %13372 = vmatpush3.bf16.msra.mxu0 %v13371_v33  ;;  %v254_v50 = vld [vmem:[%s14430_s9 + $0x1c8] sm:$0xff]  ;;  %v13407_v51 = vpack.c.bf16 %v236_v45, %v235_v44  ;;  %v205_v53 = vld [vmem:[%s14430_s9 + $0x40] sm:$0xff]  ;;  %v223_v58 = vld [vmem:[%s14430_s9 + $0xd0] sm:$0xff] }
  0x6f   :  { %13374 = vmatprep.subr.bf16.mxu0 %v13373_v39  ;;  %v206_v54 = vld [vmem:[%s14430_s9 + $0x48] sm:$0xff]  ;;  %v237_v55 = vld [vmem:[%s14430_s9 + $0x140] sm:$0xff]  ;;  %v13409_v56 = vpack.c.bf16 %v254_v50, %v253_v49  ;;  %v224_v59 = vld [vmem:[%s14430_s9 + $0xd8] sm:$0xff] }
  0x70   :  { %13404 = vmatpush3.bf16.msra.mxu1 %v13403_v38  ;;  %v238_v57 = vld [vmem:[%s14430_s9 + $0x148] sm:$0xff]  ;;  %v255_v60 = vld [vmem:[%s14430_s9 + $0x1d0] sm:$0xff]  ;;  %v256_v61 = vld [vmem:[%s14430_s9 + $0x1d8] sm:$0xff]  ;;  %v13379_v62 = vpack.c.bf16 %v206_v54, %v205_v53  ;;  %v13381_v0 = vpack.c.bf16 %v224_v59, %v223_v58 }
  0x71   :  { %13406 = vmatprep.subr.bf16.mxu1 %v13405_v43  ;;  %v13411_v63 = vpack.c.bf16 %v238_v57, %v237_v55  ;;  %v207_v1 = vld [vmem:[%s14430_s9 + $0x50] sm:$0xff]  ;;  %v208_v2 = vld [vmem:[%s14430_s9 + $0x58] sm:$0xff]  ;;  %v13413_v4 = vpack.c.bf16 %v256_v61, %v255_v60  ;;  %v225_v6 = vld [vmem:[%s14430_s9 + $0xe0] sm:$0xff] }
  0x72   :  { %13376 = vmatpush3.bf16.msra.mxu0 %v13375_v48  ;;  %v239_v3 = vld [vmem:[%s14430_s9 + $0x150] sm:$0xff]  ;;  %v240_v5 = vld [vmem:[%s14430_s9 + $0x158] sm:$0xff]  ;;  %v226_v7 = vld [vmem:[%s14430_s9 + $0xe8] sm:$0xff]  ;;  %v13383_v10 = vpack.c.bf16 %v208_v2, %v207_v1 }
  0x73   :  { %13378 = vmatprep.subr.bf16.mxu0 %v13377_v52  ;;  %v257_v8 = vld [vmem:[%s14430_s9 + $0x1e0] sm:$0xff]  ;;  %v258_v9 = vld [vmem:[%s14430_s9 + $0x1e8] sm:$0xff]  ;;  %v13415_v13 = vpack.c.bf16 %v240_v5, %v239_v3  ;;  %v13385_v14 = vpack.c.bf16 %v226_v7, %v225_v6  ;;  %v227_v19 = vld [vmem:[%s14430_s9 + $0xf0] sm:$0xff] }
  0x74   :  { %13408 = vmatpush3.bf16.msra.mxu1 %v13407_v51  ;;  %v209_v11 = vld [vmem:[%s14430_s9 + $0x60] sm:$0xff]  ;;  %v192_v12 = vld [vmem:[%s14425_s5 + $0x8] sm:$0xff]  ;;  %v13417_v18 = vpack.c.bf16 %v258_v9, %v257_v8  ;;  %v228_v20 = vld [vmem:[%s14430_s9 + $0xf8] sm:$0xff] }
  0x75   :  { %13410 = vmatprep.subr.bf16.mxu1 %v13409_v56  ;;  %v210_v15 = vld [vmem:[%s14430_s9 + $0x68] sm:$0xff]  ;;  %v241_v16 = vld [vmem:[%s14430_s9 + $0x160] sm:$0xff]  ;;  %364 = vmatprep.mubr.f32.mxu0 %v192_v12  ;;  %v194_v21 = vld [vmem:[%s14425_s5 + $0x18] sm:$0xff]  ;;  %v13389_v26 = vpack.c.bf16 %v228_v20, %v227_v19 }
  0x76   :  { %13380 = vmatpush3.bf16.msra.mxu0 %v13379_v62  ;;  %v242_v17 = vld [vmem:[%s14430_s9 + $0x168] sm:$0xff]  ;;  %v259_v22 = vld [vmem:[%s14430_s9 + $0x1f0] sm:$0xff]  ;;  %v260_v23 = vld [vmem:[%s14430_s9 + $0x1f8] sm:$0xff]  ;;  %434 = vmatprep.mubr.f32.mxu1 %v194_v21  ;;  %v13387_v24 = vpack.c.bf16 %v210_v15, %v209_v11 }
  0x77   :  { %13382 = vmatprep.subr.bf16.mxu0 %v13381_v0  ;;  %v13419_v25 = vpack.c.bf16 %v242_v17, %v241_v16  ;;  %v211_v27 = vld [vmem:[%s14430_s9 + $0x70] sm:$0xff]  ;;  %v212_v28 = vld [vmem:[%s14430_s9 + $0x78] sm:$0xff]  ;;  %v13421_v30 = vpack.c.bf16 %v260_v23, %v259_v22  ;;  %v277_v32 = vld [vmem:[%s14430_s9 + $0x280] sm:$0xff] }
  0x78   :  { %13412 = vmatpush3.bf16.msra.mxu1 %v13411_v63  ;;  %v243_v29 = vld [vmem:[%s14430_s9 + $0x170] sm:$0xff]  ;;  %v244_v31 = vld [vmem:[%s14430_s9 + $0x178] sm:$0xff]  ;;  %v278_v33 = vld [vmem:[%s14430_s9 + $0x288] sm:$0xff]  ;;  %v13391_v34 = vpack.c.bf16 %v212_v28, %v211_v27 }
  0x79   :  { %13414 = vmatprep.subr.bf16.mxu1 %v13413_v4  ;;  %v13423_v35 = vpack.c.bf16 %v244_v31, %v243_v29  ;;  %v13425_v36 = vpack.c.bf16 %v278_v33, %v277_v32  ;;  %v261_v37 = vld [vmem:[%s14430_s9 + $0x200] sm:$0xff]  ;;  %v262_v38 = vld [vmem:[%s14430_s9 + $0x208] sm:$0xff]  ;;  %v279_v39 = vld [vmem:[%s14430_s9 + $0x290] sm:$0xff] }
  0x7a   :  { %13384 = vmatpush3.bf16.msra.mxu0 %v13383_v10  ;;  %v280_v40 = vld [vmem:[%s14430_s9 + $0x298] sm:$0xff]  ;;  %v191_v41 = vld [vmem:[%s14425_s5] sm:$0xff]  ;;  %v13427_v42 = vpack.c.bf16 %v262_v38, %v261_v37  ;;  %v193_v43 = vld [vmem:[%s14425_s5 + $0x10] sm:$0xff] }
  0x7b   :  { %13386 = vmatprep.subr.bf16.mxu0 %v13385_v14  ;;  %v13429_v44 = vpack.c.bf16 %v280_v40, %v279_v39  ;;  %v263_v45 = vld [vmem:[%s14430_s9 + $0x210] sm:$0xff]  ;;  %v264_v46 = vld [vmem:[%s14430_s9 + $0x218] sm:$0xff]  ;;  %v281_v47 = vld [vmem:[%s14430_s9 + $0x2a0] sm:$0xff] }
  0x7c   :  { %13416 = vmatpush3.bf16.msra.mxu1 %v13415_v13  ;;  %v282_v48 = vld [vmem:[%s14430_s9 + $0x2a8] sm:$0xff]  ;;  %v13431_v50 = vpack.c.bf16 %v264_v46, %v263_v45  ;;  %v265_v52 = vld [vmem:[%s14430_s9 + $0x220] sm:$0xff]  ;;  %v283_v54 = vld [vmem:[%s14430_s9 + $0x2b0] sm:$0xff] }
  0x7d   :  { %13418 = vmatprep.subr.bf16.mxu1 %v13417_v18  ;;  %v196_v49 = vld [vmem:[%s14425_s5 + $0x28] sm:$0xff]  ;;  %v13433_v51 = vpack.c.bf16 %v282_v48, %v281_v47  ;;  %v284_v55 = vld [vmem:[%s14430_s9 + $0x2b8] sm:$0xff]  ;;  %v267_v58 = vld [vmem:[%s14430_s9 + $0x230] sm:$0xff] }
  0x7e   :  { %13388 = vmatpush3.bf16.msra.mxu0 %v13387_v24  ;;  %v266_v53 = vld [vmem:[%s14430_s9 + $0x228] sm:$0xff]  ;;  %v13437_v57 = vpack.c.bf16 %v284_v55, %v283_v54  ;;  %v268_v59 = vld [vmem:[%s14430_s9 + $0x238] sm:$0xff]  ;;  %v285_v60 = vld [vmem:[%s14430_s9 + $0x2c0] sm:$0xff] }
  0x7f   :  { %13390 = vmatprep.subr.bf16.mxu0 %v13389_v26  ;;  %v13435_v56 = vpack.c.bf16 %v266_v53, %v265_v52  ;;  %v286_v61 = vld [vmem:[%s14430_s9 + $0x2c8] sm:$0xff]  ;;  %v13439_v62 = vpack.c.bf16 %v268_v59, %v267_v58  ;;  %v269_v0 = vld [vmem:[%s14430_s9 + $0x240] sm:$0xff]  ;;  %v287_v2 = vld [vmem:[%s14430_s9 + $0x2d0] sm:$0xff] }
  0x80   :  { %13420 = vmatpush3.bf16.msra.mxu1 %v13419_v25  ;;  %v13441_v63 = vpack.c.bf16 %v286_v61, %v285_v60  ;;  %v270_v1 = vld [vmem:[%s14430_s9 + $0x248] sm:$0xff]  ;;  %v288_v3 = vld [vmem:[%s14430_s9 + $0x2d8] sm:$0xff]  ;;  %v271_v6 = vld [vmem:[%s14430_s9 + $0x250] sm:$0xff] }
  0x81   :  { %13422 = vmatprep.subr.bf16.mxu1 %v13421_v30  ;;  %v13443_v4 = vpack.c.bf16 %v270_v1, %v269_v0  ;;  %v13445_v5 = vpack.c.bf16 %v288_v3, %v287_v2  ;;  %v272_v7 = vld [vmem:[%s14430_s9 + $0x258] sm:$0xff]  ;;  %v289_v8 = vld [vmem:[%s14430_s9 + $0x2e0] sm:$0xff]  ;;  %v290_v9 = vld [vmem:[%s14430_s9 + $0x2e8] sm:$0xff] }
  0x82   :  { %13392 = vmatpush3.bf16.msra.mxu0 %v13391_v34  ;;  %v13447_v10 = vpack.c.bf16 %v272_v7, %v271_v6  ;;  %v13449_v11 = vpack.c.bf16 %v290_v9, %v289_v8  ;;  %v273_v12 = vld [vmem:[%s14430_s9 + $0x260] sm:$0xff]  ;;  %v274_v13 = vld [vmem:[%s14430_s9 + $0x268] sm:$0xff]  ;;  %v291_v14 = vld [vmem:[%s14430_s9 + $0x2f0] sm:$0xff] }
  0x83   :  { %13426 = vmatprep.subr.bf16.mxu0 %v13425_v36  ;;  %v292_v15 = vld [vmem:[%s14430_s9 + $0x2f8] sm:$0xff]  ;;  %v13451_v16 = vpack.c.bf16 %v274_v13, %v273_v12  ;;  %v275_v18 = vld [vmem:[%s14430_s9 + $0x270] sm:$0xff]  ;;  %v195_v21 = vld [vmem:[%s14425_s5 + $0x20] sm:$0xff]  ;;  %s14411_s5 = smov 96  }
  0x84   :  { %13424 = vmatpush3.bf16.msra.mxu1 %v13423_v35  ;;  %v13453_v17 = vpack.c.bf16 %v292_v15, %v291_v14  ;;  %v276_v19 = vld [vmem:[%s14430_s9 + $0x278] sm:$0xff]  ;;  %v11539_v23 = vld [vmem:[%s14435_s13] ss:$0 sm:$0xff]  ;;  %v530_v58 = vld [vmem:[%s14460_s3 + $0x8] sm:$0xff]  ;;  %s14413_s9 = smov 80   ;;  %s16393_s13 = sld [smem:[#allocation8_spill]] }
  0x85   :  { %365 = vmatmul.mubr.f32.vlgmr.msra.gmra.mrb[0].mxu0 %v191_v41  ;;  %v13455_v20 = vpack.c.bf16 %v276_v19, %v275_v18  ;;  %v510_v35 = vld [vmem:[%s14440_s17] sm:$0x1]  ;;  %v546_v61 = vld [vmem:[%s14470_s14 + $0x8] sm:$0xff]  ;;  %v532_v0 = vld [vmem:[%s14460_s3 + $0x18] sm:$0xff]  ;;  %s16394_s17 = sld [smem:[#allocation10_spill]] }
  0x86   :  { %13428 = vmatpush3.bf16.msra.mxu0 %v13427_v42  ;;  %504 = vmatprep.mubr.f32.mxu0 %v196_v49  ;;  %v511_v38 = vld [vmem:[%s14445_s21] sm:$0x1f]  ;;  %v547_v1 = vld [vmem:[%s14470_s14 + $0x10] sm:$0xff]  ;;  %v548_v3 = vld [vmem:[%s14470_s14 + $0x18] sm:$0xff]  ;;  %s16395_s21 = sld [smem:[#allocation9_spill]] }
  0x87   :  { %435 = vmatmul.mubr.f32.vlgmr.msra.gmra.mrb[0].mxu1 %v193_v43  ;;  %13430 = vmatprep.subr.bf16.mxu0 %v13429_v44  ;;  %v545_v60 = vld [vmem:[%s14470_s14] sm:$0xff]  ;;  %v13493_v6 = vpack.c.bf16 %v548_v3, %v547_v1  ;;  %v550_v9 = vld [vmem:[%s14470_s14 + $0x28] sm:$0xff]  ;;  %v536_v12 = vld [vmem:[%s14460_s3 + $0x38] sm:$0xff] }
  0x88   :  { %v549_v8 = vld [vmem:[%s14470_s14 + $0x20] sm:$0xff]  ;;  %v551_v14 = vld [vmem:[%s14470_s14 + $0x30] sm:$0xff]  ;;  %v552_v15 = vld [vmem:[%s14470_s14 + $0x38] sm:$0xff] }
  0x89   :  { %v538_v18 = vld [vmem:[%s14465_s8 + $0x8] sm:$0xff] }
  0x8a   :  { %13432 = vmatpush3.bf16.msra.mxu0 %v13431_v50 }
  0x8b   :  { %13434 = vmatprep.subr.bf16.mxu0 %v13433_v51 }
  0x8e   :  { %13436 = vmatpush3.bf16.msra.mxu0 %v13435_v56 }
  0x8f   :  { %13438 = vmatprep.subr.bf16.mxu0 %v13437_v57  ;;  %v529_v57 = vld [vmem:[%s14460_s3] sm:$0xff] }
  0x90   :  { %v13457_v59 = vpack.c.bf16 %v530_v58, %v529_v57 }
  0x92   :  { %13440 = vmatpush3.bf16.msra.mxu0 %v13439_v62  ;;  %v13489_v62 = vpack.c.bf16 %v546_v61, %v545_v60  ;;  %13458 = vmatprep.subr.bf16.mxu1 %v13457_v59 }
  0x93   :  { %13442 = vmatprep.subr.bf16.mxu0 %v13441_v63  ;;  %v531_v63 = vld [vmem:[%s14460_s3 + $0x10] sm:$0xff]  ;;  %13460 = vmatpush3.bf16.msra.mxu1 %v13457_v59 }
  0x94   :  { %v13461_v2 = vpack.c.bf16 %v532_v0, %v531_v63 }
  0x96   :  { %13444 = vmatpush3.bf16.msra.mxu0 %v13443_v4  ;;  %v533_v4 = vld [vmem:[%s14460_s3 + $0x20] sm:$0xff]  ;;  %13462 = vmatprep.subr.bf16.mxu1 %v13461_v2 }
  0x97   :  { %13446 = vmatprep.subr.bf16.mxu0 %v13445_v5  ;;  %v534_v5 = vld [vmem:[%s14460_s3 + $0x28] sm:$0xff]  ;;  %13464 = vmatpush3.bf16.msra.mxu1 %v13461_v2 }
  0x98   :  { %v13465_v7 = vpack.c.bf16 %v534_v5, %v533_v4 }
  0x9a   :  { %13448 = vmatpush3.bf16.msra.mxu0 %v13447_v10  ;;  %v13497_v10 = vpack.c.bf16 %v550_v9, %v549_v8  ;;  %13466 = vmatprep.subr.bf16.mxu1 %v13465_v7 }
  0x9b   :  { %13450 = vmatprep.subr.bf16.mxu0 %v13449_v11  ;;  %v535_v11 = vld [vmem:[%s14460_s3 + $0x30] sm:$0xff]  ;;  %13468 = vmatpush3.bf16.msra.mxu1 %v13465_v7 }
  0x9c   :  { %v13469_v13 = vpack.c.bf16 %v536_v12, %v535_v11 }
  0x9e   :  { %13452 = vmatpush3.bf16.msra.mxu0 %v13451_v16  ;;  %13470 = vmatprep.subr.bf16.mxu1 %v13469_v13  ;;  %v13501_v16 = vpack.c.bf16 %v552_v15, %v551_v14 }
  0x9f   :  { %13454 = vmatprep.subr.bf16.mxu0 %v13453_v17  ;;  %13472 = vmatpush3.bf16.msra.mxu1 %v13469_v13  ;;  %v537_v17 = vld [vmem:[%s14465_s8] sm:$0xff] }
  0xa0   :  { %v13473_v19 = vpack.c.bf16 %v538_v18, %v537_v17 }
  0xa2   :  { %13456 = vmatpush3.bf16.msra.mxu0 %v13455_v20  ;;  %13474 = vmatprep.subr.bf16.mxu1 %v13473_v19 }
  0xa3   :  { %13490 = vmatprep.subr.bf16.mxu0 %v13489_v62 }
  0xa5   :  { %505 = vmatmul.mubr.f32.vlgmr.msra.gmra.mrb[2].mxu0 %v195_v21 }
  0xa6   :  { %13492 = vmatpush3.bf16.msra.mxu0 %v13489_v62 }
  0xa7   :  { %13494 = vmatprep.subr.bf16.mxu0 %v13493_v6 }
  0xaa   :  { %13496 = vmatpush3.bf16.msra.mxu0 %v13493_v6 }
  0xab   :  { %13498 = vmatprep.subr.bf16.mxu0 %v13497_v10 }
  0xae   :  { %13500 = vmatpush3.bf16.msra.mxu0 %v13497_v10 }
  0xaf   :  { %13502 = vmatprep.subr.bf16.mxu0 %v13501_v16 }
  0xb2   :  { %13504 = vmatpush3.bf16.msra.mxu0 %v13501_v16 }
 0x158   :  { %v11956_v22 = vpop.f32.mrb[0].mxu0 }
 0x159   :  { %v11957_v24 = vpop.f32.mrb[1].mxu0 }
 0x15a   :  { %v11991_v25 = vpop.f32.mrb[0].mxu1  ;;  %v11958_v26 = vadd.f32 %v11957_v24, %v11956_v22 }
 0x15b   :  { %v11992_v27 = vpop.f32.mrb[1].mxu1 }
 0x15c   :  { %v11993_v28 = vadd.f32 %v11992_v27, %v11991_v25  ;;  %v367_v29 = vadd.f32 %v11958_v26, %v11539_v23  ;;  %v11540_v27 = vld [vmem:[%s14450_s25] ss:$0 sm:$0xff] }
 0x15e   :  { %v437_v30 = vadd.f32 %v11993_v28, %v367_v29  ;;  %v11541_v29 = vld [vmem:[%s14455_s29] ss:$0 sm:$0xff] }
 0x178   :  { %v12026_v31 = vpop.f32.mrb[2].mxu0 }
 0x179   :  { %v12027_v32 = vpop.f32.mrb[3].mxu0 }
 0x17a   :  { %v12028_v33 = vadd.f32 %v12027_v32, %v12026_v31 }
 0x17c   :  { %v507_v34 = vadd.f32 %v12028_v33, %v437_v30 }
 0x17e   :  { %v513_v36 = vrot.slane %v507_v34, 7  ;;  %v518_v37 = vrot.slane %v507_v34, 3  ;;  %v539_v34 = vld [vmem:[%s14465_s8 + $0x10] sm:$0xff] }
 0x180   :  { %v520_v39 = vsel %vm515_vm0, %v510_v35, %v518_v37  ;;  %v516_v40 = vsel %vm515_vm0, %v510_v35, %v513_v36  ;;  %v540_v35 = vld [vmem:[%s14465_s8 + $0x18] sm:$0xff] }
 0x181   :  { %v521_v41 = vadd.f32 %v520_v39, %v511_v38  ;;  %v517_v42 = vadd.f32 %v516_v40, %v511_v38  ;;  %v13477_v38 = vpack.c.bf16 %v540_v35, %v539_v34  ;;  %v541_v39 = vld [vmem:[%s14465_s8 + $0x20] sm:$0xff]  ;;  %v542_v40 = vld [vmem:[%s14465_s8 + $0x28] sm:$0xff] }
 0x183   :  { %v14747_v43 = vrot.slane %v521_v41, 3  ;;  %v13481_v41 = vpack.c.bf16 %v542_v40, %v541_v39 }
 0x185   :  { %v14751_v44 = vsel %vm525_vm1, %v517_v42, %v14747_v43  ;;  %v619_v46 = vsel %vm618_vm3, %v14747_v43, 0.0  ;;  %v543_v42 = vld [vmem:[%s14465_s8 + $0x30] sm:$0xff] }
 0x186   :  { %v615_v45 = vsel %vm614_vm2, %v14751_v44, 0.0 }
 0x187   :  { %616 = vadd.xlane.f32.xlu0 %v615_v45  ;;  %v544_v45 = vld [vmem:[%s14465_s8 + $0x38] sm:$0xff] }
 0x18b   :  { %620 = vadd.xlane.f32.xlu0 %v619_v46  ;;  %v13485_v46 = vpack.c.bf16 %v544_v45, %v543_v42  ;;  %v557_v45 = vld [vmem:[%s14475_s19 + $0x20] sm:$0xff] }
 0x214   :  { %v617_v47 = vpop.xlane.xlu0 %616 }
 0x215   :  { %v623_v48 = vmul.f32 0.015625, %v617_v47  ;;  %v14408_v47 = vmov 0.0  }
 0x217   :  { %v14758_v49 = vsub.f32 %v14751_v44, %v623_v48 }
 0x218   :  { %v621_v50 = vpop.xlane.xlu0 %620 }
 0x219   :  { %v624_v51 = vmul.f32 0.015625, %v621_v50  ;;  %v627_v52 = vmul.f32 %v14758_v49, %v14758_v49 }
 0x21b   :  { %v14763_v53 = vsub.f32 %v14747_v43, %v624_v51  ;;  %v629_v54 = vsel %vm614_vm2, %v627_v52, 0.0 }
 0x21c   :  { %630 = vadd.xlane.f32.xlu1 %v629_v54 }
 0x21d   :  { %v628_v55 = vmul.f32 %v14763_v53, %v14763_v53 }
 0x21f   :  { %v632_v56 = vsel %vm618_vm3, %v628_v55, 0.0 }
 0x220   :  { %633 = vadd.xlane.f32.xlu1 %v632_v56 }
 0x2a9   :  { %v631_v20 = vpop.xlane.xlu1 %630 }
 0x2aa   :  { %v635_v21 = vmul.f32 0.015625, %v631_v20  ;;  %v555_v20 = vld [vmem:[%s14475_s19 + $0x10] sm:$0xff] }
 0x2ac   :  { %v637_v22 = vadd.f32 1e-05, %v635_v21  ;;  %v556_v21 = vld [vmem:[%s14475_s19 + $0x18] sm:$0xff] }
 0x2ad   :  { %v634_v23 = vpop.xlane.xlu1 %633 }
 0x2ae   :  { %14078 = vrsqrt.f32 %v637_v22  ;;  %v636_v24 = vmul.f32 0.015625, %v634_v23  ;;  %v14412_v22 = vmov 0.0|0.0   ;;  %v14859_v23 = vpack.c.bf16 %v556_v21, %v555_v20 }
 0x2af   :  { %13505 = vmatprep.subr.bf16.mxu0 %v14412_v22 }
 0x2b0   :  { %v638_v25 = vadd.f32 1e-05, %v636_v24 }
 0x2b2   :  { %14080 = vrsqrt.f32 %v638_v25 }
 0x2b8   :  { %v14079_v26 = vpop.eup %14078 }
 0x2b9   :  { %v641_v28 = vmul.f32 %v14079_v26, %v14758_v49 }
 0x2bb   :  { %v649_v30 = vmul.f32 %v11540_v27, %v641_v28 }
 0x2bc   :  { %v14081_v31 = vpop.eup %14080 }
 0x2bd   :  { %v642_v32 = vmul.f32 %v14081_v31, %v14763_v53  ;;  %v657_v33 = vadd.f32 %v11541_v29, %v649_v30  ;;  %v553_v30 = vld [vmem:[%s14475_s19] sm:$0xff]  ;;  %v554_v31 = vld [vmem:[%s14475_s19 + $0x8] sm:$0xff] }
 0x2bf   :  { %v650_v36 = vmul.f32 %v11540_v27, %v642_v32  ;;  %12586 = vmatprep.mubr.msk.f32.mxu1 %vm614_vm2, %v657_v33  ;;  %12624 = vmatprep.mubr.msk.f32.mxu0 %vm614_vm2, %v657_v33  ;;  %v14875_v32 = vpack.c.bf16 %v554_v31, %v553_v30 }
 0x2c1   :  { %v658_v37 = vadd.f32 %v11541_v29, %v650_v36 }
 0x2c3   :  { %12587 = vmatmul.mubr.msk.f32.vlgmr.msra.gmra.mrb[2].mxu1 %vm614_vm2, %v658_v37  ;;  %12625 = vmatmul.mubr.msk.f32.vlgmr.msra.gmra.mrb[4].mxu0 %vm614_vm2, %v658_v37 }
 0x2c4   :  { %13476 = vmatpush3.bf16.msra.mxu1 %v13473_v19  ;;  %12605 = vmatprep.mubr.msk.f32.mxu1 %vm614_vm2, %v657_v33 }
 0x2c5   :  { %13478 = vmatprep.subr.bf16.mxu1 %v13477_v38  ;;  %12651 = vmatprep.mubr.msk.f32.mxu0 %vm14409_vm4, %v14408_v47 }
 0x2c6   :  { %13507 = vmatpush3.bf16.msra.mxu0 %v14859_v23 }
 0x2c7   :  { %13508 = vmatprep.subr.bf16.mxu0 %v14412_v22 }
 0x2c8   :  { %13480 = vmatpush3.bf16.msra.mxu1 %v13477_v38 }
 0x2c9   :  { %13482 = vmatprep.subr.bf16.mxu1 %v13481_v41 }
 0x2cc   :  { %13484 = vmatpush3.bf16.msra.mxu1 %v13481_v41 }
 0x2cd   :  { %13486 = vmatprep.subr.bf16.mxu1 %v13485_v46 }
 0x2d0   :  { %13488 = vmatpush3.bf16.msra.mxu1 %v13485_v46  ;;  %v558_v46 = vld [vmem:[%s14475_s19 + $0x28] sm:$0xff] }
 0x2d1   :  { %12627 = vmatprep.subr.mxu1 %v14408_v47 }
 0x2d3   :  { %12606 = vmatmul.mubr.msk.f32.vlgmr.msra.gmra.mrb[4].mxu1 %vm614_vm2, %v658_v37 }
 0x2d4   :  { %12629 = vmatprep.mubr.msk.f32.mxu1 %vm14409_vm4, %v14408_v47 }
 0x396   :  { %v14808_v48 = vpop.f32.mrb[2].mxu1  ;;  %v12626_v49 = vpop.f32.mrb[4].mxu0 }
 0x397   :  { %v1946_v50 = vrot.slane %v12626_v49, 5  ;;  %v731_v51 = vpop.f32.mrb[3].mxu1  ;;  %v14810_v52 = vpop.f32.mrb[5].mxu0  ;;  %v14895_v49 = vpack.c.bf16 %v558_v46, %v557_v45 }
 0x398   :  { %v1945_v53 = vrot.slane %v14810_v52, 5  ;;  %v14821_v59 = vmul.f32 0.125, %v731_v51 }
 0x39a   :  { %v14814_v54 = vsel %vm1851_vm5, %v1945_v53, %v1946_v50 }
 0x3a6   :  { %v12607_v55 = vpop.f32.mrb[4].mxu1 }
 0x3a7   :  { %v1857_v56 = vrot.slane %v12607_v55, 5  ;;  %v14816_v57 = vpop.f32.mrb[5].mxu1 }
 0x3a8   :  { %v1856_v58 = vrot.slane %v14816_v57, 5  ;;  %12628 = vmatpush3.xpose.msk.msra.mxu1 %vm892_vm6, %v14816_v57 }
 0x3a9   :  { %12632 = vmatprep.subr.mxu1 %v14408_v47 }
 0x3aa   :  { %v14825_v60 = vsel %vm1851_vm5, %v1856_v58, %v1857_v56 }
 0x3ab   :  { %12630 = vmatmul.mubr.msk.f32.vlgmr.msra.gmra.mrb[6].mxu1 %vm892_vm6, %v14821_v59 }
 0x3ac   :  { %12633 = vmatpush3.msk.msra.mxu1 %vm525_vm1, %v14810_v52  ;;  %12634 = vmatprep.mubr.msk.f32.mxu1 %vm14409_vm4, %v14408_v47 }
 0x3ad   :  { %12637 = vmatprep.subr.mxu1 %v14408_v47 }
 0x47e   :  { %v965_v61 = vpop.f32.mrb[6].mxu1 }
 0x47f   :  { %v12631_v62 = vpop.f32.mrb[7].mxu1  ;;  %v970_v63 = vsel %vm969_vm7, %v965_v61, -inf }
 0x480   :  { %971 = vmax.xlane.f32.xlu0 %v970_v63  ;;  %v1852_v62 = vrot.slane %v14821_v59, 5 }
 0x496   :  { %1060 = vrot.lane.b32.xlu0 %v14816_v57, %s14410_s0 }
 0x50d   :  { %v972_v0 = vpop.xlane.xlu0 %971 }
 0x50e   :  { %v973_v1 = vsub.f32 %v965_v61, %v972_v0 }
 0x510   :  { %v974_v2 = vmul.f32 1.442695, %v973_v1 }
 0x511   :  { %v1061_v8 = vpop.permute.xlu0 %1060 }
 0x512   :  { %14082 = vpow2.f32 %v974_v2 }
 0x51c   :  { %v14083_v3 = vpop.eup %14082 }
 0x51d   :  { %v976_v4 = vsel %vm969_vm7, %v14083_v3, 0.0 }
 0x51e   :  { %977 = vadd.xlane.f32.xlu1 %v976_v4 }
 0x52f   :  { %1058 = vrot.lane.b32.xlu1 %v14821_v59, %s14410_s0 }
 0x5ab   :  { %v978_v5 = vpop.xlane.xlu1 %977 }
 0x5ac   :  { %14084 = vrcp.f32 %v978_v5 }
 0x5af   :  { %v1059_v9 = vpop.permute.xlu1 %1058 }
 0x5b6   :  { %v14085_v6 = vpop.eup %14084 }
 0x5b7   :  { %v980_v7 = vmul.f32 %v14085_v6, %v14083_v3 }
 0x5b9   :  { %12635 = vmatmul.mubr.msk.f32.vlgmr.msra.gmra.mrb[8].mxu1 %vm981_vm8, %v980_v7 }
 0x5ba   :  { %12638 = vmatpush3.xpose.msk.msra.mxu1 %vm892_vm6, %v1061_v8  ;;  %12639 = vmatprep.mubr.msk.f32.mxu1 %vm14409_vm4, %v14408_v47 }
 0x5bb   :  { %12642 = vmatprep.subr.mxu1 %v14408_v47 }
 0x5bd   :  { %12640 = vmatmul.mubr.msk.f32.vlgmr.msra.gmra.mrb[10].mxu1 %vm892_vm6, %v1059_v9 }
 0x5be   :  { %12644 = vmatprep.mubr.msk.f32.mxu1 %vm14409_vm4, %v14408_v47 }
 0x68c   :  { %v1054_v10 = vpop.f32.mrb[8].mxu1 }
 0x68d   :  { %v12636_v11 = vpop.f32.mrb[9].mxu1 }
 0x690   :  { %v1132_v12 = vpop.f32.mrb[10].mxu1 }
 0x691   :  { %v12641_v13 = vpop.f32.mrb[11].mxu1  ;;  %v1136_v14 = vsel %vm969_vm7, %v1132_v12, -inf }
 0x692   :  { %1137 = vmax.xlane.f32.xlu1 %v1136_v14  ;;  %v560_v13 = vld [vmem:[%s14475_s19 + $0x38] sm:$0xff] }
 0x6a3   :  { %1372 = vrot.lane.b32.xlu1 %v14816_v57, %s14411_s5 }
 0x6a7   :  { %1370 = vrot.lane.b32.xlu1 %v14821_v59, %s14411_s5 }
 0x71f   :  { %v1138_v15 = vpop.xlane.xlu1 %1137 }
 0x720   :  { %v1139_v16 = vsub.f32 %v1132_v12, %v1138_v15  ;;  %v559_v12 = vld [vmem:[%s14475_s19 + $0x30] sm:$0xff] }
 0x721   :  { %v14944_v15 = vpack.c.bf16 %v560_v13, %v559_v12 }
 0x722   :  { %v1140_v17 = vmul.f32 1.442695, %v1139_v16 }
 0x723   :  { %v1373_v27 = vpop.permute.xlu1 %1372 }
 0x724   :  { %14086 = vpow2.f32 %v1140_v17 }
 0x727   :  { %v1371_v29 = vpop.permute.xlu1 %1370 }
 0x72e   :  { %v14087_v18 = vpop.eup %14086 }
 0x72f   :  { %v1142_v19 = vsel %vm969_vm7, %v14087_v18, 0.0 }
 0x730   :  { %1143 = vadd.xlane.f32.xlu0 %v1142_v19 }
 0x746   :  { %1147 = vrot.lane.b32.xlu0 %v14810_v52, %s14410_s0 }
 0x7bd   :  { %v1144_v24 = vpop.xlane.xlu0 %1143 }
 0x7be   :  { %14088 = vrcp.f32 %v1144_v24 }
 0x7c1   :  { %v1148_v25 = vpop.permute.xlu0 %1147 }
 0x7c2   :  { %12643 = vmatpush3.msk.msra.mxu1 %vm525_vm1, %v1148_v25 }
 0x7c3   :  { %12661 = vmatprep.subr.mxu1 %v14408_v47 }
 0x7c8   :  { %v14089_v26 = vpop.eup %14088 }
 0x7c9   :  { %v1146_v28 = vmul.f32 %v14089_v26, %v14087_v18 }
 0x7cb   :  { %12645 = vmatmul.mubr.msk.f32.vlgmr.msra.gmra.mrb[12].mxu1 %vm981_vm8, %v1146_v28 }
 0x7cc   :  { %12662 = vmatpush3.xpose.msk.msra.mxu1 %vm892_vm6, %v1373_v27  ;;  %12663 = vmatprep.mubr.msk.f32.mxu1 %vm14409_vm4, %v14408_v47 }
 0x7cd   :  { %12666 = vmatprep.subr.mxu1 %v14408_v47 }
 0x7cf   :  { %12664 = vmatmul.mubr.msk.f32.vlgmr.msra.gmra.mrb[14].mxu1 %vm892_vm6, %v1371_v29 }
 0x7d0   :  { %12668 = vmatprep.mubr.msk.f32.mxu1 %vm14409_vm4, %v14408_v47 }
 0x89e   :  { %v1220_v33 = vpop.f32.mrb[12].mxu1 }
 0x89f   :  { %v12646_v34 = vpop.f32.mrb[13].mxu1  ;;  %12652 = vmatmul.mubr.msk.f32.vlgmr.msra.gmra.mrb[6].mxu0 %vm892_vm6, %v1220_v33 }
 0x8a0   :  { %13510 = vmatpush3.bf16.msra.mxu0 %v14875_v32  ;;  %12658 = vmatprep.mubr.msk.f32.mxu0 %vm14409_vm4, %v14408_v47 }
 0x8a1   :  { %13511 = vmatprep.subr.bf16.mxu0 %v14412_v22 }
 0x8a2   :  { %v1444_v35 = vpop.f32.mrb[14].mxu1 }
 0x8a3   :  { %v12665_v36 = vpop.f32.mrb[15].mxu1  ;;  %v1448_v37 = vsel %vm969_vm7, %v1444_v35, -inf }
 0x8a4   :  { %1449 = vmax.xlane.f32.xlu1 %v1448_v37 }
 0x8a7   :  { %12659 = vmatmul.mubr.msk.f32.vlgmr.msra.gmra.mrb[6].mxu0 %vm892_vm6, %v1054_v10 }
 0x8a8   :  { %12675 = vmatprep.mubr.msk.f32.mxu0 %vm14409_vm4, %v14408_v47  ;;  %13513 = vmatpush3.bf16.msra.mxu0 %v14895_v49 }
 0x8a9   :  { %12683 = vmatprep.subr.mxu0 %v14408_v47 }
 0x8b5   :  { %1612 = vrot.lane.b32.xlu1 %v14816_v57, %s14413_s9  ;;  %v741_v57 = vmul.f32 0.125, %v14808_v48 }
 0x8b7   :  { %v1853_v58 = vrot.slane %v741_v57, 5 }
 0x8b9   :  { %1610 = vrot.lane.b32.xlu1 %v14821_v59, %s14413_s9  ;;  %v14915_v48 = vsel %vm1851_vm5, %v1852_v62, %v1853_v58 }
 0x931   :  { %v1450_v38 = vpop.xlane.xlu1 %1449 }
 0x932   :  { %v1451_v39 = vsub.f32 %v1444_v35, %v1450_v38 }
 0x934   :  { %v1452_v40 = vmul.f32 1.442695, %v1451_v39 }
 0x935   :  { %v1613_v55 = vpop.permute.xlu1 %1612 }
 0x936   :  { %14090 = vpow2.f32 %v1452_v40 }
 0x939   :  { %v1611_v61 = vpop.permute.xlu1 %1610 }
 0x940   :  { %v14091_v41 = vpop.eup %14090 }
 0x941   :  { %v1454_v42 = vsel %vm969_vm7, %v14091_v41, 0.0 }
 0x942   :  { %1455 = vadd.xlane.f32.xlu0 %v1454_v42 }
 0x958   :  { %1459 = vrot.lane.b32.xlu0 %v14810_v52, %s14411_s5 }
 0x9cf   :  { %v1456_v50 = vpop.xlane.xlu0 %1455 }
 0x9d0   :  { %14092 = vrcp.f32 %v1456_v50 }
 0x9d3   :  { %v1460_v51 = vpop.permute.xlu0 %1459 }
 0x9d4   :  { %12667 = vmatpush3.msk.msra.mxu1 %vm525_vm1, %v1460_v51 }
 0x9d5   :  { %12678 = vmatprep.subr.mxu1 %v14408_v47 }
 0x9da   :  { %v14093_v53 = vpop.eup %14092 }
 0x9db   :  { %v1458_v56 = vmul.f32 %v14093_v53, %v14091_v41 }
 0x9dd   :  { %12669 = vmatmul.mubr.msk.f32.vlgmr.msra.gmra.mrb[16].mxu1 %vm981_vm8, %v1458_v56 }
 0x9de   :  { %12679 = vmatpush3.xpose.msk.msra.mxu1 %vm892_vm6, %v1613_v55  ;;  %12680 = vmatprep.mubr.msk.f32.mxu1 %vm14409_vm4, %v14408_v47 }
 0x9df   :  { %12695 = vmatprep.subr.mxu1 %v14408_v47 }
 0x9e1   :  { %12681 = vmatmul.mubr.msk.f32.vlgmr.msra.gmra.mrb[18].mxu1 %vm892_vm6, %v1611_v61 }
 0x9e2   :  { %12696 = vmatpush3.xpose.msk.msra.mxu1 %vm892_vm6, %v14825_v60  ;;  %12697 = vmatprep.mubr.msk.f32.mxu1 %vm14409_vm4, %v14408_v47 }
 0x9e3   :  { %12700 = vmatprep.subr.mxu1 %v14408_v47 }
 0x9e5   :  { %12698 = vmatmul.mubr.msk.f32.vlgmr.msra.gmra.mrb[20].mxu1 %vm892_vm6, %v14915_v48 }
 0x9e6   :  { %12701 = vmatpush3.msk.msra.mxu1 %vm525_vm1, %v14814_v54  ;;  %12702 = vmatprep.mubr.msk.f32.mxu1 %vm14409_vm4, %v14408_v47 }
 0x9e7   :  { %12710 = vmatprep.subr.mxu1 %v14408_v47 }
 0xab0   :  { %v1532_v59 = vpop.f32.mrb[16].mxu1 }
 0xab1   :  { %v12670_v63 = vpop.f32.mrb[17].mxu1  ;;  %12676 = vmatmul.mubr.msk.f32.vlgmr.msra.gmra.mrb[6].mxu0 %vm892_vm6, %v1532_v59 }
 0xab2   :  { %12685 = vmatprep.mubr.msk.f32.mxu0 %vm14409_vm4, %v14408_v47 }
 0xab4   :  { %v1684_v0 = vpop.f32.mrb[18].mxu1 }
 0xab5   :  { %v12682_v1 = vpop.f32.mrb[19].mxu1  ;;  %v1688_v2 = vsel %vm969_vm7, %v1684_v0, -inf }
 0xab6   :  { %1689 = vmax.xlane.f32.xlu0 %v1688_v2 }
 0xab8   :  { %v1929_v3 = vpop.f32.mrb[20].mxu1 }
 0xab9   :  { %v12699_v4 = vpop.f32.mrb[21].mxu1 }
 0xacc   :  { %1699 = vrot.lane.b32.xlu0 %v14810_v52, %s14413_s9  ;;  %v1933_v52 = vsel %vm969_vm7, %v1929_v3, -inf }
 0xad0   :  { %2023 = vrot.lane.b32.xlu0 %v14915_v48, %s14410_s0 }
 0xb43   :  { %v1690_v5 = vpop.xlane.xlu0 %1689 }
 0xb44   :  { %v1691_v6 = vsub.f32 %v1684_v0, %v1690_v5 }
 0xb46   :  { %v1692_v7 = vmul.f32 1.442695, %v1691_v6 }
 0xb47   :  { %v1700_v8 = vpop.permute.xlu0 %1699 }
 0xb48   :  { %14094 = vpow2.f32 %v1692_v7  ;;  %12684 = vmatpush3.msk.msra.mxu0 %vm525_vm1, %v1700_v8 }
 0xb49   :  { %13514 = vmatprep.subr.bf16.mxu0 %v14412_v22 }
 0xb4b   :  { %v2024_v20 = vpop.permute.xlu0 %2023 }
 0xb52   :  { %v14095_v9 = vpop.eup %14094 }
 0xb53   :  { %v1694_v10 = vsel %vm969_vm7, %v14095_v9, 0.0 }
 0xb54   :  { %1695 = vadd.xlane.f32.xlu1 %v1694_v10 }
 0xb65   :  { %2025 = vrot.lane.b32.xlu1 %v14825_v60, %s14410_s0 }
 0xb89   :  { %1934 = vmax.xlane.f32.xlu1 %v1933_v52 }
 0xb9a   :  { %2112 = vrot.lane.b32.xlu1 %v14814_v54, %s14410_s0 }
 0xb9e   :  { %2335 = vrot.lane.b32.xlu1 %v14915_v48, %s14411_s5 }
 0xbe1   :  { %v1696_v11 = vpop.xlane.xlu1 %1695 }
 0xbe2   :  { %14096 = vrcp.f32 %v1696_v11 }
 0xbe5   :  { %v2026_v18 = vpop.permute.xlu1 %2025 }
 0xbec   :  { %v14097_v14 = vpop.eup %14096 }
 0xbed   :  { %v1698_v16 = vmul.f32 %v14097_v14, %v14095_v9 }
 0xbef   :  { %12686 = vmatmul.mubr.msk.f32.vlgmr.msra.gmra.mrb[8].mxu0 %vm981_vm8, %v1698_v16 }
 0xbf0   :  { %13516 = vmatpush3.bf16.msra.mxu0 %v14944_v15  ;;  %12692 = vmatprep.mubr.msk.f32.mxu0 %vm14409_vm4, %v14408_v47 }
 0xbf1   :  { %12705 = vmatprep.subr.mxu0 %v14408_v47 }
 0xc16   :  { %v1935_v21 = vpop.xlane.xlu1 %1934 }
 0xc17   :  { %v1936_v24 = vsub.f32 %v1929_v3, %v1935_v21 }
 0xc19   :  { %v1937_v25 = vmul.f32 1.442695, %v1936_v24 }
 0xc1a   :  { %v2113_v41 = vpop.permute.xlu1 %2112 }
 0xc1b   :  { %14098 = vpow2.f32 %v1937_v25 }
 0xc1e   :  { %v2336_v51 = vpop.permute.xlu1 %2335 }
 0xc25   :  { %v14099_v31 = vpop.eup %14098 }
 0xcc2   :  { %v1772_v17 = vpop.f32.mrb[8].mxu0 }
 0xcc3   :  { %v12687_v19 = vpop.f32.mrb[9].mxu0  ;;  %12693 = vmatmul.mubr.msk.f32.vlgmr.msra.gmra.mrb[6].mxu0 %vm892_vm6, %v1772_v17 }
 0xcc4   :  { %12706 = vmatpush3.xpose.msk.msra.mxu0 %vm892_vm6, %v2026_v18  ;;  %12707 = vmatprep.mubr.msk.f32.mxu0 %vm14409_vm4, %v14408_v47 }
 0xcc5   :  { %13517 = vmatprep.subr.bf16.mxu0 %v14412_v22 }
 0xcc7   :  { %12708 = vmatmul.mubr.msk.f32.vlgmr.msra.gmra.mrb[10].mxu0 %vm892_vm6, %v2024_v20 }
 0xcc8   :  { %13519 = vmatpush3.bf16.msra.mxu0 %v14859_v23  ;;  %12719 = vmatprep.mubr.msk.f32.mxu0 %vm14409_vm4, %v14408_v47  ;;  %v1939_v23 = vsel %vm969_vm7, %v14099_v31, 0.0 }
 0xcc9   :  { %13520 = vmatprep.subr.bf16.mxu0 %v14412_v22 }
 0xd96   :  { %v14961_v26 = vpop.f32.mrb[6].mxu0 }
 0xd97   :  { %v12694_v27 = vpop.f32.mrb[7].mxu0 }
 0xd98   :  { %v11588_v27 = vld [vmem:[%s14480_s24] ss:$0 sm:$0xff] }
 0xd9a   :  { %v2097_v28 = vpop.f32.mrb[10].mxu0 }
 0xd9b   :  { %v12709_v29 = vpop.f32.mrb[11].mxu0  ;;  %v2101_v30 = vsel %vm969_vm7, %v2097_v28, -inf }
 0xd9c   :  { %2102 = vmax.xlane.f32.xlu0 %v2101_v30 }
 0xda0   :  { %1940 = vadd.xlane.f32.xlu0 %v1939_v23 }
 0xe29   :  { %v2103_v33 = vpop.xlane.xlu0 %2102 }
 0xe2a   :  { %v2104_v34 = vsub.f32 %v2097_v28, %v2103_v33 }
 0xe2c   :  { %v2105_v35 = vmul.f32 1.442695, %v2104_v34 }
 0xe2d   :  { %v1941_v36 = vpop.xlane.xlu0 %1940 }
 0xe2e   :  { %14100 = vpow2.f32 %v2105_v35 }
 0xe2f   :  { %14102 = vrcp.f32 %v1941_v36 }
 0xe38   :  { %v14101_v37 = vpop.eup %14100 }
 0xe39   :  { %v14103_v38 = vpop.eup %14102  ;;  %v2107_v39 = vsel %vm969_vm7, %v14101_v37, 0.0 }
 0xe3a   :  { %2108 = vadd.xlane.f32.xlu0 %v2107_v39  ;;  %v1943_v40 = vmul.f32 %v14103_v38, %v14099_v31 }
 0xe3c   :  { %12703 = vmatmul.mubr.msk.f32.vlgmr.msra.gmra.mrb[22].mxu1 %vm981_vm8, %v1943_v40  ;;  %v565_v40 = vld [vmem:[%s14495_s12 + $0x8] sm:$0xff] }
 0xe3d   :  { %12711 = vmatpush3.msk.msra.mxu1 %vm525_vm1, %v2113_v41  ;;  %12712 = vmatprep.mubr.msk.f32.mxu1 %vm14409_vm4, %v14408_v47  ;;  %v567_v41 = vld [vmem:[%s14495_s12 + $0x18] sm:$0xff] }
 0xe3e   :  { %12729 = vmatprep.subr.mxu1 %v14408_v47 }
 0xe50   :  { %2337 = vrot.lane.b32.xlu0 %v14825_v60, %s14411_s5 }
 0xec7   :  { %v2109_v42 = vpop.xlane.xlu0 %2108 }
 0xec8   :  { %14104 = vrcp.f32 %v2109_v42  ;;  %v13529_v42 = vpack.c.bf16 %v567_v41, %v565_v40  ;;  %v588_v40 = vld [vmem:[%s16394_s17 + $0x38] sm:$0xff] }
 0xecb   :  { %v2338_v50 = vpop.permute.xlu0 %2337 }
 0xed2   :  { %v14105_v45 = vpop.eup %14104 }
 0xed3   :  { %v2111_v46 = vmul.f32 %v14105_v45, %v14101_v37  ;;  %v564_v45 = vld [vmem:[%s14495_s12] sm:$0xff] }
 0xed5   :  { %12713 = vmatmul.mubr.msk.f32.vlgmr.msra.gmra.mrb[24].mxu1 %vm981_vm8, %v2111_v46  ;;  %v566_v46 = vld [vmem:[%s14495_s12 + $0x10] sm:$0xff] }
 0xed6   :  { %12730 = vmatpush3.xpose.msk.msra.mxu1 %vm892_vm6, %v2338_v50  ;;  %12731 = vmatprep.mubr.msk.f32.mxu1 %vm14409_vm4, %v14408_v47  ;;  %v13531_v50 = vpack.c.bf16 %v566_v46, %v564_v45  ;;  %v606_v45 = vld [vmem:[%s16394_s17 + $0xc8] sm:$0xff] }
 0xed7   :  { %12734 = vmatprep.subr.mxu1 %v14408_v47 }
 0xed9   :  { %12732 = vmatmul.mubr.msk.f32.vlgmr.msra.gmra.mrb[26].mxu1 %vm892_vm6, %v2336_v51  ;;  %v569_v51 = vld [vmem:[%s14495_s12 + $0x28] sm:$0xff] }
 0xeda   :  { %12736 = vmatprep.mubr.msk.f32.mxu1 %vm14409_vm4, %v14408_v47 }
 0xf0f   :  { %v2019_v53 = vpop.f32.mrb[22].mxu1 }
 0xf10   :  { %v12704_v55 = vpop.f32.mrb[23].mxu1 }
 0xfa8   :  { %v2185_v56 = vpop.f32.mrb[24].mxu1 }
 0xfa9   :  { %v12714_v57 = vpop.f32.mrb[25].mxu1  ;;  %12720 = vmatmul.mubr.msk.f32.vlgmr.msra.gmra.mrb[12].mxu0 %vm892_vm6, %v2185_v56  ;;  %v568_v56 = vld [vmem:[%s14495_s12 + $0x20] sm:$0xff] }
 0xfaa   :  { %13522 = vmatpush3.bf16.msra.mxu0 %v14875_v32  ;;  %12726 = vmatprep.mubr.msk.f32.mxu0 %vm14409_vm4, %v14408_v47  ;;  %v570_v57 = vld [vmem:[%s14495_s12 + $0x30] sm:$0xff] }
 0xfab   :  { %13523 = vmatprep.subr.bf16.mxu0 %v14412_v22 }
 0xfac   :  { %v2409_v58 = vpop.f32.mrb[26].mxu1 }
 0xfad   :  { %v12733_v61 = vpop.f32.mrb[27].mxu1  ;;  %v2413_v62 = vsel %vm969_vm7, %v2409_v58, -inf }
 0xfae   :  { %2414 = vmax.xlane.f32.xlu1 %v2413_v62  ;;  %v573_v61 = vld [vmem:[%s14495_s12 + $0x48] sm:$0xff]  ;;  %v575_v62 = vld [vmem:[%s14495_s12 + $0x58] sm:$0xff] }
 0xfb1   :  { %12727 = vmatmul.mubr.msk.f32.vlgmr.msra.gmra.mrb[12].mxu0 %vm892_vm6, %v2019_v53  ;;  %v571_v53 = vld [vmem:[%s14495_s12 + $0x38] sm:$0xff] }
 0xfb2   :  { %13525 = vmatpush3.bf16.msra.mxu0 %v14895_v49  ;;  %12743 = vmatprep.mubr.msk.f32.mxu0 %vm14409_vm4, %v14408_v47  ;;  %v13533_v55 = vpack.c.bf16 %v571_v53, %v569_v51  ;;  %v590_v51 = vld [vmem:[%s16394_s17 + $0x48] sm:$0xff] }
 0xfb3   :  { %12751 = vmatprep.subr.mxu0 %v14408_v47 }
 0xfbf   :  { %2577 = vrot.lane.b32.xlu1 %v14825_v60, %s14413_s9 }
 0xfc3   :  { %2575 = vrot.lane.b32.xlu1 %v14915_v48, %s14413_s9 }
0x103b   :  { %v2415_v32 = vpop.xlane.xlu1 %2414 }
0x103c   :  { %v2416_v59 = vsub.f32 %v2409_v58, %v2415_v32  ;;  %v13535_v58 = vpack.c.bf16 %v570_v57, %v568_v56  ;;  %v13537_v32 = vpack.c.bf16 %v575_v62, %v573_v61  ;;  %v608_v56 = vld [vmem:[%s16394_s17 + $0xd8] sm:$0xff] }
0x103d   :  { %v592_v61 = vld [vmem:[%s16394_s17 + $0x58] sm:$0xff] }
0x103e   :  { %v2417_v63 = vmul.f32 1.442695, %v2416_v59  ;;  %v572_v59 = vld [vmem:[%s14495_s12 + $0x40] sm:$0xff] }
0x103f   :  { %v2578_v48 = vpop.permute.xlu1 %2577 }
0x1040   :  { %14106 = vpow2.f32 %v2417_v63  ;;  %v574_v63 = vld [vmem:[%s14495_s12 + $0x50] sm:$0xff] }
0x1043   :  { %v2576_v4 = vpop.permute.xlu1 %2575 }
0x104a   :  { %v14107_v0 = vpop.eup %14106 }
0x104b   :  { %v2419_v1 = vsel %vm969_vm7, %v14107_v0, 0.0 }
0x104c   :  { %2420 = vadd.xlane.f32.xlu0 %v2419_v1  ;;  %v577_v1 = vld [vmem:[%s14495_s12 + $0x68] sm:$0xff] }
0x1062   :  { %2424 = vrot.lane.b32.xlu0 %v14814_v54, %s14411_s5 }
0x10d9   :  { %v2421_v49 = vpop.xlane.xlu0 %2420 }
0x10da   :  { %14108 = vrcp.f32 %v2421_v49  ;;  %v579_v49 = vld [vmem:[%s14495_s12 + $0x78] sm:$0xff] }
0x10dd   :  { %v2425_v2 = vpop.permute.xlu0 %2424 }
0x10de   :  { %12735 = vmatpush3.msk.msra.mxu1 %vm525_vm1, %v2425_v2  ;;  %v576_v2 = vld [vmem:[%s14495_s12 + $0x60] sm:$0xff] }
0x10df   :  { %12746 = vmatprep.subr.mxu1 %v14408_v47 }
0x10e4   :  { %v14109_v60 = vpop.eup %14108 }
0x10e5   :  { %v2423_v3 = vmul.f32 %v14109_v60, %v14107_v0  ;;  %v13539_v0 = vpack.c.bf16 %v574_v63, %v572_v59  ;;  %v13541_v60 = vpack.c.bf16 %v579_v49, %v577_v1  ;;  %v610_v59 = vld [vmem:[%s16394_s17 + $0xe8] sm:$0xff] }
0x10e6   :  { %v594_v1 = vld [vmem:[%s16394_s17 + $0x68] sm:$0xff] }
0x10e7   :  { %12737 = vmatmul.mubr.msk.f32.vlgmr.msra.gmra.mrb[28].mxu1 %vm981_vm8, %v2423_v3 }
0x10e8   :  { %12747 = vmatpush3.xpose.msk.msra.mxu1 %vm892_vm6, %v2578_v48  ;;  %12748 = vmatprep.mubr.msk.f32.mxu1 %vm14409_vm4, %v14408_v47  ;;  %v578_v48 = vld [vmem:[%s14495_s12 + $0x70] sm:$0xff] }
0x10e9   :  { %13530 = vmatprep.subr.bf16.mxu1 %v13529_v42  ;;  %v13543_v3 = vpack.c.bf16 %v578_v48, %v576_v2  ;;  %v605_v42 = vld [vmem:[%s16394_s17 + $0xc0] sm:$0xff]  ;;  %v611_v2 = vld [vmem:[%s16394_s17 + $0xf0] sm:$0xff] }
0x10ea   :  { %v13561_v46 = vpack.c.bf16 %v606_v45, %v605_v42 }
0x10eb   :  { %12749 = vmatmul.mubr.msk.f32.vlgmr.msra.gmra.mrb[30].mxu1 %vm892_vm6, %v2576_v4 }
0x10ec   :  { %2952 = vmatprep.mubr.f32.mxu1 %v14408_v47  ;;  %13532 = vmatpush1.bf16.msra.mxu1 %v13531_v50  ;;  %v589_v50 = vld [vmem:[%s16394_s17 + $0x40] sm:$0xff] }
0x10ed   :  { %13534 = vmatprep.subr.bf16.mxu1 %v13533_v55  ;;  %v13563_v53 = vpack.c.bf16 %v590_v51, %v589_v50  ;;  %v607_v55 = vld [vmem:[%s16394_s17 + $0xd0] sm:$0xff] }
0x10ee   :  { %v13565_v57 = vpack.c.bf16 %v608_v56, %v607_v55 }
0x10f0   :  { %13536 = vmatpush1.bf16.msra.mxu1 %v13535_v58  ;;  %v591_v58 = vld [vmem:[%s16394_s17 + $0x50] sm:$0xff] }
0x10f1   :  { %13538 = vmatprep.subr.bf16.mxu1 %v13537_v32  ;;  %v13567_v62 = vpack.c.bf16 %v592_v61, %v591_v58  ;;  %v609_v32 = vld [vmem:[%s16394_s17 + $0xe0] sm:$0xff] }
0x10f2   :  { %v13569_v63 = vpack.c.bf16 %v610_v59, %v609_v32 }
0x10f4   :  { %13540 = vmatpush1.bf16.msra.mxu1 %v13539_v0  ;;  %v593_v0 = vld [vmem:[%s16394_s17 + $0x60] sm:$0xff] }
0x10f5   :  { %13542 = vmatprep.subr.bf16.mxu1 %v13541_v60  ;;  %v13571_v49 = vpack.c.bf16 %v594_v1, %v593_v0  ;;  %v612_v60 = vld [vmem:[%s16394_s17 + $0xf8] sm:$0xff] }
0x10f6   :  { %v13573_v48 = vpack.c.bf16 %v612_v60, %v611_v2 }
0x10f8   :  { %13544 = vmatpush1.bf16.msra.mxu1 %v13543_v3  ;;  %v595_v3 = vld [vmem:[%s16394_s17 + $0x70] sm:$0xff] }
0x11ba   :  { %v2497_v5 = vpop.f32.mrb[28].mxu1 }
0x11bb   :  { %v12738_v6 = vpop.f32.mrb[29].mxu1  ;;  %12744 = vmatmul.mubr.msk.f32.vlgmr.msra.gmra.mrb[12].mxu0 %vm892_vm6, %v2497_v5 }
0x11bc   :  { %12753 = vmatprep.mubr.msk.f32.mxu0 %vm14409_vm4, %v14408_v47 }
0x11be   :  { %v2649_v7 = vpop.f32.mrb[30].mxu1 }
0x11bf   :  { %v12750_v8 = vpop.f32.mrb[31].mxu1  ;;  %v2653_v9 = vsel %vm969_vm7, %v2649_v7, -inf }
0x11c0   :  { %2654 = vmax.xlane.f32.xlu1 %v2653_v9 }
0x124d   :  { %v2655_v10 = vpop.xlane.xlu1 %2654 }
0x124e   :  { %v2656_v52 = vsub.f32 %v2649_v7, %v2655_v10 }
0x1250   :  { %v2657_v11 = vmul.f32 1.442695, %v2656_v52  ;;  %v11589_v52 = vld [vmem:[%s14485_s30] ss:$0 sm:$0xff] }
0x1252   :  { %14110 = vpow2.f32 %v2657_v11 }
0x125c   :  { %v14111_v12 = vpop.eup %14110 }
0x125d   :  { %v2659_v13 = vsel %vm969_vm7, %v14111_v12, 0.0 }
0x125e   :  { %2660 = vadd.xlane.f32.xlu0 %v2659_v13 }
0x1274   :  { %2664 = vrot.lane.b32.xlu0 %v14814_v54, %s14413_s9 }
0x12eb   :  { %v2661_v14 = vpop.xlane.xlu0 %2660 }
0x12ec   :  { %14112 = vrcp.f32 %v2661_v14 }
0x12ef   :  { %v2665_v16 = vpop.permute.xlu0 %2664 }
0x12f0   :  { %12752 = vmatpush3.msk.msra.mxu0 %vm525_vm1, %v2665_v16 }
0x12f1   :  { %13526 = vmatprep.subr.bf16.mxu0 %v14412_v22 }
0x12f6   :  { %v14113_v17 = vpop.eup %14112 }
0x12f7   :  { %v2663_v18 = vmul.f32 %v14113_v17, %v14111_v12  ;;  %v11590_v12 = vld [vmem:[%s16393_s13] ss:$0 sm:$0xff] }
0x12f9   :  { %12754 = vmatmul.mubr.msk.f32.vlgmr.msra.gmra.mrb[14].mxu0 %vm981_vm8, %v2663_v18 }
0x12fa   :  { %13528 = vmatpush3.bf16.msra.mxu0 %v14944_v15  ;;  %12760 = vmatprep.mubr.msk.f32.mxu0 %vm14409_vm4, %v14408_v47 }
0x13cc   :  { %v2737_v19 = vpop.f32.mrb[14].mxu0 }
0x13cd   :  { %v12755_v20 = vpop.f32.mrb[15].mxu0  ;;  %12761 = vmatmul.mubr.msk.f32.vlgmr.msra.gmra.mrb[12].mxu0 %vm892_vm6, %v2737_v19 }
0x13ce   :  { %v597_v20 = vld [vmem:[%s16394_s17 + $0x80] sm:$0xff] }
0x14a0   :  { %v2810_v54 = vpop.f32.mrb[12].mxu0 }
0x14a1   :  { %v2816_v21 = vrot.slane %v2810_v54, 3  ;;  %v12762_v24 = vpop.f32.mrb[13].mxu0  ;;  %v598_v54 = vld [vmem:[%s16394_s17 + $0x88] sm:$0xff] }
0x14a2   :  { %v581_v24 = vld [vmem:[%s16394_s17] sm:$0xff] }
0x14a3   :  { %v2818_v25 = vsel %vm525_vm1, %v14961_v26, %v2816_v21  ;;  %v2820_v28 = vadd.f32 %v2816_v21, %v14747_v43  ;;  %v13545_v21 = vpack.c.bf16 %v598_v54, %v597_v20 }
0x14a4   :  { %v2819_v29 = vadd.f32 %v2818_v25, %v14751_v44  ;;  %v582_v25 = vld [vmem:[%s16394_s17 + $0x8] sm:$0xff] }
0x14a5   :  { %v2828_v31 = vadd.f32 %v11588_v27, %v2820_v28  ;;  %13546 = vmatprep.subr.bf16.mxu0 %v13545_v21  ;;  %v599_v28 = vld [vmem:[%s16394_s17 + $0x90] sm:$0xff] }
0x14a6   :  { %v2827_v30 = vadd.f32 %v11588_v27, %v2819_v29  ;;  %v13547_v27 = vpack.c.bf16 %v582_v25, %v581_v24  ;;  %v600_v29 = vld [vmem:[%s16394_s17 + $0x98] sm:$0xff] }
0x14a7   :  { %v2832_v23 = vsel %vm618_vm3, %v2828_v31, 0.0 }
0x14a8   :  { %v2829_v15 = vsel %vm614_vm2, %v2827_v30, 0.0  ;;  %13548 = vmatpush3.bf16.msra.mxu0 %v13547_v27 }
0x14a9   :  { %2830 = vadd.xlane.f32.xlu1 %v2829_v15  ;;  %v583_v15 = vld [vmem:[%s16394_s17 + $0x10] sm:$0xff] }
0x14ad   :  { %2833 = vadd.xlane.f32.xlu1 %v2832_v23 }
0x1536   :  { %v2831_v33 = vpop.xlane.xlu1 %2830 }
0x1537   :  { %v2835_v34 = vmul.f32 0.015625, %v2831_v33  ;;  %v601_v33 = vld [vmem:[%s16394_s17 + $0xa0] sm:$0xff] }
0x1539   :  { %v2837_v26 = vsub.f32 %v2827_v30, %v2835_v34  ;;  %v13549_v30 = vpack.c.bf16 %v600_v29, %v599_v28  ;;  %v602_v34 = vld [vmem:[%s16394_s17 + $0xa8] sm:$0xff] }
0x153a   :  { %v2834_v35 = vpop.xlane.xlu1 %2833 }
0x153b   :  { %v2836_v36 = vmul.f32 0.015625, %v2834_v35  ;;  %v2839_v43 = vmul.f32 %v2837_v26, %v2837_v26  ;;  %13550 = vmatprep.subr.bf16.mxu0 %v13549_v30  ;;  %v585_v35 = vld [vmem:[%s16394_s17 + $0x20] sm:$0xff] }
0x153d   :  { %v2838_v44 = vsub.f32 %v2828_v31, %v2836_v36  ;;  %v2841_v37 = vsel %vm614_vm2, %v2839_v43, 0.0  ;;  %v584_v31 = vld [vmem:[%s16394_s17 + $0x18] sm:$0xff]  ;;  %v586_v36 = vld [vmem:[%s16394_s17 + $0x28] sm:$0xff] }
0x153e   :  { %2842 = vadd.xlane.f32.xlu1 %v2841_v37  ;;  %v13551_v23 = vpack.c.bf16 %v584_v31, %v583_v15  ;;  %v13555_v43 = vpack.c.bf16 %v586_v36, %v585_v35  ;;  %v604_v37 = vld [vmem:[%s16394_s17 + $0xb8] sm:$0xff] }
0x153f   :  { %v2840_v38 = vmul.f32 %v2838_v44, %v2838_v44 }
0x1540   :  { %13552 = vmatpush3.bf16.msra.mxu0 %v13551_v23 }
0x1541   :  { %v2844_v39 = vsel %vm618_vm3, %v2840_v38, 0.0 }
0x1542   :  { %2845 = vadd.xlane.f32.xlu1 %v2844_v39  ;;  %v587_v39 = vld [vmem:[%s16394_s17 + $0x30] sm:$0xff] }
0x1543   :  { %v13559_v41 = vpack.c.bf16 %v588_v40, %v587_v39 }
0x15cb   :  { %v2843_v4 = vpop.xlane.xlu1 %2842 }
0x15cc   :  { %v2847_v5 = vmul.f32 0.015625, %v2843_v4  ;;  %v596_v4 = vld [vmem:[%s16394_s17 + $0x78] sm:$0xff] }
0x15ce   :  { %v2849_v6 = vadd.f32 1e-05, %v2847_v5  ;;  %v13575_v5 = vpack.c.bf16 %v596_v4, %v595_v3 }
0x15cf   :  { %v2846_v7 = vpop.xlane.xlu1 %2845 }
0x15d0   :  { %14114 = vrsqrt.f32 %v2849_v6  ;;  %v2848_v8 = vmul.f32 0.015625, %v2846_v7  ;;  %v2872_v6 = vlaneseq }
0x15d2   :  { %v2850_v9 = vadd.f32 1e-05, %v2848_v8  ;;  %v15090_v7 = vshrl.u32 %v2872_v6, 7 }
0x15d4   :  { %14116 = vrsqrt.f32 %v2850_v9  ;;  %v15093_v8 = vsub.s32 0, %v15090_v7  ;;  %v580_v9 = vld [vmem:[%s16395_s21] sm:$0x3] }
0x15da   :  { %v14115_v10 = vpop.eup %14114 }
0x15db   :  { %v2853_v11 = vmul.f32 %v14115_v10, %v2837_v26  ;;  %v13553_v26 = vpack.c.bf16 %v602_v34, %v601_v33  ;;  %v15097_v10 = vsub.s32 1, %v15090_v7 }
0x15dd   :  { %v2861_v13 = vmul.f32 %v11589_v52, %v2853_v11  ;;  %13554 = vmatprep.subr.bf16.mxu0 %v13553_v26  ;;  %v2879_v11 = vrot.slane %v580_v9, %v15097_v10 }
0x15de   :  { %v14117_v14 = vpop.eup %14116  ;;  %13556 = vmatpush3.bf16.msra.mxu0 %v13555_v43 }
0x15df   :  { %v15048_v16 = vadd.f32 %v11590_v12, %v2861_v13  ;;  %v2854_v17 = vmul.f32 %v14117_v14, %v2838_v44  ;;  %v603_v44 = vld [vmem:[%s16394_s17 + $0xb0] sm:$0xff] }
0x15e0   :  { %v13557_v38 = vpack.c.bf16 %v604_v37, %v603_v44 }
0x15e1   :  { %11591 = vmatmul.mubr.msk.f32.vlgmr.msra.gmra.mrb[32].mxu1 %vm614_vm2, %v15048_v16  ;;  %v2862_v18 = vmul.f32 %v11589_v52, %v2854_v17  ;;  %v2875_v52 = vrot.slane %v580_v9, %v15093_v8 }
0x15e2   :  { %2958 = vmatprep.mubr.f32.mxu1 %v14408_v47  ;;  %13558 = vmatprep.subr.bf16.mxu0 %v13557_v38 }
0x15e3   :  { %v15053_v19 = vadd.f32 %v11590_v12, %v2862_v18  ;;  %13560 = vmatpush3.bf16.msra.mxu0 %v13559_v41 }
0x15e4   :  { %13562 = vmatprep.subr.bf16.mxu0 %v13561_v46 }
0x15e5   :  { %11592 = vmatmul.mubr.msk.f32.gmra.mrb[34].mxu1 %vm614_vm2, %v15053_v19 }
0x15e7   :  { %13564 = vmatpush3.bf16.msra.mxu0 %v13563_v53 }
0x15e8   :  { %13566 = vmatprep.subr.bf16.mxu0 %v13565_v57 }
0x15eb   :  { %13568 = vmatpush3.bf16.msra.mxu0 %v13567_v62 }
0x15ec   :  { %13570 = vmatprep.subr.bf16.mxu0 %v13569_v63 }
0x15ef   :  { %13572 = vmatpush3.bf16.msra.mxu0 %v13571_v49 }
0x15f0   :  { %13574 = vmatprep.subr.bf16.mxu0 %v13573_v48 }
0x15f3   :  { %13576 = vmatpush3.bf16.msra.mxu0 %v13575_v5 }
0x16b4   :  { %v2954_v12 = vpop.f32.mrb[32].mxu1 }
0x16b5   :  { %v15101_v13 = vadd.f32 %v2954_v12, %v2875_v52  ;;  %v2956_v14 = vpop.f32.mrb[33].mxu1 }
0x16b6   :  { %v15103_v17 = vadd.f32 %v2956_v14, %v2879_v11 }
0x16b7   :  { %v15106_v18 = vmul.f32 0.70710677, %v15101_v13 }
0x16b8   :  { %v15109_v20 = vmul.f32 0.70710677, %v15103_v17  ;;  %v2960_v54 = vpop.f32.mrb[34].mxu1 }
0x16b9   :  { %v2973_v21 = vand.u32 2147483647, %v15106_v18  ;;  %v15112_v24 = vadd.f32 %v2960_v54, %v2875_v52  ;;  %v2962_v25 = vpop.f32.mrb[35].mxu1  ;;  %vm3053_vm9 = vcmp.lt.f32.partialorder %v15106_v18, 0.0 }
0x16ba   :  { %v2974_v27 = vand.u32 2147483647, %v15109_v20  ;;  %v15115_v28 = vadd.f32 %v2962_v25, %v2879_v11  ;;  %vm3054_vm10 = vcmp.lt.f32.partialorder %v15109_v20, 0.0 }
0x16bb   :  { %v2977_v29 = vmul.f32 0.3275911, %v2973_v21  ;;  %v15118_v30 = vmul.f32 0.70710677, %v15112_v24  ;;  %v3029_v37 = vsub.f32 0.0, %v2973_v21 }
0x16bc   :  { %v2978_v15 = vmul.f32 0.3275911, %v2974_v27  ;;  %v15121_v31 = vmul.f32 0.70710677, %v15115_v28  ;;  %v3030_v38 = vsub.f32 0.0, %v2974_v27 }
0x16bd   :  { %v2981_v23 = vadd.f32 1.0, %v2977_v29  ;;  %v2975_v33 = vand.u32 2147483647, %v15118_v30  ;;  %v3033_v40 = vmul.f32 %v3029_v37, %v2973_v21  ;;  %vm3055_vm11 = vcmp.lt.f32.partialorder %v15118_v30, 0.0 }
0x16be   :  { %v2982_v34 = vadd.f32 1.0, %v2978_v15  ;;  %v2976_v26 = vand.u32 2147483647, %v15121_v31  ;;  %v3034_v46 = vmul.f32 %v3030_v38, %v2974_v27  ;;  %vm3056_vm12 = vcmp.lt.f32.partialorder %v15121_v31, 0.0 }
0x16bf   :  { %14118 = vrcp.f32 %v2981_v23  ;;  %v2979_v35 = vmul.f32 0.3275911, %v2975_v33  ;;  %v3031_v41 = vsub.f32 0.0, %v2975_v33  ;;  %v3037_v56 = vmul.f32 1.442695, %v3033_v40 }
0x16c0   :  { %14120 = vrcp.f32 %v2982_v34  ;;  %v2980_v36 = vmul.f32 0.3275911, %v2976_v26  ;;  %v3032_v50 = vsub.f32 0.0, %v2976_v26  ;;  %v3039_v32 = vmul.f32 1.442695, %v3034_v46 }
0x16c1   :  { %v2983_v43 = vadd.f32 1.0, %v2979_v35  ;;  %v3035_v57 = vmul.f32 %v3031_v41, %v2975_v33 }
0x16c2   :  { %v2984_v44 = vadd.f32 1.0, %v2980_v36  ;;  %v3036_v59 = vmul.f32 %v3032_v50, %v2976_v26 }
0x16c3   :  { %14122 = vrcp.f32 %v2983_v43  ;;  %v3041_v60 = vmul.f32 1.442695, %v3035_v57 }
0x16c4   :  { %14124 = vrcp.f32 %v2984_v44  ;;  %v3043_v5 = vmul.f32 1.442695, %v3036_v59 }
0x16c5   :  { %14126 = vpow2.f32 %v3037_v56 }
0x16c6   :  { %14128 = vpow2.f32 %v3039_v32 }
0x16c7   :  { %14130 = vpow2.f32 %v3041_v60 }
0x16c8   :  { %14132 = vpow2.f32 %v3043_v5 }
0x16c9   :  { %v14119_v39 = vpop.eup %14118 }
0x16ca   :  { %v14121_v42 = vpop.eup %14120  ;;  %v2993_v45 = vmul.f32 1.0614054, %v14119_v39 }
0x16cb   :  { %v2994_v51 = vmul.f32 1.0614054, %v14121_v42 }
0x16cc   :  { %v2997_v53 = vadd.f32 -1.4531521, %v2993_v45 }
0x16cd   :  { %v14123_v55 = vpop.eup %14122  ;;  %v2998_v58 = vadd.f32 -1.4531521, %v2994_v51 }
0x16ce   :  { %v14125_v61 = vpop.eup %14124  ;;  %v3001_v62 = vmul.f32 %v14119_v39, %v2997_v53  ;;  %v2995_v63 = vmul.f32 1.0614054, %v14123_v55 }
0x16cf   :  { %v3002_v0 = vmul.f32 %v14121_v42, %v2998_v58  ;;  %v2996_v1 = vmul.f32 1.0614054, %v14125_v61  ;;  %v14127_v43 = vpop.eup %14126 }
0x16d0   :  { %v3005_v49 = vadd.f32 1.4214138, %v3001_v62  ;;  %v2999_v2 = vadd.f32 -1.4531521, %v2995_v63  ;;  %v14129_v38 = vpop.eup %14128 }
0x16d1   :  { %v3006_v48 = vadd.f32 1.4214138, %v3002_v0  ;;  %v3000_v3 = vadd.f32 -1.4531521, %v2996_v1  ;;  %v14131_v53 = vpop.eup %14130 }
0x16d2   :  { %v3009_v4 = vmul.f32 %v14119_v39, %v3005_v49  ;;  %v3003_v9 = vmul.f32 %v14123_v55, %v2999_v2  ;;  %v14133_v58 = vpop.eup %14132  ;;  %v2966_v2 = vmul.f32 0.5, %v15103_v17  ;;  %v2967_v17 = vmul.f32 0.5, %v15112_v24 }
0x16d3   :  { %v3010_v52 = vmul.f32 %v14121_v42, %v3006_v48  ;;  %v3004_v11 = vmul.f32 %v14125_v61, %v3000_v3 }
0x16d4   :  { %v3013_v12 = vadd.f32 -0.28449672, %v3009_v4  ;;  %v3007_v14 = vadd.f32 1.4214138, %v3003_v9  ;;  %v2968_v9 = vmul.f32 0.5, %v15115_v28 }
0x16d5   :  { %v3014_v54 = vadd.f32 -0.28449672, %v3010_v52  ;;  %v3008_v21 = vadd.f32 1.4214138, %v3004_v11 }
0x16d6   :  { %v3017_v25 = vmul.f32 %v14119_v39, %v3013_v12  ;;  %v3011_v27 = vmul.f32 %v14123_v55, %v3007_v14  ;;  %v11593_v12 = vld [vmem:[%s16396_s6] ss:$0 sm:$0xff] }
0x16d7   :  { %v3018_v29 = vmul.f32 %v14121_v42, %v3014_v54  ;;  %v3012_v15 = vmul.f32 %v14125_v61, %v3008_v21 }
0x16d8   :  { %v3021_v23 = vadd.f32 0.2548296, %v3017_v25  ;;  %v3015_v33 = vadd.f32 -0.28449672, %v3011_v27 }
0x16d9   :  { %v3022_v34 = vadd.f32 0.2548296, %v3018_v29  ;;  %v3016_v26 = vadd.f32 -0.28449672, %v3012_v15 }
0x16da   :  { %v3025_v35 = vmul.f32 %v14119_v39, %v3021_v23  ;;  %v3019_v36 = vmul.f32 %v14123_v55, %v3015_v33 }
0x16db   :  { %v3026_v44 = vmul.f32 %v14121_v42, %v3022_v34  ;;  %v3020_v37 = vmul.f32 %v14125_v61, %v3016_v26 }
0x16dc   :  { %v3045_v40 = vmul.f32 %v14127_v43, %v3025_v35  ;;  %v3023_v41 = vadd.f32 0.2548296, %v3019_v36 }
0x16dd   :  { %v3046_v45 = vmul.f32 %v14129_v38, %v3026_v44  ;;  %v3024_v46 = vadd.f32 0.2548296, %v3020_v37  ;;  %v11596_v38 = vld [vmem:[%s14460_s3 + $0x40] sm:$0xff] }
0x16de   :  { %v3049_v50 = vsub.f32 1.0, %v3045_v40  ;;  %v3027_v51 = vmul.f32 %v14123_v55, %v3023_v41  ;;  %v11597_v40 = vld [vmem:[%s14460_s3 + $0x48] sm:$0xff] }
0x16df   :  { %v3050_v56 = vsub.f32 1.0, %v3046_v45  ;;  %v3028_v57 = vmul.f32 %v14125_v61, %v3024_v46  ;;  %v2965_v61 = vmul.f32 0.5, %v15101_v13  ;;  %v13577_v41 = vpack.c.bf16 %v11597_v40, %v11596_v38  ;;  %v11612_v45 = vld [vmem:[%s14470_s14 + $0x40] sm:$0xff]  ;;  %v11613_v46 = vld [vmem:[%s14470_s14 + $0x48] sm:$0xff] }
0x16e0   :  { %v3057_v62 = vsub.f32 0.0, %v3049_v50  ;;  %v3047_v32 = vmul.f32 %v14131_v53, %v3027_v51  ;;  %v13609_v51 = vpack.c.bf16 %v11613_v46, %v11612_v45  ;;  %v11599_v53 = vld [vmem:[%s14460_s3 + $0x58] sm:$0xff] }
0x16e1   :  { %v3058_v39 = vsub.f32 0.0, %v3050_v56  ;;  %v3048_v59 = vmul.f32 %v14133_v58, %v3028_v57  ;;  %v11615_v57 = vld [vmem:[%s14470_s14 + $0x58] sm:$0xff]  ;;  %13578 = vmatprep.subr.bf16.mxu1 %v13577_v41 }
0x16e2   :  { %v3061_v63 = vsel %vm3053_vm9, %v3057_v62, %v3049_v50  ;;  %v3051_v42 = vsub.f32 1.0, %v3047_v32  ;;  %v11598_v50 = vld [vmem:[%s14460_s3 + $0x50] sm:$0xff]  ;;  %v11600_v32 = vld [vmem:[%s14460_s3 + $0x60] sm:$0xff]  ;;  %13580 = vmatpush3.bf16.msra.mxu1 %v13577_v41  ;;  %13610 = vmatprep.subr.bf16.mxu0 %v13609_v51 }
0x16e3   :  { %v3065_v0 = vadd.f32 1.0, %v3061_v63  ;;  %v3062_v1 = vsel %vm3054_vm10, %v3058_v39, %v3050_v56  ;;  %v3052_v49 = vsub.f32 1.0, %v3048_v59  ;;  %v11614_v56 = vld [vmem:[%s14470_s14 + $0x50] sm:$0xff]  ;;  %v13581_v58 = vpack.c.bf16 %v11599_v53, %v11598_v50  ;;  %v11601_v39 = vld [vmem:[%s14460_s3 + $0x68] sm:$0xff]  ;;  %v11616_v59 = vld [vmem:[%s14470_s14 + $0x60] sm:$0xff] }
0x16e4   :  { %v3066_v55 = vadd.f32 1.0, %v3062_v1  ;;  %v3059_v60 = vsub.f32 0.0, %v3051_v42  ;;  %v13613_v62 = vpack.c.bf16 %v11615_v57, %v11614_v56  ;;  %v11617_v63 = vld [vmem:[%s14470_s14 + $0x68] sm:$0xff]  ;;  %v11602_v1 = vld [vmem:[%s14460_s3 + $0x70] sm:$0xff] }
0x16e5   :  { %v3060_v48 = vsub.f32 0.0, %v3052_v49  ;;  %v3069_v4 = vmul.f32 %v3065_v0, %v2965_v61  ;;  %13582 = vmatprep.subr.bf16.mxu1 %v13581_v58  ;;  %v13617_v0 = vpack.c.bf16 %v11617_v63, %v11616_v59 }
0x16e6   :  { %v3070_v18 = vmul.f32 %v3066_v55, %v2966_v2  ;;  %v3063_v3 = vsel %vm3055_vm11, %v3059_v60, %v3051_v42  ;;  %v13585_v42 = vpack.c.bf16 %v11601_v39, %v11600_v32  ;;  %13584 = vmatpush3.bf16.msra.mxu1 %v13581_v58  ;;  %v11618_v55 = vld [vmem:[%s14470_s14 + $0x70] sm:$0xff]  ;;  %v11619_v60 = vld [vmem:[%s14470_s14 + $0x78] sm:$0xff]  ;;  %s16401_s14 = sld [smem:[#allocation15_spill]] }
0x16e7   :  { %v3064_v20 = vsel %vm3056_vm12, %v3060_v48, %v3052_v49  ;;  %v3067_v5 = vadd.f32 1.0, %v3063_v3  ;;  %v11603_v49 = vld [vmem:[%s14460_s3 + $0x78] sm:$0xff]  ;;  %v13621_v61 = vpack.c.bf16 %v11619_v60, %v11618_v55  ;;  %v11604_v48 = vld [vmem:[%s14465_s8 + $0x40] sm:$0xff]  ;;  %s16399_s3 = sld [smem:[#allocation13_spill]] }
0x16e8   :  { %3143 = vmatprep.mubr.f32.mxu0 %v3070_v18  ;;  %v3068_v52 = vadd.f32 1.0, %v3064_v20  ;;  %13586 = vmatprep.subr.bf16.mxu1 %v13585_v42  ;;  %v13589_v2 = vpack.c.bf16 %v11603_v49, %v11602_v1  ;;  %v11605_v18 = vld [vmem:[%s14465_s8 + $0x48] sm:$0xff] }
0x16e9   :  { %3144 = vmatmul.mubr.f32.vlgmr.msra.gmra.mrb[16].mxu0 %v3069_v4  ;;  %v3071_v13 = vmul.f32 %v3067_v5, %v2967_v17  ;;  %v13593_v3 = vpack.c.bf16 %v11605_v18, %v11604_v48 }
0x16ea   :  { %v3072_v11 = vmul.f32 %v3068_v52, %v2968_v9  ;;  %13612 = vmatpush3.bf16.msra.mxu0 %v13609_v51  ;;  %13588 = vmatpush3.bf16.msra.mxu1 %v13585_v42 }
0x16eb   :  { %13614 = vmatprep.subr.bf16.mxu0 %v13613_v62  ;;  %13590 = vmatprep.subr.bf16.mxu1 %v13589_v2 }
0x16ec   :  { %3148 = vmatprep.mubr.f32.mxu0 %v3072_v11 }
0x16ed   :  { %3149 = vmatmul.mubr.f32.gmra.mrb[18].mxu0 %v3071_v13  ;;  %v11681_v13 = vld [vmem:[%s14450_s25 + $0x1] ss:$0 sm:$0xff]  ;;  %s16397_s25 = sld [smem:[#allocation14_spill]] }
0x16ee   :  { %13616 = vmatpush3.bf16.msra.mxu0 %v13613_v62  ;;  %13592 = vmatpush3.bf16.msra.mxu1 %v13589_v2 }
0x16ef   :  { %13618 = vmatprep.subr.bf16.mxu0 %v13617_v0  ;;  %13594 = vmatprep.subr.bf16.mxu1 %v13593_v3 }
0x16f2   :  { %13620 = vmatpush3.bf16.msra.mxu0 %v13617_v0 }
0x16f3   :  { %13622 = vmatprep.subr.bf16.mxu0 %v13621_v61 }
0x16f6   :  { %13624 = vmatpush3.bf16.msra.mxu0 %v13621_v61 }
0x16f7   :  { %12830 = vmatprep.subr.mxu0 %v14408_v47 }
0x17bc   :  { %v12147_v30 = vpop.f32.mrb[16].mxu0 }
0x17bd   :  { %v12148_v31 = vpop.f32.mrb[17].mxu0 }
0x17be   :  { %v12149_v14 = vadd.f32 %v12148_v31, %v12147_v30 }
0x17c0   :  { %v3146_v54 = vadd.f32 %v12149_v14, %v11593_v12  ;;  %v12150_v21 = vpop.f32.mrb[18].mxu0 }
0x17c1   :  { %v12151_v25 = vpop.f32.mrb[19].mxu0 }
0x17c2   :  { %v15135_v27 = vadd.f32 %v3146_v54, %v15048_v16  ;;  %v12152_v28 = vadd.f32 %v12151_v25, %v12150_v21  ;;  %v11606_v25 = vld [vmem:[%s14465_s8 + $0x50] sm:$0xff] }
0x17c4   :  { %v3151_v29 = vadd.f32 %v12152_v28, %v11593_v12  ;;  %v3256_v24 = vsel %vm614_vm2, %v15135_v27, 0.0  ;;  %v11682_v12 = vld [vmem:[%s14455_s29 + $0x1] ss:$0 sm:$0xff]  ;;  %v11607_v28 = vld [vmem:[%s14465_s8 + $0x58] sm:$0xff]  ;;  %s16398_s29 = sld [smem:[#allocation12_spill]] }
0x17c5   :  { %3257 = vadd.xlane.f32.xlu1 %v3256_v24 }
0x17c6   :  { %v15140_v15 = vadd.f32 %v3151_v29, %v15053_v19 }
0x17c8   :  { %v3259_v23 = vsel %vm618_vm3, %v15140_v15, 0.0 }
0x17c9   :  { %3260 = vadd.xlane.f32.xlu0 %v3259_v23  ;;  %v13597_v23 = vpack.c.bf16 %v11607_v28, %v11606_v25  ;;  %v11620_v25 = vld [vmem:[%s14475_s19 + $0x40] sm:$0xff]  ;;  %v11621_v28 = vld [vmem:[%s14475_s19 + $0x48] sm:$0xff] }
0x1852   :  { %v3258_v33 = vpop.xlane.xlu1 %3257 }
0x1853   :  { %v3262_v16 = vmul.f32 0.015625, %v3258_v33  ;;  %v11608_v33 = vld [vmem:[%s14465_s8 + $0x60] sm:$0xff] }
0x1855   :  { %v15145_v34 = vsub.f32 %v15135_v27, %v3262_v16  ;;  %v11609_v16 = vld [vmem:[%s14465_s8 + $0x68] sm:$0xff] }
0x1856   :  { %v3261_v26 = vpop.xlane.xlu0 %3260 }
0x1857   :  { %v3263_v35 = vmul.f32 0.015625, %v3261_v26  ;;  %v3266_v19 = vmul.f32 %v15145_v34, %v15145_v34  ;;  %v11610_v26 = vld [vmem:[%s14465_s8 + $0x70] sm:$0xff] }
0x1859   :  { %v15150_v36 = vsub.f32 %v15140_v15, %v3263_v35  ;;  %v3268_v43 = vsel %vm614_vm2, %v3266_v19, 0.0  ;;  %v11611_v35 = vld [vmem:[%s14465_s8 + $0x78] sm:$0xff]  ;;  %s16400_s8 = sld [smem:[#allocation16_spill]] }
0x185a   :  { %3269 = vadd.xlane.f32.xlu1 %v3268_v43  ;;  %v13605_v19 = vpack.c.bf16 %v11611_v35, %v11610_v26 }
0x185b   :  { %v3267_v44 = vmul.f32 %v15150_v36, %v15150_v36 }
0x185d   :  { %v3271_v37 = vsel %vm618_vm3, %v3267_v44, 0.0 }
0x185e   :  { %3272 = vadd.xlane.f32.xlu1 %v3271_v37 }
0x18e7   :  { %v3270_v4 = vpop.xlane.xlu1 %3269 }
0x18e8   :  { %v3274_v20 = vmul.f32 0.015625, %v3270_v4 }
0x18ea   :  { %v3276_v5 = vadd.f32 1e-05, %v3274_v20 }
0x18eb   :  { %v3273_v9 = vpop.xlane.xlu1 %3272 }
0x18ec   :  { %14134 = vrsqrt.f32 %v3276_v5  ;;  %v3275_v52 = vmul.f32 0.015625, %v3273_v9 }
0x18ee   :  { %v3277_v17 = vadd.f32 1e-05, %v3275_v52  ;;  %v11622_v52 = vld [vmem:[%s14475_s19 + $0x50] sm:$0xff] }
0x18f0   :  { %14136 = vrsqrt.f32 %v3277_v17  ;;  %v11623_v17 = vld [vmem:[%s14475_s19 + $0x58] sm:$0xff] }
0x18f6   :  { %v14135_v11 = vpop.eup %14134 }
0x18f7   :  { %v3280_v30 = vmul.f32 %v14135_v11, %v15145_v34  ;;  %v13601_v34 = vpack.c.bf16 %v11609_v16, %v11608_v33  ;;  %v15248_v11 = vpack.c.bf16 %v11623_v17, %v11622_v52 }
0x18f9   :  { %v3288_v31 = vmul.f32 %v11681_v13, %v3280_v30 }
0x18fa   :  { %v14137_v14 = vpop.eup %14136 }
0x18fb   :  { %v3281_v54 = vmul.f32 %v14137_v14, %v15150_v36  ;;  %v3296_v21 = vadd.f32 %v11682_v12, %v3288_v31 }
0x18fd   :  { %v3289_v29 = vmul.f32 %v11681_v13, %v3281_v54  ;;  %12779 = vmatprep.mubr.msk.f32.mxu1 %vm614_vm2, %v3296_v21  ;;  %12817 = vmatprep.mubr.msk.f32.mxu0 %vm614_vm2, %v3296_v21 }
0x18ff   :  { %v3297_v24 = vadd.f32 %v11682_v12, %v3289_v29  ;;  %v15262_v29 = vpack.c.bf16 %v11621_v28, %v11620_v25 }
0x1901   :  { %12780 = vmatmul.mubr.msk.f32.vlgmr.msra.gmra.mrb[36].mxu1 %vm614_vm2, %v3297_v24  ;;  %12818 = vmatmul.mubr.msk.f32.vlgmr.msra.gmra.mrb[20].mxu0 %vm614_vm2, %v3297_v24 }
0x1902   :  { %13596 = vmatpush3.bf16.msra.mxu1 %v13593_v3  ;;  %12798 = vmatprep.mubr.msk.f32.mxu1 %vm614_vm2, %v3296_v21 }
0x1903   :  { %13598 = vmatprep.subr.bf16.mxu1 %v13597_v23  ;;  %12832 = vmatprep.mubr.msk.f32.mxu0 %vm14409_vm4, %v14408_v47 }
0x1906   :  { %13600 = vmatpush3.bf16.msra.mxu1 %v13597_v23 }
0x1907   :  { %13602 = vmatprep.subr.bf16.mxu1 %v13601_v34 }
0x190a   :  { %13604 = vmatpush3.bf16.msra.mxu1 %v13601_v34 }
0x190b   :  { %13606 = vmatprep.subr.bf16.mxu1 %v13605_v19 }
0x190e   :  { %13608 = vmatpush3.bf16.msra.mxu1 %v13605_v19 }
0x190f   :  { %12820 = vmatprep.subr.mxu1 %v14408_v47 }
0x1911   :  { %12799 = vmatmul.mubr.msk.f32.vlgmr.msra.gmra.mrb[38].mxu1 %vm614_vm2, %v3297_v24 }
0x1912   :  { %12822 = vmatprep.mubr.msk.f32.mxu1 %vm14409_vm4, %v14408_v47 }
0x19d4   :  { %v15196_v36 = vpop.f32.mrb[36].mxu1  ;;  %v12819_v43 = vpop.f32.mrb[20].mxu0 }
0x19d5   :  { %v4581_v44 = vrot.slane %v12819_v43, 5  ;;  %v3370_v37 = vpop.f32.mrb[37].mxu1  ;;  %v15198_v38 = vpop.f32.mrb[21].mxu0 }
0x19d6   :  { %v4580_v40 = vrot.slane %v15198_v38, 5  ;;  %v15211_v53 = vmul.f32 0.125, %v3370_v37 }
0x19d8   :  { %v15202_v41 = vsel %vm1851_vm5, %v4580_v40, %v4581_v44  ;;  %v11624_v40 = vld [vmem:[%s14475_s19 + $0x60] sm:$0xff] }
0x19e4   :  { %v12800_v45 = vpop.f32.mrb[38].mxu1 }
0x19e5   :  { %v4492_v46 = vrot.slane %v12800_v45, 5  ;;  %v15204_v50 = vpop.f32.mrb[39].mxu1  ;;  %v11625_v45 = vld [vmem:[%s14475_s19 + $0x68] sm:$0xff] }
0x19e6   :  { %v4491_v51 = vrot.slane %v15204_v50, 5  ;;  %3696 = vrot.lane.b32.xlu1 %v15204_v50, %s14410_s0  ;;  %12821 = vmatpush3.xpose.msk.msra.mxu1 %vm892_vm6, %v15204_v50 }
0x19e7   :  { %12825 = vmatprep.subr.mxu1 %v14408_v47 }
0x19e8   :  { %v15215_v56 = vsel %vm1851_vm5, %v4491_v51, %v4492_v46  ;;  %v15284_v46 = vpack.c.bf16 %v11625_v45, %v11624_v40 }
0x19e9   :  { %12823 = vmatmul.mubr.msk.f32.vlgmr.msra.gmra.mrb[40].mxu1 %vm892_vm6, %v15211_v53 }
0x19ea   :  { %3694 = vrot.lane.b32.xlu1 %v15211_v53, %s14410_s0  ;;  %12826 = vmatpush3.msk.msra.mxu1 %vm525_vm1, %v15198_v38 }
0x19eb   :  { %12827 = vmatprep.mubr.msk.f32.mxu1 %vm14409_vm4, %v14408_v47  ;;  %12835 = vmatprep.subr.mxu1 %v14408_v47 }
0x1a58   :  { %v3697_v57 = vpop.permute.xlu1 %3696 }
0x1a59   :  { %12831 = vmatpush3.xpose.msk.msra.mxu0 %vm892_vm6, %v3697_v57 }
0x1a5a   :  { %13625 = vmatprep.subr.bf16.mxu0 %v14412_v22 }
0x1a5c   :  { %v3695_v58 = vpop.permute.xlu1 %3694 }
0x1a5d   :  { %12833 = vmatmul.mubr.msk.f32.vlgmr.msra.gmra.mrb[22].mxu0 %vm892_vm6, %v3695_v58 }
0x1a5e   :  { %12844 = vmatprep.mubr.msk.f32.mxu0 %vm14409_vm4, %v14408_v47  ;;  %13627 = vmatpush3.bf16.msra.mxu0 %v15248_v11 }
0x1a5f   :  { %13628 = vmatprep.subr.bf16.mxu0 %v14412_v22 }
0x1abc   :  { %v3603_v62 = vpop.f32.mrb[40].mxu1 }
0x1abd   :  { %v12824_v32 = vpop.f32.mrb[41].mxu1  ;;  %v3607_v39 = vsel %vm969_vm7, %v3603_v62, -inf }
0x1abe   :  { %3608 = vmax.xlane.f32.xlu0 %v3607_v39 }
0x1ad4   :  { %3783 = vrot.lane.b32.xlu0 %v15198_v38, %s14410_s0 }
0x1b30   :  { %v3768_v59 = vpop.f32.mrb[22].mxu0 }
0x1b31   :  { %v12834_v63 = vpop.f32.mrb[23].mxu0  ;;  %v3772_v42 = vsel %vm969_vm7, %v3768_v59, -inf }
0x1b32   :  { %3773 = vmax.xlane.f32.xlu1 %v3772_v42 }
0x1b43   :  { %4006 = vrot.lane.b32.xlu1 %v15211_v53, %s14411_s5 }
0x1b4b   :  { %v3609_v0 = vpop.xlane.xlu0 %3608 }
0x1b4c   :  { %v3610_v1 = vsub.f32 %v3603_v62, %v3609_v0  ;;  %v3380_v62 = vmul.f32 0.125, %v15196_v36 }
0x1b4e   :  { %v3611_v49 = vmul.f32 1.442695, %v3610_v1 }
0x1b4f   :  { %v3784_v4 = vpop.permute.xlu0 %3783 }
0x1b50   :  { %14138 = vpow2.f32 %v3611_v49 }
0x1b5a   :  { %v14139_v2 = vpop.eup %14138 }
0x1b5b   :  { %v3613_v55 = vsel %vm969_vm7, %v14139_v2, 0.0 }
0x1b5c   :  { %3614 = vadd.xlane.f32.xlu0 %v3613_v55 }
0x1bbf   :  { %v3774_v60 = vpop.xlane.xlu1 %3773 }
0x1bc0   :  { %v3775_v61 = vsub.f32 %v3768_v59, %v3774_v60  ;;  %v4487_v59 = vrot.slane %v15211_v53, 5 }
0x1bc2   :  { %v3776_v48 = vmul.f32 1.442695, %v3775_v61 }
0x1bc3   :  { %v4007_v14 = vpop.permute.xlu1 %4006 }
0x1bc4   :  { %14140 = vpow2.f32 %v3776_v48 }
0x1bce   :  { %v14141_v18 = vpop.eup %14140 }
0x1bcf   :  { %v3778_v3 = vsel %vm969_vm7, %v14141_v18, 0.0 }
0x1bd0   :  { %3779 = vadd.xlane.f32.xlu0 %v3778_v3 }
0x1be6   :  { %4008 = vrot.lane.b32.xlu0 %v15204_v50, %s14411_s5 }
0x1be9   :  { %v3615_v20 = vpop.xlane.xlu0 %3614 }
0x1bea   :  { %14142 = vrcp.f32 %v3615_v20 }
0x1bf4   :  { %v14143_v5 = vpop.eup %14142 }
0x1bf5   :  { %v3617_v9 = vmul.f32 %v14143_v5, %v14139_v2 }
0x1bf7   :  { %12828 = vmatmul.mubr.msk.f32.vlgmr.msra.gmra.mrb[42].mxu1 %vm981_vm8, %v3617_v9 }
0x1bf8   :  { %12836 = vmatpush3.msk.msra.mxu1 %vm525_vm1, %v3784_v4  ;;  %12837 = vmatprep.mubr.msk.f32.mxu1 %vm14409_vm4, %v14408_v47 }
0x1bf9   :  { %12854 = vmatprep.subr.mxu1 %v14408_v47 }
0x1c5d   :  { %v3780_v13 = vpop.xlane.xlu0 %3779 }
0x1c5e   :  { %14144 = vrcp.f32 %v3780_v13 }
0x1c61   :  { %v4009_v31 = vpop.permute.xlu0 %4008 }
0x1c68   :  { %v14145_v30 = vpop.eup %14144 }
0x1c69   :  { %v3782_v12 = vmul.f32 %v14145_v30, %v14141_v18  ;;  %v11626_v30 = vld [vmem:[%s14475_s19 + $0x70] sm:$0xff] }
0x1c6b   :  { %12838 = vmatmul.mubr.msk.f32.vlgmr.msra.gmra.mrb[44].mxu1 %vm981_vm8, %v3782_v12  ;;  %v11627_v12 = vld [vmem:[%s14475_s19 + $0x78] sm:$0xff]  ;;  %s16402_s19 = sld [smem:[#allocation18_spill]] }
0x1c6c   :  { %12855 = vmatpush3.xpose.msk.msra.mxu1 %vm892_vm6, %v4009_v31  ;;  %12856 = vmatprep.mubr.msk.f32.mxu1 %vm14409_vm4, %v14408_v47 }
0x1c6d   :  { %12859 = vmatprep.subr.mxu1 %v14408_v47 }
0x1c6f   :  { %12857 = vmatmul.mubr.msk.f32.vlgmr.msra.gmra.mrb[46].mxu1 %vm892_vm6, %v4007_v14  ;;  %v15328_v14 = vpack.c.bf16 %v11627_v12, %v11626_v30 }
0x1c70   :  { %12861 = vmatprep.mubr.msk.f32.mxu1 %vm14409_vm4, %v14408_v47 }
0x1cca   :  { %v3690_v54 = vpop.f32.mrb[42].mxu1 }
0x1ccb   :  { %v12829_v21 = vpop.f32.mrb[43].mxu1 }
0x1d3e   :  { %v3856_v24 = vpop.f32.mrb[44].mxu1 }
0x1d3f   :  { %v12839_v23 = vpop.f32.mrb[45].mxu1  ;;  %12845 = vmatmul.mubr.msk.f32.vlgmr.msra.gmra.mrb[24].mxu0 %vm892_vm6, %v3856_v24 }
0x1d40   :  { %13630 = vmatpush3.bf16.msra.mxu0 %v15262_v29  ;;  %12851 = vmatprep.mubr.msk.f32.mxu0 %vm14409_vm4, %v14408_v47 }
0x1d41   :  { %13631 = vmatprep.subr.bf16.mxu0 %v14412_v22 }
0x1d42   :  { %v4080_v33 = vpop.f32.mrb[46].mxu1 }
0x1d43   :  { %v12858_v16 = vpop.f32.mrb[47].mxu1  ;;  %v4084_v34 = vsel %vm969_vm7, %v4080_v33, -inf }
0x1d44   :  { %4085 = vmax.xlane.f32.xlu0 %v4084_v34 }
0x1d47   :  { %12852 = vmatmul.mubr.msk.f32.vlgmr.msra.gmra.mrb[24].mxu0 %vm892_vm6, %v3690_v54 }
0x1d48   :  { %12868 = vmatprep.mubr.msk.f32.mxu0 %vm14409_vm4, %v14408_v47  ;;  %13633 = vmatpush3.bf16.msra.mxu0 %v15284_v46 }
0x1d49   :  { %12876 = vmatprep.subr.mxu0 %v14408_v47 }
0x1d5a   :  { %4095 = vrot.lane.b32.xlu0 %v15198_v38, %s14411_s5 }
0x1d5e   :  { %4246 = vrot.lane.b32.xlu0 %v15211_v53, %s14413_s9 }
0x1dd1   :  { %v4086_v26 = vpop.xlane.xlu0 %4085 }
0x1dd2   :  { %v4087_v35 = vsub.f32 %v4080_v33, %v4086_v26 }
0x1dd4   :  { %v4088_v19 = vmul.f32 1.442695, %v4087_v35 }
0x1dd5   :  { %v4096_v43 = vpop.permute.xlu0 %4095 }
0x1dd6   :  { %14146 = vpow2.f32 %v4088_v19  ;;  %12860 = vmatpush3.msk.msra.mxu1 %vm525_vm1, %v4096_v43 }
0x1dd7   :  { %12871 = vmatprep.subr.mxu1 %v14408_v47 }
0x1dd9   :  { %v4247_v39 = vpop.permute.xlu0 %4246 }
0x1de0   :  { %v14147_v44 = vpop.eup %14146 }
0x1de1   :  { %v4090_v37 = vsel %vm969_vm7, %v14147_v44, 0.0 }
0x1de2   :  { %4091 = vadd.xlane.f32.xlu1 %v4090_v37 }
0x1df3   :  { %4248 = vrot.lane.b32.xlu1 %v15204_v50, %s14413_s9  ;;  %v4488_v50 = vrot.slane %v3380_v62, 5 }
0x1df5   :  { %v15302_v36 = vsel %vm1851_vm5, %v4487_v59, %v4488_v50 }
0x1e6f   :  { %v4092_v51 = vpop.xlane.xlu1 %4091 }
0x1e70   :  { %14148 = vrcp.f32 %v4092_v51 }
0x1e73   :  { %v4249_v32 = vpop.permute.xlu1 %4248 }
0x1e7a   :  { %v14149_v57 = vpop.eup %14148 }
0x1e7b   :  { %v4094_v58 = vmul.f32 %v14149_v57, %v14147_v44 }
0x1e7d   :  { %12862 = vmatmul.mubr.msk.f32.vlgmr.msra.gmra.mrb[48].mxu1 %vm981_vm8, %v4094_v58 }
0x1e7e   :  { %12872 = vmatpush3.xpose.msk.msra.mxu1 %vm892_vm6, %v4249_v32  ;;  %12873 = vmatprep.mubr.msk.f32.mxu1 %vm14409_vm4, %v14408_v47 }
0x1e7f   :  { %12888 = vmatprep.subr.mxu1 %v14408_v47 }
0x1e81   :  { %12874 = vmatmul.mubr.msk.f32.vlgmr.msra.gmra.mrb[50].mxu1 %vm892_vm6, %v4247_v39 }
0x1e82   :  { %12889 = vmatpush3.xpose.msk.msra.mxu1 %vm892_vm6, %v15215_v56  ;;  %12890 = vmatprep.mubr.msk.f32.mxu1 %vm14409_vm4, %v14408_v47 }
0x1e83   :  { %12893 = vmatprep.subr.mxu1 %v14408_v47 }
0x1e85   :  { %12891 = vmatmul.mubr.msk.f32.vlgmr.msra.gmra.mrb[52].mxu1 %vm892_vm6, %v15302_v36 }
0x1e86   :  { %12894 = vmatpush3.msk.msra.mxu1 %vm525_vm1, %v15202_v41  ;;  %12895 = vmatprep.mubr.msk.f32.mxu1 %vm14409_vm4, %v14408_v47 }
0x1e87   :  { %12903 = vmatprep.subr.mxu1 %v14408_v47 }
0x1f50   :  { %v4168_v53 = vpop.f32.mrb[48].mxu1 }
0x1f51   :  { %v12863_v63 = vpop.f32.mrb[49].mxu1  ;;  %12869 = vmatmul.mubr.msk.f32.vlgmr.msra.gmra.mrb[24].mxu0 %vm892_vm6, %v4168_v53 }
0x1f52   :  { %12878 = vmatprep.mubr.msk.f32.mxu0 %vm14409_vm4, %v14408_v47 }
0x1f54   :  { %v4320_v42 = vpop.f32.mrb[50].mxu1 }
0x1f55   :  { %v12875_v0 = vpop.f32.mrb[51].mxu1  ;;  %v4324_v1 = vsel %vm969_vm7, %v4320_v42, -inf }
0x1f56   :  { %4325 = vmax.xlane.f32.xlu0 %v4324_v1 }
0x1f58   :  { %v4564_v49 = vpop.f32.mrb[52].mxu1 }
0x1f59   :  { %v12892_v2 = vpop.f32.mrb[53].mxu1  ;;  %v4568_v55 = vsel %vm969_vm7, %v4564_v49, -inf }
0x1f6c   :  { %4335 = vrot.lane.b32.xlu0 %v15198_v38, %s14413_s9 }
0x1f70   :  { %4658 = vrot.lane.b32.xlu0 %v15302_v36, %s14410_s0 }
0x1f8f   :  { %4569 = vmax.xlane.f32.xlu0 %v4568_v55 }
0x1fe3   :  { %v4326_v60 = vpop.xlane.xlu0 %4325 }
0x1fe4   :  { %v4327_v61 = vsub.f32 %v4320_v42, %v4326_v60 }
0x1fe6   :  { %v4328_v48 = vmul.f32 1.442695, %v4327_v61 }
0x1fe7   :  { %v4336_v18 = vpop.permute.xlu0 %4335 }
0x1fe8   :  { %14150 = vpow2.f32 %v4328_v48  ;;  %12877 = vmatpush3.msk.msra.mxu0 %vm525_vm1, %v4336_v18 }
0x1fe9   :  { %13634 = vmatprep.subr.bf16.mxu0 %v14412_v22 }
0x1feb   :  { %v4659_v4 = vpop.permute.xlu0 %4658 }
0x1ff2   :  { %v14151_v3 = vpop.eup %14150 }
0x1ff3   :  { %v4330_v38 = vsel %vm969_vm7, %v14151_v3, 0.0 }
0x1ff4   :  { %4331 = vadd.xlane.f32.xlu1 %v4330_v38 }
0x2005   :  { %4660 = vrot.lane.b32.xlu1 %v15215_v56, %s14410_s0 }
0x201c   :  { %v4570_v20 = vpop.xlane.xlu0 %4569 }
0x201d   :  { %v4571_v5 = vsub.f32 %v4564_v49, %v4570_v20 }
0x201f   :  { %v4572_v9 = vmul.f32 1.442695, %v4571_v5 }
0x2021   :  { %14152 = vpow2.f32 %v4572_v9 }
0x202b   :  { %v14153_v52 = vpop.eup %14152 }
0x202c   :  { %v4574_v17 = vsel %vm969_vm7, %v14153_v52, 0.0 }
0x202d   :  { %4575 = vadd.xlane.f32.xlu0 %v4574_v17 }
0x2081   :  { %v4332_v13 = vpop.xlane.xlu1 %4331 }
0x2082   :  { %14154 = vrcp.f32 %v4332_v13 }
0x2085   :  { %v4661_v23 = vpop.permute.xlu1 %4660 }
0x208c   :  { %v14155_v31 = vpop.eup %14154 }
0x208d   :  { %v4334_v54 = vmul.f32 %v14155_v31, %v14151_v3 }
0x208f   :  { %12879 = vmatmul.mubr.msk.f32.vlgmr.msra.gmra.mrb[26].mxu0 %vm981_vm8, %v4334_v54 }
0x2090   :  { %13636 = vmatpush3.bf16.msra.mxu0 %v15328_v14  ;;  %12885 = vmatprep.mubr.msk.f32.mxu0 %vm14409_vm4, %v14408_v47 }
0x2091   :  { %12898 = vmatprep.subr.mxu0 %v14408_v47 }
0x20ba   :  { %v4576_v21 = vpop.xlane.xlu0 %4575 }
0x20bb   :  { %14156 = vrcp.f32 %v4576_v21 }
0x20c5   :  { %v14157_v25 = vpop.eup %14156 }
0x20c6   :  { %v4578_v28 = vmul.f32 %v14157_v25, %v14153_v52 }
0x20c8   :  { %12896 = vmatmul.mubr.msk.f32.vlgmr.msra.gmra.mrb[54].mxu1 %vm981_vm8, %v4578_v28 }
0x20c9   :  { %12905 = vmatprep.mubr.msk.f32.mxu1 %vm14409_vm4, %v14408_v47 }
0x2162   :  { %v4408_v24 = vpop.f32.mrb[26].mxu0 }
0x2163   :  { %v12880_v33 = vpop.f32.mrb[27].mxu0  ;;  %12886 = vmatmul.mubr.msk.f32.vlgmr.msra.gmra.mrb[24].mxu0 %vm892_vm6, %v4408_v24 }
0x2164   :  { %12899 = vmatpush3.xpose.msk.msra.mxu0 %vm892_vm6, %v4661_v23  ;;  %12900 = vmatprep.mubr.msk.f32.mxu0 %vm14409_vm4, %v14408_v47  ;;  %v11729_v23 = vld [vmem:[%s14480_s24 + $0x1] ss:$0 sm:$0xff]  ;;  %s16403_s24 = sld [smem:[#allocation17_spill]] }
0x2165   :  { %13637 = vmatprep.subr.bf16.mxu0 %v14412_v22 }
0x2167   :  { %12901 = vmatmul.mubr.msk.f32.vlgmr.msra.gmra.mrb[28].mxu0 %vm892_vm6, %v4659_v4 }
0x2168   :  { %13639 = vmatpush3.bf16.msra.mxu0 %v15248_v11  ;;  %12912 = vmatprep.mubr.msk.f32.mxu0 %vm14409_vm4, %v14408_v47 }
0x2169   :  { %13640 = vmatprep.subr.bf16.mxu0 %v14412_v22 }
0x219b   :  { %v4654_v16 = vpop.f32.mrb[54].mxu1 }
0x219c   :  { %v12897_v34 = vpop.f32.mrb[55].mxu1 }
0x2236   :  { %v15348_v26 = vpop.f32.mrb[24].mxu0 }
0x2237   :  { %v12887_v35 = vpop.f32.mrb[25].mxu0 }
0x223a   :  { %v4732_v19 = vpop.f32.mrb[28].mxu0 }
0x223b   :  { %v12902_v43 = vpop.f32.mrb[29].mxu0  ;;  %v4736_v44 = vsel %vm969_vm7, %v4732_v19, -inf }
0x223c   :  { %4737 = vmax.xlane.f32.xlu1 %v4736_v44 }
0x224d   :  { %4972 = vrot.lane.b32.xlu1 %v15215_v56, %s14411_s5 }
0x2251   :  { %4970 = vrot.lane.b32.xlu1 %v15302_v36, %s14411_s5 }
0x22c9   :  { %v4738_v11 = vpop.xlane.xlu1 %4737 }
0x22ca   :  { %v4739_v37 = vsub.f32 %v4732_v19, %v4738_v11 }
0x22cc   :  { %v4740_v40 = vmul.f32 1.442695, %v4739_v37 }
0x22cd   :  { %v4973_v32 = vpop.permute.xlu1 %4972 }
0x22ce   :  { %14158 = vpow2.f32 %v4740_v40  ;;  %v11634_v40 = vld [vmem:[%s14495_s12 + $0x98] sm:$0xff] }
0x22d1   :  { %v4971_v39 = vpop.permute.xlu1 %4970 }
0x22d8   :  { %v14159_v45 = vpop.eup %14158 }
0x22d9   :  { %v4742_v51 = vsel %vm969_vm7, %v14159_v45, 0.0 }
0x22da   :  { %4743 = vadd.xlane.f32.xlu0 %v4742_v51  ;;  %v11631_v51 = vld [vmem:[%s14495_s12 + $0x80] sm:$0xff] }
0x22f0   :  { %4747 = vrot.lane.b32.xlu0 %v15202_v41, %s14410_s0 }
0x2367   :  { %v4744_v57 = vpop.xlane.xlu0 %4743 }
0x2368   :  { %14160 = vrcp.f32 %v4744_v57  ;;  %v11633_v57 = vld [vmem:[%s14495_s12 + $0x90] sm:$0xff] }
0x236b   :  { %v4748_v58 = vpop.permute.xlu0 %4747 }
0x236c   :  { %12904 = vmatpush3.msk.msra.mxu1 %vm525_vm1, %v4748_v58  ;;  %v13651_v58 = vpack.c.bf16 %v11633_v57, %v11631_v51  ;;  %v11656_v51 = vld [vmem:[%s16394_s17 + $0x140] sm:$0xff]  ;;  %v11657_v57 = vld [vmem:[%s16394_s17 + $0x148] sm:$0xff] }
0x236d   :  { %12922 = vmatprep.subr.mxu1 %v14408_v47 }
0x2372   :  { %v14161_v62 = vpop.eup %14160 }
0x2373   :  { %v4746_v50 = vmul.f32 %v14161_v62, %v14159_v45  ;;  %v11636_v62 = vld [vmem:[%s14495_s12 + $0xa8] sm:$0xff] }
0x2375   :  { %12906 = vmatmul.mubr.msk.f32.vlgmr.msra.gmra.mrb[56].mxu1 %vm981_vm8, %v4746_v50 }
0x2376   :  { %12923 = vmatpush3.xpose.msk.msra.mxu1 %vm892_vm6, %v4973_v32  ;;  %12924 = vmatprep.mubr.msk.f32.mxu1 %vm14409_vm4, %v14408_v47  ;;  %v11638_v32 = vld [vmem:[%s14495_s12 + $0xb8] sm:$0xff] }
0x2377   :  { %12927 = vmatprep.subr.mxu1 %v14408_v47  ;;  %v13653_v50 = vpack.c.bf16 %v11638_v32, %v11636_v62  ;;  %v11674_v62 = vld [vmem:[%s16394_s17 + $0x1d0] sm:$0xff]  ;;  %v11675_v32 = vld [vmem:[%s16394_s17 + $0x1d8] sm:$0xff] }
0x2379   :  { %12925 = vmatmul.mubr.msk.f32.vlgmr.msra.gmra.mrb[58].mxu1 %vm892_vm6, %v4971_v39  ;;  %v11635_v39 = vld [vmem:[%s14495_s12 + $0xa0] sm:$0xff] }
0x237a   :  { %12929 = vmatprep.mubr.msk.f32.mxu1 %vm14409_vm4, %v14408_v47 }
0x2448   :  { %v4820_v59 = vpop.f32.mrb[56].mxu1 }
0x2449   :  { %v12907_v53 = vpop.f32.mrb[57].mxu1  ;;  %12913 = vmatmul.mubr.msk.f32.vlgmr.msra.gmra.mrb[30].mxu0 %vm892_vm6, %v4820_v59  ;;  %v11637_v59 = vld [vmem:[%s14495_s12 + $0xb0] sm:$0xff] }
0x244a   :  { %13642 = vmatpush3.bf16.msra.mxu0 %v15262_v29  ;;  %12919 = vmatprep.mubr.msk.f32.mxu0 %vm14409_vm4, %v14408_v47  ;;  %v13655_v53 = vpack.c.bf16 %v11637_v59, %v11635_v39  ;;  %v11658_v39 = vld [vmem:[%s16394_s17 + $0x150] sm:$0xff]  ;;  %v11659_v59 = vld [vmem:[%s16394_s17 + $0x158] sm:$0xff] }
0x244b   :  { %13643 = vmatprep.subr.bf16.mxu0 %v14412_v22 }
0x244c   :  { %v5044_v63 = vpop.f32.mrb[58].mxu1 }
0x244d   :  { %v12926_v42 = vpop.f32.mrb[59].mxu1  ;;  %v5048_v0 = vsel %vm969_vm7, %v5044_v63, -inf }
0x244e   :  { %5049 = vmax.xlane.f32.xlu0 %v5048_v0  ;;  %v11642_v42 = vld [vmem:[%s14495_s12 + $0xd8] sm:$0xff] }
0x2451   :  { %12920 = vmatmul.mubr.msk.f32.vlgmr.msra.gmra.mrb[30].mxu0 %vm892_vm6, %v4654_v16 }
0x2452   :  { %13645 = vmatpush3.bf16.msra.mxu0 %v15284_v46  ;;  %12936 = vmatprep.mubr.msk.f32.mxu0 %vm14409_vm4, %v14408_v47 }
0x2453   :  { %12944 = vmatprep.subr.mxu0 %v14408_v47 }
0x2464   :  { %5059 = vrot.lane.b32.xlu0 %v15202_v41, %s14411_s5 }
0x2468   :  { %5210 = vrot.lane.b32.xlu0 %v15302_v36, %s14413_s9 }
0x24db   :  { %v5050_v29 = vpop.xlane.xlu0 %5049 }
0x24dc   :  { %v5051_v1 = vsub.f32 %v5044_v63, %v5050_v29  ;;  %v11640_v63 = vld [vmem:[%s14495_s12 + $0xc8] sm:$0xff]  ;;  %v11639_v29 = vld [vmem:[%s14495_s12 + $0xc0] sm:$0xff] }
0x24dd   :  { %v13657_v0 = vpack.c.bf16 %v11642_v42, %v11640_v63  ;;  %v11676_v63 = vld [vmem:[%s16394_s17 + $0x1e0] sm:$0xff]  ;;  %v11677_v42 = vld [vmem:[%s16394_s17 + $0x1e8] sm:$0xff] }
0x24de   :  { %v5052_v49 = vmul.f32 1.442695, %v5051_v1  ;;  %v11641_v1 = vld [vmem:[%s14495_s12 + $0xd0] sm:$0xff] }
0x24df   :  { %v5060_v2 = vpop.permute.xlu0 %5059 }
0x24e0   :  { %14162 = vpow2.f32 %v5052_v49  ;;  %12928 = vmatpush3.msk.msra.mxu1 %vm525_vm1, %v5060_v2  ;;  %v13659_v49 = vpack.c.bf16 %v11641_v1, %v11639_v29  ;;  %v11644_v2 = vld [vmem:[%s14495_s12 + $0xe8] sm:$0xff]  ;;  %v11660_v29 = vld [vmem:[%s16394_s17 + $0x160] sm:$0xff] }
0x24e1   :  { %12939 = vmatprep.subr.mxu1 %v14408_v47  ;;  %v11661_v1 = vld [vmem:[%s16394_s17 + $0x168] sm:$0xff] }
0x24e3   :  { %v5211_v18 = vpop.permute.xlu0 %5210 }
0x24ea   :  { %v14163_v46 = vpop.eup %14162 }
0x24eb   :  { %v5054_v55 = vsel %vm969_vm7, %v14163_v46, 0.0 }
0x24ec   :  { %5055 = vadd.xlane.f32.xlu1 %v5054_v55  ;;  %v11643_v55 = vld [vmem:[%s14495_s12 + $0xe0] sm:$0xff] }
0x24fd   :  { %5212 = vrot.lane.b32.xlu1 %v15215_v56, %s14413_s9 }
0x2579   :  { %v5056_v60 = vpop.xlane.xlu1 %5055 }
0x257a   :  { %14164 = vrcp.f32 %v5056_v60 }
0x257d   :  { %v5213_v48 = vpop.permute.xlu1 %5212 }
0x2584   :  { %v14165_v61 = vpop.eup %14164 }
0x2585   :  { %v5058_v36 = vmul.f32 %v14165_v61, %v14163_v46  ;;  %v11646_v46 = vld [vmem:[%s14495_s12 + $0xf8] sm:$0xff]  ;;  %v11645_v61 = vld [vmem:[%s14495_s12 + $0xf0] sm:$0xff] }
0x2586   :  { %v13661_v60 = vpack.c.bf16 %v11646_v46, %v11644_v2  ;;  %v11678_v2 = vld [vmem:[%s16394_s17 + $0x1f0] sm:$0xff]  ;;  %v11679_v46 = vld [vmem:[%s16394_s17 + $0x1f8] sm:$0xff] }
0x2587   :  { %12930 = vmatmul.mubr.msk.f32.vlgmr.msra.gmra.mrb[60].mxu1 %vm981_vm8, %v5058_v36  ;;  %v13663_v36 = vpack.c.bf16 %v11645_v61, %v11643_v55  ;;  %v13693_v55 = vpack.c.bf16 %v11679_v46, %v11678_v2  ;;  %v11663_v61 = vld [vmem:[%s16394_s17 + $0x178] sm:$0xff] }
0x2588   :  { %12940 = vmatpush3.xpose.msk.msra.mxu1 %vm892_vm6, %v5213_v48  ;;  %12941 = vmatprep.mubr.msk.f32.mxu1 %vm14409_vm4, %v14408_v47 }
0x258b   :  { %12942 = vmatmul.mubr.msk.f32.vlgmr.msra.gmra.mrb[62].mxu1 %vm892_vm6, %v5211_v18 }
0x258c   :  { %5587 = vmatprep.mubr.f32.mxu1 %v14408_v47 }
0x265a   :  { %v5132_v3 = vpop.f32.mrb[60].mxu1 }
0x265b   :  { %v12931_v38 = vpop.f32.mrb[61].mxu1  ;;  %12937 = vmatmul.mubr.msk.f32.vlgmr.msra.gmra.mrb[30].mxu0 %vm892_vm6, %v5132_v3 }
0x265c   :  { %12946 = vmatprep.mubr.msk.f32.mxu0 %vm14409_vm4, %v14408_v47 }
0x265e   :  { %v5284_v56 = vpop.f32.mrb[62].mxu1 }
0x265f   :  { %v12943_v4 = vpop.f32.mrb[63].mxu1  ;;  %v5288_v20 = vsel %vm969_vm7, %v5284_v56, -inf }
0x2660   :  { %5289 = vmax.xlane.f32.xlu1 %v5288_v20  ;;  %v15439_v20 = vld [vmem:[%s16393_s13 + $0x1] ss:$0 sm:$0xff] }
0x26ed   :  { %v5290_v5 = vpop.xlane.xlu1 %5289 }
0x26ee   :  { %v5291_v9 = vsub.f32 %v5284_v56, %v5290_v5  ;;  %v15436_v56 = vld [vmem:[%s14485_s30 + $0x1] ss:$0 sm:$0xff]  ;;  %s16404_s30 = sld [smem:[#allocation19_spill]] }
0x26f0   :  { %v5292_v52 = vmul.f32 1.442695, %v5291_v9 }
0x26f2   :  { %14166 = vpow2.f32 %v5292_v52  ;;  %v11664_v52 = vld [vmem:[%s16394_s17 + $0x180] sm:$0xff] }
0x26fc   :  { %v14167_v17 = vpop.eup %14166 }
0x26fd   :  { %v5294_v13 = vsel %vm969_vm7, %v14167_v17, 0.0  ;;  %vm6548_vm7 = vcmask 64512  }
0x26fe   :  { %5295 = vadd.xlane.f32.xlu0 %v5294_v13 }
0x2714   :  { %5299 = vrot.lane.b32.xlu0 %v15202_v41, %s14413_s9 }
0x278b   :  { %v5296_v30 = vpop.xlane.xlu0 %5295 }
0x278c   :  { %14168 = vrcp.f32 %v5296_v30  ;;  %v11648_v30 = vld [vmem:[%s16394_s17 + $0x100] sm:$0xff] }
0x278f   :  { %v5300_v12 = vpop.permute.xlu0 %5299 }
0x2790   :  { %12945 = vmatpush3.msk.msra.mxu0 %vm525_vm1, %v5300_v12  ;;  %v11649_v12 = vld [vmem:[%s16394_s17 + $0x108] sm:$0xff] }
0x2791   :  { %13646 = vmatprep.subr.bf16.mxu0 %v14412_v22 }
0x2796   :  { %v14169_v31 = vpop.eup %14168 }
0x2797   :  { %v5298_v54 = vmul.f32 %v14169_v31, %v14167_v17  ;;  %v11665_v17 = vld [vmem:[%s16394_s17 + $0x188] sm:$0xff]  ;;  %v13667_v31 = vpack.c.bf16 %v11649_v12, %v11648_v30 }
0x2798   :  { %v13665_v13 = vpack.c.bf16 %v11665_v17, %v11664_v52 }
0x2799   :  { %12947 = vmatmul.mubr.msk.f32.vlgmr.msra.gmra.mrb[32].mxu0 %vm981_vm8, %v5298_v54  ;;  %v11666_v54 = vld [vmem:[%s16394_s17 + $0x190] sm:$0xff] }
0x279a   :  { %13648 = vmatpush3.bf16.msra.mxu0 %v15328_v14  ;;  %12953 = vmatprep.mubr.msk.f32.mxu0 %vm14409_vm4, %v14408_v47 }
0x279b   :  { %13666 = vmatprep.subr.bf16.mxu0 %v13665_v13 }
0x286c   :  { %v5372_v21 = vpop.f32.mrb[32].mxu0 }
0x286d   :  { %v12948_v25 = vpop.f32.mrb[33].mxu0  ;;  %12954 = vmatmul.mubr.msk.f32.vlgmr.msra.gmra.mrb[30].mxu0 %vm892_vm6, %v5372_v21  ;;  %v11667_v21 = vld [vmem:[%s16394_s17 + $0x198] sm:$0xff] }
0x286e   :  { %13668 = vmatpush3.bf16.msra.mxu0 %v13667_v31  ;;  %v13669_v25 = vpack.c.bf16 %v11667_v21, %v11666_v54 }
0x2870   :  { %13670 = vmatprep.subr.bf16.mxu0 %v13669_v25 }
0x2940   :  { %v5445_v41 = vpop.f32.mrb[30].mxu0 }
0x2941   :  { %v5451_v28 = vrot.slane %v5445_v41, 3  ;;  %v12955_v24 = vpop.f32.mrb[31].mxu0  ;;  %v11650_v41 = vld [vmem:[%s16394_s17 + $0x110] sm:$0xff] }
0x2943   :  { %v5453_v33 = vsel %vm525_vm1, %v15348_v26, %v5451_v28  ;;  %v5455_v16 = vadd.f32 %v5451_v28, %v15140_v15  ;;  %v11632_v15 = vld [vmem:[%s14495_s12 + $0x88] sm:$0xff]  ;;  %v11651_v28 = vld [vmem:[%s16394_s17 + $0x118] sm:$0xff]  ;;  %s16405_s12 = sld [smem:[#allocation22_spill]] }
0x2944   :  { %v5454_v14 = vadd.f32 %v5453_v33, %v15135_v27  ;;  %v13649_v45 = vpack.c.bf16 %v11634_v40, %v11632_v15  ;;  %v13671_v24 = vpack.c.bf16 %v11651_v28, %v11650_v41  ;;  %v11669_v33 = vld [vmem:[%s16394_s17 + $0x1a8] sm:$0xff]  ;;  %v11672_v15 = vld [vmem:[%s16394_s17 + $0x1c0] sm:$0xff] }
0x2945   :  { %v15413_v34 = vadd.f32 %v11729_v23, %v5455_v16  ;;  %v11673_v40 = vld [vmem:[%s16394_s17 + $0x1c8] sm:$0xff] }
0x2946   :  { %v5462_v35 = vadd.f32 %v11729_v23, %v5454_v14  ;;  %13650 = vmatprep.subr.bf16.mxu1 %v13649_v45  ;;  %13672 = vmatpush3.bf16.msra.mxu0 %v13671_v24  ;;  %v11668_v23 = vld [vmem:[%s16394_s17 + $0x1a0] sm:$0xff]  ;;  %v13681_v45 = vpack.c.bf16 %v11673_v40, %v11672_v15 }
0x2947   :  { %v5467_v27 = vsel %vm618_vm3, %v15413_v34, 0.0  ;;  %13652 = vmatpush1.bf16.msra.mxu1 %v13651_v58  ;;  %v13673_v16 = vpack.c.bf16 %v11669_v33, %v11668_v23  ;;  %v11652_v14 = vld [vmem:[%s16394_s17 + $0x120] sm:$0xff]  ;;  %v13683_v58 = vpack.c.bf16 %v11657_v57, %v11656_v51 }
0x2948   :  { %v5464_v19 = vsel %vm614_vm2, %v5462_v35, 0.0  ;;  %13654 = vmatprep.subr.bf16.mxu1 %v13653_v50  ;;  %v13685_v50 = vpack.c.bf16 %v11675_v32, %v11674_v62 }
0x2949   :  { %5465 = vadd.xlane.f32.xlu1 %v5464_v19  ;;  %13674 = vmatprep.subr.bf16.mxu0 %v13673_v16 }
0x294b   :  { %13656 = vmatpush1.bf16.msra.mxu1 %v13655_v53  ;;  %v13687_v53 = vpack.c.bf16 %v11659_v59, %v11658_v39 }
0x294c   :  { %13658 = vmatprep.subr.bf16.mxu1 %v13657_v0  ;;  %v13689_v0 = vpack.c.bf16 %v11677_v42, %v11676_v63 }
0x294f   :  { %13660 = vmatpush1.bf16.msra.mxu1 %v13659_v49  ;;  %v13691_v49 = vpack.c.bf16 %v11661_v1, %v11660_v29 }
0x2950   :  { %13662 = vmatprep.subr.bf16.mxu1 %v13661_v60  ;;  %v11662_v60 = vld [vmem:[%s16394_s17 + $0x170] sm:$0xff] }
0x2953   :  { %13664 = vmatpush1.bf16.msra.mxu1 %v13663_v36  ;;  %v13695_v36 = vpack.c.bf16 %v11663_v61, %v11662_v60 }
0x29d6   :  { %v5466_v43 = vpop.xlane.xlu1 %5465 }
0x29d7   :  { %v5470_v44 = vmul.f32 0.015625, %v5466_v43  ;;  %v11670_v43 = vld [vmem:[%s16394_s17 + $0x1b0] sm:$0xff] }
0x29d9   :  { %v5472_v11 = vsub.f32 %v5462_v35, %v5470_v44  ;;  %v11653_v35 = vld [vmem:[%s16394_s17 + $0x128] sm:$0xff]  ;;  %v11671_v44 = vld [vmem:[%s16394_s17 + $0x1b8] sm:$0xff] }
0x29da   :  { %v13675_v19 = vpack.c.bf16 %v11653_v35, %v11652_v14 }
0x29db   :  { %v5474_v37 = vmul.f32 %v5472_v11, %v5472_v11 }
0x29dc   :  { %13676 = vmatpush3.bf16.msra.mxu0 %v13675_v19 }
0x29dd   :  { %v5476_v26 = vsel %vm614_vm2, %v5474_v37, 0.0  ;;  %v11654_v37 = vld [vmem:[%s16394_s17 + $0x130] sm:$0xff] }
0x29de   :  { %5477 = vadd.xlane.f32.xlu1 %v5476_v26  ;;  %v11655_v26 = vld [vmem:[%s16394_s17 + $0x138] sm:$0xff] }
0x29e2   :  { %5468 = vadd.xlane.f32.xlu1 %v5467_v27  ;;  %v13679_v27 = vpack.c.bf16 %v11655_v26, %v11654_v37 }
0x2a6b   :  { %v5478_v48 = vpop.xlane.xlu1 %5477 }
0x2a6c   :  { %v5482_v18 = vmul.f32 0.015625, %v5478_v48  ;;  %v11647_v48 = vld [vmem:[%s16395_s21 + $0x2] sm:$0x3] }
0x2a6e   :  { %v5484_v3 = vadd.f32 1e-05, %v5482_v18  ;;  %v15482_v18 = vrot.slane %v11647_v48, %v15093_v8 }
0x2a70   :  { %14170 = vrsqrt.f32 %v5484_v3  ;;  %v15485_v3 = vrot.slane %v11647_v48, %v15097_v10 }
0x2a7a   :  { %v14171_v38 = vpop.eup %14170 }
0x2a7b   :  { %v5488_v4 = vmul.f32 %v14171_v38, %v5472_v11  ;;  %v13677_v11 = vpack.c.bf16 %v11671_v44, %v11670_v43 }
0x2a7d   :  { %v5496_v5 = vmul.f32 %v15436_v56, %v5488_v4  ;;  %13678 = vmatprep.subr.bf16.mxu0 %v13677_v11 }
0x2a7e   :  { %13680 = vmatpush3.bf16.msra.mxu0 %v13679_v27 }
0x2a7f   :  { %v15443_v9 = vadd.f32 %v15439_v20, %v5496_v5  ;;  %13682 = vmatprep.subr.bf16.mxu0 %v13681_v45 }
0x2a81   :  { %11732 = vmatmul.mubr.msk.f32.vlgmr.msra.gmra.mrb[64].mxu1 %vm614_vm2, %v15443_v9 }
0x2a82   :  { %5593 = vmatprep.mubr.f32.mxu1 %v14408_v47  ;;  %13684 = vmatpush3.bf16.msra.mxu0 %v13683_v58 }
0x2a83   :  { %13686 = vmatprep.subr.bf16.mxu0 %v13685_v50 }
0x2a86   :  { %13688 = vmatpush3.bf16.msra.mxu0 %v13687_v53 }
0x2a87   :  { %13690 = vmatprep.subr.bf16.mxu0 %v13689_v0 }
0x2a8a   :  { %13692 = vmatpush3.bf16.msra.mxu0 %v13691_v49 }
0x2a8b   :  { %13694 = vmatprep.subr.bf16.mxu0 %v13693_v55 }
0x2a8e   :  { %13696 = vmatpush3.bf16.msra.mxu0 %v13695_v36 }
0x2b54   :  { %v5589_v38 = vpop.f32.mrb[64].mxu1 }
0x2b55   :  { %v5590_v4 = vadd.f32 %v5589_v38, %v15482_v18  ;;  %v5591_v5 = vpop.f32.mrb[65].mxu1 }
0x2b56   :  { %v5592_v52 = vadd.f32 %v5591_v5, %v15485_v3 }
0x2b57   :  { %v5604_v17 = vmul.f32 0.70710677, %v5590_v4  ;;  %v5600_v48 = vmul.f32 0.5, %v5590_v4 }
0x2b58   :  { %v5605_v13 = vmul.f32 0.70710677, %v5592_v52  ;;  %v5601_v61 = vmul.f32 0.5, %v5592_v52 }
0x2b59   :  { %v5608_v30 = vand.u32 2147483647, %v5604_v17  ;;  %vm5688_vm13 = vcmp.lt.f32.partialorder %v5604_v17, 0.0 }
0x2b5a   :  { %v5609_v12 = vand.u32 2147483647, %v5605_v13  ;;  %vm5689_vm14 = vcmp.lt.f32.partialorder %v5605_v13, 0.0 }
0x2b5b   :  { %v5612_v31 = vmul.f32 0.3275911, %v5608_v30  ;;  %v5664_v41 = vsub.f32 0.0, %v5608_v30 }
0x2b5c   :  { %v5613_v54 = vmul.f32 0.3275911, %v5609_v12  ;;  %v5665_v28 = vsub.f32 0.0, %v5609_v12 }
0x2b5d   :  { %v5616_v21 = vadd.f32 1.0, %v5612_v31  ;;  %v5668_v23 = vmul.f32 %v5664_v41, %v5608_v30  ;;  %v5469_v30 = vpop.xlane.xlu1 %5468  ;;  %v11734_v31 = vld [vmem:[%s16396_s6 + $0x1] ss:$0 sm:$0xff] }
0x2b5e   :  { %v5617_v25 = vadd.f32 1.0, %v5613_v54  ;;  %v5669_v14 = vmul.f32 %v5665_v28, %v5609_v12 }
0x2b5f   :  { %14172 = vrcp.f32 %v5616_v21  ;;  %v5672_v43 = vmul.f32 1.442695, %v5668_v23 }
0x2b60   :  { %14174 = vrcp.f32 %v5617_v25  ;;  %v5674_v37 = vmul.f32 1.442695, %v5669_v14  ;;  %v5471_v25 = vmul.f32 0.015625, %v5469_v30  ;;  %v11736_v30 = vld [vmem:[%s16399_s3] ss:$0 sm:$0xff] }
0x2b61   :  { %14176 = vpow2.f32 %v5672_v43 }
0x2b62   :  { %14178 = vpow2.f32 %v5674_v37  ;;  %v5473_v13 = vsub.f32 %v15413_v34, %v5471_v25 }
0x2b69   :  { %v14173_v24 = vpop.eup %14172 }
0x2b6a   :  { %v14175_v33 = vpop.eup %14174  ;;  %v5628_v16 = vmul.f32 1.0614054, %v14173_v24 }
0x2b6b   :  { %v5629_v35 = vmul.f32 1.0614054, %v14175_v33  ;;  %v14177_v59 = vpop.eup %14176 }
0x2b6c   :  { %v5632_v19 = vadd.f32 -1.4531521, %v5628_v16  ;;  %v14179_v63 = vpop.eup %14178 }
0x2b6d   :  { %v5633_v44 = vadd.f32 -1.4531521, %v5629_v35 }
0x2b6e   :  { %v5636_v11 = vmul.f32 %v14173_v24, %v5632_v19 }
0x2b6f   :  { %v5637_v26 = vmul.f32 %v14175_v33, %v5633_v44 }
0x2b70   :  { %v5640_v27 = vadd.f32 1.4214138, %v5636_v11 }
0x2b71   :  { %v5641_v15 = vadd.f32 1.4214138, %v5637_v26 }
0x2b72   :  { %v5644_v40 = vmul.f32 %v14173_v24, %v5640_v27  ;;  %v5823_v27 = vld [vmem:[%s16397_s25 + $0x8] sm:$0xff] }
0x2b73   :  { %v5645_v45 = vmul.f32 %v14175_v33, %v5641_v15  ;;  %v5825_v15 = vld [vmem:[%s16397_s25 + $0x18] sm:$0xff] }
0x2b74   :  { %v5648_v51 = vadd.f32 -0.28449672, %v5644_v40  ;;  %v13697_v40 = vpack.c.bf16 %v5825_v15, %v5823_v27 }
0x2b75   :  { %v5649_v57 = vadd.f32 -0.28449672, %v5645_v45  ;;  %v5822_v45 = vld [vmem:[%s16397_s25] sm:$0xff] }
0x2b76   :  { %v5652_v58 = vmul.f32 %v14173_v24, %v5648_v51  ;;  %v5824_v51 = vld [vmem:[%s16397_s25 + $0x10] sm:$0xff]  ;;  %13698 = vmatprep.subr.bf16.mxu1 %v13697_v40 }
0x2b77   :  { %v5653_v62 = vmul.f32 %v14175_v33, %v5649_v57  ;;  %v13699_v57 = vpack.c.bf16 %v5824_v51, %v5822_v45 }
0x2b78   :  { %v5656_v32 = vadd.f32 0.2548296, %v5652_v58  ;;  %v5829_v58 = vld [vmem:[%s16397_s25 + $0x38] sm:$0xff] }
0x2b79   :  { %v5657_v50 = vadd.f32 0.2548296, %v5653_v62  ;;  %13700 = vmatpush1.bf16.msra.mxu1 %v13699_v57  ;;  %v5826_v62 = vld [vmem:[%s16397_s25 + $0x20] sm:$0xff] }
0x2b7a   :  { %v5660_v39 = vmul.f32 %v14173_v24, %v5656_v32  ;;  %v5475_v24 = vmul.f32 %v5473_v13, %v5473_v13  ;;  %v5828_v32 = vld [vmem:[%s16397_s25 + $0x30] sm:$0xff] }
0x2b7b   :  { %v5661_v53 = vmul.f32 %v14175_v33, %v5657_v50  ;;  %v13703_v50 = vpack.c.bf16 %v5828_v32, %v5826_v62  ;;  %v5994_v32 = vld [vmem:[%s16400_s8 + $0x80] sm:$0xff] }
0x2b7c   :  { %v5680_v42 = vmul.f32 %v14177_v59, %v5660_v39  ;;  %v5479_v23 = vsel %vm618_vm3, %v5475_v24, 0.0  ;;  %v5831_v39 = vld [vmem:[%s16397_s25 + $0x48] sm:$0xff]  ;;  %v5833_v59 = vld [vmem:[%s16397_s25 + $0x58] sm:$0xff] }
0x2b7d   :  { %v5681_v0 = vmul.f32 %v14179_v63, %v5661_v53  ;;  %v13705_v53 = vpack.c.bf16 %v5833_v59, %v5831_v39  ;;  %v5830_v63 = vld [vmem:[%s16397_s25 + $0x40] sm:$0xff] }
0x2b7e   :  { %v5684_v29 = vsub.f32 1.0, %v5680_v42  ;;  %v5832_v42 = vld [vmem:[%s16397_s25 + $0x50] sm:$0xff] }
0x2b7f   :  { %v5685_v1 = vsub.f32 1.0, %v5681_v0  ;;  %v13707_v0 = vpack.c.bf16 %v5832_v42, %v5830_v63  ;;  %v5979_v63 = vld [vmem:[%s16400_s8 + $0x8] sm:$0xff] }
0x2b80   :  { %v5692_v49 = vsub.f32 0.0, %v5684_v29 }
0x2b81   :  { %v5693_v2 = vsub.f32 0.0, %v5685_v1 }
0x2b82   :  { %v5696_v46 = vsel %vm5688_vm13, %v5692_v49, %v5684_v29  ;;  %v5835_v29 = vld [vmem:[%s16397_s25 + $0x68] sm:$0xff] }
0x2b83   :  { %v5700_v55 = vadd.f32 1.0, %v5696_v46  ;;  %v5697_v60 = vsel %vm5689_vm14, %v5693_v2, %v5685_v1  ;;  %v5837_v1 = vld [vmem:[%s16397_s25 + $0x78] sm:$0xff]  ;;  %v5834_v2 = vld [vmem:[%s16397_s25 + $0x60] sm:$0xff]  ;;  %v5836_v46 = vld [vmem:[%s16397_s25 + $0x70] sm:$0xff] }
0x2b84   :  { %v5701_v36 = vadd.f32 1.0, %v5697_v60  ;;  %v13709_v49 = vpack.c.bf16 %v5837_v1, %v5835_v29 }
0x2b85   :  { %v5704_v5 = vmul.f32 %v5700_v55, %v5600_v48  ;;  %v13711_v55 = vpack.c.bf16 %v5836_v46, %v5834_v2  ;;  %v5996_v46 = vld [vmem:[%s16400_s8 + $0x90] sm:$0xff] }
0x2b86   :  { %v5705_v38 = vmul.f32 %v5701_v36, %v5601_v61 }
0x2b88   :  { %5778 = vmatprep.mubr.f32.mxu0 %v5705_v38  ;;  %v11735_v38 = vld [vmem:[%s16398_s29] ss:$0 sm:$0xff] }
0x2b89   :  { %5779 = vmatmul.mubr.f32.vlgmr.msra.gmra.mrb[34].mxu0 %v5704_v5 }
0x2c5c   :  { %v12271_v12 = vpop.f32.mrb[34].mxu0 }
0x2c5d   :  { %v12272_v54 = vpop.f32.mrb[35].mxu0 }
0x2c5e   :  { %v12273_v21 = vadd.f32 %v12272_v54, %v12271_v12 }
0x2c60   :  { %v5781_v41 = vadd.f32 %v12273_v21, %v11734_v31 }
0x2c62   :  { %v5788_v17 = vadd.f32 %v5781_v41, %v15443_v9 }
0x2c64   :  { %v5790_v28 = vrot.slane %v5788_v17, 4 }
0x2c66   :  { %v5792_v52 = vsel %vm515_vm0, %v5788_v17, %v5790_v28 }
0x2c67   :  { %v5795_v4 = vsel %vm618_vm3, %v5792_v52, 0.0 }
0x2c68   :  { %5796 = vadd.xlane.f32.xlu1 %v5795_v4 }
0x2c6c   :  { %5480 = vadd.xlane.f32.xlu1 %v5479_v23 }
0x2cf5   :  { %v5797_v33 = vpop.xlane.xlu1 %5796 }
0x2cf6   :  { %v5798_v16 = vmul.f32 0.015625, %v5797_v33 }
0x2cf8   :  { %v5799_v14 = vsub.f32 %v5792_v52, %v5798_v16 }
0x2cf9   :  { %v5481_v35 = vpop.xlane.xlu1 %5480 }
0x2cfa   :  { %v5483_v9 = vmul.f32 0.015625, %v5481_v35  ;;  %v5800_v34 = vmul.f32 %v5799_v14, %v5799_v14 }
0x2cfc   :  { %v5485_v19 = vadd.f32 1e-05, %v5483_v9  ;;  %v5801_v43 = vsel %vm618_vm3, %v5800_v34, 0.0 }
0x2cfd   :  { %5802 = vadd.xlane.f32.xlu0 %v5801_v43 }
0x2cfe   :  { %14180 = vrsqrt.f32 %v5485_v19 }
0x2d08   :  { %v14181_v44 = vpop.eup %14180 }
0x2d09   :  { %v5489_v11 = vmul.f32 %v14181_v44, %v5473_v13 }
0x2d0b   :  { %v5497_v37 = vmul.f32 %v15436_v56, %v5489_v11  ;;  %v5827_v56 = vld [vmem:[%s16397_s25 + $0x28] sm:$0xff] }
0x2d0d   :  { %v5505_v26 = vadd.f32 %v15439_v20, %v5497_v37  ;;  %v13701_v20 = vpack.c.bf16 %v5829_v58, %v5827_v56 }
0x2d0f   :  { %11733 = vmatmul.mubr.msk.f32.gmra.mrb[66].mxu1 %vm614_vm2, %v5505_v26  ;;  %13702 = vmatprep.subr.bf16.mxu1 %v13701_v20 }
0x2d10   :  { %5917 = vmatprep.mubr.f32.mxu1 %v14408_v47  ;;  %13704 = vmatpush1.bf16.msra.mxu1 %v13703_v50  ;;  %v5995_v50 = vld [vmem:[%s16400_s8 + $0x88] sm:$0xff] }
0x2d11   :  { %13706 = vmatprep.subr.bf16.mxu1 %v13705_v53  ;;  %v13713_v59 = vpack.c.bf16 %v5995_v50, %v5994_v32  ;;  %v5978_v53 = vld [vmem:[%s16400_s8] sm:$0xff]  ;;  %v5991_v50 = vld [vmem:[%s16400_s8 + $0x68] sm:$0xff] }
0x2d12   :  { %v5990_v32 = vld [vmem:[%s16400_s8 + $0x60] sm:$0xff] }
0x2d14   :  { %13708 = vmatpush1.bf16.msra.mxu1 %v13707_v0  ;;  %v13715_v0 = vpack.c.bf16 %v5979_v63, %v5978_v53  ;;  %v6009_v53 = vld [vmem:[%s16400_s8 + $0xf8] sm:$0xff] }
0x2d15   :  { %13710 = vmatprep.subr.bf16.mxu1 %v13709_v49 }
0x2d18   :  { %13712 = vmatpush1.bf16.msra.mxu1 %v13711_v55  ;;  %v5997_v55 = vld [vmem:[%s16400_s8 + $0x98] sm:$0xff] }
0x2d19   :  { %13714 = vmatprep.subr.bf16.mxu1 %v13713_v59  ;;  %v6008_v59 = vld [vmem:[%s16400_s8 + $0xf0] sm:$0xff] }
0x2d1a   :  { %v13741_v63 = vpack.c.bf16 %v6009_v53, %v6008_v59 }
0x2d8a   :  { %v5803_v60 = vpop.xlane.xlu0 %5802 }
0x2d8b   :  { %v5804_v61 = vmul.f32 0.015625, %v5803_v60 }
0x2d8d   :  { %v5805_v36 = vadd.f32 1e-05, %v5804_v61  ;;  %v13717_v61 = vpack.c.bf16 %v5997_v55, %v5996_v46 }
0x2d8f   :  { %14182 = vrsqrt.f32 %v5805_v36  ;;  %v5980_v36 = vld [vmem:[%s16400_s8 + $0x10] sm:$0xff] }
0x2d99   :  { %v14183_v48 = vpop.eup %14182 }
0x2d9a   :  { %v5807_v5 = vmul.f32 %v14183_v48, %v5799_v14  ;;  %v5981_v48 = vld [vmem:[%s16400_s8 + $0x18] sm:$0xff] }
0x2d9c   :  { %v5814_v12 = vmul.f32 %v11735_v38, %v5807_v5  ;;  %v13719_v5 = vpack.c.bf16 %v5981_v48, %v5980_v36 }
0x2d9e   :  { %v5821_v31 = vadd.f32 %v11736_v30, %v5814_v12 }
0x2da0   :  { %11737 = vmatmul.mubr.msk.f32.vlgmr.msra.gmra.mrb[68].mxu1 %vm614_vm2, %v5821_v31  ;;  %v5998_v31 = vld [vmem:[%s16400_s8 + $0xa0] sm:$0xff] }
0x2da1   :  { %13716 = vmatpush3.bf16.msra.mxu1 %v13715_v0  ;;  %v5993_v0 = vld [vmem:[%s16400_s8 + $0x78] sm:$0xff] }
0x2da2   :  { %13718 = vmatprep.subr.bf16.mxu1 %v13717_v61 }
0x2da5   :  { %13720 = vmatpush3.bf16.msra.mxu1 %v13719_v5 }
0x2de2   :  { %v5595_v54 = vpop.f32.mrb[66].mxu1 }
0x2de3   :  { %v15520_v21 = vadd.f32 %v5595_v54, %v15482_v18  ;;  %v5597_v25 = vpop.f32.mrb[67].mxu1  ;;  %v5999_v54 = vld [vmem:[%s16400_s8 + $0xa8] sm:$0xff] }
0x2de4   :  { %v15523_v41 = vadd.f32 %v5597_v25, %v15485_v3 }
0x2de5   :  { %v15526_v17 = vmul.f32 0.70710677, %v15520_v21 }
0x2de6   :  { %v15529_v13 = vmul.f32 0.70710677, %v15523_v41 }
0x2de7   :  { %v5610_v28 = vand.u32 2147483647, %v15526_v17  ;;  %vm5690_vm15 = vcmp.lt.f32.partialorder %v15526_v17, 0.0  ;;  %v6000_v17 = vld [vmem:[%s16400_s8 + $0xb0] sm:$0xff] }
0x2de8   :  { %v5611_v52 = vand.u32 2147483647, %v15529_v13  ;;  %vm5691_vm1 = vcmp.lt.f32.partialorder %v15529_v13, 0.0  ;;  %v5985_v13 = vld [vmem:[%s16400_s8 + $0x38] sm:$0xff] }
0x2de9   :  { %v5614_v4 = vmul.f32 0.3275911, %v5610_v28  ;;  %v5666_v18 = vsub.f32 0.0, %v5610_v28 }
0x2dea   :  { %v5615_v24 = vmul.f32 0.3275911, %v5611_v52  ;;  %v5667_v16 = vsub.f32 0.0, %v5611_v52 }
0x2deb   :  { %v5618_v23 = vadd.f32 1.0, %v5614_v4  ;;  %v5670_v14 = vmul.f32 %v5666_v18, %v5610_v28  ;;  %v13721_v28 = vpack.c.bf16 %v5999_v54, %v5998_v31  ;;  %v5983_v4 = vld [vmem:[%s16400_s8 + $0x28] sm:$0xff] }
0x2dec   :  { %v5619_v33 = vadd.f32 1.0, %v5615_v24  ;;  %v5671_v9 = vmul.f32 %v5667_v16, %v5611_v52  ;;  %v5982_v52 = vld [vmem:[%s16400_s8 + $0x20] sm:$0xff]  ;;  %v5603_v16 = vmul.f32 0.5, %v15523_v41 }
0x2ded   :  { %14184 = vrcp.f32 %v5618_v23  ;;  %v5676_v44 = vmul.f32 1.442695, %v5670_v14  ;;  %v13723_v23 = vpack.c.bf16 %v5983_v4, %v5982_v52  ;;  %13722 = vmatprep.subr.bf16.mxu1 %v13721_v28  ;;  %v6001_v14 = vld [vmem:[%s16400_s8 + $0xb8] sm:$0xff]  ;;  %v6002_v41 = vld [vmem:[%s16400_s8 + $0xc0] sm:$0xff] }
0x2dee   :  { %14186 = vrcp.f32 %v5619_v33  ;;  %v5678_v37 = vmul.f32 1.442695, %v5671_v9  ;;  %v13725_v9 = vpack.c.bf16 %v6001_v14, %v6000_v17 }
0x2def   :  { %14188 = vpow2.f32 %v5676_v44  ;;  %13724 = vmatpush3.bf16.msra.mxu1 %v13723_v23 }
0x2df0   :  { %14190 = vpow2.f32 %v5678_v37  ;;  %13726 = vmatprep.subr.bf16.mxu1 %v13725_v9 }
0x2df7   :  { %v14185_v3 = vpop.eup %14184 }
0x2df8   :  { %v14187_v35 = vpop.eup %14186  ;;  %v5630_v34 = vmul.f32 1.0614054, %v14185_v3 }
0x2df9   :  { %v5631_v19 = vmul.f32 1.0614054, %v14187_v35  ;;  %v14189_v29 = vpop.eup %14188 }
0x2dfa   :  { %v5634_v43 = vadd.f32 -1.4531521, %v5630_v34  ;;  %v14191_v49 = vpop.eup %14190  ;;  %v5984_v34 = vld [vmem:[%s16400_s8 + $0x30] sm:$0xff] }
0x2dfb   :  { %v5635_v11 = vadd.f32 -1.4531521, %v5631_v19 }
0x2dfc   :  { %v5638_v26 = vmul.f32 %v14185_v3, %v5634_v43  ;;  %v13727_v43 = vpack.c.bf16 %v5985_v13, %v5984_v34 }
0x2dfd   :  { %v5639_v27 = vmul.f32 %v14187_v35, %v5635_v11  ;;  %v6003_v11 = vld [vmem:[%s16400_s8 + $0xc8] sm:$0xff] }
0x2dfe   :  { %v5642_v15 = vadd.f32 1.4214138, %v5638_v26  ;;  %13728 = vmatpush3.bf16.msra.mxu1 %v13727_v43  ;;  %v13729_v37 = vpack.c.bf16 %v6003_v11, %v6002_v41  ;;  %v5987_v26 = vld [vmem:[%s16400_s8 + $0x48] sm:$0xff] }
0x2dff   :  { %v5643_v40 = vadd.f32 1.4214138, %v5639_v27 }
0x2e00   :  { %v5646_v45 = vmul.f32 %v14185_v3, %v5642_v15  ;;  %13730 = vmatprep.subr.bf16.mxu1 %v13729_v37  ;;  %v6004_v15 = vld [vmem:[%s16400_s8 + $0xd0] sm:$0xff] }
0x2e01   :  { %v5647_v51 = vmul.f32 %v14187_v35, %v5643_v40  ;;  %v6005_v40 = vld [vmem:[%s16400_s8 + $0xd8] sm:$0xff] }
0x2e02   :  { %v5650_v57 = vadd.f32 -0.28449672, %v5646_v45  ;;  %v13733_v45 = vpack.c.bf16 %v6005_v40, %v6004_v15 }
0x2e03   :  { %v5651_v56 = vadd.f32 -0.28449672, %v5647_v51  ;;  %v5988_v51 = vld [vmem:[%s16400_s8 + $0x50] sm:$0xff] }
0x2e04   :  { %v5654_v58 = vmul.f32 %v14185_v3, %v5650_v57  ;;  %v5989_v57 = vld [vmem:[%s16400_s8 + $0x58] sm:$0xff] }
0x2e05   :  { %v5655_v20 = vmul.f32 %v14187_v35, %v5651_v56  ;;  %v13735_v56 = vpack.c.bf16 %v5989_v57, %v5988_v51 }
0x2e06   :  { %v5658_v62 = vadd.f32 0.2548296, %v5654_v58  ;;  %v6006_v58 = vld [vmem:[%s16400_s8 + $0xe0] sm:$0xff] }
0x2e07   :  { %v5659_v39 = vadd.f32 0.2548296, %v5655_v20  ;;  %v6007_v20 = vld [vmem:[%s16400_s8 + $0xe8] sm:$0xff] }
0x2e08   :  { %v5662_v42 = vmul.f32 %v14185_v3, %v5658_v62  ;;  %v13737_v62 = vpack.c.bf16 %v6007_v20, %v6006_v58 }
0x2e09   :  { %v5663_v1 = vmul.f32 %v14187_v35, %v5659_v39  ;;  %v5602_v35 = vmul.f32 0.5, %v15520_v21  ;;  %v5986_v21 = vld [vmem:[%s16400_s8 + $0x40] sm:$0xff]  ;;  %v13739_v39 = vpack.c.bf16 %v5991_v50, %v5990_v32 }
0x2e0a   :  { %v5682_v2 = vmul.f32 %v14189_v29, %v5662_v42  ;;  %v13731_v27 = vpack.c.bf16 %v5987_v26, %v5986_v21  ;;  %v5992_v42 = vld [vmem:[%s16400_s8 + $0x70] sm:$0xff] }
0x2e0b   :  { %v5683_v60 = vmul.f32 %v14191_v49, %v5663_v1  ;;  %v13743_v29 = vpack.c.bf16 %v5993_v0, %v5992_v42  ;;  %v5838_v1 = vld [vmem:[%s16401_s14] sm:$0x3] }
0x2e0c   :  { %v5686_v38 = vsub.f32 1.0, %v5682_v2  ;;  %13732 = vmatpush3.bf16.msra.mxu1 %v13731_v27  ;;  %v5843_v49 = vrot.slane %v5838_v1, %v15093_v8  ;;  %v5847_v2 = vrot.slane %v5838_v1, %v15097_v10 }
0x2e0d   :  { %v5687_v30 = vsub.f32 1.0, %v5683_v60  ;;  %13734 = vmatprep.subr.bf16.mxu1 %v13733_v45 }
0x2e0e   :  { %v5694_v12 = vsub.f32 0.0, %v5686_v38 }
0x2e0f   :  { %v5695_v25 = vsub.f32 0.0, %v5687_v30 }
0x2e10   :  { %v5698_v24 = vsel %vm5690_vm15, %v5694_v12, %v5686_v38  ;;  %13736 = vmatpush3.bf16.msra.mxu1 %v13735_v56 }
0x2e11   :  { %v5699_v33 = vsel %vm5691_vm1, %v5695_v25, %v5687_v30  ;;  %v5702_v18 = vadd.f32 1.0, %v5698_v24  ;;  %13738 = vmatprep.subr.bf16.mxu1 %v13737_v62 }
0x2e12   :  { %v5703_v3 = vadd.f32 1.0, %v5699_v33 }
0x2e13   :  { %v5706_v44 = vmul.f32 %v5702_v18, %v5602_v35 }
0x2e14   :  { %v5707_v19 = vmul.f32 %v5703_v3, %v5603_v16  ;;  %13740 = vmatpush3.bf16.msra.mxu1 %v13739_v39 }
0x2e15   :  { %13742 = vmatprep.subr.bf16.mxu1 %v13741_v63 }
0x2e16   :  { %5783 = vmatprep.mubr.f32.mxu0 %v5707_v19 }
0x2e17   :  { %5784 = vmatmul.mubr.f32.gmra.mrb[36].mxu0 %v5706_v44 }
0x2e18   :  { %13744 = vmatpush3.bf16.msra.mxu1 %v13743_v29 }
0x2e73   :  { %v5919_v46 = vpop.f32.mrb[68].mxu1 }
0x2e74   :  { %v5920_v55 = vadd.f32 %v5919_v46, %v5843_v49  ;;  %v5921_v60 = vpop.f32.mrb[69].mxu1  ;;  %v6088_v49 = vld [vmem:[%s16402_s19] sm:$0x7f] }
0x2e75   :  { %v5922_v61 = vadd.f32 %v5921_v60, %v5847_v2  ;;  %v11738_v46 = vld [vmem:[%s16403_s24] ss:$0 sm:$0xff] }
0x2e76   :  { %v5926_v36 = vmul.f32 0.70710677, %v5920_v55  ;;  %v5924_v63 = vmul.f32 0.5, %v5920_v55 }
0x2e77   :  { %v5927_v48 = vmul.f32 0.70710677, %v5922_v61  ;;  %v5925_v59 = vmul.f32 0.5, %v5922_v61 }
0x2e78   :  { %v5928_v38 = vand.u32 2147483647, %v5926_v36  ;;  %vm5968_vm3 = vcmp.lt.f32.partialorder %v5926_v36, 0.0  ;;  %v11739_v36 = vld [vmem:[%s16402_s19 + $0x8] sm:$0x7f] }
0x2e79   :  { %v5929_v5 = vand.u32 2147483647, %v5927_v48  ;;  %vm5969_vm5 = vcmp.lt.f32.partialorder %v5927_v48, 0.0  ;;  %v6090_v48 = vrot.slane %v6088_v49, 7 }
0x2e7a   :  { %v5930_v30 = vmul.f32 0.3275911, %v5928_v38  ;;  %v5956_v25 = vsub.f32 0.0, %v5928_v38 }
0x2e7b   :  { %v5931_v12 = vmul.f32 0.3275911, %v5929_v5  ;;  %v5957_v28 = vsub.f32 0.0, %v5929_v5 }
0x2e7c   :  { %v5932_v31 = vadd.f32 1.0, %v5930_v30  ;;  %v5958_v4 = vmul.f32 %v5956_v25, %v5928_v38  ;;  %v6087_v30 = vld [vmem:[%s16404_s30] sm:$0xff] }
0x2e7d   :  { %v5933_v54 = vadd.f32 1.0, %v5931_v12  ;;  %v5959_v33 = vmul.f32 %v5957_v28, %v5929_v5  ;;  %v6100_v12 = vrot.slane %v11739_v36, 7 }
0x2e7e   :  { %14192 = vrcp.f32 %v5932_v31  ;;  %v5960_v3 = vmul.f32 1.442695, %v5958_v4 }
0x2e7f   :  { %14194 = vrcp.f32 %v5933_v54  ;;  %v5962_v35 = vmul.f32 1.442695, %v5959_v33 }
0x2e80   :  { %14196 = vpow2.f32 %v5960_v3 }
0x2e81   :  { %14198 = vpow2.f32 %v5962_v35 }
0x2e88   :  { %v14193_v52 = vpop.eup %14192 }
0x2e89   :  { %v14195_v24 = vpop.eup %14194  ;;  %v5938_v23 = vmul.f32 1.0614054, %v14193_v52 }
0x2e8a   :  { %v5939_v18 = vmul.f32 1.0614054, %v14195_v24  ;;  %v14197_v15 = vpop.eup %14196 }
0x2e8b   :  { %v5940_v16 = vadd.f32 -1.4531521, %v5938_v23  ;;  %v14199_v45 = vpop.eup %14198 }
0x2e8c   :  { %v5941_v17 = vadd.f32 -1.4531521, %v5939_v18 }
0x2e8d   :  { %v5942_v14 = vmul.f32 %v14193_v52, %v5940_v16 }
0x2e8e   :  { %v5943_v9 = vmul.f32 %v14195_v24, %v5941_v17 }
0x2e8f   :  { %v5944_v34 = vadd.f32 1.4214138, %v5942_v14 }
0x2e90   :  { %v5945_v13 = vadd.f32 1.4214138, %v5943_v9  ;;  %v6106_v9 = vld [vmem:[%s16405_s12] sm:$0xff] }
0x2e91   :  { %v5946_v19 = vmul.f32 %v14193_v52, %v5944_v34  ;;  %v6107_v34 = vld [vmem:[%s16405_s12 + $0x8] sm:$0xff] }
0x2e92   :  { %v5947_v43 = vmul.f32 %v14195_v24, %v5945_v13  ;;  %v13745_v13 = vpack.c.bf16 %v6107_v34, %v6106_v9 }
0x2e93   :  { %v5948_v44 = vadd.f32 -0.28449672, %v5946_v19  ;;  %v6122_v19 = vld [vmem:[%s16406_s2] sm:$0xff] }
0x2e94   :  { %v5949_v41 = vadd.f32 -0.28449672, %v5947_v43  ;;  %v6123_v43 = vld [vmem:[%s16406_s2 + $0x8] sm:$0xff]  ;;  %13746 = vmatprep.subr.bf16.mxu0 %v13745_v13 }
0x2e95   :  { %v5950_v11 = vmul.f32 %v14193_v52, %v5948_v44  ;;  %v13777_v44 = vpack.c.bf16 %v6123_v43, %v6122_v19  ;;  %13748 = vmatpush3.bf16.msra.mxu0 %v13745_v13  ;;  %v6545_v19 = vand.u32 127, %v2872_v6  ;;  %v11913_v43 = vld [vmem:[%s16413_s15 + $0x1] ss:$0 sm:$0xff] }
0x2e96   :  { %v5951_v37 = vmul.f32 %v14195_v24, %v5949_v41  ;;  %v6108_v41 = vld [vmem:[%s16405_s12 + $0x10] sm:$0xff] }
0x2e97   :  { %v5952_v21 = vadd.f32 0.2548296, %v5950_v11  ;;  %13778 = vmatprep.subr.bf16.mxu1 %v13777_v44  ;;  %v6109_v11 = vld [vmem:[%s16405_s12 + $0x18] sm:$0xff] }
0x2e98   :  { %v5953_v26 = vadd.f32 0.2548296, %v5951_v37  ;;  %v13749_v37 = vpack.c.bf16 %v6109_v11, %v6108_v41 }
0x2e99   :  { %v5954_v27 = vmul.f32 %v14193_v52, %v5952_v21  ;;  %v6124_v21 = vld [vmem:[%s16406_s2 + $0x10] sm:$0xff] }
0x2e9a   :  { %v5955_v40 = vmul.f32 %v14195_v24, %v5953_v26  ;;  %v6125_v26 = vld [vmem:[%s16406_s2 + $0x18] sm:$0xff]  ;;  %13750 = vmatprep.subr.bf16.mxu0 %v13749_v37 }
0x2e9b   :  { %v5964_v51 = vmul.f32 %v14197_v15, %v5954_v27  ;;  %v13781_v27 = vpack.c.bf16 %v6125_v26, %v6124_v21  ;;  %13752 = vmatpush3.bf16.msra.mxu0 %v13749_v37  ;;  %v6110_v15 = vld [vmem:[%s16405_s12 + $0x20] sm:$0xff] }
0x2e9c   :  { %v5965_v57 = vmul.f32 %v14199_v45, %v5955_v40  ;;  %v6111_v40 = vld [vmem:[%s16405_s12 + $0x28] sm:$0xff] }
0x2e9d   :  { %v5966_v56 = vsub.f32 1.0, %v5964_v51  ;;  %v13753_v45 = vpack.c.bf16 %v6111_v40, %v6110_v15  ;;  %v6126_v51 = vld [vmem:[%s16406_s2 + $0x20] sm:$0xff] }
0x2e9e   :  { %v5967_v58 = vsub.f32 1.0, %v5965_v57  ;;  %v6127_v57 = vld [vmem:[%s16406_s2 + $0x28] sm:$0xff] }
0x2e9f   :  { %v5970_v20 = vsub.f32 0.0, %v5966_v56  ;;  %13754 = vmatprep.subr.bf16.mxu0 %v13753_v45 }
0x2ea0   :  { %v5971_v62 = vsub.f32 0.0, %v5967_v58  ;;  %13756 = vmatpush3.bf16.msra.mxu0 %v13753_v45 }
0x2ea1   :  { %v5972_v32 = vsel %vm5968_vm3, %v5970_v20, %v5966_v56  ;;  %v13785_v56 = vpack.c.bf16 %v6127_v57, %v6126_v51  ;;  %v6113_v20 = vld [vmem:[%s16405_s12 + $0x38] sm:$0xff] }
0x2ea2   :  { %v5974_v50 = vadd.f32 1.0, %v5972_v32  ;;  %v5973_v39 = vsel %vm5969_vm5, %v5971_v62, %v5967_v58  ;;  %v6112_v58 = vld [vmem:[%s16405_s12 + $0x30] sm:$0xff] }
0x2ea3   :  { %v5975_v53 = vadd.f32 1.0, %v5973_v39  ;;  %v13757_v62 = vpack.c.bf16 %v6113_v20, %v6112_v58  ;;  %v6128_v32 = vld [vmem:[%s16406_s2 + $0x30] sm:$0xff] }
0x2ea4   :  { %v5976_v0 = vmul.f32 %v5974_v50, %v5924_v63  ;;  %v6129_v50 = vld [vmem:[%s16406_s2 + $0x38] sm:$0xff] }
0x2ea5   :  { %v5977_v42 = vmul.f32 %v5975_v53, %v5925_v59  ;;  %v13789_v39 = vpack.c.bf16 %v6129_v50, %v6128_v32  ;;  %13758 = vmatprep.subr.bf16.mxu0 %v13757_v62  ;;  %v6114_v59 = vld [vmem:[%s16407_s7] sm:$0xff]  ;;  %v6115_v53 = vld [vmem:[%s16407_s7 + $0x8] sm:$0xff] }
0x2ea6   :  { %13760 = vmatpush3.bf16.msra.mxu0 %v13757_v62  ;;  %v13761_v63 = vpack.c.bf16 %v6115_v53, %v6114_v59 }
0x2ea7   :  { %6081 = vmatprep.mubr.f32.mxu1 %v5977_v42 }
0x2ea8   :  { %6082 = vmatmul.mubr.f32.vlgmr.msra.gmra.mrb[70].mxu1 %v5976_v0  ;;  %13762 = vmatprep.subr.bf16.mxu0 %v13761_v63 }
0x2ea9   :  { %13780 = vmatpush3.bf16.msra.mxu1 %v13777_v44 }
0x2eaa   :  { %13782 = vmatprep.subr.bf16.mxu1 %v13781_v27 }
0x2ead   :  { %13784 = vmatpush3.bf16.msra.mxu1 %v13781_v27 }
0x2eae   :  { %13786 = vmatprep.subr.bf16.mxu1 %v13785_v56 }
0x2eb1   :  { %13788 = vmatpush3.bf16.msra.mxu1 %v13785_v56 }
0x2eb2   :  { %13790 = vmatprep.subr.bf16.mxu1 %v13789_v39 }
0x2eb5   :  { %13792 = vmatpush3.bf16.msra.mxu1 %v13789_v39 }
0x2eb6   :  { %13028 = vmatprep.subr.mxu1 %v14408_v47 }
0x2eea   :  { %v12274_v29 = vpop.f32.mrb[36].mxu0 }
0x2eeb   :  { %v12275_v1 = vpop.f32.mrb[37].mxu0 }
0x2f7b   :  { %v12309_v2 = vpop.f32.mrb[70].mxu1 }
0x2f7c   :  { %v12310_v60 = vpop.f32.mrb[71].mxu1 }
0x2f7d   :  { %v12311_v38 = vadd.f32 %v12310_v60, %v12309_v2  ;;  %v11740_v60 = vld [vmem:[%s16408_s10] ss:$0 sm:$0xff] }
0x2f7f   :  { %v6084_v5 = vadd.f32 %v12311_v38, %v11738_v46  ;;  %v11741_v38 = vld [vmem:[%s16409_s11] ss:$0 sm:$0xff] }
0x2f81   :  { %v6097_v61 = vrot.slane %v6084_v5, 1  ;;  %v6092_v31 = vsel %vm515_vm0, %v6084_v5, %v6090_v48 }
0x2f82   :  { %v15577_v55 = vadd.f32 %v6092_v31, %v6087_v30  ;;  %v6117_v31 = vld [vmem:[%s16407_s7 + $0x18] sm:$0xff] }
0x2f83   :  { %v6102_v54 = vsel %vm515_vm0, %v6097_v61, %v6100_v12  ;;  %v6116_v61 = vld [vmem:[%s16407_s7 + $0x10] sm:$0xff]  ;;  %vm15663_vm0 = vcmp.le.s32.totalorder %v6545_v19, %v15090_v7 }
0x2f84   :  { %v6191_v25 = vsel %vm614_vm2, %v15577_v55, 0.0  ;;  %v15582_v28 = vadd.f32 %v6102_v54, %v6087_v30 }
0x2f85   :  { %6192 = vadd.xlane.f32.xlu1 %v6191_v25 }
0x2f86   :  { %v6194_v52 = vsel %vm614_vm2, %v15582_v28, 0.0 }
0x2f89   :  { %6195 = vadd.xlane.f32.xlu1 %v6194_v52  ;;  %v13765_v52 = vpack.c.bf16 %v6117_v31, %v6116_v61 }
0x3012   :  { %v6193_v4 = vpop.xlane.xlu1 %6192 }
0x3013   :  { %v6197_v24 = vmul.f32 0.015625, %v6193_v4  ;;  %v6118_v4 = vld [vmem:[%s16407_s7 + $0x20] sm:$0xff] }
0x3015   :  { %v15587_v23 = vsub.f32 %v15577_v55, %v6197_v24  ;;  %v6119_v24 = vld [vmem:[%s16407_s7 + $0x28] sm:$0xff] }
0x3016   :  { %v6196_v33 = vpop.xlane.xlu1 %6195 }
0x3017   :  { %v6198_v18 = vmul.f32 0.015625, %v6196_v33  ;;  %v6201_v16 = vmul.f32 %v15587_v23, %v15587_v23  ;;  %v6120_v33 = vld [vmem:[%s16407_s7 + $0x30] sm:$0xff] }
0x3019   :  { %v15592_v3 = vsub.f32 %v15582_v28, %v6198_v18  ;;  %v6203_v17 = vsel %vm614_vm2, %v6201_v16, 0.0  ;;  %v6121_v18 = vld [vmem:[%s16407_s7 + $0x38] sm:$0xff] }
0x301a   :  { %6204 = vadd.xlane.f32.xlu1 %v6203_v17  ;;  %v13773_v16 = vpack.c.bf16 %v6121_v18, %v6120_v33 }
0x301b   :  { %v6202_v14 = vmul.f32 %v15592_v3, %v15592_v3 }
0x301d   :  { %v6206_v35 = vsel %vm614_vm2, %v6202_v14, 0.0 }
0x301e   :  { %6207 = vadd.xlane.f32.xlu1 %v6206_v35 }
0x30a7   :  { %v6205_v42 = vpop.xlane.xlu1 %6204 }
0x30a8   :  { %v6209_v0 = vmul.f32 0.015625, %v6205_v42 }
0x30aa   :  { %v6211_v29 = vadd.f32 1e-05, %v6209_v0 }
0x30ab   :  { %v6208_v1 = vpop.xlane.xlu1 %6207 }
0x30ac   :  { %14200 = vrsqrt.f32 %v6211_v29  ;;  %v6210_v49 = vmul.f32 0.015625, %v6208_v1  ;;  %v6132_v29 = vld [vmem:[%s16412_s16 + $0x10] sm:$0xff]  ;;  %v6133_v1 = vld [vmem:[%s16412_s16 + $0x18] sm:$0xff] }
0x30ae   :  { %v6212_v2 = vadd.f32 1e-05, %v6210_v49  ;;  %v15694_v49 = vpack.c.bf16 %v6133_v1, %v6132_v29 }
0x30b0   :  { %14202 = vrsqrt.f32 %v6212_v2 }
0x30b6   :  { %v14201_v46 = vpop.eup %14200 }
0x30b7   :  { %v6215_v36 = vmul.f32 %v14201_v46, %v15587_v23  ;;  %v13769_v23 = vpack.c.bf16 %v6119_v24, %v6118_v4  ;;  %v6130_v46 = vld [vmem:[%s16412_s16] sm:$0xff] }
0x30b9   :  { %v6223_v48 = vmul.f32 %v11740_v60, %v6215_v36 }
0x30ba   :  { %v14203_v5 = vpop.eup %14202 }
0x30bb   :  { %v6216_v30 = vmul.f32 %v14203_v5, %v15592_v3  ;;  %v6231_v12 = vadd.f32 %v11741_v38, %v6223_v48 }
0x30bd   :  { %v6224_v54 = vmul.f32 %v11740_v60, %v6216_v30  ;;  %12972 = vmatprep.mubr.msk.f32.mxu0 %vm614_vm2, %v6231_v12  ;;  %13010 = vmatprep.mubr.msk.f32.mxu1 %vm614_vm2, %v6231_v12  ;;  %v6131_v60 = vld [vmem:[%s16412_s16 + $0x8] sm:$0xff] }
0x30bf   :  { %v6232_v25 = vadd.f32 %v11741_v38, %v6224_v54  ;;  %v15700_v38 = vpack.c.bf16 %v6131_v60, %v6130_v46 }
0x30c1   :  { %12973 = vmatmul.mubr.msk.f32.vlgmr.msra.gmra.mrb[38].mxu0 %vm614_vm2, %v6232_v25  ;;  %13011 = vmatmul.mubr.msk.f32.vlgmr.msra.gmra.mrb[72].mxu1 %vm614_vm2, %v6232_v25 }
0x30c2   :  { %13764 = vmatpush3.bf16.msra.mxu0 %v13761_v63  ;;  %12991 = vmatprep.mubr.msk.f32.mxu0 %vm614_vm2, %v6231_v12 }
0x30c3   :  { %13766 = vmatprep.subr.bf16.mxu0 %v13765_v52  ;;  %13030 = vmatprep.mubr.msk.f32.mxu1 %vm14409_vm4, %v14408_v47 }
0x30c6   :  { %13768 = vmatpush3.bf16.msra.mxu0 %v13765_v52 }
0x30c7   :  { %13770 = vmatprep.subr.bf16.mxu0 %v13769_v23 }
0x30ca   :  { %13772 = vmatpush3.bf16.msra.mxu0 %v13769_v23 }
0x30cb   :  { %13774 = vmatprep.subr.bf16.mxu0 %v13773_v16 }
0x30ce   :  { %13776 = vmatpush3.bf16.msra.mxu0 %v13773_v16 }
0x30cf   :  { %13013 = vmatprep.subr.mxu0 %v14408_v47 }
0x30d1   :  { %12992 = vmatmul.mubr.msk.f32.vlgmr.msra.gmra.mrb[40].mxu0 %vm614_vm2, %v6232_v25 }
0x30d2   :  { %13015 = vmatprep.mubr.msk.f32.mxu0 %vm14409_vm4, %v14408_v47 }
0x3194   :  { %v15638_v3 = vpop.f32.mrb[38].mxu0  ;;  %v15640_v17 = vpop.f32.mrb[72].mxu1 }
0x3195   :  { %v6305_v14 = vpop.f32.mrb[39].mxu0  ;;  %v15642_v35 = vpop.f32.mrb[73].mxu1 }
0x3196   :  { %v15644_v9 = vmul.f32 0.125, %v6305_v14 }
0x3198   :  { %6633 = vrot.lane.b32.xlu0 %v15644_v9, %s14410_s0 }
0x31a4   :  { %v15648_v34 = vpop.f32.mrb[40].mxu0 }
0x31a5   :  { %v15650_v13 = vpop.f32.mrb[41].mxu0 }
0x31a6   :  { %13014 = vmatpush3.xpose.msk.msra.mxu0 %vm892_vm6, %v15650_v13 }
0x31a7   :  { %13018 = vmatprep.subr.mxu0 %v14408_v47 }
0x31a9   :  { %13016 = vmatmul.mubr.msk.f32.vlgmr.msra.gmra.mrb[42].mxu0 %vm892_vm6, %v15644_v9 }
0x31aa   :  { %13019 = vmatpush3.msra.mxu0 %v15642_v35  ;;  %13020 = vmatprep.mubr.msk.f32.mxu0 %vm14409_vm4, %v14408_v47 }
0x31ab   :  { %13023 = vmatprep.subr.mxu0 %v14408_v47 }
0x320a   :  { %v6634_v57 = vpop.permute.xlu0 %6633 }
0x327c   :  { %v6538_v44 = vpop.f32.mrb[42].mxu0 }
0x327d   :  { %v6547_v41 = vsel %vm15663_vm0, %v6538_v44, -1e+30  ;;  %v13017_v11 = vpop.f32.mrb[43].mxu0 }
0x327e   :  { %v6549_v37 = vsel %vm6548_vm7, %v6547_v41, -inf }
0x327f   :  { %6550 = vmax.xlane.f32.xlu1 %v6549_v37  ;;  %v6134_v37 = vld [vmem:[%s16412_s16 + $0x20] sm:$0xff] }
0x330c   :  { %v6551_v21 = vpop.xlane.xlu1 %6550 }
0x330d   :  { %v6552_v26 = vsub.f32 %v6547_v41, %v6551_v21  ;;  %v6135_v21 = vld [vmem:[%s16412_s16 + $0x28] sm:$0xff] }
0x330f   :  { %v6553_v27 = vmul.f32 1.442695, %v6552_v26  ;;  %v15733_v26 = vpack.c.bf16 %v6135_v21, %v6134_v37 }
0x3311   :  { %14204 = vpow2.f32 %v6553_v27 }
0x331b   :  { %v14205_v15 = vpop.eup %14204 }
0x331c   :  { %v6555_v6 = vsel %vm6548_vm7, %v14205_v15, 0.0 }
0x331d   :  { %6556 = vadd.xlane.f32.xlu1 %v6555_v6 }
0x332e   :  { %6635 = vrot.lane.b32.xlu1 %v15650_v13, %s14410_s0 }
0x33aa   :  { %v6557_v7 = vpop.xlane.xlu1 %6556 }
0x33ab   :  { %14206 = vrcp.f32 %v6557_v7 }
0x33ae   :  { %v6636_v51 = vpop.permute.xlu1 %6635 }
0x33b5   :  { %v14207_v40 = vpop.eup %14206 }
0x33b6   :  { %v6559_v45 = vmul.f32 %v14207_v40, %v14205_v15 }
0x33b8   :  { %13021 = vmatmul.mubr.msk.f32.vlgmr.msra.gmra.mrb[44].mxu0 %vm6548_vm7, %v6559_v45 }
0x33b9   :  { %13024 = vmatpush3.xpose.msk.msra.mxu0 %vm892_vm6, %v6636_v51  ;;  %13025 = vmatprep.mubr.msk.f32.mxu0 %vm14409_vm4, %v14408_v47 }
0x33ba   :  { %13793 = vmatprep.subr.bf16.mxu0 %v14412_v22 }
0x33bc   :  { %13026 = vmatmul.mubr.msk.f32.vlgmr.msra.gmra.mrb[46].mxu0 %vm892_vm6, %v6634_v57 }
0x33bd   :  { %13037 = vmatprep.mubr.msk.f32.mxu0 %vm14409_vm4, %v14408_v47  ;;  %13795 = vmatpush3.bf16.msra.mxu0 %v15694_v49 }
0x33be   :  { %13047 = vmatprep.subr.mxu0 %v14408_v47 }
0x348b   :  { %v6629_v56 = vpop.f32.mrb[44].mxu0 }
0x348c   :  { %v13022_v58 = vpop.f32.mrb[45].mxu0 }
0x348d   :  { %v15754_v58 = vmul.f32 0.125, %v15638_v3 }
0x348f   :  { %v6707_v20 = vpop.f32.mrb[46].mxu0 }
0x3490   :  { %v6711_v62 = vsel %vm15663_vm0, %v6707_v20, -1e+30  ;;  %v13027_v32 = vpop.f32.mrb[47].mxu0 }
0x3491   :  { %v6712_v50 = vsel %vm6548_vm7, %v6711_v62, -inf }
0x3492   :  { %6713 = vmax.xlane.f32.xlu1 %v6712_v50 }
0x34a3   :  { %6724 = vrot.lane.b32.xlu1 %v15642_v35, %s14410_s0 }
0x34a7   :  { %6946 = vrot.lane.b32.xlu1 %v15644_v9, %s14411_s5 }
0x351f   :  { %v6714_v39 = vpop.xlane.xlu1 %6713 }
0x3520   :  { %v6715_v59 = vsub.f32 %v6711_v62, %v6714_v39 }
0x3522   :  { %v6716_v53 = vmul.f32 1.442695, %v6715_v59  ;;  %v6136_v59 = vld [vmem:[%s16412_s16 + $0x30] sm:$0xff] }
0x3523   :  { %v6725_v63 = vpop.permute.xlu1 %6724 }
0x3524   :  { %14208 = vpow2.f32 %v6716_v53  ;;  %13029 = vmatpush3.msra.mxu1 %v6725_v63  ;;  %v6137_v53 = vld [vmem:[%s16412_s16 + $0x38] sm:$0xff] }
0x3525   :  { %13796 = vmatprep.subr.bf16.mxu1 %v14412_v22  ;;  %v15763_v63 = vpack.c.bf16 %v6137_v53, %v6136_v59 }
0x3527   :  { %v6947_v61 = vpop.permute.xlu1 %6946 }
0x352e   :  { %v14209_v42 = vpop.eup %14208 }
0x352f   :  { %v6718_v0 = vsel %vm6548_vm7, %v14209_v42, 0.0 }
0x3530   :  { %6719 = vadd.xlane.f32.xlu0 %v6718_v0 }
0x3546   :  { %6948 = vrot.lane.b32.xlu0 %v15650_v13, %s14411_s5 }
0x35bd   :  { %v6720_v2 = vpop.xlane.xlu0 %6719 }
0x35be   :  { %14210 = vrcp.f32 %v6720_v2 }
0x35c1   :  { %v6949_v30 = vpop.permute.xlu0 %6948 }
0x35c8   :  { %v14211_v36 = vpop.eup %14210 }
0x35c9   :  { %v6722_v48 = vmul.f32 %v14211_v36, %v14209_v42 }
0x35cb   :  { %13031 = vmatmul.mubr.msk.f32.vlgmr.msra.gmra.mrb[74].mxu1 %vm6548_vm7, %v6722_v48 }
0x35cc   :  { %13798 = vmatpush3.bf16.msra.mxu1 %v15700_v38  ;;  %13044 = vmatprep.mubr.msk.f32.mxu1 %vm14409_vm4, %v14408_v47 }
0x35cd   :  { %13052 = vmatprep.subr.mxu1 %v14408_v47 }
0x35cf   :  { %13045 = vmatmul.mubr.msk.f32.vlgmr.msra.gmra.mrb[76].mxu1 %vm892_vm6, %v6629_v56 }
0x35d0   :  { %13054 = vmatprep.mubr.msk.f32.mxu1 %vm14409_vm4, %v14408_v47 }
0x369e   :  { %v6796_v5 = vpop.f32.mrb[74].mxu1 }
0x369f   :  { %v13032_v12 = vpop.f32.mrb[75].mxu1  ;;  %13038 = vmatmul.mubr.msk.f32.vlgmr.msra.gmra.mrb[48].mxu0 %vm892_vm6, %v6796_v5 }
0x36a0   :  { %13048 = vmatpush3.xpose.msk.msra.mxu0 %vm892_vm6, %v6949_v30  ;;  %13049 = vmatprep.mubr.msk.f32.mxu0 %vm14409_vm4, %v14408_v47 }
0x36a1   :  { %13799 = vmatprep.subr.bf16.mxu0 %v14412_v22 }
0x36a2   :  { %v6942_v31 = vpop.f32.mrb[76].mxu1 }
0x36a3   :  { %v13046_v54 = vpop.f32.mrb[77].mxu1  ;;  %13050 = vmatmul.mubr.msk.f32.vlgmr.msra.gmra.mrb[50].mxu0 %vm892_vm6, %v6947_v61 }
0x36a4   :  { %13061 = vmatprep.mubr.msk.f32.mxu0 %vm14409_vm4, %v14408_v47  ;;  %13801 = vmatpush3.bf16.msra.mxu0 %v15733_v26 }
0x36a5   :  { %13069 = vmatprep.subr.mxu0 %v14408_v47 }
0x3772   :  { %v6869_v25 = vpop.f32.mrb[48].mxu0 }
0x3773   :  { %v15718_v52 = vadd.f32 %v6942_v31, %v6869_v25  ;;  %v13039_v4 = vpop.f32.mrb[49].mxu0 }
0x3776   :  { %v7020_v24 = vpop.f32.mrb[50].mxu0 }
0x3777   :  { %v7024_v23 = vsel %vm15663_vm0, %v7020_v24, -1e+30  ;;  %v13051_v33 = vpop.f32.mrb[51].mxu0 }
0x3778   :  { %v7025_v18 = vsel %vm6548_vm7, %v7024_v23, -inf }
0x3779   :  { %7026 = vmax.xlane.f32.xlu1 %v7025_v18 }
0x378a   :  { %7036 = vrot.lane.b32.xlu1 %v15642_v35, %s14411_s5 }
0x378e   :  { %7186 = vrot.lane.b32.xlu1 %v15644_v9, %s14413_s9 }
0x3806   :  { %v7027_v16 = vpop.xlane.xlu1 %7026 }
0x3807   :  { %v7028_v14 = vsub.f32 %v7024_v23, %v7027_v16 }
0x3809   :  { %v7029_v19 = vmul.f32 1.442695, %v7028_v14 }
0x380a   :  { %v7037_v44 = vpop.permute.xlu1 %7036 }
0x380b   :  { %14212 = vpow2.f32 %v7029_v19  ;;  %13053 = vmatpush3.msra.mxu1 %v7037_v44 }
0x380c   :  { %13064 = vmatprep.subr.mxu1 %v14408_v47 }
0x3815   :  { %v14213_v41 = vpop.eup %14212 }
0x3816   :  { %v7031_v11 = vsel %vm6548_vm7, %v14213_v41, 0.0 }
0x3817   :  { %7032 = vadd.xlane.f32.xlu0 %v7031_v11 }
0x382d   :  { %7188 = vrot.lane.b32.xlu0 %v15650_v13, %s14413_s9  ;;  %v7187_v13 = vpop.permute.xlu1 %7186 }
0x38a4   :  { %v7033_v9 = vpop.xlane.xlu0 %7032 }
0x38a5   :  { %14214 = vrcp.f32 %v7033_v9 }
0x38a8   :  { %v7189_v6 = vpop.permute.xlu0 %7188 }
0x38af   :  { %v14215_v27 = vpop.eup %14214 }
0x38b0   :  { %v7035_v15 = vmul.f32 %v14215_v27, %v14213_v41 }
0x38b2   :  { %13055 = vmatmul.mubr.msk.f32.vlgmr.msra.gmra.mrb[78].mxu1 %vm6548_vm7, %v7035_v15 }
0x38b3   :  { %13065 = vmatpush3.xpose.msk.msra.mxu1 %vm892_vm6, %v7189_v6  ;;  %13066 = vmatprep.mubr.msk.f32.mxu1 %vm14409_vm4, %v14408_v47 }
0x38b4   :  { %13802 = vmatprep.subr.bf16.mxu1 %v14412_v22 }
0x38b6   :  { %13067 = vmatmul.mubr.msk.f32.vlgmr.msra.gmra.mrb[80].mxu1 %vm892_vm6, %v7187_v13 }
0x38b7   :  { %13078 = vmatprep.mubr.msk.f32.mxu1 %vm14409_vm4, %v14408_v47  ;;  %13804 = vmatpush3.bf16.msra.mxu1 %v15763_v63 }
0x38b8   :  { %13086 = vmatprep.subr.mxu1 %v14408_v47 }
0x3985   :  { %v7108_v7 = vpop.f32.mrb[78].mxu1 }
0x3986   :  { %v13056_v40 = vpop.f32.mrb[79].mxu1  ;;  %13062 = vmatmul.mubr.msk.f32.vlgmr.msra.gmra.mrb[52].mxu0 %vm892_vm6, %v7108_v7 }
0x3987   :  { %13071 = vmatprep.mubr.msk.f32.mxu0 %vm14409_vm4, %v14408_v47 }
0x3989   :  { %v7260_v45 = vpop.f32.mrb[80].mxu1 }
0x398a   :  { %v7264_v51 = vsel %vm15663_vm0, %v7260_v45, -1e+30  ;;  %v13068_v57 = vpop.f32.mrb[81].mxu1 }
0x398b   :  { %v7265_v56 = vsel %vm6548_vm7, %v7264_v51, -inf }
0x398c   :  { %7266 = vmax.xlane.f32.xlu1 %v7265_v56 }
0x399d   :  { %7589 = vrot.lane.b32.xlu1 %v15648_v34, %s14410_s0 }
0x39a1   :  { %7587 = vrot.lane.b32.xlu1 %v15754_v58, %s14410_s0 }
0x3a19   :  { %v7267_v20 = vpop.xlane.xlu1 %7266 }
0x3a1a   :  { %v7268_v62 = vsub.f32 %v7264_v51, %v7267_v20 }
0x3a1c   :  { %v7269_v32 = vmul.f32 1.442695, %v7268_v62 }
0x3a1d   :  { %v7590_v46 = vpop.permute.xlu1 %7589 }
0x3a1e   :  { %14216 = vpow2.f32 %v7269_v32 }
0x3a21   :  { %v7588_v60 = vpop.permute.xlu1 %7587 }
0x3a28   :  { %v14217_v50 = vpop.eup %14216 }
0x3a29   :  { %v7271_v39 = vsel %vm6548_vm7, %v14217_v50, 0.0 }
0x3a2a   :  { %7272 = vadd.xlane.f32.xlu0 %v7271_v39 }
0x3a40   :  { %7276 = vrot.lane.b32.xlu0 %v15642_v35, %s14413_s9 }
0x3a59   :  { %v7181_v3 = vpop.f32.mrb[52].mxu0 }
0x3a5a   :  { %v7185_v42 = vadd.f32 %v7181_v3, %v15718_v52  ;;  %v13063_v0 = vpop.f32.mrb[53].mxu0 }
0x3ab7   :  { %v7273_v29 = vpop.xlane.xlu0 %7272 }
0x3ab8   :  { %14218 = vrcp.f32 %v7273_v29 }
0x3abb   :  { %v7277_v1 = vpop.permute.xlu0 %7276 }
0x3abc   :  { %13070 = vmatpush3.msra.mxu0 %v7277_v1 }
0x3abd   :  { %13081 = vmatprep.subr.mxu0 %v14408_v47 }
0x3ac2   :  { %v14219_v2 = vpop.eup %14218 }
0x3ac3   :  { %v7275_v35 = vmul.f32 %v14219_v2, %v14217_v50 }
0x3ac5   :  { %13072 = vmatmul.mubr.msk.f32.vlgmr.msra.gmra.mrb[54].mxu0 %vm6548_vm7, %v7275_v35 }
0x3ac6   :  { %13082 = vmatpush3.xpose.msk.msra.mxu0 %vm892_vm6, %v15648_v34  ;;  %13083 = vmatprep.mubr.msk.f32.mxu0 %vm14409_vm4, %v14408_v47 }
0x3ac7   :  { %13091 = vmatprep.subr.mxu0 %v14408_v47 }
0x3ac9   :  { %13084 = vmatmul.mubr.msk.f32.vlgmr.msra.gmra.mrb[56].mxu0 %vm892_vm6, %v15754_v58 }
0x3aca   :  { %13092 = vmatpush3.xpose.msk.msra.mxu0 %vm892_vm6, %v7590_v46  ;;  %13093 = vmatprep.mubr.msk.f32.mxu0 %vm14409_vm4, %v14408_v47 }
0x3acb   :  { %13805 = vmatprep.subr.bf16.mxu0 %v14412_v22 }
0x3acd   :  { %13094 = vmatmul.mubr.msk.f32.vlgmr.msra.gmra.mrb[58].mxu0 %vm892_vm6, %v7588_v60 }
0x3ace   :  { %13807 = vmatpush3.bf16.msra.mxu0 %v15694_v49  ;;  %13105 = vmatprep.mubr.msk.f32.mxu0 %vm14409_vm4, %v14408_v47 }
0x3acf   :  { %13115 = vmatprep.subr.mxu0 %v14408_v47 }
0x3b98   :  { %v7348_v36 = vpop.f32.mrb[54].mxu0 }
0x3b99   :  { %v13073_v48 = vpop.f32.mrb[55].mxu0  ;;  %13079 = vmatmul.mubr.msk.f32.vlgmr.msra.gmra.mrb[82].mxu1 %vm892_vm6, %v7348_v36 }
0x3b9a   :  { %13087 = vmatpush3.msra.mxu1 %v15640_v17  ;;  %13088 = vmatprep.mubr.msk.f32.mxu1 %vm14409_vm4, %v14408_v47 }
0x3b9b   :  { %13096 = vmatprep.subr.mxu1 %v14408_v47 }
0x3b9c   :  { %v7498_v5 = vpop.f32.mrb[56].mxu0 }
0x3b9d   :  { %v7502_v49 = vsel %vm15663_vm0, %v7498_v5, -1e+30  ;;  %v13085_v30 = vpop.f32.mrb[57].mxu0 }
0x3b9e   :  { %v7503_v12 = vsel %vm6548_vm7, %v7502_v49, -inf }
0x3b9f   :  { %7504 = vmax.xlane.f32.xlu0 %v7503_v12 }
0x3ba0   :  { %v7661_v61 = vpop.f32.mrb[58].mxu0 }
0x3ba1   :  { %v7665_v31 = vsel %vm15663_vm0, %v7661_v61, -1e+30  ;;  %v13095_v54 = vpop.f32.mrb[59].mxu0 }
0x3ba2   :  { %v7666_v25 = vsel %vm6548_vm7, %v7665_v31, -inf }
0x3ba3   :  { %7667 = vmax.xlane.f32.xlu1 %v7666_v25 }
0x3bb4   :  { %7678 = vrot.lane.b32.xlu1 %v15640_v17, %s14410_s0 }
0x3bb8   :  { %7900 = vrot.lane.b32.xlu1 %v15754_v58, %s14411_s5 }
0x3c2c   :  { %v7505_v52 = vpop.xlane.xlu0 %7504 }
0x3c2d   :  { %v7506_v4 = vsub.f32 %v7502_v49, %v7505_v52 }
0x3c2f   :  { %v7507_v24 = vmul.f32 1.442695, %v7506_v4  ;;  %v11780_v4 = vld [vmem:[%s16413_s15] ss:$0 sm:$0xff] }
0x3c30   :  { %v7668_v23 = vpop.xlane.xlu1 %7667 }
0x3c31   :  { %14220 = vpow2.f32 %v7507_v24  ;;  %v7669_v33 = vsub.f32 %v7665_v31, %v7668_v23 }
0x3c33   :  { %v7670_v18 = vmul.f32 1.442695, %v7669_v33 }
0x3c34   :  { %v7679_v6 = vpop.permute.xlu1 %7678 }
0x3c35   :  { %14222 = vpow2.f32 %v7670_v18 }
0x3c3b   :  { %v14221_v16 = vpop.eup %14220 }
0x3c3c   :  { %v7509_v14 = vsel %vm6548_vm7, %v14221_v16, 0.0 }
0x3c3d   :  { %7510 = vadd.xlane.f32.xlu0 %v7509_v14 }
0x3c3f   :  { %v14223_v19 = vpop.eup %14222 }
0x3c40   :  { %v7672_v44 = vsel %vm6548_vm7, %v14223_v19, 0.0 }
0x3c41   :  { %7673 = vadd.xlane.f32.xlu0 %v7672_v44 }
0x3c57   :  { %7902 = vrot.lane.b32.xlu0 %v15648_v34, %s14411_s5 }
0x3c6c   :  { %v7421_v41 = vpop.f32.mrb[82].mxu1 }
0x3c6d   :  { %v15805_v11 = vadd.f32 %v7421_v41, %v7185_v42  ;;  %v13080_v37 = vpop.f32.mrb[83].mxu1 }
0x3c6f   :  { %v8380_v52 = vadd.f32 %v15805_v11, %v15577_v55 }
0x3c71   :  { %v8388_v33 = vadd.f32 %v11780_v4, %v8380_v52 }
0x3c73   :  { %v8390_v18 = vsel %vm614_vm2, %v8388_v33, 0.0 }
0x3cca   :  { %v7511_v21 = vpop.xlane.xlu0 %7510 }
0x3ccb   :  { %14224 = vrcp.f32 %v7511_v21 }
0x3cce   :  { %v7674_v9 = vpop.xlane.xlu0 %7673 }
0x3ccf   :  { %14226 = vrcp.f32 %v7674_v9 }
0x3cd2   :  { %v7903_v57 = vpop.permute.xlu0 %7902 }
0x3cd5   :  { %v14225_v27 = vpop.eup %14224 }
0x3cd6   :  { %v7513_v15 = vmul.f32 %v14225_v27, %v14221_v16 }
0x3cd8   :  { %13089 = vmatmul.mubr.msk.f32.vlgmr.msra.gmra.mrb[84].mxu1 %vm6548_vm7, %v7513_v15 }
0x3cd9   :  { %v14227_v13 = vpop.eup %14226  ;;  %13097 = vmatpush3.msra.mxu1 %v7679_v6  ;;  %13098 = vmatprep.mubr.msk.f32.mxu1 %vm14409_vm4, %v14408_v47 }
0x3cda   :  { %v7676_v7 = vmul.f32 %v14227_v13, %v14223_v19  ;;  %13808 = vmatprep.subr.bf16.mxu1 %v14412_v22 }
0x3cdc   :  { %13099 = vmatmul.mubr.msk.f32.vlgmr.msra.gmra.mrb[86].mxu1 %vm6548_vm7, %v7676_v7 }
0x3cdd   :  { %13810 = vmatpush3.bf16.msra.mxu1 %v15700_v38  ;;  %13112 = vmatprep.mubr.msk.f32.mxu1 %vm14409_vm4, %v14408_v47  ;;  %v7901_v38 = vpop.permute.xlu1 %7900 }
0x3cde   :  { %13120 = vmatprep.subr.mxu1 %v14408_v47 }
0x3dab   :  { %v7583_v40 = vpop.f32.mrb[84].mxu1 }
0x3dac   :  { %v13090_v45 = vpop.f32.mrb[85].mxu1  ;;  %13113 = vmatmul.mubr.msk.f32.vlgmr.msra.gmra.mrb[88].mxu1 %vm892_vm6, %v7583_v40 }
0x3dad   :  { %13122 = vmatprep.mubr.msk.f32.mxu1 %vm14409_vm4, %v14408_v47 }
0x3daf   :  { %v7750_v51 = vpop.f32.mrb[86].mxu1 }
0x3db0   :  { %v13100_v56 = vpop.f32.mrb[87].mxu1  ;;  %13106 = vmatmul.mubr.msk.f32.vlgmr.msra.gmra.mrb[60].mxu0 %vm892_vm6, %v7750_v51 }
0x3db1   :  { %13116 = vmatpush3.xpose.msk.msra.mxu0 %vm892_vm6, %v7903_v57  ;;  %13117 = vmatprep.mubr.msk.f32.mxu0 %vm14409_vm4, %v14408_v47  ;;  %v6142_v57 = vld [vmem:[%s16414_s18 + $0x8] sm:$0xff]  ;;  %v6144_v56 = vld [vmem:[%s16414_s18 + $0x18] sm:$0xff] }
0x3db2   :  { %13811 = vmatprep.subr.bf16.mxu0 %v14412_v22 }
0x3db4   :  { %13118 = vmatmul.mubr.msk.f32.vlgmr.msra.gmra.mrb[62].mxu0 %vm892_vm6, %v7901_v38  ;;  %v13817_v38 = vpack.c.bf16 %v6144_v56, %v6142_v57  ;;  %v6164_v57 = vld [vmem:[%s16417_s26 + $0x30] sm:$0xff]  ;;  %v6165_v56 = vld [vmem:[%s16417_s26 + $0x38] sm:$0xff] }
0x3db5   :  { %13813 = vmatpush3.bf16.msra.mxu0 %v15733_v26  ;;  %13129 = vmatprep.mubr.msk.f32.mxu0 %vm14409_vm4, %v14408_v47 }
0x3db6   :  { %13137 = vmatprep.subr.mxu0 %v14408_v47 }
0x3e7f   :  { %v7896_v20 = vpop.f32.mrb[88].mxu1 }
0x3e80   :  { %v13114_v62 = vpop.f32.mrb[89].mxu1 }
0x3e81   :  { %v6143_v62 = vld [vmem:[%s16414_s18 + $0x10] sm:$0xff] }
0x3e83   :  { %v7823_v32 = vpop.f32.mrb[60].mxu0 }
0x3e84   :  { %v7897_v50 = vadd.f32 %v7896_v20, %v7823_v32  ;;  %v13107_v39 = vpop.f32.mrb[61].mxu0  ;;  %v6141_v20 = vld [vmem:[%s16414_s18] sm:$0xff]  ;;  %v6146_v32 = vld [vmem:[%s16414_s18 + $0x28] sm:$0xff] }
0x3e87   :  { %v7974_v59 = vpop.f32.mrb[62].mxu0 }
0x3e88   :  { %v7978_v53 = vsel %vm15663_vm0, %v7974_v59, -1e+30  ;;  %v13119_v3 = vpop.f32.mrb[63].mxu0  ;;  %v6145_v59 = vld [vmem:[%s16414_s18 + $0x20] sm:$0xff] }
0x3e89   :  { %v7979_v42 = vsel %vm6548_vm7, %v7978_v53, -inf }
0x3e8a   :  { %7980 = vmax.xlane.f32.xlu1 %v7979_v42  ;;  %v6150_v42 = vld [vmem:[%s16414_s18 + $0x48] sm:$0xff] }
0x3e9b   :  { %8142 = vrot.lane.b32.xlu1 %v15648_v34, %s14413_s9 }
0x3e9f   :  { %8140 = vrot.lane.b32.xlu1 %v15754_v58, %s14413_s9 }
0x3f17   :  { %v7981_v26 = vpop.xlane.xlu1 %7980 }
0x3f18   :  { %v7982_v0 = vsub.f32 %v7978_v53, %v7981_v26  ;;  %v6147_v53 = vld [vmem:[%s16414_s18 + $0x30] sm:$0xff]  ;;  %v6152_v26 = vld [vmem:[%s16414_s18 + $0x58] sm:$0xff] }
0x3f19   :  { %v13823_v3 = vpack.c.bf16 %v6147_v53, %v6145_v59  ;;  %v6184_v59 = vld [vmem:[%s16417_s26 + $0xd0] sm:$0xff]  ;;  %v6185_v53 = vld [vmem:[%s16417_s26 + $0xd8] sm:$0xff] }
0x3f1a   :  { %v7983_v29 = vmul.f32 1.442695, %v7982_v0  ;;  %v13825_v0 = vpack.c.bf16 %v6152_v26, %v6150_v42  ;;  %v13853_v42 = vpack.c.bf16 %v6185_v53, %v6184_v59  ;;  %v6168_v26 = vld [vmem:[%s16417_s26 + $0x50] sm:$0xff] }
0x3f1b   :  { %v8143_v60 = vpop.permute.xlu1 %8142 }
0x3f1c   :  { %14228 = vpow2.f32 %v7983_v29  ;;  %v6149_v29 = vld [vmem:[%s16414_s18 + $0x40] sm:$0xff] }
0x3f1f   :  { %v8141_v36 = vpop.permute.xlu1 %8140 }
0x3f26   :  { %v14229_v1 = vpop.eup %14228 }
0x3f27   :  { %v7985_v2 = vsel %vm6548_vm7, %v14229_v1, 0.0 }
0x3f28   :  { %7986 = vadd.xlane.f32.xlu0 %v7985_v2 }
0x3f3e   :  { %7990 = vrot.lane.b32.xlu0 %v15640_v17, %s14411_s5 }
0x3fb5   :  { %v7987_v35 = vpop.xlane.xlu0 %7986 }
0x3fb6   :  { %14230 = vrcp.f32 %v7987_v35  ;;  %v6154_v35 = vld [vmem:[%s16414_s18 + $0x68] sm:$0xff] }
0x3fb9   :  { %v7991_v46 = vpop.permute.xlu0 %7990 }
0x3fba   :  { %13121 = vmatpush3.msra.mxu1 %v7991_v46  ;;  %v6156_v46 = vld [vmem:[%s16414_s18 + $0x78] sm:$0xff] }
0x3fbb   :  { %13132 = vmatprep.subr.mxu1 %v14408_v47 }
0x3fc0   :  { %v14231_v34 = vpop.eup %14230 }
0x3fc1   :  { %v7989_v58 = vmul.f32 %v14231_v34, %v14229_v1  ;;  %v6151_v1 = vld [vmem:[%s16414_s18 + $0x50] sm:$0xff]  ;;  %v6153_v34 = vld [vmem:[%s16414_s18 + $0x60] sm:$0xff] }
0x3fc2   :  { %v13827_v2 = vpack.c.bf16 %v6151_v1, %v6149_v29 }
0x3fc3   :  { %13123 = vmatmul.mubr.msk.f32.vlgmr.msra.gmra.mrb[90].mxu1 %vm6548_vm7, %v7989_v58  ;;  %v6155_v58 = vld [vmem:[%s16414_s18 + $0x70] sm:$0xff] }
0x3fc4   :  { %13133 = vmatpush3.xpose.msk.msra.mxu1 %vm892_vm6, %v8143_v60  ;;  %13134 = vmatprep.mubr.msk.f32.mxu1 %vm14409_vm4, %v14408_v47  ;;  %v13829_v60 = vpack.c.bf16 %v6156_v46, %v6154_v35  ;;  %v6186_v35 = vld [vmem:[%s16417_s26 + $0xe0] sm:$0xff]  ;;  %v6187_v46 = vld [vmem:[%s16417_s26 + $0xe8] sm:$0xff] }
0x3fc5   :  { %13814 = vmatprep.subr.bf16.mxu1 %v14412_v22 }
0x3fc7   :  { %13135 = vmatmul.mubr.msk.f32.vlgmr.msra.gmra.mrb[92].mxu1 %vm892_vm6, %v8141_v36  ;;  %v13831_v36 = vpack.c.bf16 %v6155_v58, %v6153_v34  ;;  %v13857_v34 = vpack.c.bf16 %v6187_v46, %v6186_v35  ;;  %v6171_v58 = vld [vmem:[%s16417_s26 + $0x68] sm:$0xff] }
0x3fc8   :  { %13816 = vmatpush3.bf16.msra.mxu1 %v15763_v63  ;;  %13146 = vmatprep.mubr.msk.f32.mxu1 %vm14409_vm4, %v14408_v47 }
0x4096   :  { %v8062_v48 = vpop.f32.mrb[90].mxu1 }
0x4097   :  { %v13124_v5 = vpop.f32.mrb[91].mxu1  ;;  %13130 = vmatmul.mubr.msk.f32.vlgmr.msra.gmra.mrb[64].mxu0 %vm892_vm6, %v8062_v48 }
0x4098   :  { %13139 = vmatprep.mubr.msk.f32.mxu0 %vm14409_vm4, %v14408_v47 }
0x409a   :  { %v8214_v49 = vpop.f32.mrb[92].mxu1 }
0x409b   :  { %v8218_v30 = vsel %vm15663_vm0, %v8214_v49, -1e+30  ;;  %v13136_v12 = vpop.f32.mrb[93].mxu1 }
0x409c   :  { %v8219_v61 = vsel %vm6548_vm7, %v8218_v30, -inf }
0x409d   :  { %8220 = vmax.xlane.f32.xlu0 %v8219_v61 }
0x40b3   :  { %8230 = vrot.lane.b32.xlu0 %v15640_v17, %s14413_s9 }
0x412a   :  { %v8221_v63 = vpop.xlane.xlu0 %8220 }
0x412b   :  { %v8222_v31 = vsub.f32 %v8218_v30, %v8221_v63 }
0x412d   :  { %v8223_v54 = vmul.f32 1.442695, %v8222_v31 }
0x412e   :  { %v8231_v25 = vpop.permute.xlu0 %8230 }
0x412f   :  { %14232 = vpow2.f32 %v8223_v54  ;;  %13138 = vmatpush3.msra.mxu0 %v8231_v25  ;;  %v15890_v25 = vld [vmem:[%s16415_s22] ss:$0 sm:$0xff] }
0x4130   :  { %13818 = vmatprep.subr.bf16.mxu0 %v13817_v38  ;;  %v13847_v38 = vpack.c.bf16 %v6165_v56, %v6164_v57 }
0x4139   :  { %v14233_v24 = vpop.eup %14232 }
0x413a   :  { %v8225_v23 = vsel %vm6548_vm7, %v14233_v24, 0.0 }
0x413b   :  { %8226 = vadd.xlane.f32.xlu1 %v8225_v23 }
0x413f   :  { %8391 = vadd.xlane.f32.xlu1 %v8390_v18  ;;  %v6175_v18 = vld [vmem:[%s16417_s26 + $0x88] sm:$0xff] }
0x416a   :  { %v8135_v16 = vpop.f32.mrb[64].mxu0 }
0x416b   :  { %v8139_v17 = vadd.f32 %v8135_v16, %v7897_v50  ;;  %v13131_v14 = vpop.f32.mrb[65].mxu0  ;;  %v6148_v50 = vld [vmem:[%s16414_s18 + $0x38] sm:$0xff] }
0x416c   :  { %v13821_v39 = vpack.c.bf16 %v6148_v50, %v6146_v32  ;;  %v6159_v14 = vld [vmem:[%s16417_s26 + $0x8] sm:$0xff]  ;;  %v6166_v32 = vld [vmem:[%s16417_s26 + $0x40] sm:$0xff] }
0x416d   :  { %v6167_v50 = vld [vmem:[%s16417_s26 + $0x48] sm:$0xff] }
0x41c8   :  { %v8227_v19 = vpop.xlane.xlu1 %8226 }
0x41c9   :  { %14234 = vrcp.f32 %v8227_v19 }
0x41cc   :  { %v8392_v37 = vpop.xlane.xlu1 %8391 }
0x41cd   :  { %v8396_v21 = vmul.f32 0.015625, %v8392_v37  ;;  %v6161_v37 = vld [vmem:[%s16417_s26 + $0x18] sm:$0xff] }
0x41cf   :  { %v8398_v6 = vsub.f32 %v8388_v33, %v8396_v21  ;;  %v6174_v33 = vld [vmem:[%s16417_s26 + $0x80] sm:$0xff] }
0x41d0   :  { %v13833_v16 = vpack.c.bf16 %v6175_v18, %v6174_v33  ;;  %v6157_v33 = vld [vmem:[%s16418_s28] sm:$0x3] }
0x41d1   :  { %v8400_v45 = vmul.f32 %v8398_v6, %v8398_v6  ;;  %v15943_v18 = vrot.slane %v6157_v33, %v15093_v8 }
0x41d2   :  { %13834 = vmatprep.subr.bf16.mxu1 %v13833_v16  ;;  %v15946_v16 = vrot.slane %v6157_v33, %v15097_v10 }
0x41d3   :  { %v14235_v44 = vpop.eup %14234  ;;  %v8402_v51 = vsel %vm614_vm2, %v8400_v45, 0.0  ;;  %v6181_v45 = vld [vmem:[%s16417_s26 + $0xb8] sm:$0xff] }
0x41d4   :  { %v8229_v41 = vmul.f32 %v14235_v44, %v14233_v24  ;;  %v6176_v44 = vld [vmem:[%s16417_s26 + $0x90] sm:$0xff] }
0x41d6   :  { %13140 = vmatmul.mubr.msk.f32.vlgmr.msra.gmra.mrb[66].mxu0 %vm6548_vm7, %v8229_v41  ;;  %v6177_v41 = vld [vmem:[%s16417_s26 + $0x98] sm:$0xff] }
0x41d7   :  { %8513 = vmatprep.mubr.f32.mxu0 %v14408_v47 }
0x42a9   :  { %v8302_v55 = vpop.f32.mrb[66].mxu0 }
0x42aa   :  { %v13141_v11 = vpop.f32.mrb[67].mxu0  ;;  %13147 = vmatmul.mubr.msk.f32.vlgmr.msra.gmra.mrb[94].mxu1 %vm892_vm6, %v8302_v55  ;;  %v13837_v55 = vpack.c.bf16 %v6177_v41, %v6176_v44 }
0x42ab   :  { %v6160_v11 = vld [vmem:[%s16417_s26 + $0x10] sm:$0xff] }
0x42ac   :  { %v13839_v21 = vpack.c.bf16 %v6161_v37, %v6160_v11 }
0x437d   :  { %v8375_v9 = vpop.f32.mrb[94].mxu1 }
0x437e   :  { %v8379_v27 = vadd.f32 %v8375_v9, %v8139_v17  ;;  %v13148_v15 = vpop.f32.mrb[95].mxu1  ;;  %v6158_v17 = vld [vmem:[%s16417_s26] sm:$0xff] }
0x437f   :  { %v13835_v19 = vpack.c.bf16 %v6159_v14, %v6158_v17  ;;  %v6178_v9 = vld [vmem:[%s16417_s26 + $0xa0] sm:$0xff] }
0x4380   :  { %v8381_v13 = vadd.f32 %v8379_v27, %v15582_v28  ;;  %v13819_v28 = vpack.c.bf16 %v6143_v62, %v6141_v20  ;;  %v6179_v27 = vld [vmem:[%s16417_s26 + $0xa8] sm:$0xff]  ;;  %v6182_v20 = vld [vmem:[%s16417_s26 + $0xc0] sm:$0xff] }
0x4381   :  { %13836 = vmatpush3.bf16.msra.mxu1 %v13835_v19  ;;  %v13841_v15 = vpack.c.bf16 %v6179_v27, %v6178_v9  ;;  %v6183_v62 = vld [vmem:[%s16417_s26 + $0xc8] sm:$0xff] }
0x4382   :  { %v8389_v7 = vadd.f32 %v11780_v4, %v8381_v13  ;;  %13820 = vmatpush1.bf16.msra.mxu0 %v13819_v28  ;;  %v15893_v4 = vld [vmem:[%s16416_s23] ss:$0 sm:$0xff]  ;;  %13838 = vmatprep.subr.bf16.mxu1 %v13837_v55  ;;  %v6163_v13 = vld [vmem:[%s16417_s26 + $0x28] sm:$0xff]  ;;  %v13849_v28 = vpack.c.bf16 %v6183_v62, %v6182_v20 }
0x4383   :  { %13822 = vmatprep.subr.bf16.mxu0 %v13821_v39  ;;  %v13851_v39 = vpack.c.bf16 %v6167_v50, %v6166_v32 }
0x4384   :  { %v8393_v40 = vsel %vm614_vm2, %v8389_v7, 0.0 }
0x4385   :  { %8394 = vadd.xlane.f32.xlu1 %v8393_v40  ;;  %13840 = vmatpush3.bf16.msra.mxu1 %v13839_v21  ;;  %v6180_v40 = vld [vmem:[%s16417_s26 + $0xb0] sm:$0xff] }
0x4386   :  { %13824 = vmatpush1.bf16.msra.mxu0 %v13823_v3  ;;  %13842 = vmatprep.subr.bf16.mxu1 %v13841_v15 }
0x4387   :  { %13826 = vmatprep.subr.bf16.mxu0 %v13825_v0  ;;  %v6169_v0 = vld [vmem:[%s16417_s26 + $0x58] sm:$0xff] }
0x4388   :  { %v13855_v1 = vpack.c.bf16 %v6169_v0, %v6168_v26 }
0x4389   :  { %8403 = vadd.xlane.f32.xlu1 %v8402_v51  ;;  %v13845_v51 = vpack.c.bf16 %v6181_v45, %v6180_v40 }
0x438a   :  { %13828 = vmatpush1.bf16.msra.mxu0 %v13827_v2 }
0x438b   :  { %13830 = vmatprep.subr.bf16.mxu0 %v13829_v60  ;;  %v6170_v60 = vld [vmem:[%s16417_s26 + $0x60] sm:$0xff] }
0x438e   :  { %13832 = vmatpush1.bf16.msra.mxu0 %v13831_v36  ;;  %v13859_v36 = vpack.c.bf16 %v6171_v58, %v6170_v60 }
0x4412   :  { %v8395_v48 = vpop.xlane.xlu1 %8394 }
0x4413   :  { %v8397_v5 = vmul.f32 0.015625, %v8395_v48  ;;  %v6188_v48 = vld [vmem:[%s16417_s26 + $0xf0] sm:$0xff] }
0x4415   :  { %v15884_v49 = vsub.f32 %v8389_v7, %v8397_v5  ;;  %v6189_v5 = vld [vmem:[%s16417_s26 + $0xf8] sm:$0xff] }
0x4416   :  { %v8404_v30 = vpop.xlane.xlu1 %8403 }
0x4417   :  { %v8408_v12 = vmul.f32 0.015625, %v8404_v30  ;;  %v8401_v61 = vmul.f32 %v15884_v49, %v15884_v49  ;;  %v13861_v30 = vpack.c.bf16 %v6189_v5, %v6188_v48 }
0x4419   :  { %v8410_v63 = vadd.f32 1e-05, %v8408_v12  ;;  %v8405_v31 = vsel %vm614_vm2, %v8401_v61, 0.0  ;;  %v6172_v12 = vld [vmem:[%s16417_s26 + $0x70] sm:$0xff]  ;;  %v6173_v61 = vld [vmem:[%s16417_s26 + $0x78] sm:$0xff] }
0x441a   :  { %8406 = vadd.xlane.f32.xlu1 %v8405_v31 }
0x441b   :  { %14236 = vrsqrt.f32 %v8410_v63  ;;  %v13863_v63 = vpack.c.bf16 %v6173_v61, %v6172_v12 }
0x4425   :  { %v14237_v54 = vpop.eup %14236 }
0x4426   :  { %v8414_v52 = vmul.f32 %v14237_v54, %v8398_v6  ;;  %v6162_v6 = vld [vmem:[%s16417_s26 + $0x20] sm:$0xff] }
0x4427   :  { %v13843_v7 = vpack.c.bf16 %v6163_v13, %v6162_v6 }
0x4428   :  { %v8422_v24 = vmul.f32 %v15890_v25, %v8414_v52 }
0x4429   :  { %13844 = vmatpush3.bf16.msra.mxu1 %v13843_v7 }
0x442a   :  { %v15897_v23 = vadd.f32 %v15893_v4, %v8422_v24  ;;  %13846 = vmatprep.subr.bf16.mxu1 %v13845_v51 }
0x442c   :  { %11783 = vmatmul.mubr.msk.f32.vlgmr.msra.gmra.mrb[68].mxu0 %vm614_vm2, %v15897_v23 }
0x442d   :  { %8519 = vmatprep.mubr.f32.mxu0 %v14408_v47  ;;  %13848 = vmatpush3.bf16.msra.mxu1 %v13847_v38 }
0x442e   :  { %13850 = vmatprep.subr.bf16.mxu1 %v13849_v28 }
0x4431   :  { %13852 = vmatpush3.bf16.msra.mxu1 %v13851_v39 }
0x4432   :  { %13854 = vmatprep.subr.bf16.mxu1 %v13853_v42 }
0x4435   :  { %13856 = vmatpush3.bf16.msra.mxu1 %v13855_v1 }
0x4436   :  { %13858 = vmatprep.subr.bf16.mxu1 %v13857_v34 }
0x4439   :  { %13860 = vmatpush3.bf16.msra.mxu1 %v13859_v36 }
0x443a   :  { %13862 = vmatprep.subr.bf16.mxu1 %v13861_v30 }
0x443d   :  { %13864 = vmatpush3.bf16.msra.mxu1 %v13863_v63 }
0x44a7   :  { %v8407_v3 = vpop.xlane.xlu1 %8406 }
0x44a8   :  { %v8409_v29 = vmul.f32 0.015625, %v8407_v3 }
0x44aa   :  { %v8411_v2 = vadd.f32 1e-05, %v8409_v29 }
0x44ac   :  { %14238 = vrsqrt.f32 %v8411_v2 }
0x44b6   :  { %v14239_v31 = vpop.eup %14238 }
0x44b7   :  { %v8415_v54 = vmul.f32 %v14239_v31, %v15884_v49 }
0x44b9   :  { %v8423_v52 = vmul.f32 %v15890_v25, %v8415_v54 }
0x44bb   :  { %v15937_v24 = vadd.f32 %v15893_v4, %v8423_v52 }
0x44bd   :  { %11784 = vmatmul.mubr.msk.f32.gmra.mrb[70].mxu0 %vm614_vm2, %v15937_v24 }
0x44ff   :  { %v8515_v17 = vpop.f32.mrb[68].mxu0 }
0x4500   :  { %v8516_v14 = vadd.f32 %v8515_v17, %v15943_v18  ;;  %v8517_v19 = vpop.f32.mrb[69].mxu0 }
0x4501   :  { %v8518_v49 = vadd.f32 %v8517_v19, %v15946_v16 }
0x4502   :  { %v8530_v25 = vmul.f32 0.70710677, %v8516_v14  ;;  %v8526_v31 = vmul.f32 0.5, %v8516_v14 }
0x4503   :  { %v8531_v44 = vmul.f32 0.70710677, %v8518_v49  ;;  %v8527_v61 = vmul.f32 0.5, %v8518_v49 }
0x4504   :  { %v8534_v4 = vand.u32 2147483647, %v8530_v25  ;;  %vm8614_vm8 = vcmp.lt.f32.partialorder %v8530_v25, 0.0 }
0x4505   :  { %v8535_v41 = vand.u32 2147483647, %v8531_v44  ;;  %vm8615_vm9 = vcmp.lt.f32.partialorder %v8531_v44, 0.0 }
0x4506   :  { %v8538_v55 = vmul.f32 0.3275911, %v8534_v4  ;;  %v8590_v9 = vsub.f32 0.0, %v8534_v4 }
0x4507   :  { %v8539_v11 = vmul.f32 0.3275911, %v8535_v41  ;;  %v8591_v27 = vsub.f32 0.0, %v8535_v41 }
0x4508   :  { %v8542_v37 = vadd.f32 1.0, %v8538_v55  ;;  %v8594_v6 = vmul.f32 %v8590_v9, %v8534_v4 }
0x4509   :  { %v8543_v21 = vadd.f32 1.0, %v8539_v11  ;;  %v8595_v40 = vmul.f32 %v8591_v27, %v8535_v41 }
0x450a   :  { %14240 = vrcp.f32 %v8542_v37  ;;  %v8598_v57 = vmul.f32 1.442695, %v8594_v6 }
0x450b   :  { %14242 = vrcp.f32 %v8543_v21  ;;  %v8600_v20 = vmul.f32 1.442695, %v8595_v40 }
0x450c   :  { %14244 = vpow2.f32 %v8598_v57 }
0x450d   :  { %14246 = vpow2.f32 %v8600_v20 }
0x4514   :  { %v14241_v15 = vpop.eup %14240 }
0x4515   :  { %v14243_v13 = vpop.eup %14242  ;;  %v8554_v7 = vmul.f32 1.0614054, %v14241_v15 }
0x4516   :  { %v8555_v45 = vmul.f32 1.0614054, %v14243_v13  ;;  %v14245_v1 = vpop.eup %14244 }
0x4517   :  { %v8558_v51 = vadd.f32 -1.4531521, %v8554_v7  ;;  %v14247_v35 = vpop.eup %14246 }
0x4518   :  { %v8559_v56 = vadd.f32 -1.4531521, %v8555_v45 }
0x4519   :  { %v8562_v38 = vmul.f32 %v14241_v15, %v8558_v51 }
0x451a   :  { %v8563_v62 = vmul.f32 %v14243_v13, %v8559_v56 }
0x451b   :  { %v8566_v28 = vadd.f32 1.4214138, %v8562_v38 }
0x451c   :  { %v8567_v32 = vadd.f32 1.4214138, %v8563_v62 }
0x451d   :  { %v8570_v50 = vmul.f32 %v14241_v15, %v8566_v28 }
0x451e   :  { %v8571_v39 = vmul.f32 %v14243_v13, %v8567_v32 }
0x451f   :  { %v8574_v59 = vadd.f32 -0.28449672, %v8570_v50 }
0x4520   :  { %v8575_v53 = vadd.f32 -0.28449672, %v8571_v39 }
0x4521   :  { %v8578_v3 = vmul.f32 %v14241_v15, %v8574_v59 }
0x4522   :  { %v8579_v42 = vmul.f32 %v14243_v13, %v8575_v53 }
0x4523   :  { %v8582_v26 = vadd.f32 0.2548296, %v8578_v3 }
0x4524   :  { %v8583_v0 = vadd.f32 0.2548296, %v8579_v42 }
0x4525   :  { %v8586_v29 = vmul.f32 %v14241_v15, %v8582_v26 }
0x4526   :  { %v8587_v2 = vmul.f32 %v14243_v13, %v8583_v0 }
0x4527   :  { %v8606_v46 = vmul.f32 %v14245_v1, %v8586_v29 }
0x4528   :  { %v8607_v34 = vmul.f32 %v14247_v35, %v8587_v2 }
0x4529   :  { %v8610_v60 = vsub.f32 1.0, %v8606_v46 }
0x452a   :  { %v8611_v58 = vsub.f32 1.0, %v8607_v34 }
0x452b   :  { %v8618_v36 = vsub.f32 0.0, %v8610_v60 }
0x452c   :  { %v8619_v48 = vsub.f32 0.0, %v8611_v58 }
0x452d   :  { %v8622_v5 = vsel %vm8614_vm8, %v8618_v36, %v8610_v60 }
0x452e   :  { %v8626_v30 = vadd.f32 1.0, %v8622_v5  ;;  %v8623_v12 = vsel %vm8615_vm9, %v8619_v48, %v8611_v58 }
0x452f   :  { %v8627_v63 = vadd.f32 1.0, %v8623_v12 }
0x4530   :  { %v8630_v52 = vmul.f32 %v8626_v30, %v8526_v31 }
0x4531   :  { %v8631_v54 = vmul.f32 %v8627_v63, %v8527_v61 }
0x4533   :  { %8704 = vmatprep.mubr.f32.mxu1 %v8631_v54  ;;  %v11785_v54 = vld [vmem:[%s16419_s1] ss:$0 sm:$0xff] }
0x4534   :  { %8705 = vmatmul.mubr.f32.vlgmr.msra.gmra.mrb[96].mxu1 %v8630_v52 }
0x4590   :  { %v8521_v33 = vpop.f32.mrb[70].mxu0 }
0x4591   :  { %v8522_v17 = vadd.f32 %v8521_v33, %v15943_v18  ;;  %v8523_v19 = vpop.f32.mrb[71].mxu0 }
0x4592   :  { %v8524_v4 = vadd.f32 %v8523_v19, %v15946_v16 }
0x4593   :  { %v8532_v41 = vmul.f32 0.70710677, %v8522_v17  ;;  %v8528_v12 = vmul.f32 0.5, %v8522_v17 }
0x4594   :  { %v8533_v25 = vmul.f32 0.70710677, %v8524_v4  ;;  %v8529_v5 = vmul.f32 0.5, %v8524_v4 }
0x4595   :  { %v8536_v55 = vand.u32 2147483647, %v8532_v41  ;;  %vm8616_vm10 = vcmp.lt.f32.partialorder %v8532_v41, 0.0 }
0x4596   :  { %v8537_v11 = vand.u32 2147483647, %v8533_v25  ;;  %vm8617_vm11 = vcmp.lt.f32.partialorder %v8533_v25, 0.0 }
0x4597   :  { %v8540_v44 = vmul.f32 0.3275911, %v8536_v55  ;;  %v8592_v14 = vsub.f32 0.0, %v8536_v55 }
0x4598   :  { %v8541_v37 = vmul.f32 0.3275911, %v8537_v11  ;;  %v8593_v9 = vsub.f32 0.0, %v8537_v11 }
0x4599   :  { %v8544_v21 = vadd.f32 1.0, %v8540_v44  ;;  %v8596_v15 = vmul.f32 %v8592_v14, %v8536_v55 }
0x459a   :  { %v8545_v49 = vadd.f32 1.0, %v8541_v37  ;;  %v8597_v13 = vmul.f32 %v8593_v9, %v8537_v11 }
0x459b   :  { %14248 = vrcp.f32 %v8544_v21  ;;  %v8602_v16 = vmul.f32 1.442695, %v8596_v15 }
0x459c   :  { %14250 = vrcp.f32 %v8545_v49  ;;  %v8604_v51 = vmul.f32 1.442695, %v8597_v13 }
0x459d   :  { %14252 = vpow2.f32 %v8602_v16 }
0x459e   :  { %14254 = vpow2.f32 %v8604_v51 }
0x45a5   :  { %v14249_v27 = vpop.eup %14248 }
0x45a6   :  { %v14251_v6 = vpop.eup %14250  ;;  %v8556_v18 = vmul.f32 1.0614054, %v14249_v27 }
0x45a7   :  { %v8557_v7 = vmul.f32 1.0614054, %v14251_v6  ;;  %v14253_v26 = vpop.eup %14252 }
0x45a8   :  { %v8560_v40 = vadd.f32 -1.4531521, %v8556_v18  ;;  %v14255_v29 = vpop.eup %14254 }
0x45a9   :  { %v8561_v45 = vadd.f32 -1.4531521, %v8557_v7 }
0x45aa   :  { %v8564_v57 = vmul.f32 %v14249_v27, %v8560_v40 }
0x45ab   :  { %v8565_v56 = vmul.f32 %v14251_v6, %v8561_v45  ;;  %v11873_v45 = vld [vmem:[%s16408_s10 + $0x1] ss:$0 sm:$0xff] }
0x45ac   :  { %v8568_v38 = vadd.f32 1.4214138, %v8564_v57  ;;  %v11874_v57 = vld [vmem:[%s16409_s11 + $0x1] ss:$0 sm:$0xff] }
0x45ad   :  { %v8569_v20 = vadd.f32 1.4214138, %v8565_v56 }
0x45ae   :  { %v8572_v62 = vmul.f32 %v14249_v27, %v8568_v38 }
0x45af   :  { %v8573_v28 = vmul.f32 %v14251_v6, %v8569_v20  ;;  %v11788_v20 = vld [vmem:[%s16405_s12 + $0x40] sm:$0xff] }
0x45b0   :  { %v8576_v32 = vadd.f32 -0.28449672, %v8572_v62  ;;  %v11789_v62 = vld [vmem:[%s16405_s12 + $0x48] sm:$0xff] }
0x45b1   :  { %v8577_v50 = vadd.f32 -0.28449672, %v8573_v28  ;;  %v13865_v28 = vpack.c.bf16 %v11789_v62, %v11788_v20 }
0x45b2   :  { %v8580_v39 = vmul.f32 %v14249_v27, %v8576_v32  ;;  %v11804_v32 = vld [vmem:[%s16406_s2 + $0x40] sm:$0xff] }
0x45b3   :  { %v8581_v59 = vmul.f32 %v14251_v6, %v8577_v50  ;;  %v11805_v50 = vld [vmem:[%s16406_s2 + $0x48] sm:$0xff]  ;;  %13866 = vmatprep.subr.bf16.mxu0 %v13865_v28 }
0x45b4   :  { %v8584_v53 = vadd.f32 0.2548296, %v8580_v39  ;;  %v13897_v39 = vpack.c.bf16 %v11805_v50, %v11804_v32  ;;  %13868 = vmatpush3.bf16.msra.mxu0 %v13865_v28 }
0x45b5   :  { %v8585_v3 = vadd.f32 0.2548296, %v8581_v59  ;;  %v11790_v59 = vld [vmem:[%s16405_s12 + $0x50] sm:$0xff] }
0x45b6   :  { %v8588_v42 = vmul.f32 %v14249_v27, %v8584_v53  ;;  %13898 = vmatprep.subr.bf16.mxu1 %v13897_v39  ;;  %v11791_v53 = vld [vmem:[%s16405_s12 + $0x58] sm:$0xff] }
0x45b7   :  { %v8589_v0 = vmul.f32 %v14251_v6, %v8585_v3  ;;  %13900 = vmatpush3.bf16.msra.mxu1 %v13897_v39  ;;  %v13869_v3 = vpack.c.bf16 %v11791_v53, %v11790_v59 }
0x45b8   :  { %v8608_v1 = vmul.f32 %v14253_v26, %v8588_v42  ;;  %v11806_v42 = vld [vmem:[%s16406_s2 + $0x50] sm:$0xff]  ;;  %v11807_v26 = vld [vmem:[%s16406_s2 + $0x58] sm:$0xff] }
0x45b9   :  { %v8609_v2 = vmul.f32 %v14255_v29, %v8589_v0  ;;  %v13901_v0 = vpack.c.bf16 %v11807_v26, %v11806_v42  ;;  %13870 = vmatprep.subr.bf16.mxu0 %v13869_v3  ;;  %v11792_v29 = vld [vmem:[%s16405_s12 + $0x60] sm:$0xff] }
0x45ba   :  { %v8612_v35 = vsub.f32 1.0, %v8608_v1  ;;  %13872 = vmatpush3.bf16.msra.mxu0 %v13869_v3  ;;  %v11793_v1 = vld [vmem:[%s16405_s12 + $0x68] sm:$0xff] }
0x45bb   :  { %v8613_v46 = vsub.f32 1.0, %v8609_v2  ;;  %13902 = vmatprep.subr.bf16.mxu1 %v13901_v0  ;;  %v13873_v2 = vpack.c.bf16 %v11793_v1, %v11792_v29 }
0x45bc   :  { %v8620_v34 = vsub.f32 0.0, %v8612_v35  ;;  %13904 = vmatpush3.bf16.msra.mxu1 %v13901_v0 }
0x45bd   :  { %v8621_v60 = vsub.f32 0.0, %v8613_v46  ;;  %13874 = vmatprep.subr.bf16.mxu0 %v13873_v2 }
0x45be   :  { %v8624_v58 = vsel %vm8616_vm10, %v8620_v34, %v8612_v35  ;;  %v11808_v35 = vld [vmem:[%s16406_s2 + $0x60] sm:$0xff]  ;;  %13876 = vmatpush3.bf16.msra.mxu0 %v13873_v2 }
0x45bf   :  { %v8625_v36 = vsel %vm8617_vm11, %v8621_v60, %v8613_v46  ;;  %v8628_v48 = vadd.f32 1.0, %v8624_v58  ;;  %v11809_v46 = vld [vmem:[%s16406_s2 + $0x68] sm:$0xff]  ;;  %v11794_v60 = vld [vmem:[%s16405_s12 + $0x70] sm:$0xff]  ;;  %v11795_v58 = vld [vmem:[%s16405_s12 + $0x78] sm:$0xff] }
0x45c0   :  { %v8629_v30 = vadd.f32 1.0, %v8625_v36  ;;  %v13905_v34 = vpack.c.bf16 %v11809_v46, %v11808_v35  ;;  %v13877_v36 = vpack.c.bf16 %v11795_v58, %v11794_v60  ;;  %v11814_v46 = vld [vmem:[%s16412_s16 + $0x50] sm:$0xff] }
0x45c1   :  { %v8632_v63 = vmul.f32 %v8628_v48, %v8528_v12  ;;  %v11810_v48 = vld [vmem:[%s16406_s2 + $0x70] sm:$0xff]  ;;  %v11796_v12 = vld [vmem:[%s16407_s7 + $0x40] sm:$0xff] }
0x45c2   :  { %v8633_v61 = vmul.f32 %v8629_v30, %v8529_v5  ;;  %13906 = vmatprep.subr.bf16.mxu1 %v13905_v34  ;;  %v11811_v5 = vld [vmem:[%s16406_s2 + $0x78] sm:$0xff]  ;;  %13878 = vmatprep.subr.bf16.mxu0 %v13877_v36 }
0x45c3   :  { %13908 = vmatpush3.bf16.msra.mxu1 %v13905_v34  ;;  %v13909_v30 = vpack.c.bf16 %v11811_v5, %v11810_v48  ;;  %13880 = vmatpush3.bf16.msra.mxu0 %v13877_v36  ;;  %v11815_v34 = vld [vmem:[%s16412_s16 + $0x58] sm:$0xff]  ;;  %v11812_v48 = vld [vmem:[%s16412_s16 + $0x40] sm:$0xff]  ;;  %v11813_v5 = vld [vmem:[%s16412_s16 + $0x48] sm:$0xff] }
0x45c4   :  { %8709 = vmatprep.mubr.f32.mxu1 %v8633_v61  ;;  %v11797_v61 = vld [vmem:[%s16407_s7 + $0x48] sm:$0xff]  ;;  %v16064_v60 = vpack.c.bf16 %v11815_v34, %v11814_v46 }
0x45c5   :  { %8710 = vmatmul.mubr.f32.gmra.mrb[98].mxu1 %v8632_v63  ;;  %13910 = vmatprep.subr.bf16.mxu1 %v13909_v30  ;;  %v13881_v63 = vpack.c.bf16 %v11797_v61, %v11796_v12  ;;  %v16071_v12 = vpack.c.bf16 %v11813_v5, %v11812_v48 }
0x45c7   :  { %13912 = vmatpush3.bf16.msra.mxu1 %v13909_v30  ;;  %13882 = vmatprep.subr.bf16.mxu0 %v13881_v63 }
0x45c8   :  { %13211 = vmatprep.subr.mxu1 %v14408_v47 }
0x4607   :  { %v12430_v31 = vpop.f32.mrb[96].mxu1 }
0x4608   :  { %v12431_v52 = vpop.f32.mrb[97].mxu1 }
0x4609   :  { %v12432_v33 = vadd.f32 %v12431_v52, %v12430_v31 }
0x460b   :  { %v8707_v19 = vadd.f32 %v12432_v33, %v11785_v54 }
0x460d   :  { %v15954_v55 = vadd.f32 %v8707_v19, %v15897_v23 }
0x460f   :  { %v8817_v41 = vsel %vm614_vm2, %v15954_v55, 0.0 }
0x4610   :  { %8818 = vadd.xlane.f32.xlu0 %v8817_v41  ;;  %v11798_v41 = vld [vmem:[%s16407_s7 + $0x50] sm:$0xff] }
0x4698   :  { %v12433_v25 = vpop.f32.mrb[98].mxu1 }
0x4699   :  { %v12434_v4 = vpop.f32.mrb[99].mxu1 }
0x469a   :  { %v12435_v11 = vadd.f32 %v12434_v4, %v12433_v25  ;;  %v11799_v25 = vld [vmem:[%s16407_s7 + $0x58] sm:$0xff] }
0x469c   :  { %v8712_v17 = vadd.f32 %v12435_v11, %v11785_v54 }
0x469d   :  { %v8819_v44 = vpop.xlane.xlu0 %8818 }
0x469e   :  { %v15959_v37 = vadd.f32 %v8712_v17, %v15937_v24  ;;  %v8823_v21 = vmul.f32 0.015625, %v8819_v44  ;;  %v13885_v17 = vpack.c.bf16 %v11799_v25, %v11798_v41  ;;  %v11800_v44 = vld [vmem:[%s16407_s7 + $0x60] sm:$0xff] }
0x46a0   :  { %v8825_v49 = vsub.f32 %v15954_v55, %v8823_v21  ;;  %v8820_v14 = vsel %vm614_vm2, %v15959_v37, 0.0  ;;  %v11801_v21 = vld [vmem:[%s16407_s7 + $0x68] sm:$0xff] }
0x46a1   :  { %8821 = vadd.xlane.f32.xlu1 %v8820_v14  ;;  %v11802_v14 = vld [vmem:[%s16407_s7 + $0x70] sm:$0xff] }
0x46a2   :  { %v8827_v23 = vmul.f32 %v8825_v49, %v8825_v49 }
0x46a4   :  { %v8829_v9 = vsel %vm614_vm2, %v8827_v23, 0.0  ;;  %v11803_v23 = vld [vmem:[%s16407_s7 + $0x78] sm:$0xff] }
0x46a5   :  { %8830 = vadd.xlane.f32.xlu1 %v8829_v9  ;;  %v13893_v9 = vpack.c.bf16 %v11803_v23, %v11802_v14 }
0x472e   :  { %v8822_v27 = vpop.xlane.xlu1 %8821 }
0x472f   :  { %v8824_v15 = vmul.f32 0.015625, %v8822_v27 }
0x4731   :  { %v15966_v24 = vsub.f32 %v15959_v37, %v8824_v15 }
0x4732   :  { %v8831_v6 = vpop.xlane.xlu1 %8830 }
0x4733   :  { %v8835_v13 = vmul.f32 0.015625, %v8831_v6  ;;  %v8828_v18 = vmul.f32 %v15966_v24, %v15966_v24 }
0x4735   :  { %v8837_v7 = vadd.f32 1e-05, %v8835_v13  ;;  %v8832_v40 = vsel %vm614_vm2, %v8828_v18, 0.0 }
0x4736   :  { %8833 = vadd.xlane.f32.xlu1 %v8832_v40 }
0x4737   :  { %14256 = vrsqrt.f32 %v8837_v7 }
0x4741   :  { %v14257_v16 = vpop.eup %14256 }
0x4742   :  { %v8841_v51 = vmul.f32 %v14257_v16, %v8825_v49  ;;  %v13889_v49 = vpack.c.bf16 %v11801_v21, %v11800_v44 }
0x4744   :  { %v8849_v56 = vmul.f32 %v11873_v45, %v8841_v51 }
0x4746   :  { %v15973_v38 = vadd.f32 %v11874_v57, %v8849_v56 }
0x4748   :  { %13165 = vmatprep.mubr.msk.f32.mxu0 %vm614_vm2, %v15973_v38  ;;  %13203 = vmatprep.mubr.msk.f32.mxu1 %vm614_vm2, %v15973_v38 }
0x47c3   :  { %v8834_v31 = vpop.xlane.xlu1 %8833 }
0x47c4   :  { %v8836_v54 = vmul.f32 0.015625, %v8834_v31 }
0x47c6   :  { %v8838_v52 = vadd.f32 1e-05, %v8836_v54 }
0x47c8   :  { %14258 = vrsqrt.f32 %v8838_v52 }
0x47d2   :  { %v14259_v33 = vpop.eup %14258 }
0x47d3   :  { %v8842_v19 = vmul.f32 %v14259_v33, %v15966_v24 }
0x47d5   :  { %v8850_v4 = vmul.f32 %v11873_v45, %v8842_v19 }
0x47d7   :  { %v8858_v11 = vadd.f32 %v11874_v57, %v8850_v4 }
0x47d9   :  { %13166 = vmatmul.mubr.msk.f32.vlgmr.msra.gmra.mrb[72].mxu0 %vm614_vm2, %v8858_v11  ;;  %13204 = vmatmul.mubr.msk.f32.vlgmr.msra.gmra.mrb[100].mxu1 %vm614_vm2, %v8858_v11 }
0x47da   :  { %13884 = vmatpush3.bf16.msra.mxu0 %v13881_v63  ;;  %13184 = vmatprep.mubr.msk.f32.mxu0 %vm614_vm2, %v15973_v38 }
0x47db   :  { %13886 = vmatprep.subr.bf16.mxu0 %v13885_v17  ;;  %13213 = vmatprep.mubr.msk.f32.mxu1 %vm14409_vm4, %v14408_v47 }
0x47de   :  { %13888 = vmatpush3.bf16.msra.mxu0 %v13885_v17 }
0x47df   :  { %13890 = vmatprep.subr.bf16.mxu0 %v13889_v49 }
0x47e2   :  { %13892 = vmatpush3.bf16.msra.mxu0 %v13889_v49 }
0x47e3   :  { %13894 = vmatprep.subr.bf16.mxu0 %v13893_v9 }
0x47e6   :  { %13896 = vmatpush3.bf16.msra.mxu0 %v13893_v9 }
0x47e7   :  { %13206 = vmatprep.subr.mxu0 %v14408_v47 }
0x47e9   :  { %13185 = vmatmul.mubr.msk.f32.vlgmr.msra.gmra.mrb[74].mxu0 %vm614_vm2, %v8858_v11 }
0x47ea   :  { %13208 = vmatprep.mubr.msk.f32.mxu0 %vm14409_vm4, %v14408_v47 }
0x48ac   :  { %v16015_v27 = vpop.f32.mrb[72].mxu0  ;;  %v16017_v15 = vpop.f32.mrb[100].mxu1 }
0x48ad   :  { %v8931_v24 = vpop.f32.mrb[73].mxu0  ;;  %v16019_v6 = vpop.f32.mrb[101].mxu1 }
0x48ae   :  { %13212 = vmatpush3.msra.mxu1 %v16019_v6  ;;  %v16031_v7 = vmul.f32 0.125, %v8931_v24 }
0x48af   :  { %13221 = vmatprep.subr.mxu1 %v14408_v47 }
0x48bc   :  { %v16023_v13 = vpop.f32.mrb[74].mxu0 }
0x48bd   :  { %v16025_v18 = vpop.f32.mrb[75].mxu0 }
0x48be   :  { %9255 = vrot.lane.b32.xlu1 %v16025_v18, %s14410_s0  ;;  %13207 = vmatpush3.xpose.msk.msra.mxu0 %vm892_vm6, %v16025_v18 }
0x48bf   :  { %13216 = vmatprep.subr.mxu0 %v14408_v47 }
0x48c1   :  { %13209 = vmatmul.mubr.msk.f32.vlgmr.msra.gmra.mrb[76].mxu0 %vm892_vm6, %v16031_v7 }
0x48c2   :  { %9253 = vrot.lane.b32.xlu1 %v16031_v7, %s14410_s0  ;;  %13218 = vmatprep.mubr.msk.f32.mxu0 %vm14409_vm4, %v14408_v47 }
0x4930   :  { %v9256_v40 = vpop.permute.xlu1 %9255 }
0x4931   :  { %13217 = vmatpush3.xpose.msk.msra.mxu0 %vm892_vm6, %v9256_v40 }
0x4932   :  { %13913 = vmatprep.subr.bf16.mxu0 %v14412_v22 }
0x4934   :  { %v9254_v16 = vpop.permute.xlu1 %9253 }
0x4935   :  { %13219 = vmatmul.mubr.msk.f32.vlgmr.msra.gmra.mrb[78].mxu0 %vm892_vm6, %v9254_v16 }
0x4936   :  { %13230 = vmatprep.mubr.msk.f32.mxu0 %vm14409_vm4, %v14408_v47  ;;  %13915 = vmatpush3.bf16.msra.mxu0 %v16064_v60 }
0x4937   :  { %13240 = vmatprep.subr.mxu0 %v14408_v47 }
0x4994   :  { %v9164_v45 = vpop.f32.mrb[76].mxu0 }
0x4995   :  { %v9168_v51 = vsel %vm15663_vm0, %v9164_v45, -1e+30  ;;  %v13210_v57 = vpop.f32.mrb[77].mxu0 }
0x4996   :  { %v9169_v56 = vsel %vm6548_vm7, %v9168_v51, -inf }
0x4997   :  { %9170 = vmax.xlane.f32.xlu0 %v9169_v56 }
0x4a08   :  { %v9327_v38 = vpop.f32.mrb[78].mxu0 }
0x4a09   :  { %v9331_v20 = vsel %vm15663_vm0, %v9327_v38, -1e+30  ;;  %v13220_v62 = vpop.f32.mrb[79].mxu0 }
0x4a0a   :  { %v9332_v28 = vsel %vm6548_vm7, %v9331_v20, -inf }
0x4a0b   :  { %9333 = vmax.xlane.f32.xlu1 %v9332_v28 }
0x4a24   :  { %v9171_v32 = vpop.xlane.xlu0 %9170 }
0x4a25   :  { %v9172_v50 = vsub.f32 %v9168_v51, %v9171_v32  ;;  %v11816_v51 = vld [vmem:[%s16412_s16 + $0x60] sm:$0xff] }
0x4a27   :  { %v9173_v39 = vmul.f32 1.442695, %v9172_v50 }
0x4a29   :  { %14260 = vpow2.f32 %v9173_v39 }
0x4a33   :  { %v14261_v59 = vpop.eup %14260 }
0x4a34   :  { %v9175_v53 = vsel %vm6548_vm7, %v14261_v59, 0.0 }
0x4a35   :  { %9176 = vadd.xlane.f32.xlu0 %v9175_v53 }
0x4a98   :  { %v9334_v3 = vpop.xlane.xlu1 %9333 }
0x4a99   :  { %v9335_v42 = vsub.f32 %v9331_v20, %v9334_v3 }
0x4a9b   :  { %v9336_v26 = vmul.f32 1.442695, %v9335_v42 }
0x4a9d   :  { %14262 = vpow2.f32 %v9336_v26 }
0x4aa7   :  { %v14263_v0 = vpop.eup %14262 }
0x4aa8   :  { %v9338_v29 = vsel %vm6548_vm7, %v14263_v0, 0.0 }
0x4aa9   :  { %9339 = vadd.xlane.f32.xlu0 %v9338_v29 }
0x4abf   :  { %9344 = vrot.lane.b32.xlu0 %v16019_v6, %s14410_s0 }
0x4ac2   :  { %v9177_v1 = vpop.xlane.xlu0 %9176 }
0x4ac3   :  { %14264 = vrcp.f32 %v9177_v1  ;;  %9568 = vrot.lane.b32.xlu0 %v16025_v18, %s14411_s5  ;;  %v16129_v1 = vmul.f32 0.125, %v16015_v27 }
0x4ac7   :  { %9566 = vrot.lane.b32.xlu0 %v16031_v7, %s14411_s5 }
0x4acd   :  { %v14265_v2 = vpop.eup %14264 }
0x4ace   :  { %v9179_v35 = vmul.f32 %v14265_v2, %v14261_v59  ;;  %v11818_v2 = vld [vmem:[%s16412_s16 + $0x70] sm:$0xff] }
0x4ad0   :  { %13214 = vmatmul.mubr.msk.f32.vlgmr.msra.gmra.mrb[102].mxu1 %vm6548_vm7, %v9179_v35  ;;  %v11819_v35 = vld [vmem:[%s16412_s16 + $0x78] sm:$0xff] }
0x4ad1   :  { %13223 = vmatprep.mubr.msk.f32.mxu1 %vm14409_vm4, %v14408_v47  ;;  %v16135_v46 = vpack.c.bf16 %v11819_v35, %v11818_v2 }
0x4b36   :  { %v9340_v58 = vpop.xlane.xlu0 %9339 }
0x4b37   :  { %14266 = vrcp.f32 %v9340_v58 }
0x4b3a   :  { %v9345_v36 = vpop.permute.xlu0 %9344 }
0x4b3b   :  { %13222 = vmatpush3.msra.mxu1 %v9345_v36 }
0x4b3c   :  { %13916 = vmatprep.subr.bf16.mxu1 %v14412_v22 }
0x4b3e   :  { %v9569_v54 = vpop.permute.xlu0 %9568 }
0x4b41   :  { %v14267_v30 = vpop.eup %14266 }
0x4b42   :  { %v9342_v61 = vmul.f32 %v14267_v30, %v14263_v0  ;;  %v9567_v19 = vpop.permute.xlu0 %9566 }
0x4b44   :  { %13224 = vmatmul.mubr.msk.f32.vlgmr.msra.gmra.mrb[104].mxu1 %vm6548_vm7, %v9342_v61 }
0x4b45   :  { %13918 = vmatpush3.bf16.msra.mxu1 %v16071_v12  ;;  %13237 = vmatprep.mubr.msk.f32.mxu1 %vm14409_vm4, %v14408_v47 }
0x4b46   :  { %13245 = vmatprep.subr.mxu1 %v14408_v47 }
0x4ba3   :  { %v9249_v63 = vpop.f32.mrb[102].mxu1 }
0x4ba4   :  { %v13215_v31 = vpop.f32.mrb[103].mxu1  ;;  %13238 = vmatmul.mubr.msk.f32.vlgmr.msra.gmra.mrb[106].mxu1 %vm892_vm6, %v9249_v63 }
0x4ba5   :  { %13247 = vmatprep.mubr.msk.f32.mxu1 %vm14409_vm4, %v14408_v47 }
0x4c17   :  { %v9416_v52 = vpop.f32.mrb[104].mxu1 }
0x4c18   :  { %v13225_v33 = vpop.f32.mrb[105].mxu1  ;;  %13231 = vmatmul.mubr.msk.f32.vlgmr.msra.gmra.mrb[80].mxu0 %vm892_vm6, %v9416_v52 }
0x4c19   :  { %13241 = vmatpush3.xpose.msk.msra.mxu0 %vm892_vm6, %v9569_v54  ;;  %13242 = vmatprep.mubr.msk.f32.mxu0 %vm14409_vm4, %v14408_v47 }
0x4c1a   :  { %13919 = vmatprep.subr.bf16.mxu0 %v14412_v22 }
0x4c1c   :  { %13243 = vmatmul.mubr.msk.f32.vlgmr.msra.gmra.mrb[82].mxu0 %vm892_vm6, %v9567_v19 }
0x4c1d   :  { %13254 = vmatprep.mubr.msk.f32.mxu0 %vm14409_vm4, %v14408_v47 }
0x4c77   :  { %v9562_v41 = vpop.f32.mrb[106].mxu1 }
0x4c78   :  { %v13239_v25 = vpop.f32.mrb[107].mxu1 }
0x4ceb   :  { %v9489_v4 = vpop.f32.mrb[80].mxu0 }
0x4cec   :  { %v16089_v11 = vadd.f32 %v9562_v41, %v9489_v4  ;;  %v13232_v17 = vpop.f32.mrb[81].mxu0 }
0x4cef   :  { %v9640_v44 = vpop.f32.mrb[82].mxu0 }
0x4cf0   :  { %v9644_v21 = vsel %vm15663_vm0, %v9640_v44, -1e+30  ;;  %v13244_v49 = vpop.f32.mrb[83].mxu0 }
0x4cf1   :  { %v9645_v14 = vsel %vm6548_vm7, %v9644_v21, -inf }
0x4cf2   :  { %9646 = vmax.xlane.f32.xlu1 %v9645_v14 }
0x4d03   :  { %9656 = vrot.lane.b32.xlu1 %v16019_v6, %s14411_s5 }
0x4d07   :  { %9808 = vrot.lane.b32.xlu1 %v16025_v18, %s14413_s9  ;;  %v11817_v18 = vld [vmem:[%s16412_s16 + $0x68] sm:$0xff] }
0x4d08   :  { %v16106_v57 = vpack.c.bf16 %v11817_v18, %v11816_v51 }
0x4d0a   :  { %13921 = vmatpush3.bf16.msra.mxu0 %v16106_v57 }
0x4d0b   :  { %9806 = vrot.lane.b32.xlu1 %v16031_v7, %s14413_s9  ;;  %13262 = vmatprep.subr.mxu0 %v14408_v47 }
0x4d7f   :  { %v9647_v23 = vpop.xlane.xlu1 %9646 }
0x4d80   :  { %v9648_v9 = vsub.f32 %v9644_v21, %v9647_v23 }
0x4d82   :  { %v9649_v24 = vmul.f32 1.442695, %v9648_v9 }
0x4d83   :  { %v9657_v40 = vpop.permute.xlu1 %9656 }
0x4d84   :  { %14268 = vpow2.f32 %v9649_v24  ;;  %13246 = vmatpush3.msra.mxu1 %v9657_v40 }
0x4d85   :  { %13257 = vmatprep.subr.mxu1 %v14408_v47 }
0x4d87   :  { %v9809_v38 = vpop.permute.xlu1 %9808 }
0x4d8e   :  { %v14269_v16 = vpop.eup %14268 }
0x4d8f   :  { %v9651_v45 = vsel %vm6548_vm7, %v14269_v16, 0.0 }
0x4d90   :  { %9652 = vadd.xlane.f32.xlu0 %v9651_v45 }
0x4da6   :  { %9896 = vrot.lane.b32.xlu0 %v16019_v6, %s14413_s9  ;;  %v9807_v6 = vpop.permute.xlu1 %9806 }
0x4e1d   :  { %v9653_v7 = vpop.xlane.xlu0 %9652 }
0x4e1e   :  { %14270 = vrcp.f32 %v9653_v7 }
0x4e21   :  { %v9897_v28 = vpop.permute.xlu0 %9896 }
0x4e28   :  { %v14271_v56 = vpop.eup %14270 }
0x4e29   :  { %v9655_v20 = vmul.f32 %v14271_v56, %v14269_v16 }
0x4e2b   :  { %13248 = vmatmul.mubr.msk.f32.vlgmr.msra.gmra.mrb[108].mxu1 %vm6548_vm7, %v9655_v20 }
0x4e2c   :  { %13258 = vmatpush3.xpose.msk.msra.mxu1 %vm892_vm6, %v9809_v38  ;;  %13259 = vmatprep.mubr.msk.f32.mxu1 %vm14409_vm4, %v14408_v47 }
0x4e2d   :  { %13922 = vmatprep.subr.bf16.mxu1 %v14412_v22 }
0x4e2f   :  { %13260 = vmatmul.mubr.msk.f32.vlgmr.msra.gmra.mrb[110].mxu1 %vm892_vm6, %v9807_v6 }
0x4e30   :  { %13271 = vmatprep.mubr.msk.f32.mxu1 %vm14409_vm4, %v14408_v47  ;;  %13924 = vmatpush3.bf16.msra.mxu1 %v16135_v46 }
0x4e31   :  { %13279 = vmatprep.subr.mxu1 %v14408_v47 }
0x4efe   :  { %v9728_v62 = vpop.f32.mrb[108].mxu1 }
0x4eff   :  { %v13249_v32 = vpop.f32.mrb[109].mxu1  ;;  %13255 = vmatmul.mubr.msk.f32.vlgmr.msra.gmra.mrb[84].mxu0 %vm892_vm6, %v9728_v62 }
0x4f00   :  { %13263 = vmatpush3.msra.mxu0 %v9897_v28  ;;  %13264 = vmatprep.mubr.msk.f32.mxu0 %vm14409_vm4, %v14408_v47 }
0x4f01   :  { %13274 = vmatprep.subr.mxu0 %v14408_v47 }
0x4f02   :  { %v9880_v50 = vpop.f32.mrb[110].mxu1 }
0x4f03   :  { %v9884_v39 = vsel %vm15663_vm0, %v9880_v50, -1e+30  ;;  %v13261_v59 = vpop.f32.mrb[111].mxu1 }
0x4f04   :  { %v9885_v53 = vsel %vm6548_vm7, %v9884_v39, -inf }
0x4f05   :  { %9886 = vmax.xlane.f32.xlu1 %v9885_v53 }
0x4f92   :  { %v9887_v3 = vpop.xlane.xlu1 %9886 }
0x4f93   :  { %v9888_v42 = vsub.f32 %v9884_v39, %v9887_v3 }
0x4f95   :  { %v9889_v26 = vmul.f32 1.442695, %v9888_v42 }
0x4f97   :  { %14272 = vpow2.f32 %v9889_v26 }
0x4fa1   :  { %v14273_v0 = vpop.eup %14272 }
0x4fa2   :  { %v9891_v29 = vsel %vm6548_vm7, %v14273_v0, 0.0 }
0x4fa3   :  { %9892 = vadd.xlane.f32.xlu0 %v9891_v29 }
0x4fb9   :  { %10209 = vrot.lane.b32.xlu0 %v16023_v13, %s14410_s0 }
0x4fbd   :  { %10207 = vrot.lane.b32.xlu0 %v16129_v1, %s14410_s0 }
0x4fd2   :  { %v9801_v34 = vpop.f32.mrb[84].mxu0 }
0x4fd3   :  { %v9805_v58 = vadd.f32 %v9801_v34, %v16089_v11  ;;  %v13256_v36 = vpop.f32.mrb[85].mxu0 }
0x5030   :  { %v9893_v48 = vpop.xlane.xlu0 %9892 }
0x5031   :  { %14274 = vrcp.f32 %v9893_v48 }
0x5034   :  { %v10210_v30 = vpop.permute.xlu0 %10209 }
0x5038   :  { %v10208_v61 = vpop.permute.xlu0 %10207 }
0x503b   :  { %v14275_v5 = vpop.eup %14274 }
0x503c   :  { %v9895_v27 = vmul.f32 %v14275_v5, %v14273_v0 }
0x503e   :  { %13265 = vmatmul.mubr.msk.f32.vlgmr.msra.gmra.mrb[86].mxu0 %vm6548_vm7, %v9895_v27 }
0x503f   :  { %13275 = vmatpush3.xpose.msk.msra.mxu0 %vm892_vm6, %v16023_v13  ;;  %13276 = vmatprep.mubr.msk.f32.mxu0 %vm14409_vm4, %v14408_v47 }
0x5040   :  { %13284 = vmatprep.subr.mxu0 %v14408_v47 }
0x5042   :  { %13277 = vmatmul.mubr.msk.f32.vlgmr.msra.gmra.mrb[88].mxu0 %vm892_vm6, %v16129_v1 }
0x5043   :  { %13285 = vmatpush3.xpose.msk.msra.mxu0 %vm892_vm6, %v10210_v30  ;;  %13286 = vmatprep.mubr.msk.f32.mxu0 %vm14409_vm4, %v14408_v47 }
0x5044   :  { %13925 = vmatprep.subr.bf16.mxu0 %v14412_v22 }
0x5046   :  { %13287 = vmatmul.mubr.msk.f32.vlgmr.msra.gmra.mrb[90].mxu0 %vm892_vm6, %v10208_v61 }
0x5047   :  { %13927 = vmatpush3.bf16.msra.mxu0 %v16064_v60  ;;  %13298 = vmatprep.mubr.msk.f32.mxu0 %vm14409_vm4, %v14408_v47 }
0x5048   :  { %13308 = vmatprep.subr.mxu0 %v14408_v47 }
0x5111   :  { %v9968_v63 = vpop.f32.mrb[86].mxu0 }
0x5112   :  { %v13266_v31 = vpop.f32.mrb[87].mxu0  ;;  %13272 = vmatmul.mubr.msk.f32.vlgmr.msra.gmra.mrb[112].mxu1 %vm892_vm6, %v9968_v63 }
0x5113   :  { %13280 = vmatpush3.msra.mxu1 %v16017_v15  ;;  %13281 = vmatprep.mubr.msk.f32.mxu1 %vm14409_vm4, %v14408_v47 }
0x5114   :  { %13289 = vmatprep.subr.mxu1 %v14408_v47 }
0x5115   :  { %v10118_v54 = vpop.f32.mrb[88].mxu0 }
0x5116   :  { %v10122_v60 = vsel %vm15663_vm0, %v10118_v54, -1e+30  ;;  %v13278_v52 = vpop.f32.mrb[89].mxu0 }
0x5117   :  { %v10123_v33 = vsel %vm6548_vm7, %v10122_v60, -inf }
0x5118   :  { %10124 = vmax.xlane.f32.xlu1 %v10123_v33 }
0x5119   :  { %v10281_v19 = vpop.f32.mrb[90].mxu0 }
0x511a   :  { %v10285_v41 = vsel %vm15663_vm0, %v10281_v19, -1e+30  ;;  %v13288_v25 = vpop.f32.mrb[91].mxu0 }
0x511b   :  { %v10286_v4 = vsel %vm6548_vm7, %v10285_v41, -inf }
0x511c   :  { %10287 = vmax.xlane.f32.xlu0 %v10286_v4 }
0x51a5   :  { %v10125_v11 = vpop.xlane.xlu1 %10124 }
0x51a6   :  { %v10126_v17 = vsub.f32 %v10122_v60, %v10125_v11 }
0x51a8   :  { %v10127_v44 = vmul.f32 1.442695, %v10126_v17 }
0x51a9   :  { %v10288_v21 = vpop.xlane.xlu0 %10287 }
0x51aa   :  { %14276 = vpow2.f32 %v10127_v44  ;;  %v10289_v49 = vsub.f32 %v10285_v41, %v10288_v21 }
0x51ac   :  { %v10290_v14 = vmul.f32 1.442695, %v10289_v49 }
0x51ae   :  { %14278 = vpow2.f32 %v10290_v14 }
0x51b4   :  { %v14277_v23 = vpop.eup %14276 }
0x51b5   :  { %v10129_v9 = vsel %vm6548_vm7, %v14277_v23, 0.0 }
0x51b6   :  { %10130 = vadd.xlane.f32.xlu1 %v10129_v9 }
0x51b8   :  { %v14279_v24 = vpop.eup %14278 }
0x51b9   :  { %v10292_v40 = vsel %vm6548_vm7, %v14279_v24, 0.0 }
0x51ba   :  { %10293 = vadd.xlane.f32.xlu1 %v10292_v40 }
0x51cb   :  { %10298 = vrot.lane.b32.xlu1 %v16017_v15, %s14410_s0  ;;  %s16420_s0 = sld [smem:[#allocation33_spill]] }
0x51cf   :  { %10522 = vrot.lane.b32.xlu1 %v16023_v13, %s14411_s5 }
0x51d3   :  { %10520 = vrot.lane.b32.xlu1 %v16129_v1, %s14411_s5 }
0x51e5   :  { %v10041_v16 = vpop.f32.mrb[112].mxu1 }
0x51e6   :  { %v16176_v45 = vadd.f32 %v10041_v16, %v9805_v58  ;;  %v13273_v51 = vpop.f32.mrb[113].mxu1 }
0x51e8   :  { %v11000_v11 = vadd.f32 %v16176_v45, %v15954_v55 }
0x51ea   :  { %v11008_v49 = vadd.f32 %v11913_v43, %v11000_v11 }
0x51ec   :  { %v11010_v14 = vsel %vm614_vm2, %v11008_v49, 0.0 }
0x5243   :  { %v10131_v18 = vpop.xlane.xlu1 %10130 }
0x5244   :  { %14280 = vrcp.f32 %v10131_v18 }
0x5247   :  { %v10294_v7 = vpop.xlane.xlu1 %10293 }
0x5248   :  { %14282 = vrcp.f32 %v10294_v7 }
0x524b   :  { %v10299_v20 = vpop.permute.xlu1 %10298 }
0x524e   :  { %v14281_v56 = vpop.eup %14280 }
0x524f   :  { %v10133_v38 = vmul.f32 %v14281_v56, %v14277_v23  ;;  %v10523_v50 = vpop.permute.xlu1 %10522 }
0x5251   :  { %13282 = vmatmul.mubr.msk.f32.vlgmr.msra.gmra.mrb[114].mxu1 %vm6548_vm7, %v10133_v38 }
0x5252   :  { %v14283_v6 = vpop.eup %14282  ;;  %13290 = vmatpush3.msra.mxu1 %v10299_v20  ;;  %13291 = vmatprep.mubr.msk.f32.mxu1 %vm14409_vm4, %v14408_v47 }
0x5253   :  { %v10296_v62 = vmul.f32 %v14283_v6, %v14279_v24  ;;  %13928 = vmatprep.subr.bf16.mxu1 %v14412_v22 }
0x5255   :  { %13292 = vmatmul.mubr.msk.f32.vlgmr.msra.gmra.mrb[116].mxu1 %vm6548_vm7, %v10296_v62 }
0x5256   :  { %13930 = vmatpush3.bf16.msra.mxu1 %v16071_v12  ;;  %13305 = vmatprep.mubr.msk.f32.mxu1 %vm14409_vm4, %v14408_v47  ;;  %v10521_v12 = vpop.permute.xlu1 %10520 }
0x5257   :  { %13313 = vmatprep.subr.mxu1 %v14408_v47 }
0x5324   :  { %v10203_v28 = vpop.f32.mrb[114].mxu1 }
0x5325   :  { %v13283_v32 = vpop.f32.mrb[115].mxu1  ;;  %13306 = vmatmul.mubr.msk.f32.vlgmr.msra.gmra.mrb[118].mxu1 %vm892_vm6, %v10203_v28 }
0x5326   :  { %13315 = vmatprep.mubr.msk.f32.mxu1 %vm14409_vm4, %v14408_v47  ;;  %v11824_v32 = vld [vmem:[%s16414_s18 + $0x88] sm:$0xff] }
0x5328   :  { %v10370_v39 = vpop.f32.mrb[116].mxu1 }
0x5329   :  { %v13293_v59 = vpop.f32.mrb[117].mxu1  ;;  %13299 = vmatmul.mubr.msk.f32.vlgmr.msra.gmra.mrb[92].mxu0 %vm892_vm6, %v10370_v39 }
0x532a   :  { %13309 = vmatpush3.xpose.msk.msra.mxu0 %vm892_vm6, %v10523_v50  ;;  %13310 = vmatprep.mubr.msk.f32.mxu0 %vm14409_vm4, %v14408_v47  ;;  %v11826_v50 = vld [vmem:[%s16414_s18 + $0x98] sm:$0xff]  ;;  %v11823_v59 = vld [vmem:[%s16414_s18 + $0x80] sm:$0xff] }
0x532b   :  { %13931 = vmatprep.subr.bf16.mxu0 %v14412_v22  ;;  %v13937_v39 = vpack.c.bf16 %v11826_v50, %v11824_v32  ;;  %v11864_v32 = vld [vmem:[%s16417_s26 + $0x1c0] sm:$0xff]  ;;  %v11865_v50 = vld [vmem:[%s16417_s26 + $0x1c8] sm:$0xff] }
0x532d   :  { %13311 = vmatmul.mubr.msk.f32.vlgmr.msra.gmra.mrb[94].mxu0 %vm892_vm6, %v10521_v12  ;;  %v11825_v12 = vld [vmem:[%s16414_s18 + $0x90] sm:$0xff] }
0x532e   :  { %13933 = vmatpush3.bf16.msra.mxu0 %v16106_v57  ;;  %13322 = vmatprep.mubr.msk.f32.mxu0 %vm14409_vm4, %v14408_v47 }
0x532f   :  { %13330 = vmatprep.subr.mxu0 %v14408_v47 }
0x53f8   :  { %v10516_v53 = vpop.f32.mrb[118].mxu1 }
0x53f9   :  { %v13307_v3 = vpop.f32.mrb[119].mxu1 }
0x53fa   :  { %v11830_v3 = vld [vmem:[%s16414_s18 + $0xb8] sm:$0xff] }
0x53fc   :  { %v10443_v42 = vpop.f32.mrb[92].mxu0 }
0x53fd   :  { %v10517_v26 = vadd.f32 %v10516_v53, %v10443_v42  ;;  %v13300_v0 = vpop.f32.mrb[93].mxu0  ;;  %v11828_v53 = vld [vmem:[%s16414_s18 + $0xa8] sm:$0xff] }
0x53fe   :  { %v13941_v42 = vpack.c.bf16 %v11830_v3, %v11828_v53  ;;  %v11829_v0 = vld [vmem:[%s16414_s18 + $0xb0] sm:$0xff]  ;;  %v11867_v3 = vld [vmem:[%s16417_s26 + $0x1d8] sm:$0xff] }
0x53ff   :  { %v11866_v53 = vld [vmem:[%s16417_s26 + $0x1d0] sm:$0xff] }
0x5400   :  { %v10594_v29 = vpop.f32.mrb[94].mxu0 }
0x5401   :  { %v10598_v2 = vsel %vm15663_vm0, %v10594_v29, -1e+30  ;;  %v13312_v35 = vpop.f32.mrb[95].mxu0 }
0x5402   :  { %v10599_v34 = vsel %vm6548_vm7, %v10598_v2, -inf  ;;  %v11834_v35 = vld [vmem:[%s16414_s18 + $0xd8] sm:$0xff] }
0x5403   :  { %10600 = vmax.xlane.f32.xlu0 %v10599_v34 }
0x5419   :  { %10610 = vrot.lane.b32.xlu0 %v16017_v15, %s14411_s5 }
0x541d   :  { %10762 = vrot.lane.b32.xlu0 %v16023_v13, %s14413_s9 }
0x5421   :  { %10760 = vrot.lane.b32.xlu0 %v16129_v1, %s14413_s9 }
0x5490   :  { %v10601_v57 = vpop.xlane.xlu0 %10600 }
0x5491   :  { %v10602_v58 = vsub.f32 %v10598_v2, %v10601_v57  ;;  %v11832_v2 = vld [vmem:[%s16414_s18 + $0xc8] sm:$0xff]  ;;  %v11831_v57 = vld [vmem:[%s16414_s18 + $0xc0] sm:$0xff] }
0x5492   :  { %v13945_v34 = vpack.c.bf16 %v11834_v35, %v11832_v2 }
0x5493   :  { %v10603_v36 = vmul.f32 1.442695, %v10602_v58  ;;  %v11833_v58 = vld [vmem:[%s16414_s18 + $0xd0] sm:$0xff] }
0x5494   :  { %v10611_v48 = vpop.permute.xlu0 %10610 }
0x5495   :  { %14284 = vpow2.f32 %v10603_v36  ;;  %13314 = vmatpush3.msra.mxu1 %v10611_v48  ;;  %v13947_v36 = vpack.c.bf16 %v11833_v58, %v11831_v57  ;;  %v11836_v48 = vld [vmem:[%s16414_s18 + $0xe8] sm:$0xff]  ;;  %v11868_v57 = vld [vmem:[%s16417_s26 + $0x1e0] sm:$0xff] }
0x5496   :  { %13325 = vmatprep.subr.mxu1 %v14408_v47  ;;  %v11869_v58 = vld [vmem:[%s16417_s26 + $0x1e8] sm:$0xff] }
0x5498   :  { %v10763_v63 = vpop.permute.xlu0 %10762 }
0x549c   :  { %v10761_v1 = vpop.permute.xlu0 %10760 }
0x549f   :  { %v14285_v5 = vpop.eup %14284 }
0x54a0   :  { %v10605_v27 = vsel %vm6548_vm7, %v14285_v5, 0.0 }
0x54a1   :  { %10606 = vadd.xlane.f32.xlu1 %v10605_v27  ;;  %v11835_v27 = vld [vmem:[%s16414_s18 + $0xe0] sm:$0xff] }
0x552e   :  { %v10607_v30 = vpop.xlane.xlu1 %10606 }
0x552f   :  { %14286 = vrcp.f32 %v10607_v30 }
0x5539   :  { %v14287_v61 = vpop.eup %14286 }
0x553a   :  { %v10609_v13 = vmul.f32 %v14287_v61, %v14285_v5  ;;  %v11838_v5 = vld [vmem:[%s16414_s18 + $0xf8] sm:$0xff]  ;;  %v11837_v61 = vld [vmem:[%s16414_s18 + $0xf0] sm:$0xff] }
0x553b   :  { %v13949_v30 = vpack.c.bf16 %v11838_v5, %v11836_v48  ;;  %v11852_v48 = vld [vmem:[%s16417_s26 + $0x160] sm:$0xff]  ;;  %v11853_v5 = vld [vmem:[%s16417_s26 + $0x168] sm:$0xff] }
0x553c   :  { %13316 = vmatmul.mubr.msk.f32.vlgmr.msra.gmra.mrb[120].mxu1 %vm6548_vm7, %v10609_v13 }
0x553d   :  { %13326 = vmatpush3.xpose.msk.msra.mxu1 %vm892_vm6, %v10763_v63  ;;  %13327 = vmatprep.mubr.msk.f32.mxu1 %vm14409_vm4, %v14408_v47  ;;  %v13951_v63 = vpack.c.bf16 %v11837_v61, %v11835_v27  ;;  %v13979_v27 = vpack.c.bf16 %v11853_v5, %v11852_v48  ;;  %v11871_v61 = vld [vmem:[%s16417_s26 + $0x1f8] sm:$0xff] }
0x553e   :  { %13934 = vmatprep.subr.bf16.mxu1 %v14412_v22 }
0x5540   :  { %13328 = vmatmul.mubr.msk.f32.vlgmr.msra.gmra.mrb[122].mxu1 %vm892_vm6, %v10761_v1 }
0x5541   :  { %13936 = vmatpush3.bf16.msra.mxu1 %v16135_v46  ;;  %13339 = vmatprep.mubr.msk.f32.mxu1 %vm14409_vm4, %v14408_v47 }
0x560f   :  { %v10682_v31 = vpop.f32.mrb[120].mxu1 }
0x5610   :  { %v13317_v54 = vpop.f32.mrb[121].mxu1  ;;  %13323 = vmatmul.mubr.msk.f32.vlgmr.msra.gmra.mrb[96].mxu0 %vm892_vm6, %v10682_v31 }
0x5611   :  { %13332 = vmatprep.mubr.msk.f32.mxu0 %vm14409_vm4, %v14408_v47 }
0x5613   :  { %v10834_v60 = vpop.f32.mrb[122].mxu1 }
0x5614   :  { %v10838_v22 = vsel %vm15663_vm0, %v10834_v60, -1e+30  ;;  %v13329_v52 = vpop.f32.mrb[123].mxu1 }
0x5615   :  { %v10839_v33 = vsel %vm6548_vm7, %v10838_v22, -inf }
0x5616   :  { %10840 = vmax.xlane.f32.xlu0 %v10839_v33 }
0x56a3   :  { %v10841_v46 = vpop.xlane.xlu0 %10840 }
0x56a4   :  { %v10842_v19 = vsub.f32 %v10838_v22, %v10841_v46 }
0x56a6   :  { %v10843_v41 = vmul.f32 1.442695, %v10842_v19  ;;  %v16261_v19 = vld [vmem:[%s16415_s22 + $0x1] ss:$0 sm:$0xff] }
0x56a8   :  { %14288 = vpow2.f32 %v10843_v41 }
0x56b2   :  { %v14289_v25 = vpop.eup %14288 }
0x56b3   :  { %v10845_v4 = vsel %vm6548_vm7, %v14289_v25, 0.0 }
0x56b4   :  { %10846 = vadd.xlane.f32.xlu1 %v10845_v4 }
0x56c5   :  { %10850 = vrot.lane.b32.xlu1 %v16017_v15, %s14413_s9 }
0x56e3   :  { %v10755_v17 = vpop.f32.mrb[96].mxu0 }
0x56e4   :  { %v10759_v44 = vadd.f32 %v10755_v17, %v10517_v26  ;;  %v13324_v21 = vpop.f32.mrb[97].mxu0  ;;  %v11827_v26 = vld [vmem:[%s16414_s18 + $0xa0] sm:$0xff]  ;;  %v11857_v17 = vld [vmem:[%s16417_s26 + $0x188] sm:$0xff] }
0x56e5   :  { %v13943_v29 = vpack.c.bf16 %v11829_v0, %v11827_v26  ;;  %v11840_v21 = vld [vmem:[%s16417_s26 + $0x100] sm:$0xff]  ;;  %v13973_v26 = vpack.c.bf16 %v11867_v3, %v11866_v53  ;;  %v11850_v0 = vld [vmem:[%s16417_s26 + $0x150] sm:$0xff] }
0x56e9   :  { %11011 = vadd.xlane.f32.xlu1 %v11010_v14 }
0x5741   :  { %v10847_v23 = vpop.xlane.xlu1 %10846 }
0x5742   :  { %14290 = vrcp.f32 %v10847_v23  ;;  %v11858_v23 = vld [vmem:[%s16417_s26 + $0x190] sm:$0xff] }
0x5745   :  { %v10851_v9 = vpop.permute.xlu1 %10850 }
0x5746   :  { %13331 = vmatpush3.msra.mxu0 %v10851_v9  ;;  %v11859_v9 = vld [vmem:[%s16417_s26 + $0x198] sm:$0xff] }
0x5747   :  { %13938 = vmatprep.subr.bf16.mxu0 %v13937_v39  ;;  %v13969_v39 = vpack.c.bf16 %v11865_v50, %v11864_v32 }
0x574c   :  { %v14291_v24 = vpop.eup %14290 }
0x574d   :  { %v10849_v40 = vmul.f32 %v14291_v24, %v14289_v25  ;;  %v16264_v25 = vld [vmem:[%s16416_s23 + $0x1] ss:$0 sm:$0xff]  ;;  %v13957_v24 = vpack.c.bf16 %v11859_v9, %v11858_v23 }
0x574f   :  { %13333 = vmatmul.mubr.msk.f32.vlgmr.msra.gmra.mrb[98].mxu0 %vm6548_vm7, %v10849_v40  ;;  %v11842_v40 = vld [vmem:[%s16417_s26 + $0x110] sm:$0xff] }
0x5750   :  { %11133 = vmatprep.mubr.f32.mxu0 %v14408_v47 }
0x5776   :  { %v11012_v16 = vpop.xlane.xlu1 %11011 }
0x5777   :  { %v11016_v45 = vmul.f32 0.015625, %v11012_v16  ;;  %v11861_v16 = vld [vmem:[%s16417_s26 + $0x1a8] sm:$0xff] }
0x5779   :  { %v11018_v56 = vsub.f32 %v11008_v49, %v11016_v45  ;;  %v11841_v49 = vld [vmem:[%s16417_s26 + $0x108] sm:$0xff] }
0x577a   :  { %v13955_v14 = vpack.c.bf16 %v11841_v49, %v11840_v21 }
0x577b   :  { %v11020_v62 = vmul.f32 %v11018_v56, %v11018_v56 }
0x577d   :  { %v11022_v28 = vsel %vm614_vm2, %v11020_v62, 0.0  ;;  %v11847_v62 = vld [vmem:[%s16417_s26 + $0x138] sm:$0xff] }
0x5822   :  { %v10922_v15 = vpop.f32.mrb[98].mxu0 }
0x5823   :  { %v13334_v55 = vpop.f32.mrb[99].mxu0  ;;  %13340 = vmatmul.mubr.msk.f32.vlgmr.msra.gmra.mrb[124].mxu1 %vm892_vm6, %v10922_v15 }
0x5824   :  { %v11860_v55 = vld [vmem:[%s16417_s26 + $0x1a0] sm:$0xff] }
0x5825   :  { %v13961_v45 = vpack.c.bf16 %v11861_v16, %v11860_v55 }
0x58f6   :  { %v10995_v51 = vpop.f32.mrb[124].mxu1 }
0x58f7   :  { %v10999_v18 = vadd.f32 %v10995_v51, %v10759_v44  ;;  %v13341_v7 = vpop.f32.mrb[125].mxu1  ;;  %v11844_v51 = vld [vmem:[%s16417_s26 + $0x120] sm:$0xff] }
0x58f9   :  { %v11001_v38 = vadd.f32 %v10999_v18, %v15959_v37  ;;  %v13939_v37 = vpack.c.bf16 %v11825_v12, %v11823_v59  ;;  %v11845_v18 = vld [vmem:[%s16417_s26 + $0x128] sm:$0xff]  ;;  %v11848_v59 = vld [vmem:[%s16417_s26 + $0x140] sm:$0xff] }
0x58fa   :  { %v13963_v7 = vpack.c.bf16 %v11845_v18, %v11844_v51  ;;  %v11849_v12 = vld [vmem:[%s16417_s26 + $0x148] sm:$0xff] }
0x58fb   :  { %v11009_v20 = vadd.f32 %v11913_v43, %v11001_v38  ;;  %13940 = vmatpush1.bf16.msra.mxu0 %v13939_v37  ;;  %v11856_v43 = vld [vmem:[%s16417_s26 + $0x180] sm:$0xff]  ;;  %v11863_v38 = vld [vmem:[%s16417_s26 + $0x1b8] sm:$0xff]  ;;  %v13971_v37 = vpack.c.bf16 %v11849_v12, %v11848_v59 }
0x58fc   :  { %13942 = vmatprep.subr.bf16.mxu0 %v13941_v42  ;;  %v13953_v44 = vpack.c.bf16 %v11857_v17, %v11856_v43 }
0x58fd   :  { %v11013_v6 = vsel %vm614_vm2, %v11009_v20, 0.0 }
0x58fe   :  { %11014 = vadd.xlane.f32.xlu0 %v11013_v6  ;;  %13954 = vmatprep.subr.bf16.mxu1 %v13953_v44  ;;  %v11846_v6 = vld [vmem:[%s16417_s26 + $0x130] sm:$0xff] }
0x58ff   :  { %13944 = vmatpush1.bf16.msra.mxu0 %v13943_v29  ;;  %13956 = vmatpush3.bf16.msra.mxu1 %v13955_v14  ;;  %v11851_v29 = vld [vmem:[%s16417_s26 + $0x158] sm:$0xff] }
0x5900   :  { %13946 = vmatprep.subr.bf16.mxu0 %v13945_v34  ;;  %13958 = vmatprep.subr.bf16.mxu1 %v13957_v24  ;;  %v13975_v35 = vpack.c.bf16 %v11851_v29, %v11850_v0 }
0x5902   :  { %11023 = vadd.xlane.f32.xlu0 %v11022_v28  ;;  %v13967_v28 = vpack.c.bf16 %v11847_v62, %v11846_v6 }
0x5903   :  { %13948 = vmatpush1.bf16.msra.mxu0 %v13947_v36  ;;  %v13977_v36 = vpack.c.bf16 %v11869_v58, %v11868_v57 }
0x5904   :  { %13950 = vmatprep.subr.bf16.mxu0 %v13949_v30  ;;  %v11870_v30 = vld [vmem:[%s16417_s26 + $0x1f0] sm:$0xff] }
0x5907   :  { %13952 = vmatpush1.bf16.msra.mxu0 %v13951_v63  ;;  %v13981_v63 = vpack.c.bf16 %v11871_v61, %v11870_v30 }
0x598b   :  { %v11015_v13 = vpop.xlane.xlu0 %11014 }
0x598c   :  { %v11017_v1 = vmul.f32 0.015625, %v11015_v13  ;;  %v11854_v13 = vld [vmem:[%s16417_s26 + $0x170] sm:$0xff] }
0x598e   :  { %v16255_v31 = vsub.f32 %v11009_v20, %v11017_v1  ;;  %v11855_v1 = vld [vmem:[%s16417_s26 + $0x178] sm:$0xff] }
0x598f   :  { %v11024_v54 = vpop.xlane.xlu0 %11023 }
0x5990   :  { %v11028_v60 = vmul.f32 0.015625, %v11024_v54  ;;  %v11021_v22 = vmul.f32 %v16255_v31, %v16255_v31  ;;  %v13983_v54 = vpack.c.bf16 %v11855_v1, %v11854_v13 }
0x5992   :  { %v11030_v52 = vadd.f32 1e-05, %v11028_v60  ;;  %v11025_v33 = vsel %vm614_vm2, %v11021_v22, 0.0 }
0x5993   :  { %11026 = vadd.xlane.f32.xlu0 %v11025_v33 }
0x5994   :  { %14292 = vrsqrt.f32 %v11030_v52 }
0x599e   :  { %v14293_v46 = vpop.eup %14292 }
0x599f   :  { %v11034_v41 = vmul.f32 %v14293_v46, %v11018_v56  ;;  %v11862_v56 = vld [vmem:[%s16417_s26 + $0x1b0] sm:$0xff]  ;;  %v11839_v46 = vld [vmem:[%s16418_s28 + $0x2] sm:$0x3] }
0x59a0   :  { %v13965_v20 = vpack.c.bf16 %v11863_v38, %v11862_v56 }
0x59a1   :  { %v11042_v4 = vmul.f32 %v16261_v19, %v11034_v41  ;;  %v16314_v41 = vrot.slane %v11839_v46, %v15093_v8 }
0x59a3   :  { %v16268_v11 = vadd.f32 %v16264_v25, %v11042_v4  ;;  %v16317_v4 = vrot.slane %v11839_v46, %v15097_v10 }
0x59a5   :  { %11916 = vmatmul.mubr.msk.f32.vlgmr.msra.gmra.mrb[100].mxu0 %vm614_vm2, %v16268_v11 }
0x59a6   :  { %11139 = vmatprep.mubr.f32.mxu0 %v14408_v47  ;;  %v11843_v47 = vld [vmem:[%s16417_s26 + $0x118] sm:$0xff] }
0x59a7   :  { %v13959_v15 = vpack.c.bf16 %v11843_v47, %v11842_v40 }
0x59a9   :  { %13960 = vmatpush3.bf16.msra.mxu1 %v13959_v15 }
0x59aa   :  { %13962 = vmatprep.subr.bf16.mxu1 %v13961_v45 }
0x59ad   :  { %13964 = vmatpush3.bf16.msra.mxu1 %v13963_v7 }
0x59ae   :  { %13966 = vmatprep.subr.bf16.mxu1 %v13965_v20 }
0x59b1   :  { %13968 = vmatpush3.bf16.msra.mxu1 %v13967_v28 }
0x59b2   :  { %13970 = vmatprep.subr.bf16.mxu1 %v13969_v39 }
0x59b5   :  { %13972 = vmatpush3.bf16.msra.mxu1 %v13971_v37 }
0x59b6   :  { %13974 = vmatprep.subr.bf16.mxu1 %v13973_v26 }
0x59b9   :  { %13976 = vmatpush3.bf16.msra.mxu1 %v13975_v35 }
0x59ba   :  { %13978 = vmatprep.subr.bf16.mxu1 %v13977_v36 }
0x59bd   :  { %13980 = vmatpush3.bf16.msra.mxu1 %v13979_v27 }
0x59be   :  { %13982 = vmatprep.subr.bf16.mxu1 %v13981_v63 }
0x59c1   :  { %13984 = vmatpush3.bf16.msra.mxu1 %v13983_v54 }
0x5a20   :  { %v11027_v42 = vpop.xlane.xlu0 %11026 }
0x5a21   :  { %v11029_v2 = vmul.f32 0.015625, %v11027_v42 }
0x5a23   :  { %v11031_v34 = vadd.f32 1e-05, %v11029_v2 }
0x5a25   :  { %14294 = vrsqrt.f32 %v11031_v34 }
0x5a2f   :  { %v14295_v60 = vpop.eup %14294 }
0x5a30   :  { %v11035_v22 = vmul.f32 %v14295_v60, %v16255_v31 }
0x5a32   :  { %v11043_v52 = vmul.f32 %v16261_v19, %v11035_v22 }
0x5a34   :  { %v16308_v33 = vadd.f32 %v16264_v25, %v11043_v52 }
0x5a36   :  { %11917 = vmatmul.mubr.msk.f32.gmra.mrb[102].mxu0 %vm614_vm2, %v16308_v33 }
0x5a78   :  { %v11135_v43 = vpop.f32.mrb[100].mxu0 }
0x5a79   :  { %v11136_v17 = vadd.f32 %v11135_v43, %v16314_v41  ;;  %v11137_v44 = vpop.f32.mrb[101].mxu0 }
0x5a7a   :  { %v11138_v31 = vadd.f32 %v11137_v44, %v16317_v4 }
0x5a7b   :  { %v11150_v19 = vmul.f32 0.70710677, %v11136_v17  ;;  %v11146_v61 = vmul.f32 0.5, %v11136_v17 }
0x5a7c   :  { %v11151_v21 = vmul.f32 0.70710677, %v11138_v31  ;;  %v11147_v27 = vmul.f32 0.5, %v11138_v31 }
0x5a7d   :  { %v11154_v25 = vand.u32 2147483647, %v11150_v19  ;;  %vm11234_vm4 = vcmp.lt.f32.partialorder %v11150_v19, 0.0 }
0x5a7e   :  { %v11155_v49 = vand.u32 2147483647, %v11151_v21  ;;  %vm11235_vm6 = vcmp.lt.f32.partialorder %v11151_v21, 0.0 }
0x5a7f   :  { %v11158_v14 = vmul.f32 0.3275911, %v11154_v25  ;;  %v11210_v8 = vsub.f32 0.0, %v11154_v25 }
0x5a80   :  { %v11159_v23 = vmul.f32 0.3275911, %v11155_v49  ;;  %v11211_v40 = vsub.f32 0.0, %v11155_v49 }
0x5a81   :  { %v11162_v9 = vadd.f32 1.0, %v11158_v14  ;;  %v11214_v47 = vmul.f32 %v11210_v8, %v11154_v25 }
0x5a82   :  { %v11163_v24 = vadd.f32 1.0, %v11159_v23  ;;  %v11215_v16 = vmul.f32 %v11211_v40, %v11155_v49 }
0x5a83   :  { %14296 = vrcp.f32 %v11162_v9  ;;  %v11218_v18 = vmul.f32 1.442695, %v11214_v47 }
0x5a84   :  { %14298 = vrcp.f32 %v11163_v24  ;;  %v11220_v38 = vmul.f32 1.442695, %v11215_v16 }
0x5a85   :  { %14300 = vpow2.f32 %v11218_v18 }
0x5a86   :  { %14302 = vpow2.f32 %v11220_v38 }
0x5a8d   :  { %v14297_v10 = vpop.eup %14296 }
0x5a8e   :  { %v14299_v15 = vpop.eup %14298  ;;  %v11174_v55 = vmul.f32 1.0614054, %v14297_v10 }
0x5a8f   :  { %v11175_v45 = vmul.f32 1.0614054, %v14299_v15  ;;  %v14301_v42 = vpop.eup %14300 }
0x5a90   :  { %v11178_v51 = vadd.f32 -1.4531521, %v11174_v55  ;;  %v14303_v0 = vpop.eup %14302 }
0x5a91   :  { %v11179_v7 = vadd.f32 -1.4531521, %v11175_v45 }
0x5a92   :  { %v11182_v56 = vmul.f32 %v14297_v10, %v11178_v51 }
0x5a93   :  { %v11183_v20 = vmul.f32 %v14299_v15, %v11179_v7 }
0x5a94   :  { %v11186_v6 = vadd.f32 1.4214138, %v11182_v56 }
0x5a95   :  { %v11187_v62 = vadd.f32 1.4214138, %v11183_v20 }
0x5a96   :  { %v11190_v28 = vmul.f32 %v14297_v10, %v11186_v6 }
0x5a97   :  { %v11191_v32 = vmul.f32 %v14299_v15, %v11187_v62 }
0x5a98   :  { %v11194_v50 = vadd.f32 -0.28449672, %v11190_v28 }
0x5a99   :  { %v11195_v39 = vadd.f32 -0.28449672, %v11191_v32 }
0x5a9a   :  { %v11198_v59 = vmul.f32 %v14297_v10, %v11194_v50 }
0x5a9b   :  { %v11199_v12 = vmul.f32 %v14299_v15, %v11195_v39 }
0x5a9c   :  { %v11202_v37 = vadd.f32 0.2548296, %v11198_v59 }
0x5a9d   :  { %v11203_v53 = vadd.f32 0.2548296, %v11199_v12 }
0x5a9e   :  { %v11206_v3 = vmul.f32 %v14297_v10, %v11202_v37 }
0x5a9f   :  { %v11207_v26 = vmul.f32 %v14299_v15, %v11203_v53 }
0x5aa0   :  { %v11226_v29 = vmul.f32 %v14301_v42, %v11206_v3 }
0x5aa1   :  { %v11227_v2 = vmul.f32 %v14303_v0, %v11207_v26 }
0x5aa2   :  { %v11230_v35 = vsub.f32 1.0, %v11226_v29 }
0x5aa3   :  { %v11231_v34 = vsub.f32 1.0, %v11227_v2 }
0x5aa4   :  { %v11238_v57 = vsub.f32 0.0, %v11230_v35 }
0x5aa5   :  { %v11239_v58 = vsub.f32 0.0, %v11231_v34 }
0x5aa6   :  { %v11242_v36 = vsel %vm11234_vm4, %v11238_v57, %v11230_v35 }
0x5aa7   :  { %v11246_v48 = vadd.f32 1.0, %v11242_v36  ;;  %v11243_v5 = vsel %vm11235_vm6, %v11239_v58, %v11231_v34 }
0x5aa8   :  { %v11247_v30 = vadd.f32 1.0, %v11243_v5 }
0x5aa9   :  { %v11250_v13 = vmul.f32 %v11246_v48, %v11146_v61  ;;  %v11918_v48 = vld [vmem:[%s16419_s1 + $0x1] ss:$0 sm:$0xff] }
0x5aaa   :  { %v11251_v63 = vmul.f32 %v11247_v30, %v11147_v27 }
0x5aac   :  { %11324 = vmatprep.mubr.f32.mxu1 %v11251_v63 }
0x5aad   :  { %11325 = vmatmul.mubr.f32.vlgmr.msra.gmra.mrb[126].mxu1 %v11250_v13 }
0x5b09   :  { %v11141_v1 = vpop.f32.mrb[102].mxu0 }
0x5b0a   :  { %v11142_v54 = vadd.f32 %v11141_v1, %v16314_v41  ;;  %v11143_v60 = vpop.f32.mrb[103].mxu0 }
0x5b0b   :  { %v11144_v22 = vadd.f32 %v11143_v60, %v16317_v4 }
0x5b0c   :  { %v11152_v52 = vmul.f32 0.70710677, %v11142_v54  ;;  %v11148_v34 = vmul.f32 0.5, %v11142_v54 }
0x5b0d   :  { %v11153_v46 = vmul.f32 0.70710677, %v11144_v22  ;;  %v11149_v2 = vmul.f32 0.5, %v11144_v22 }
0x5b0e   :  { %v11156_v43 = vand.u32 2147483647, %v11152_v52  ;;  %vm11236_vm12 = vcmp.lt.f32.partialorder %v11152_v52, 0.0 }
0x5b0f   :  { %v11157_v44 = vand.u32 2147483647, %v11153_v46  ;;  %vm11237_vm13 = vcmp.lt.f32.partialorder %v11153_v46, 0.0 }
0x5b10   :  { %v11160_v19 = vmul.f32 0.3275911, %v11156_v43  ;;  %v11212_v17 = vsub.f32 0.0, %v11156_v43 }
0x5b11   :  { %v11161_v21 = vmul.f32 0.3275911, %v11157_v44  ;;  %v11213_v49 = vsub.f32 0.0, %v11157_v44 }
0x5b12   :  { %v11164_v25 = vadd.f32 1.0, %v11160_v19  ;;  %v11216_v23 = vmul.f32 %v11212_v17, %v11156_v43 }
0x5b13   :  { %v11165_v31 = vadd.f32 1.0, %v11161_v21  ;;  %v11217_v24 = vmul.f32 %v11213_v49, %v11157_v44 }
0x5b14   :  { %14304 = vrcp.f32 %v11164_v25  ;;  %v11222_v4 = vmul.f32 1.442695, %v11216_v23 }
0x5b15   :  { %14306 = vrcp.f32 %v11165_v31  ;;  %v11224_v47 = vmul.f32 1.442695, %v11217_v24  ;;  %v11919_v24 = vld [vmem:[%s16420_s0] ss:$0 sm:$0xff] }
0x5b16   :  { %14308 = vpow2.f32 %v11222_v4 }
0x5b17   :  { %14310 = vpow2.f32 %v11224_v47  ;;  %v11382_v47 = vld [vmem:[%s14630_s4 + $0x8] sm:$0xff] }
0x5b1e   :  { %v14305_v14 = vpop.eup %14304 }
0x5b1f   :  { %v14307_v9 = vpop.eup %14306  ;;  %v11176_v41 = vmul.f32 1.0614054, %v14305_v14 }
0x5b20   :  { %v11177_v8 = vmul.f32 1.0614054, %v14307_v9  ;;  %v14309_v32 = vpop.eup %14308 }
0x5b21   :  { %v11180_v40 = vadd.f32 -1.4531521, %v11176_v41  ;;  %v14311_v39 = vpop.eup %14310 }
0x5b22   :  { %v11181_v10 = vadd.f32 -1.4531521, %v11177_v8  ;;  %v11920_v8 = vld [vmem:[%s14625_s27] ss:$0 sm:$0xff]  ;;  %s14414_s27 = smov [#allocation5]  }
0x5b23   :  { %v11184_v15 = vmul.f32 %v14305_v14, %v11180_v40  ;;  %s11484_s5 = sshll.u32 %s14414_s27, 4  ;;  %s11485_s5 = int_to_ptr.vmem [resolvable:$true] %s11484_s5 }
0x5b24   :  { %v11185_v55 = vmul.f32 %v14307_v9, %v11181_v10  ;;  %v11381_v10 = vld [vmem:[%s14630_s4] sm:$0xff]  ;;  %p14343_p9 = scmp.lt.s32.totalorder %s11485_s5, %s11485_s5 }
0x5b25   :  { %v11188_v16 = vadd.f32 1.4214138, %v11184_v15  ;;  %v13985_v15 = vpack.c.bf16 %v11382_v47, %v11381_v10 }
0x5b26   :  { %v11189_v45 = vadd.f32 1.4214138, %v11185_v55  ;;  %v11383_v55 = vld [vmem:[%s14630_s4 + $0x10] sm:$0xff] }
0x5b27   :  { %v11192_v51 = vmul.f32 %v14305_v14, %v11188_v16  ;;  %13986 = vmatprep.subr.bf16.mxu0 %v13985_v15  ;;  %v11384_v16 = vld [vmem:[%s14630_s4 + $0x18] sm:$0xff] }
0x5b28   :  { %v11193_v18 = vmul.f32 %v14307_v9, %v11189_v45  ;;  %13988 = vmatpush3.bf16.msra.mxu0 %v13985_v15  ;;  %v13989_v45 = vpack.c.bf16 %v11384_v16, %v11383_v55 }
0x5b29   :  { %v11196_v7 = vadd.f32 -0.28449672, %v11192_v51  ;;  %v11385_v51 = vld [vmem:[%s14630_s4 + $0x20] sm:$0xff] }
0x5b2a   :  { %v11197_v56 = vadd.f32 -0.28449672, %v11193_v18  ;;  %13990 = vmatprep.subr.bf16.mxu0 %v13989_v45  ;;  %v11386_v18 = vld [vmem:[%s14630_s4 + $0x28] sm:$0xff] }
0x5b2b   :  { %v11200_v38 = vmul.f32 %v14305_v14, %v11196_v7  ;;  %v13993_v7 = vpack.c.bf16 %v11386_v18, %v11385_v51 }
0x5b2c   :  { %v11201_v20 = vmul.f32 %v14307_v9, %v11197_v56  ;;  %13992 = vmatpush3.bf16.msra.mxu0 %v13989_v45  ;;  %v11387_v56 = vld [vmem:[%s14630_s4 + $0x30] sm:$0xff] }
0x5b2d   :  { %v11204_v6 = vadd.f32 0.2548296, %v11200_v38  ;;  %13994 = vmatprep.subr.bf16.mxu0 %v13993_v7  ;;  %v11388_v38 = vld [vmem:[%s14630_s4 + $0x38] sm:$0xff]  ;;  %s14338_s4 = scalar_lea.vmem %s11485_s5, 256 }
0x5b2e   :  { %v11205_v62 = vadd.f32 0.2548296, %v11201_v20  ;;  %v13997_v20 = vpack.c.bf16 %v11388_v38, %v11387_v56  ;;  %p14339_p8 = scmp.ne.s32.totalorder %s11485_s5, %s14338_s4  ;;  %p14344_p10 = scmp.lt.s32.totalorder %s14338_s4, %s14338_s4 }
0x5b2f   :  { %v11208_v28 = vmul.f32 %v14305_v14, %v11204_v6 }
0x5b30   :  { %v11209_v50 = vmul.f32 %v14307_v9, %v11205_v62  ;;  %13996 = vmatpush3.bf16.msra.mxu0 %v13993_v7  ;;  %p14345_p11 = por %p14344_p10, %p14343_p9 }
0x5b31   :  { %v11228_v59 = vmul.f32 %v14309_v32, %v11208_v28  ;;  %13998 = vmatprep.subr.bf16.mxu0 %v13997_v20 }
0x5b32   :  { %v11229_v12 = vmul.f32 %v14311_v39, %v11209_v50  ;;  %p14346_p12 = pnand %p14345_p11, %p14339_p8 }
0x5b33   :  { %v11232_v37 = vsub.f32 1.0, %v11228_v59 }
0x5b34   :  { %v11233_v53 = vsub.f32 1.0, %v11229_v12  ;;  %14000 = vmatpush3.bf16.msra.mxu0 %v13997_v20  ;;  %v11921_v12 = vld [vmem:[#allocation2] ss:$0 sm:$0xff] }
0x5b35   :  { %v11240_v3 = vsub.f32 0.0, %v11232_v37 }
0x5b36   :  { %v11241_v42 = vsub.f32 0.0, %v11233_v53 }
0x5b37   :  { %v11244_v26 = vsel %vm11236_vm12, %v11240_v3, %v11232_v37 }
0x5b38   :  { %v11245_v0 = vsel %vm11237_vm13, %v11241_v42, %v11233_v53  ;;  %v11248_v29 = vadd.f32 1.0, %v11244_v26 }
0x5b39   :  { %v11249_v35 = vadd.f32 1.0, %v11245_v0 }
0x5b3a   :  { %v11252_v58 = vmul.f32 %v11248_v29, %v11148_v34 }
0x5b3b   :  { %v11253_v57 = vmul.f32 %v11249_v35, %v11149_v2 }
0x5b3d   :  { %11329 = vmatprep.mubr.f32.mxu1 %v11253_v57 }
0x5b3e   :  { %11330 = vmatmul.mubr.f32.gmra.mrb[128].mxu1 %v11252_v58 }
0x5b80   :  { %v12554_v36 = vpop.f32.mrb[126].mxu1 }
0x5b81   :  { %v12555_v5 = vpop.f32.mrb[127].mxu1 }
0x5b82   :  { %v12556_v27 = vadd.f32 %v12555_v5, %v12554_v36 }
0x5b84   :  { %v11327_v30 = vadd.f32 %v12556_v27, %v11918_v48 }
0x5b86   :  { %v11335_v61 = vadd.f32 %v11327_v30, %v16268_v11 }
0x5b88   :  { %v11339_v63 = vsel %vm614_vm2, %v11335_v61, 0.0 }
0x5b89   :  { %11340 = vadd.xlane.f32.xlu0 %v11339_v63 }
0x5c11   :  { %v12557_v13 = vpop.f32.mrb[128].mxu1 }
0x5c12   :  { %v12558_v1 = vpop.f32.mrb[129].mxu1 }
0x5c13   :  { %v12559_v60 = vadd.f32 %v12558_v1, %v12557_v13 }
0x5c15   :  { %v11332_v22 = vadd.f32 %v12559_v60, %v11918_v48 }
0x5c16   :  { %v11341_v52 = vpop.xlane.xlu0 %11340 }
0x5c17   :  { %v11345_v54 = vmul.f32 0.015625, %v11341_v52  ;;  %v11336_v46 = vadd.f32 %v11332_v22, %v16308_v33 }
0x5c19   :  { %v11347_v43 = vsub.f32 %v11335_v61, %v11345_v54  ;;  %v11342_v44 = vsel %vm614_vm2, %v11336_v46, 0.0 }
0x5c1a   :  { %11343 = vadd.xlane.f32.xlu0 %v11342_v44 }
0x5c1b   :  { %v11349_v19 = vmul.f32 %v11347_v43, %v11347_v43 }
0x5c1d   :  { %v11351_v11 = vsel %vm614_vm2, %v11349_v19, 0.0 }
0x5c1e   :  { %11352 = vadd.xlane.f32.xlu0 %v11351_v11 }
0x5ca7   :  { %v11344_v21 = vpop.xlane.xlu0 %11343 }
0x5ca8   :  { %v11346_v25 = vmul.f32 0.015625, %v11344_v21 }
0x5caa   :  { %v11348_v31 = vsub.f32 %v11336_v46, %v11346_v25 }
0x5cab   :  { %v11353_v17 = vpop.xlane.xlu0 %11352 }
0x5cac   :  { %v11357_v49 = vmul.f32 0.015625, %v11353_v17  ;;  %v11350_v14 = vmul.f32 %v11348_v31, %v11348_v31 }
0x5cae   :  { %v11359_v23 = vadd.f32 1e-05, %v11357_v49  ;;  %v11354_v33 = vsel %vm614_vm2, %v11350_v14, 0.0 }
0x5caf   :  { %11355 = vadd.xlane.f32.xlu0 %v11354_v33 }
0x5cb0   :  { %14312 = vrsqrt.f32 %v11359_v23 }
0x5cba   :  { %v14313_v9 = vpop.eup %14312 }
0x5cbb   :  { %v11363_v41 = vmul.f32 %v14313_v9, %v11347_v43 }
0x5cbd   :  { %v11371_v40 = vmul.f32 %v11919_v24, %v11363_v41 }
0x5cbf   :  { %v11379_v4 = vadd.f32 %v11920_v8, %v11371_v40 }
0x5cc1   :  { %13358 = vmatprep.mubr.msk.f32.mxu0 %vm614_vm2, %v11379_v4 }
0x5d3c   :  { %v11356_v6 = vpop.xlane.xlu0 %11355 }
0x5d3d   :  { %v11358_v62 = vmul.f32 0.015625, %v11356_v6 }
0x5d3f   :  { %v11360_v28 = vadd.f32 1e-05, %v11358_v62 }
0x5d41   :  { %14314 = vrsqrt.f32 %v11360_v28 }
0x5d4b   :  { %v14315_v32 = vpop.eup %14314 }
0x5d4c   :  { %v11364_v50 = vmul.f32 %v14315_v32, %v11348_v31 }
0x5d4e   :  { %v11372_v39 = vmul.f32 %v11919_v24, %v11364_v50 }
0x5d50   :  { %v11380_v59 = vadd.f32 %v11920_v8, %v11372_v39 }
0x5d52   :  { %13359 = vmatmul.mubr.msk.f32.vlgmr.msra.gmra.mrb[104].mxu0 %vm614_vm2, %v11380_v59 }
0x5e25   :  { %v13360_v37 = vpop.f32.mrb[104].mxu0 }
0x5e26   :  { %v11474_v53 = vadd.f32 %v13360_v37, %v11921_v12  ;;  %v11468_v3 = vpop.f32.mrb[105].mxu0 }
0x5e27   :  { %v11469_v42 = vadd.f32 %v11921_v12, %v11468_v3 }
0x5e28   :  { %11478 = vst [vmem:[#allocation5 + $0x8] sm:$0xff] %v11474_v53 }
0x5e29   :  { %11477 = vst [vmem:[#allocation5] sm:$0xff] %v11469_v42 }
0x5e2a   :  { %14349 = shalt.err (!%p14346_p12)
}
0x5e2b   :  { %s14350_s9 = scalar_lea.hbm %s14638_s20, 256 }
0x5e2c   :  { %p14351_p13 = scmp.ne.s32.totalorder %s14638_s20, %s14350_s9  ;;  %p14354_p0 = scmp.lt.u32.totalorder %s14350_s9, %s14638_s20 }
0x5e2e   :  { %p14356_p1 = pnand %p14354_p0, %p14351_p13 }
0x5e30   :  { %14359 = shalt.err (!%p14356_p1)
}
0x5e31   :  { %s14415_s13 = smov 128   ;;  %s14416_s17 = smov 8  }
0x5e32   :  { %11490 = dma.vmem_to_hbm [thread:$0]  %s11485_s5, 256, %s14638_s20, [#allocation4], %s14415_s13, %s14415_s13, %s14416_s17  }
0x5e33   :  { %14362 = dma.done.wait [#allocation4], 256  }
0x5e34   :  { %14363 = vsyncadd [#allocation4], 4294967040 }
0x5e35   :  { %11494 = vsyncpa [#allocation3], 1 }
0x5e36   :  { %11495 = vsyncpa [#allocation4], 1 }

</bundles_post_ra>
